<compile_context>
chip_gen: v6e
topology: v6e:2x2x1
jax: 0.10.0
libtpu: 0.0.40
codegen_flags: <defaults>
</compile_context>

<pallas_src>
import numpy as np
import jax
import jax.numpy as jnp
from jax import lax
from jax.experimental import pallas as pl
from jax.experimental.pallas import tpu as pltpu

_WIN = 11          # SSIM window size (MONAI default)
_SIGMA = 1.5       # gaussian sigma (MONAI default)
_DATA_RANGE = 1.0  # MONAI default
_C1 = (0.01 * _DATA_RANGE) ** 2
_C2 = (0.03 * _DATA_RANGE) ** 2


def _gauss_1d():
    d = np.arange(_WIN, dtype=np.float32) - _WIN // 2
    g = np.exp(-0.5 * np.square(d / np.float32(_SIGMA))).astype(np.float32)
    return g / g.sum()


_G_NP = _gauss_1d()
_G = tuple(float(v) for v in _G_NP)


# ---------------------------------------------------------------------------
# Device-aware VMEM sizing (v5e/v6e: 128 MiB, v7x: 64 MiB per TensorCore).
# ---------------------------------------------------------------------------
def _vmem_capacity_bytes():
    try:
        info = pltpu.get_tpu_info()
        for attr in ("vmem_capacity_bytes", "vmem_size_bytes", "vmem_bytes"):
            v = getattr(info, attr, None)
            if v:
                return int(v)
    except Exception:
        pass
    try:
        kind = jax.devices()[0].device_kind.lower()
    except Exception:
        kind = ""
    if "v7" in kind:
        return 64 * 1024 * 1024
    if any(t in kind for t in ("v5", "v6")):
        return 128 * 1024 * 1024
    return 64 * 1024 * 1024        # conservative default


# ---------------------------------------------------------------------------
# Kernel 1: chunked per-batch reductions (min/max of x and y, masked |x-y|
# sum, mask count).  grid = (batch, chunk); the output block is the running
# accumulator (per-lane partials, finalized outside the kernel).
# ---------------------------------------------------------------------------
def _make_stats_kernel(R, CR, need_mask):
    def kernel(x_ref, y_ref, out_ref):
        c = pl.program_id(1)
        x = x_ref[0]                              # (CR, 128)
        y = y_ref[0]
        m = (y != 0.0).astype(jnp.float32)
        l1 = jnp.abs(x - y) * m

        if need_mask:
            # remainder chunk: mask rows past the real extent (padded data).
            row = lax.broadcasted_iota(jnp.int32, (CR, 128), 0)
            valid = (c * CR + row) < R
            x_lo = jnp.where(valid, x, jnp.inf)
            x_hi = jnp.where(valid, x, -jnp.inf)
            y_lo = jnp.where(valid, y, jnp.inf)
            y_hi = jnp.where(valid, y, -jnp.inf)
            l1 = jnp.where(valid, l1, 0.0)
            m = jnp.where(valid, m, 0.0)
        else:
            x_lo = x_hi = x
            y_lo = y_hi = y

        pxmin = jnp.min(x_lo, axis=0)             # (128,) per-lane partials
        pxmax = jnp.max(x_hi, axis=0)
        pymin = jnp.min(y_lo, axis=0)
        pymax = jnp.max(y_hi, axis=0)
        pl1 = jnp.sum(l1, axis=0)
        pcnt = jnp.sum(m, axis=0)

        @pl.when(c == 0)
        def _init():
            out_ref[0, 0, 0] = pxmin
            out_ref[0, 1, 0] = pxmax
            out_ref[0, 2, 0] = pymin
            out_ref[0, 3, 0] = pymax
            out_ref[0, 4, 0] = pl1
            out_ref[0, 5, 0] = pcnt

        @pl.when(c != 0)
        def _update():
            out_ref[0, 0, 0] = jnp.minimum(out_ref[0, 0, 0], pxmin)
            out_ref[0, 1, 0] = jnp.maximum(out_ref[0, 1, 0], pxmax)
            out_ref[0, 2, 0] = jnp.minimum(out_ref[0, 2, 0], pymin)
            out_ref[0, 3, 0] = jnp.maximum(out_ref[0, 3, 0], pymax)
            out_ref[0, 4, 0] = out_ref[0, 4, 0] + pl1
            out_ref[0, 5, 0] = out_ref[0, 5, 0] + pcnt

    return kernel


# ---------------------------------------------------------------------------
# Kernel 2: per-(batch*channel) SSIM, depth-slab pipelined with manual DMA.
# ---------------------------------------------------------------------------
def _make_ssim_kernel(BD, SD, num_db, od, H, W, OH, OW):
    SDH = SD * H

    def kernel(norm_ref, gw_ref, x_hbm, y_hbm, out_ref,
               xbuf, ybuf, sem, acc_ref):
        i = pl.program_id(0)
        xmin = norm_ref[4 * i]
        sx = norm_ref[4 * i + 1]
        ymin = norm_ref[4 * i + 2]
        sy = norm_ref[4 * i + 3]
        gw = gw_ref[...]                              # (W, OW), loaded once

        def slab_start(db):
            return jnp.minimum(db * BD, od - BD)

        # identical descriptor construction for start and wait (review fix)
        def x_copy(db, slot):
            return pltpu.make_async_copy(
                x_hbm.at[i, pl.ds(slab_start(db), SD)],
                xbuf.at[slot], sem.at[0, slot])

        def y_copy(db, slot):
            return pltpu.make_async_copy(
                y_hbm.at[i, pl.ds(slab_start(db), SD)],
                ybuf.at[slot], sem.at[1, slot])

        x_copy(0, 0).start()
        y_copy(0, 0).start()
        acc_ref[...] = jnp.zeros_like(acc_ref)

        if od % BD != 0:
            # hoisted out of the loop; only used (via pl.when) on the last slab
            row_idx = lax.broadcasted_iota(jnp.int32, (BD, OH, OW), 0)

        def smooth(f2):
            # W pass on the MXU: one big 2-D matmul per map (SD*H rows).
            fw = jnp.dot(f2, gw, preferred_element_type=jnp.float32)
            fw = fw.reshape(SD, H, OW)
            # D pass: leading-axis shifted multiply-adds (free slices, VPU).
            # TODO(synk): could also go on the MXU via a (BD,SD) banded matmul
            # if Mosaic supports merging the trailing (H, OW) dims cheaply.
            fd = fw[0:BD] * _G[0]
            for k in range(1, _WIN):
                fd = fd + fw[k:k + BD] * _G[k]        # (BD, H, OW)
            # H pass: sublane-axis shifted multiply-adds on the smallest array.
            fh = fd[:, 0:OH, :] * _G[0]
            for k in range(1, _WIN):
                fh = fh + fd[:, k:k + OH, :] * _G[k]  # (BD, OH, OW)
            return fh

        def body(db, carry):
            slot = db % 2
            x_copy(db, slot).wait()
            y_copy(db, slot).wait()

            @pl.when(db + 1 < num_db)
            def _():
                x_copy(db + 1, 1 - slot).start()
                y_copy(db + 1, 1 - slot).start()

            xv = xbuf[slot]                           # (SD, H, W)
            yv = ybuf[slot]
            m = (yv != 0.0).astype(jnp.float32)
            a2 = ((xv - xmin) * sx * m).reshape(SDH, W)
            b2 = ((yv - ymin) * sy * m).reshape(SDH, W)

            # per-map smoothing: no (5, SD, H, W) stack is materialized
            mu_a = smooth(a2)
            mu_b = smooth(b2)
            mu_aa = smooth(a2 * a2)
            mu_bb = smooth(b2 * b2)
            mu_ab = smooth(a2 * b2)

            var_a = mu_aa - mu_a * mu_a
            var_b = mu_bb - mu_b * mu_b
            cov = mu_ab - mu_a * mu_b
            ssim = ((2.0 * mu_a * mu_b + _C1) * (2.0 * cov + _C2)) / (
                (mu_a * mu_a + mu_b * mu_b + _C1) * (var_a + var_b + _C2))
            base = 1.0 - ssim                         # (BD, OH, OW)

            if od % BD == 0:
                acc_ref[...] += jnp.sum(base, axis=0)
            else:
                # only the (shifted) last slab can overlap previous rows
                lim = db * BD - slab_start(db)

                @pl.when(lim == 0)
                def _():
                    acc_ref[...] += jnp.sum(base, axis=0)

                @pl.when(lim > 0)
                def _():
                    masked = jnp.where(row_idx >= lim, base, 0.0)
                    acc_ref[...] += jnp.sum(masked, axis=0)

            return carry

        lax.fori_loop(0, num_db, body, 0)
        # single scalar reduce per sample (not per slab)
        out_ref[0, 0] = jnp.full((128,), jnp.sum(acc_ref[...]),
                                 dtype=jnp.float32)

    return kernel


# ---------------------------------------------------------------------------
# Static tiling helpers
# ---------------------------------------------------------------------------
def _pick_chunk_rows(R):
    """Up to 4096 rows (2 MiB per input block); remainder handled by masking."""
    return min(R, 4096)


def _pick_block_depth(od, H, W, OH, OW, budget_bytes):
    """Largest depth-slab keeping the estimated per-slab VMEM under budget."""
    best = 1
    for bd in range(1, min(od, 64) + 1):
        sd = bd + _WIN - 1
        est = 4 * (
            4 * sd * H * W          # x / y slabs, double buffered
            + 4 * sd * H * W        # mask, a, b, current product map
            + 2 * sd * H * OW       # W-pass output (+ relayout temp)
            + 3 * bd * H * OW       # D-pass accumulator + temporaries
            + 12 * bd * OH * OW     # smoothed maps + H-pass / ssim temporaries
        )
        if est <= budget_bytes:
            best = bd
    return best


# ---------------------------------------------------------------------------
# Wrapper
# ---------------------------------------------------------------------------
def ssim_l1_loss(x, y):
    B, C, D, H, W = x.shape
    assert y.shape == x.shape
    assert D >= _WIN and H >= _WIN and W >= _WIN, "spatial dims must be >= 11"
    total = C * D * H * W
    assert total % 128 == 0, "C*D*H*W must be a multiple of 128"
    x = x.astype(jnp.float32)
    y = y.astype(jnp.float32)

    cap = _vmem_capacity_bytes()

    # ---- pass 1: per-batch min/max, masked |x-y| sum, mask count ----------
    R = total // 128
    CR = _pick_chunk_rows(R)
    NC = -(-R // CR)
    need_mask = (R % CR) != 0
    xf = x.reshape(B, R, 128)
    yf = y.reshape(B, R, 128)

    stats = pl.pallas_call(
        _make_stats_kernel(R, CR, need_mask),
        out_shape=jax.ShapeDtypeStruct((B, 6, 1, 128), jnp.float32),
        grid=(B, NC),
        in_specs=[pl.BlockSpec((1, CR, 128), lambda b, c: (b, c, 0)),
                  pl.BlockSpec((1, CR, 128), lambda b, c: (b, c, 0))],
        out_specs=pl.BlockSpec((1, 6, 1, 128), lambda b, c: (b, 0, 0, 0)),
        compiler_params=pltpu.CompilerParams(
            dimension_semantics=("parallel", "arbitrary")),
        cost_estimate=pl.CostEstimate(
            flops=8 * B * total, transcendentals=0,
            bytes_accessed=2 * B * total * 4),
    )(xf, yf)

    xmin = jnp.min(stats[:, 0], axis=(1, 2))
    xmax = jnp.max(stats[:, 1], axis=(1, 2))
    ymin = jnp.min(stats[:, 2], axis=(1, 2))
    ymax = jnp.max(stats[:, 3], axis=(1, 2))
    # L1Loss('mean') over the masked selection == masked-sum / count
    # (NaN if the mask is empty, matching torch semantics).
    l1 = jnp.sum(stats[:, 4]) / jnp.sum(stats[:, 5])

    sx = jnp.where(xmax > xmin, 1.0 / (xmax - xmin), 0.0)
    sy = jnp.where(ymax > ymin, 1.0 / (ymax - ymin), 0.0)
    norm = jnp.stack([xmin, sx, ymin, sy], axis=1)       # (B, 4)
    norm = jnp.repeat(norm, C, axis=0).reshape(-1)       # (B*C*4,) -> 1D SMEM

    # ---- pass 2: per-sample SSIM over depth slabs --------------------------
    BC = B * C
    od, oh, ow = D - _WIN + 1, H - _WIN + 1, W - _WIN + 1
    budget = int(cap * 0.30)
    BD = _pick_block_depth(od, H, W, oh, ow, budget)
    SD = BD + _WIN - 1
    num_db = -(-od // BD)

    # banded Toeplitz matrix for the W gaussian pass (MXU operand)
    gw_np = np.zeros((W, ow), np.float32)
    for v in range(ow):
        gw_np[v:v + _WIN, v] = _G_NP
    gw = jnp.asarray(gw_np)

    xs = x.reshape(BC, D, H, W)
    ys = y.reshape(BC, D, H, W)

    kern = _make_ssim_kernel(BD, SD, num_db, od, H, W, oh, ow)
    flops = BC * num_db * (
        5 * (2 * SD * H * W * ow + 21 * BD * H * ow + 21 * BD * oh * ow)
        + 11 * SD * H * W + 20 * BD * oh * ow)

    ssim_part = pl.pallas_call(
        kern,
        out_shape=jax.ShapeDtypeStruct((BC, 1, 128), jnp.float32),
        grid=(BC,),
        in_specs=[pl.BlockSpec(memory_space=pltpu.MemorySpace.SMEM),   # norm
                  pl.BlockSpec((W, ow), lambda i: (0, 0)),             # gw
                  pl.BlockSpec(memory_space=pl.ANY),                   # x
                  pl.BlockSpec(memory_space=pl.ANY)],                  # y
        out_specs=pl.BlockSpec((1, 1, 128), lambda i: (i, 0, 0)),
        scratch_shapes=[pltpu.VMEM((2, SD, H, W), jnp.float32),
                        pltpu.VMEM((2, SD, H, W), jnp.float32),
                        pltpu.SemaphoreType.DMA((2, 2)),
                        pltpu.VMEM((oh, ow), jnp.float32)],
        compiler_params=pltpu.CompilerParams(
            dimension_semantics=("parallel",),
            vmem_limit_bytes=int(cap * 0.65)),
        cost_estimate=pl.CostEstimate(
            flops=int(flops), transcendentals=0,
            bytes_accessed=int(BC * num_db * 2 * SD * H * W * 4)),
    )(norm, gw, xs, ys)

    ss = jnp.sum(ssim_part[:, 0, 0]) / (BC * od * oh * ow)  # mean(1 - ssim)
    return l1 + ss


if __name__ == "__main__":
    key = jax.random.PRNGKey(0)
    kx, ky = jax.random.split(key)
    B, C, D, H, W = 2, 2, 16, 16, 16     # spatial dims must be >= window (11)
    x = jax.random.uniform(kx, (B, C, D, H, W), dtype=jnp.float32)
    y = jax.random.uniform(ky, (B, C, D, H, W), dtype=jnp.float32)
    # create a region where y == 0 so the mask path is exercised
    y = y.at[:, :, :2].set(0.0)

    loss = jax.jit(ssim_l1_loss)(x, y)
    loss = jax.block_until_ready(loss)
    assert loss.shape == () and bool(jnp.isfinite(loss))
    print("KERNEL_OK")
</pallas_src>

<mosaic_0001>
module attributes {stable_mosaic.version = 11 : i64} {
  func.func @kernel(%arg0: i32, %arg1: i32, %arg2: memref<1x64x128xf32, #tpu.memory_space<vmem>>, %arg3: memref<1x64x128xf32, #tpu.memory_space<vmem>>, %arg4: memref<1x6x1x128xf32, #tpu.memory_space<vmem>>) attributes {dimension_semantics = [#tpu.dimension_semantics<parallel>, #tpu.dimension_semantics<arbitrary>], iteration_bounds = array<i64: 2, 1>, scalar_prefetch = 0 : i64, scratch_operands = 0 : i64, tpu.core_type = #tpu.core_type<tc>, window_params = [{transform_indices = @transform_0, window_bounds = array<i64: 1, 64, 128>}, {transform_indices = @transform_1, window_bounds = array<i64: 1, 64, 128>}, {transform_indices = @transform_2, window_bounds = array<i64: 1, 6, 1, 128>}]} {
    %c0 = arith.constant 0 : index
    %c0_0 = arith.constant 0 : index
    %c0_1 = arith.constant 0 : index
    %0 = vector.load %arg2[%c0, %c0_0, %c0_1] : memref<1x64x128xf32, #tpu.memory_space<vmem>>, vector<1x64x128xf32>
    %1 = vector.shape_cast %0 : vector<1x64x128xf32> to vector<64x128xf32>
    %c0_2 = arith.constant 0 : index
    %c0_3 = arith.constant 0 : index
    %c0_4 = arith.constant 0 : index
    %2 = vector.load %arg3[%c0_2, %c0_3, %c0_4] : memref<1x64x128xf32, #tpu.memory_space<vmem>>, vector<1x64x128xf32>
    %3 = vector.shape_cast %2 : vector<1x64x128xf32> to vector<64x128xf32>
    %cst = arith.constant 0.000000e+00 : f32
    %4 = vector.broadcast %cst : f32 to vector<64x128xf32>
    %5 = arith.cmpf one, %3, %4 : vector<64x128xf32>
    %6 = arith.extui %5 : vector<64x128xi1> to vector<64x128xi32>
    %7 = arith.sitofp %6 : vector<64x128xi32> to vector<64x128xf32>
    %8 = arith.subf %1, %3 : vector<64x128xf32>
    %9 = math.absf %8 : vector<64x128xf32>
    %10 = arith.mulf %9, %7 : vector<64x128xf32>
    %cst_5 = arith.constant dense<0x7F800000> : vector<128xf32>
    %11 = vector.multi_reduction <minimumf>, %1, %cst_5 [0] : vector<64x128xf32> to vector<128xf32>
    %cst_6 = arith.constant dense<0xFF800000> : vector<128xf32>
    %12 = vector.multi_reduction <maximumf>, %1, %cst_6 [0] : vector<64x128xf32> to vector<128xf32>
    %cst_7 = arith.constant dense<0x7F800000> : vector<128xf32>
    %13 = vector.multi_reduction <minimumf>, %3, %cst_7 [0] : vector<64x128xf32> to vector<128xf32>
    %cst_8 = arith.constant dense<0xFF800000> : vector<128xf32>
    %14 = vector.multi_reduction <maximumf>, %3, %cst_8 [0] : vector<64x128xf32> to vector<128xf32>
    %cst_9 = arith.constant dense<0.000000e+00> : vector<128xf32>
    %15 = vector.multi_reduction <add>, %10, %cst_9 [0] : vector<64x128xf32> to vector<128xf32>
    %cst_10 = arith.constant dense<0.000000e+00> : vector<128xf32>
    %16 = vector.multi_reduction <add>, %7, %cst_10 [0] : vector<64x128xf32> to vector<128xf32>
    %c0_i32 = arith.constant 0 : i32
    %17 = arith.cmpi eq, %arg1, %c0_i32 : i32
    %18 = arith.extui %17 : i1 to i32
    %c0_i32_11 = arith.constant 0 : i32
    %19 = arith.cmpi ne, %18, %c0_i32_11 : i32
    scf.if %19 {
      %c0_14 = arith.constant 0 : index
      %c0_15 = arith.constant 0 : index
      %c0_16 = arith.constant 0 : index
      %c0_17 = arith.constant 0 : index
      %23 = vector.load %arg4[%c0_14, %c0_15, %c0_16, %c0_17] : memref<1x6x1x128xf32, #tpu.memory_space<vmem>>, vector<1x1x1x128xf32>
      %24 = vector.shape_cast %23 : vector<1x1x1x128xf32> to vector<128xf32>
      %25 = vector.shape_cast %11 : vector<128xf32> to vector<1x1x1x128xf32>
      tpu.vector_store %arg4[%c0_14, %c0_15, %c0_16, %c0_17], %25 {strides = array<i32>} : memref<1x6x1x128xf32, #tpu.memory_space<vmem>>, vector<1x1x1x128xf32>,
      %c0_18 = arith.constant 0 : index
      %c1 = arith.constant 1 : index
      %c0_19 = arith.constant 0 : index
      %c0_20 = arith.constant 0 : index
      %26 = vector.load %arg4[%c0_18, %c1, %c0_19, %c0_20] : memref<1x6x1x128xf32, #tpu.memory_space<vmem>>, vector<1x1x1x128xf32>
      %27 = vector.shape_cast %26 : vector<1x1x1x128xf32> to vector<128xf32>
      %28 = vector.shape_cast %12 : vector<128xf32> to vector<1x1x1x128xf32>
      tpu.vector_store %arg4[%c0_18, %c1, %c0_19, %c0_20], %28 {strides = array<i32>} : memref<1x6x1x128xf32, #tpu.memory_space<vmem>>, vector<1x1x1x128xf32>,
      %c0_21 = arith.constant 0 : index
      %c2 = arith.constant 2 : index
      %c0_22 = arith.constant 0 : index
      %c0_23 = arith.constant 0 : index
      %29 = vector.load %arg4[%c0_21, %c2, %c0_22, %c0_23] : memref<1x6x1x128xf32, #tpu.memory_space<vmem>>, vector<1x1x1x128xf32>
      %30 = vector.shape_cast %29 : vector<1x1x1x128xf32> to vector<128xf32>
      %31 = vector.shape_cast %13 : vector<128xf32> to vector<1x1x1x128xf32>
      tpu.vector_store %arg4[%c0_21, %c2, %c0_22, %c0_23], %31 {strides = array<i32>} : memref<1x6x1x128xf32, #tpu.memory_space<vmem>>, vector<1x1x1x128xf32>,
      %c0_24 = arith.constant 0 : index
      %c3 = arith.constant 3 : index
      %c0_25 = arith.constant 0 : index
      %c0_26 = arith.constant 0 : index
      %32 = vector.load %arg4[%c0_24, %c3, %c0_25, %c0_26] : memref<1x6x1x128xf32, #tpu.memory_space<vmem>>, vector<1x1x1x128xf32>
      %33 = vector.shape_cast %32 : vector<1x1x1x128xf32> to vector<128xf32>
      %34 = vector.shape_cast %14 : vector<128xf32> to vector<1x1x1x128xf32>
      tpu.vector_store %arg4[%c0_24, %c3, %c0_25, %c0_26], %34 {strides = array<i32>} : memref<1x6x1x128xf32, #tpu.memory_space<vmem>>, vector<1x1x1x128xf32>,
      %c0_27 = arith.constant 0 : index
      %c4 = arith.constant 4 : index
      %c0_28 = arith.constant 0 : index
      %c0_29 = arith.constant 0 : index
      %35 = vector.load %arg4[%c0_27, %c4, %c0_28, %c0_29] : memref<1x6x1x128xf32, #tpu.memory_space<vmem>>, vector<1x1x1x128xf32>
      %36 = vector.shape_cast %35 : vector<1x1x1x128xf32> to vector<128xf32>
      %37 = vector.shape_cast %15 : vector<128xf32> to vector<1x1x1x128xf32>
      tpu.vector_store %arg4[%c0_27, %c4, %c0_28, %c0_29], %37 {strides = array<i32>} : memref<1x6x1x128xf32, #tpu.memory_space<vmem>>, vector<1x1x1x128xf32>,
      %c0_30 = arith.constant 0 : index
      %c5 = arith.constant 5 : index
      %c0_31 = arith.constant 0 : index
      %c0_32 = arith.constant 0 : index
      %38 = vector.load %arg4[%c0_30, %c5, %c0_31, %c0_32] : memref<1x6x1x128xf32, #tpu.memory_space<vmem>>, vector<1x1x1x128xf32>
      %39 = vector.shape_cast %38 : vector<1x1x1x128xf32> to vector<128xf32>
      %40 = vector.shape_cast %16 : vector<128xf32> to vector<1x1x1x128xf32>
      tpu.vector_store %arg4[%c0_30, %c5, %c0_31, %c0_32], %40 {strides = array<i32>} : memref<1x6x1x128xf32, #tpu.memory_space<vmem>>, vector<1x1x1x128xf32>,
    } else {
    }
    %c0_i32_12 = arith.constant 0 : i32
    %20 = arith.cmpi ne, %arg1, %c0_i32_12 : i32
    %21 = arith.extui %20 : i1 to i32
    %c0_i32_13 = arith.constant 0 : i32
    %22 = arith.cmpi ne, %21, %c0_i32_13 : i32
    scf.if %22 {
      %c0_14 = arith.constant 0 : index
      %c0_15 = arith.constant 0 : index
      %c0_16 = arith.constant 0 : index
      %c0_17 = arith.constant 0 : index
      %23 = vector.load %arg4[%c0_14, %c0_15, %c0_16, %c0_17] : memref<1x6x1x128xf32, #tpu.memory_space<vmem>>, vector<1x1x1x128xf32>
      %24 = vector.shape_cast %23 : vector<1x1x1x128xf32> to vector<128xf32>
      %25 = arith.minimumf %24, %11 : vector<128xf32>
      %c0_18 = arith.constant 0 : index
      %c0_19 = arith.constant 0 : index
      %c0_20 = arith.constant 0 : index
      %c0_21 = arith.constant 0 : index
      %26 = vector.load %arg4[%c0_18, %c0_19, %c0_20, %c0_21] : memref<1x6x1x128xf32, #tpu.memory_space<vmem>>, vector<1x1x1x128xf32>
      %27 = vector.shape_cast %26 : vector<1x1x1x128xf32> to vector<128xf32>
      %28 = vector.shape_cast %25 : vector<128xf32> to vector<1x1x1x128xf32>
      tpu.vector_store %arg4[%c0_18, %c0_19, %c0_20, %c0_21], %28 {strides = array<i32>} : memref<1x6x1x128xf32, #tpu.memory_space<vmem>>, vector<1x1x1x128xf32>,
      %c0_22 = arith.constant 0 : index
      %c1 = arith.constant 1 : index
      %c0_23 = arith.constant 0 : index
      %c0_24 = arith.constant 0 : index
      %29 = vector.load %arg4[%c0_22, %c1, %c0_23, %c0_24] : memref<1x6x1x128xf32, #tpu.memory_space<vmem>>, vector<1x1x1x128xf32>
      %30 = vector.shape_cast %29 : vector<1x1x1x128xf32> to vector<128xf32>
      %31 = arith.maximumf %30, %12 : vector<128xf32>
      %c0_25 = arith.constant 0 : index
      %c1_26 = arith.constant 1 : index
      %c0_27 = arith.constant 0 : index
      %c0_28 = arith.constant 0 : index
      %32 = vector.load %arg4[%c0_25, %c1_26, %c0_27, %c0_28] : memref<1x6x1x128xf32, #tpu.memory_space<vmem>>, vector<1x1x1x128xf32>
      %33 = vector.shape_cast %32 : vector<1x1x1x128xf32> to vector<128xf32>
      %34 = vector.shape_cast %31 : vector<128xf32> to vector<1x1x1x128xf32>
      tpu.vector_store %arg4[%c0_25, %c1_26, %c0_27, %c0_28], %34 {strides = array<i32>} : memref<1x6x1x128xf32, #tpu.memory_space<vmem>>, vector<1x1x1x128xf32>,
      %c0_29 = arith.constant 0 : index
      %c2 = arith.constant 2 : index
      %c0_30 = arith.constant 0 : index
      %c0_31 = arith.constant 0 : index
      %35 = vector.load %arg4[%c0_29, %c2, %c0_30, %c0_31] : memref<1x6x1x128xf32, #tpu.memory_space<vmem>>, vector<1x1x1x128xf32>
      %36 = vector.shape_cast %35 : vector<1x1x1x128xf32> to vector<128xf32>
      %37 = arith.minimumf %36, %13 : vector<128xf32>
      %c0_32 = arith.constant 0 : index
      %c2_33 = arith.constant 2 : index
      %c0_34 = arith.constant 0 : index
      %c0_35 = arith.constant 0 : index
      %38 = vector.load %arg4[%c0_32, %c2_33, %c0_34, %c0_35] : memref<1x6x1x128xf32, #tpu.memory_space<vmem>>, vector<1x1x1x128xf32>
      %39 = vector.shape_cast %38 : vector<1x1x1x128xf32> to vector<128xf32>
      %40 = vector.shape_cast %37 : vector<128xf32> to vector<1x1x1x128xf32>
      tpu.vector_store %arg4[%c0_32, %c2_33, %c0_34, %c0_35], %40 {strides = array<i32>} : memref<1x6x1x128xf32, #tpu.memory_space<vmem>>, vector<1x1x1x128xf32>,
      %c0_36 = arith.constant 0 : index
      %c3 = arith.constant 3 : index
      %c0_37 = arith.constant 0 : index
      %c0_38 = arith.constant 0 : index
      %41 = vector.load %arg4[%c0_36, %c3, %c0_37, %c0_38] : memref<1x6x1x128xf32, #tpu.memory_space<vmem>>, vector<1x1x1x128xf32>
      %42 = vector.shape_cast %41 : vector<1x1x1x128xf32> to vector<128xf32>
      %43 = arith.maximumf %42, %14 : vector<128xf32>
      %c0_39 = arith.constant 0 : index
      %c3_40 = arith.constant 3 : index
      %c0_41 = arith.constant 0 : index
      %c0_42 = arith.constant 0 : index
      %44 = vector.load %arg4[%c0_39, %c3_40, %c0_41, %c0_42] : memref<1x6x1x128xf32, #tpu.memory_space<vmem>>, vector<1x1x1x128xf32>
      %45 = vector.shape_cast %44 : vector<1x1x1x128xf32> to vector<128xf32>
      %46 = vector.shape_cast %43 : vector<128xf32> to vector<1x1x1x128xf32>
      tpu.vector_store %arg4[%c0_39, %c3_40, %c0_41, %c0_42], %46 {strides = array<i32>} : memref<1x6x1x128xf32, #tpu.memory_space<vmem>>, vector<1x1x1x128xf32>,
      %c0_43 = arith.constant 0 : index
      %c4 = arith.constant 4 : index
      %c0_44 = arith.constant 0 : index
      %c0_45 = arith.constant 0 : index
      %47 = vector.load %arg4[%c0_43, %c4, %c0_44, %c0_45] : memref<1x6x1x128xf32, #tpu.memory_space<vmem>>, vector<1x1x1x128xf32>
      %48 = vector.shape_cast %47 : vector<1x1x1x128xf32> to vector<128xf32>
      %49 = arith.addf %48, %15 : vector<128xf32>
      %c0_46 = arith.constant 0 : index
      %c4_47 = arith.constant 4 : index
      %c0_48 = arith.constant 0 : index
      %c0_49 = arith.constant 0 : index
      %50 = vector.load %arg4[%c0_46, %c4_47, %c0_48, %c0_49] : memref<1x6x1x128xf32, #tpu.memory_space<vmem>>, vector<1x1x1x128xf32>
      %51 = vector.shape_cast %50 : vector<1x1x1x128xf32> to vector<128xf32>
      %52 = vector.shape_cast %49 : vector<128xf32> to vector<1x1x1x128xf32>
      tpu.vector_store %arg4[%c0_46, %c4_47, %c0_48, %c0_49], %52 {strides = array<i32>} : memref<1x6x1x128xf32, #tpu.memory_space<vmem>>, vector<1x1x1x128xf32>,
      %c0_50 = arith.constant 0 : index
      %c5 = arith.constant 5 : index
      %c0_51 = arith.constant 0 : index
      %c0_52 = arith.constant 0 : index
      %53 = vector.load %arg4[%c0_50, %c5, %c0_51, %c0_52] : memref<1x6x1x128xf32, #tpu.memory_space<vmem>>, vector<1x1x1x128xf32>
      %54 = vector.shape_cast %53 : vector<1x1x1x128xf32> to vector<128xf32>
      %55 = arith.addf %54, %16 : vector<128xf32>
      %c0_53 = arith.constant 0 : index
      %c5_54 = arith.constant 5 : index
      %c0_55 = arith.constant 0 : index
      %c0_56 = arith.constant 0 : index
      %56 = vector.load %arg4[%c0_53, %c5_54, %c0_55, %c0_56] : memref<1x6x1x128xf32, #tpu.memory_space<vmem>>, vector<1x1x1x128xf32>
      %57 = vector.shape_cast %56 : vector<1x1x1x128xf32> to vector<128xf32>
      %58 = vector.shape_cast %55 : vector<128xf32> to vector<1x1x1x128xf32>
      tpu.vector_store %arg4[%c0_53, %c5_54, %c0_55, %c0_56], %58 {strides = array<i32>} : memref<1x6x1x128xf32, #tpu.memory_space<vmem>>, vector<1x1x1x128xf32>,
    } else {
    }
    return
  }
  func.func @transform_0(%arg0: i32, %arg1: i32) -> (i32, i32, i32) {
    %c0_i32 = arith.constant 0 : i32
    %c0_i32_0 = arith.constant 0 : i32
    return %arg0, %arg1, %c0_i32 : i32, i32, i32
  }
  func.func @transform_1(%arg0: i32, %arg1: i32) -> (i32, i32, i32) {
    %c0_i32 = arith.constant 0 : i32
    %c0_i32_0 = arith.constant 0 : i32
    return %arg0, %arg1, %c0_i32 : i32, i32, i32
  }
  func.func @transform_2(%arg0: i32, %arg1: i32) -> (i32, i32, i32, i32) {
    %c0_i32 = arith.constant 0 : i32
    %c0_i32_0 = arith.constant 0 : i32
    %c0_i32_1 = arith.constant 0 : i32
    %c0_i32_2 = arith.constant 0 : i32
    return %arg0, %c0_i32, %c0_i32_0, %c0_i32_1 : i32, i32, i32, i32
  }
}

module attributes {stable_mosaic.version = 11 : i64} {
  func.func @kernel(%arg0: i32, %arg1: memref<16xf32, #tpu.memory_space<smem>>, %arg2: memref<16x6xf32, #tpu.memory_space<vmem>>, %arg3: memref<4x16x16x16xf32, #tpu.memory_space<any>>, %arg4: memref<4x16x16x16xf32, #tpu.memory_space<any>>, %arg5: memref<1x1x128xf32, #tpu.memory_space<vmem>>, %arg6: memref<2x16x16x16xf32, #tpu.memory_space<vmem>>, %arg7: memref<2x16x16x16xf32, #tpu.memory_space<vmem>>, %arg8: memref<2x2x!tpu.dma_semaphore, #tpu.memory_space<semaphore_mem>>, %arg9: memref<6x6xf32, #tpu.memory_space<vmem>>) attributes {dimension_semantics = [#tpu.dimension_semantics<parallel>], iteration_bounds = array<i64: 4>, scalar_prefetch = 0 : i64, scratch_operands = 4 : i64, tpu.core_type = #tpu.core_type<tc>, window_params = [{transform_indices = @transform_0, window_bounds = array<i64: 16>}, {pipeline_mode = #tpu.pipeline_mode<synchronous>, transform_indices = @transform_1, window_bounds = array<i64: 16, 6>}, {}, {}, {transform_indices = @transform_4, window_bounds = array<i64: 1, 1, 128>}]} {
    %c4_i32 = arith.constant 4 : i32
    %0 = arith.muli %c4_i32, %arg0 : i32
    %1 = arith.index_cast %0 : i32 to index
    %2 = memref.load %arg1[%1] : memref<16xf32, #tpu.memory_space<smem>>
    %c4_i32_0 = arith.constant 4 : i32
    %3 = arith.muli %c4_i32_0, %arg0 : i32
    %c1_i32 = arith.constant 1 : i32
    %4 = arith.addi %3, %c1_i32 : i32
    %5 = arith.index_cast %4 : i32 to index
    %6 = memref.load %arg1[%5] : memref<16xf32, #tpu.memory_space<smem>>
    %c4_i32_1 = arith.constant 4 : i32
    %7 = arith.muli %c4_i32_1, %arg0 : i32
    %c2_i32 = arith.constant 2 : i32
    %8 = arith.addi %7, %c2_i32 : i32
    %9 = arith.index_cast %8 : i32 to index
    %10 = memref.load %arg1[%9] : memref<16xf32, #tpu.memory_space<smem>>
    %c4_i32_2 = arith.constant 4 : i32
    %11 = arith.muli %c4_i32_2, %arg0 : i32
    %c3_i32 = arith.constant 3 : i32
    %12 = arith.addi %11, %c3_i32 : i32
    %13 = arith.index_cast %12 : i32 to index
    %14 = memref.load %arg1[%13] : memref<16xf32, #tpu.memory_space<smem>>
    %c0 = arith.constant 0 : index
    %c0_3 = arith.constant 0 : index
    %15 = vector.load %arg2[%c0, %c0_3] : memref<16x6xf32, #tpu.memory_space<vmem>>, vector<16x6xf32>
    %c0_i32 = arith.constant 0 : i32
    %c0_i32_4 = arith.constant 0 : i32
    %16 = arith.minsi %c0_i32, %c0_i32_4 : i32
    %c0_i32_5 = arith.constant 0 : i32
    %c0_i32_6 = arith.constant 0 : i32
    %c0_i32_7 = arith.constant 0 : i32
    %c0_i32_8 = arith.constant 0 : i32
    %c0_i32_9 = arith.constant 0 : i32
    %17 = tpu.memref_slice %arg3[%arg0, %16, %c0_i32_8, %c0_i32_9] : memref<4x16x16x16xf32, #tpu.memory_space<any>> -> memref<1x16x16x16xf32, #tpu.memory_space<any>>
    %18 = tpu.memref_squeeze %17 : memref<1x16x16x16xf32, #tpu.memory_space<any>> -> memref<16x16x16xf32, #tpu.memory_space<any>>
    %c0_i32_10 = arith.constant 0 : i32
    %c0_i32_11 = arith.constant 0 : i32
    %c0_i32_12 = arith.constant 0 : i32
    %19 = tpu.memref_slice %arg6[%c0_i32_5, %c0_i32_10, %c0_i32_11, %c0_i32_12] : memref<2x16x16x16xf32, #tpu.memory_space<vmem>> -> memref<1x16x16x16xf32, #tpu.memory_space<vmem>>
    %20 = tpu.memref_squeeze %19 : memref<1x16x16x16xf32, #tpu.memory_space<vmem>> -> memref<16x16x16xf32, #tpu.memory_space<vmem>>
    %21 = tpu.memref_slice %arg8[%c0_i32_6, %c0_i32_7] : memref<2x2x!tpu.dma_semaphore, #tpu.memory_space<semaphore_mem>> -> memref<1x1x!tpu.dma_semaphore, #tpu.memory_space<semaphore_mem>>
    %22 = tpu.memref_squeeze %21 : memref<1x1x!tpu.dma_semaphore, #tpu.memory_space<semaphore_mem>> -> memref<!tpu.dma_semaphore, #tpu.memory_space<semaphore_mem>>
    tpu.enqueue_dma source(%18 : memref<16x16x16xf32, #tpu.memory_space<any>>) target(%20 : memref<16x16x16xf32, #tpu.memory_space<vmem>>) target_semaphore(%22 : memref<!tpu.dma_semaphore, #tpu.memory_space<semaphore_mem>>)
    %c0_i32_13 = arith.constant 0 : i32
    %c0_i32_14 = arith.constant 0 : i32
    %23 = arith.minsi %c0_i32_13, %c0_i32_14 : i32
    %c0_i32_15 = arith.constant 0 : i32
    %c1_i32_16 = arith.constant 1 : i32
    %c0_i32_17 = arith.constant 0 : i32
    %c0_i32_18 = arith.constant 0 : i32
    %c0_i32_19 = arith.constant 0 : i32
    %24 = tpu.memref_slice %arg4[%arg0, %23, %c0_i32_18, %c0_i32_19] : memref<4x16x16x16xf32, #tpu.memory_space<any>> -> memref<1x16x16x16xf32, #tpu.memory_space<any>>
    %25 = tpu.memref_squeeze %24 : memref<1x16x16x16xf32, #tpu.memory_space<any>> -> memref<16x16x16xf32, #tpu.memory_space<any>>
    %c0_i32_20 = arith.constant 0 : i32
    %c0_i32_21 = arith.constant 0 : i32
    %c0_i32_22 = arith.constant 0 : i32
    %26 = tpu.memref_slice %arg7[%c0_i32_15, %c0_i32_20, %c0_i32_21, %c0_i32_22] : memref<2x16x16x16xf32, #tpu.memory_space<vmem>> -> memref<1x16x16x16xf32, #tpu.memory_space<vmem>>
    %27 = tpu.memref_squeeze %26 : memref<1x16x16x16xf32, #tpu.memory_space<vmem>> -> memref<16x16x16xf32, #tpu.memory_space<vmem>>
    %28 = tpu.memref_slice %arg8[%c1_i32_16, %c0_i32_17] : memref<2x2x!tpu.dma_semaphore, #tpu.memory_space<semaphore_mem>> -> memref<1x1x!tpu.dma_semaphore, #tpu.memory_space<semaphore_mem>>
    %29 = tpu.memref_squeeze %28 : memref<1x1x!tpu.dma_semaphore, #tpu.memory_space<semaphore_mem>> -> memref<!tpu.dma_semaphore, #tpu.memory_space<semaphore_mem>>
    tpu.enqueue_dma source(%25 : memref<16x16x16xf32, #tpu.memory_space<any>>) target(%27 : memref<16x16x16xf32, #tpu.memory_space<vmem>>) target_semaphore(%29 : memref<!tpu.dma_semaphore, #tpu.memory_space<semaphore_mem>>)
    %cst = arith.constant 0.000000e+00 : f32
    %30 = vector.broadcast %cst : f32 to vector<6x6xf32>
    %c0_23 = arith.constant 0 : index
    %c0_24 = arith.constant 0 : index
    %31 = vector.load %arg9[%c0_23, %c0_24] : memref<6x6xf32, #tpu.memory_space<vmem>>, vector<6x6xf32>
    tpu.vector_store %arg9[%c0_23, %c0_24], %30 {strides = array<i32>} : memref<6x6xf32, #tpu.memory_space<vmem>>, vector<6x6xf32>,
    %c0_i32_25 = arith.constant 0 : i32
    %c2_i32_26 = arith.constant 2 : i32
    %c0_i32_27 = arith.constant 0 : i32
    %32 = arith.cmpi eq, %c2_i32_26, %c0_i32_27 : i32
    %c1_i32_28 = arith.constant 1 : i32
    %33 = arith.select %32, %c1_i32_28, %c2_i32_26 : i32
    %34 = arith.remsi %c0_i32_25, %33 : i32
    %c0_i32_29 = arith.constant 0 : i32
    %35 = arith.cmpi ne, %34, %c0_i32_29 : i32
    %c0_i32_30 = arith.constant 0 : i32
    %36 = arith.cmpi slt, %34, %c0_i32_30 : i32
    %c0_i32_31 = arith.constant 0 : i32
    %37 = arith.cmpi slt, %33, %c0_i32_31 : i32
    %38 = arith.xori %36, %37 : i1
    %39 = arith.andi %38, %35 : i1
    %40 = arith.addi %34, %33 : i32
    %41 = arith.select %39, %40, %34 : i32
    %c6_i32 = arith.constant 6 : i32
    %42 = arith.muli %c0_i32_25, %c6_i32 : i32
    %c0_i32_32 = arith.constant 0 : i32
    %43 = arith.minsi %42, %c0_i32_32 : i32
    %c0_i32_33 = arith.constant 0 : i32
    %c0_i32_34 = arith.constant 0 : i32
    %c0_i32_35 = arith.constant 0 : i32
    %44 = tpu.memref_slice %arg3[%arg0, %43, %c0_i32_34, %c0_i32_35] : memref<4x16x16x16xf32, #tpu.memory_space<any>> -> memref<1x16x16x16xf32, #tpu.memory_space<any>>
    %45 = tpu.memref_squeeze %44 : memref<1x16x16x16xf32, #tpu.memory_space<any>> -> memref<16x16x16xf32, #tpu.memory_space<any>>
    %c0_i32_36 = arith.constant 0 : i32
    %c0_i32_37 = arith.constant 0 : i32
    %c0_i32_38 = arith.constant 0 : i32
    %46 = tpu.memref_slice %arg6[%41, %c0_i32_36, %c0_i32_37, %c0_i32_38] : memref<2x16x16x16xf32, #tpu.memory_space<vmem>> -> memref<1x16x16x16xf32, #tpu.memory_space<vmem>>
    %47 = tpu.memref_squeeze %46 : memref<1x16x16x16xf32, #tpu.memory_space<vmem>> -> memref<16x16x16xf32, #tpu.memory_space<vmem>>
    %48 = tpu.memref_slice %arg8[%c0_i32_33, %41] : memref<2x2x!tpu.dma_semaphore, #tpu.memory_space<semaphore_mem>> -> memref<1x1x!tpu.dma_semaphore, #tpu.memory_space<semaphore_mem>>
    %49 = tpu.memref_squeeze %48 : memref<1x1x!tpu.dma_semaphore, #tpu.memory_space<semaphore_mem>> -> memref<!tpu.dma_semaphore, #tpu.memory_space<semaphore_mem>>
    tpu.wait_dma2 semaphore(%49 : memref<!tpu.dma_semaphore, #tpu.memory_space<semaphore_mem>>) src(%45 : memref<16x16x16xf32, #tpu.memory_space<any>>) dst(%47 : memref<16x16x16xf32, #tpu.memory_space<vmem>>)
    %c6_i32_39 = arith.constant 6 : i32
    %50 = arith.muli %c0_i32_25, %c6_i32_39 : i32
    %c0_i32_40 = arith.constant 0 : i32
    %51 = arith.minsi %50, %c0_i32_40 : i32
    %c1_i32_41 = arith.constant 1 : i32
    %c0_i32_42 = arith.constant 0 : i32
    %c0_i32_43 = arith.constant 0 : i32
    %52 = tpu.memref_slice %arg4[%arg0, %51, %c0_i32_42, %c0_i32_43] : memref<4x16x16x16xf32, #tpu.memory_space<any>> -> memref<1x16x16x16xf32, #tpu.memory_space<any>>
    %53 = tpu.memref_squeeze %52 : memref<1x16x16x16xf32, #tpu.memory_space<any>> -> memref<16x16x16xf32, #tpu.memory_space<any>>
    %c0_i32_44 = arith.constant 0 : i32
    %c0_i32_45 = arith.constant 0 : i32
    %c0_i32_46 = arith.constant 0 : i32
    %54 = tpu.memref_slice %arg7[%41, %c0_i32_44, %c0_i32_45, %c0_i32_46] : memref<2x16x16x16xf32, #tpu.memory_space<vmem>> -> memref<1x16x16x16xf32, #tpu.memory_space<vmem>>
    %55 = tpu.memref_squeeze %54 : memref<1x16x16x16xf32, #tpu.memory_space<vmem>> -> memref<16x16x16xf32, #tpu.memory_space<vmem>>
    %56 = tpu.memref_slice %arg8[%c1_i32_41, %41] : memref<2x2x!tpu.dma_semaphore, #tpu.memory_space<semaphore_mem>> -> memref<1x1x!tpu.dma_semaphore, #tpu.memory_space<semaphore_mem>>
    %57 = tpu.memref_squeeze %56 : memref<1x1x!tpu.dma_semaphore, #tpu.memory_space<semaphore_mem>> -> memref<!tpu.dma_semaphore, #tpu.memory_space<semaphore_mem>>
    tpu.wait_dma2 semaphore(%57 : memref<!tpu.dma_semaphore, #tpu.memory_space<semaphore_mem>>) src(%53 : memref<16x16x16xf32, #tpu.memory_space<any>>) dst(%55 : memref<16x16x16xf32, #tpu.memory_space<vmem>>)
    %c1_i32_47 = arith.constant 1 : i32
    %58 = arith.addi %c0_i32_25, %c1_i32_47 : i32
    %c1_i32_48 = arith.constant 1 : i32
    %59 = arith.cmpi slt, %58, %c1_i32_48 : i32
    %60 = arith.extui %59 : i1 to i32
    %c0_i32_49 = arith.constant 0 : i32
    %61 = arith.cmpi ne, %60, %c0_i32_49 : i32
    scf.if %61 {
      %c1_i32_191 = arith.constant 1 : i32
      %568 = arith.addi %c0_i32_25, %c1_i32_191 : i32
      %c1_i32_192 = arith.constant 1 : i32
      %569 = arith.subi %c1_i32_192, %41 : i32
      %c6_i32_193 = arith.constant 6 : i32
      %570 = arith.muli %568, %c6_i32_193 : i32
      %c0_i32_194 = arith.constant 0 : i32
      %571 = arith.minsi %570, %c0_i32_194 : i32
      %c0_i32_195 = arith.constant 0 : i32
      %c0_i32_196 = arith.constant 0 : i32
      %c0_i32_197 = arith.constant 0 : i32
      %572 = tpu.memref_slice %arg3[%arg0, %571, %c0_i32_196, %c0_i32_197] : memref<4x16x16x16xf32, #tpu.memory_space<any>> -> memref<1x16x16x16xf32, #tpu.memory_space<any>>
      %573 = tpu.memref_squeeze %572 : memref<1x16x16x16xf32, #tpu.memory_space<any>> -> memref<16x16x16xf32, #tpu.memory_space<any>>
      %c0_i32_198 = arith.constant 0 : i32
      %c0_i32_199 = arith.constant 0 : i32
      %c0_i32_200 = arith.constant 0 : i32
      %574 = tpu.memref_slice %arg6[%569, %c0_i32_198, %c0_i32_199, %c0_i32_200] : memref<2x16x16x16xf32, #tpu.memory_space<vmem>> -> memref<1x16x16x16xf32, #tpu.memory_space<vmem>>
      %575 = tpu.memref_squeeze %574 : memref<1x16x16x16xf32, #tpu.memory_space<vmem>> -> memref<16x16x16xf32, #tpu.memory_space<vmem>>
      %576 = tpu.memref_slice %arg8[%c0_i32_195, %569] : memref<2x2x!tpu.dma_semaphore, #tpu.memory_space<semaphore_mem>> -> memref<1x1x!tpu.dma_semaphore, #tpu.memory_space<semaphore_mem>>
      %577 = tpu.memref_squeeze %576 : memref<1x1x!tpu.dma_semaphore, #tpu.memory_space<semaphore_mem>> -> memref<!tpu.dma_semaphore, #tpu.memory_space<semaphore_mem>>
      tpu.enqueue_dma source(%573 : memref<16x16x16xf32, #tpu.memory_space<any>>) target(%575 : memref<16x16x16xf32, #tpu.memory_space<vmem>>) target_semaphore(%577 : memref<!tpu.dma_semaphore, #tpu.memory_space<semaphore_mem>>)
      %c1_i32_201 = arith.constant 1 : i32
      %578 = arith.addi %c0_i32_25, %c1_i32_201 : i32
      %c1_i32_202 = arith.constant 1 : i32
      %579 = arith.subi %c1_i32_202, %41 : i32
      %c6_i32_203 = arith.constant 6 : i32
      %580 = arith.muli %578, %c6_i32_203 : i32
      %c0_i32_204 = arith.constant 0 : i32
      %581 = arith.minsi %580, %c0_i32_204 : i32
      %c1_i32_205 = arith.constant 1 : i32
      %c0_i32_206 = arith.constant 0 : i32
      %c0_i32_207 = arith.constant 0 : i32
      %582 = tpu.memref_slice %arg4[%arg0, %581, %c0_i32_206, %c0_i32_207] : memref<4x16x16x16xf32, #tpu.memory_space<any>> -> memref<1x16x16x16xf32, #tpu.memory_space<any>>
      %583 = tpu.memref_squeeze %582 : memref<1x16x16x16xf32, #tpu.memory_space<any>> -> memref<16x16x16xf32, #tpu.memory_space<any>>
      %c0_i32_208 = arith.constant 0 : i32
      %c0_i32_209 = arith.constant 0 : i32
      %c0_i32_210 = arith.constant 0 : i32
      %584 = tpu.memref_slice %arg7[%579, %c0_i32_208, %c0_i32_209, %c0_i32_210] : memref<2x16x16x16xf32, #tpu.memory_space<vmem>> -> memref<1x16x16x16xf32, #tpu.memory_space<vmem>>
      %585 = tpu.memref_squeeze %584 : memref<1x16x16x16xf32, #tpu.memory_space<vmem>> -> memref<16x16x16xf32, #tpu.memory_space<vmem>>
      %586 = tpu.memref_slice %arg8[%c1_i32_205, %579] : memref<2x2x!tpu.dma_semaphore, #tpu.memory_space<semaphore_mem>> -> memref<1x1x!tpu.dma_semaphore, #tpu.memory_space<semaphore_mem>>
      %587 = tpu.memref_squeeze %586 : memref<1x1x!tpu.dma_semaphore, #tpu.memory_space<semaphore_mem>> -> memref<!tpu.dma_semaphore, #tpu.memory_space<semaphore_mem>>
      tpu.enqueue_dma source(%583 : memref<16x16x16xf32, #tpu.memory_space<any>>) target(%585 : memref<16x16x16xf32, #tpu.memory_space<vmem>>) target_semaphore(%587 : memref<!tpu.dma_semaphore, #tpu.memory_space<semaphore_mem>>)
    } else {
    }
    %62 = arith.index_cast %41 : i32 to index
    %c0_50 = arith.constant 0 : index
    %c0_51 = arith.constant 0 : index
    %c0_52 = arith.constant 0 : index
    %63 = vector.load %arg6[%62, %c0_50, %c0_51, %c0_52] : memref<2x16x16x16xf32, #tpu.memory_space<vmem>>, vector<1x16x16x16xf32>
    %64 = vector.shape_cast %63 : vector<1x16x16x16xf32> to vector<16x16x16xf32>
    %65 = arith.index_cast %41 : i32 to index
    %c0_53 = arith.constant 0 : index
    %c0_54 = arith.constant 0 : index
    %c0_55 = arith.constant 0 : index
    %66 = vector.load %arg7[%65, %c0_53, %c0_54, %c0_55] : memref<2x16x16x16xf32, #tpu.memory_space<vmem>>, vector<1x16x16x16xf32>
    %67 = vector.shape_cast %66 : vector<1x16x16x16xf32> to vector<16x16x16xf32>
    %cst_56 = arith.constant 0.000000e+00 : f32
    %68 = vector.broadcast %cst_56 : f32 to vector<16x16x16xf32>
    %69 = arith.cmpf one, %67, %68 : vector<16x16x16xf32>
    %70 = arith.extui %69 : vector<16x16x16xi1> to vector<16x16x16xi32>
    %71 = arith.sitofp %70 : vector<16x16x16xi32> to vector<16x16x16xf32>
    %72 = vector.broadcast %2 : f32 to vector<16x16x16xf32>
    %73 = arith.subf %64, %72 : vector<16x16x16xf32>
    %74 = vector.broadcast %6 : f32 to vector<16x16x16xf32>
    %75 = arith.mulf %73, %74 : vector<16x16x16xf32>
    %76 = arith.mulf %75, %71 : vector<16x16x16xf32>
    %77 = vector.shape_cast %76 : vector<16x16x16xf32> to vector<256x16xf32>
    %78 = vector.broadcast %10 : f32 to vector<16x16x16xf32>
    %79 = arith.subf %67, %78 : vector<16x16x16xf32>
    %80 = vector.broadcast %14 : f32 to vector<16x16x16xf32>
    %81 = arith.mulf %79, %80 : vector<16x16x16xf32>
    %82 = arith.mulf %81, %71 : vector<16x16x16xf32>
    %83 = vector.shape_cast %82 : vector<16x16x16xf32> to vector<256x16xf32>
    %cst_57 = arith.constant dense<0.000000e+00> : vector<256x6xf32>
    %84 = tpu.matmul %77, %15, %cst_57 {dimension_numbers = #tpu.dot_dimension_numbers<[1], [0], [0], [1], [0, 0, 1, 1], [], []>} : vector<256x16xf32>, vector<16x6xf32>, vector<256x6xf32> -> vector<256x6xf32>
    %85 = vector.shape_cast %84 : vector<256x6xf32> to vector<16x16x6xf32>
    %86 = vector.extract_strided_slice %85 {offsets = [0, 0, 0], sizes = [6, 16, 6], strides = [1, 1, 1]} : vector<16x16x6xf32> to vector<6x16x6xf32>
    %cst_58 = arith.constant 0.00102838036 : f32
    %87 = vector.broadcast %cst_58 : f32 to vector<6x16x6xf32>
    %88 = arith.mulf %86, %87 : vector<6x16x6xf32>
    %89 = vector.extract_strided_slice %85 {offsets = [1, 0, 0], sizes = [6, 16, 6], strides = [1, 1, 1]} : vector<16x16x6xf32> to vector<6x16x6xf32>
    %cst_59 = arith.constant 0.00759875635 : f32
    %90 = vector.broadcast %cst_59 : f32 to vector<6x16x6xf32>
    %91 = arith.mulf %89, %90 : vector<6x16x6xf32>
    %92 = arith.addf %88, %91 : vector<6x16x6xf32>
    %93 = vector.extract_strided_slice %85 {offsets = [2, 0, 0], sizes = [6, 16, 6], strides = [1, 1, 1]} : vector<16x16x6xf32> to vector<6x16x6xf32>
    %cst_60 = arith.constant 0.0360007733 : f32
    %94 = vector.broadcast %cst_60 : f32 to vector<6x16x6xf32>
    %95 = arith.mulf %93, %94 : vector<6x16x6xf32>
    %96 = arith.addf %92, %95 : vector<6x16x6xf32>
    %97 = vector.extract_strided_slice %85 {offsets = [3, 0, 0], sizes = [6, 16, 6], strides = [1, 1, 1]} : vector<16x16x6xf32> to vector<6x16x6xf32>
    %cst_61 = arith.constant 0.109360687 : f32
    %98 = vector.broadcast %cst_61 : f32 to vector<6x16x6xf32>
    %99 = arith.mulf %97, %98 : vector<6x16x6xf32>
    %100 = arith.addf %96, %99 : vector<6x16x6xf32>
    %101 = vector.extract_strided_slice %85 {offsets = [4, 0, 0], sizes = [6, 16, 6], strides = [1, 1, 1]} : vector<16x16x6xf32> to vector<6x16x6xf32>
    %cst_62 = arith.constant 0.213005543 : f32
    %102 = vector.broadcast %cst_62 : f32 to vector<6x16x6xf32>
    %103 = arith.mulf %101, %102 : vector<6x16x6xf32>
    %104 = arith.addf %100, %103 : vector<6x16x6xf32>
    %105 = vector.extract_strided_slice %85 {offsets = [5, 0, 0], sizes = [6, 16, 6], strides = [1, 1, 1]} : vector<16x16x6xf32> to vector<6x16x6xf32>
    %cst_63 = arith.constant 0.266011745 : f32
    %106 = vector.broadcast %cst_63 : f32 to vector<6x16x6xf32>
    %107 = arith.mulf %105, %106 : vector<6x16x6xf32>
    %108 = arith.addf %104, %107 : vector<6x16x6xf32>
    %109 = vector.extract_strided_slice %85 {offsets = [6, 0, 0], sizes = [6, 16, 6], strides = [1, 1, 1]} : vector<16x16x6xf32> to vector<6x16x6xf32>
    %cst_64 = arith.constant 0.213005543 : f32
    %110 = vector.broadcast %cst_64 : f32 to vector<6x16x6xf32>
    %111 = arith.mulf %109, %110 : vector<6x16x6xf32>
    %112 = arith.addf %108, %111 : vector<6x16x6xf32>
    %113 = vector.extract_strided_slice %85 {offsets = [7, 0, 0], sizes = [6, 16, 6], strides = [1, 1, 1]} : vector<16x16x6xf32> to vector<6x16x6xf32>
    %cst_65 = arith.constant 0.109360687 : f32
    %114 = vector.broadcast %cst_65 : f32 to vector<6x16x6xf32>
    %115 = arith.mulf %113, %114 : vector<6x16x6xf32>
    %116 = arith.addf %112, %115 : vector<6x16x6xf32>
    %117 = vector.extract_strided_slice %85 {offsets = [8, 0, 0], sizes = [6, 16, 6], strides = [1, 1, 1]} : vector<16x16x6xf32> to vector<6x16x6xf32>
    %cst_66 = arith.constant 0.0360007733 : f32
    %118 = vector.broadcast %cst_66 : f32 to vector<6x16x6xf32>
    %119 = arith.mulf %117, %118 : vector<6x16x6xf32>
    %120 = arith.addf %116, %119 : vector<6x16x6xf32>
    %121 = vector.extract_strided_slice %85 {offsets = [9, 0, 0], sizes = [6, 16, 6], strides = [1, 1, 1]} : vector<16x16x6xf32> to vector<6x16x6xf32>
    %cst_67 = arith.constant 0.00759875635 : f32
    %122 = vector.broadcast %cst_67 : f32 to vector<6x16x6xf32>
    %123 = arith.mulf %121, %122 : vector<6x16x6xf32>
    %124 = arith.addf %120, %123 : vector<6x16x6xf32>
    %125 = vector.extract_strided_slice %85 {offsets = [10, 0, 0], sizes = [6, 16, 6], strides = [1, 1, 1]} : vector<16x16x6xf32> to vector<6x16x6xf32>
    %cst_68 = arith.constant 0.00102838036 : f32
    %126 = vector.broadcast %cst_68 : f32 to vector<6x16x6xf32>
    %127 = arith.mulf %125, %126 : vector<6x16x6xf32>
    %128 = arith.addf %124, %127 : vector<6x16x6xf32>
    %129 = vector.extract_strided_slice %128 {offsets = [0, 0, 0], sizes = [6, 6, 6], strides = [1, 1, 1]} : vector<6x16x6xf32> to vector<6x6x6xf32>
    %cst_69 = arith.constant 0.00102838036 : f32
    %130 = vector.broadcast %cst_69 : f32 to vector<6x6x6xf32>
    %131 = arith.mulf %129, %130 : vector<6x6x6xf32>
    %132 = vector.extract_strided_slice %128 {offsets = [0, 1, 0], sizes = [6, 6, 6], strides = [1, 1, 1]} : vector<6x16x6xf32> to vector<6x6x6xf32>
    %cst_70 = arith.constant 0.00759875635 : f32
    %133 = vector.broadcast %cst_70 : f32 to vector<6x6x6xf32>
    %134 = arith.mulf %132, %133 : vector<6x6x6xf32>
    %135 = arith.addf %131, %134 : vector<6x6x6xf32>
    %136 = vector.extract_strided_slice %128 {offsets = [0, 2, 0], sizes = [6, 6, 6], strides = [1, 1, 1]} : vector<6x16x6xf32> to vector<6x6x6xf32>
    %cst_71 = arith.constant 0.0360007733 : f32
    %137 = vector.broadcast %cst_71 : f32 to vector<6x6x6xf32>
    %138 = arith.mulf %136, %137 : vector<6x6x6xf32>
    %139 = arith.addf %135, %138 : vector<6x6x6xf32>
    %140 = vector.extract_strided_slice %128 {offsets = [0, 3, 0], sizes = [6, 6, 6], strides = [1, 1, 1]} : vector<6x16x6xf32> to vector<6x6x6xf32>
    %cst_72 = arith.constant 0.109360687 : f32
    %141 = vector.broadcast %cst_72 : f32 to vector<6x6x6xf32>
    %142 = arith.mulf %140, %141 : vector<6x6x6xf32>
    %143 = arith.addf %139, %142 : vector<6x6x6xf32>
    %144 = vector.extract_strided_slice %128 {offsets = [0, 4, 0], sizes = [6, 6, 6], strides = [1, 1, 1]} : vector<6x16x6xf32> to vector<6x6x6xf32>
    %cst_73 = arith.constant 0.213005543 : f32
    %145 = vector.broadcast %cst_73 : f32 to vector<6x6x6xf32>
    %146 = arith.mulf %144, %145 : vector<6x6x6xf32>
    %147 = arith.addf %143, %146 : vector<6x6x6xf32>
    %148 = vector.extract_strided_slice %128 {offsets = [0, 5, 0], sizes = [6, 6, 6], strides = [1, 1, 1]} : vector<6x16x6xf32> to vector<6x6x6xf32>
    %cst_74 = arith.constant 0.266011745 : f32
    %149 = vector.broadcast %cst_74 : f32 to vector<6x6x6xf32>
    %150 = arith.mulf %148, %149 : vector<6x6x6xf32>
    %151 = arith.addf %147, %150 : vector<6x6x6xf32>
    %152 = vector.extract_strided_slice %128 {offsets = [0, 6, 0], sizes = [6, 6, 6], strides = [1, 1, 1]} : vector<6x16x6xf32> to vector<6x6x6xf32>
    %cst_75 = arith.constant 0.213005543 : f32
    %153 = vector.broadcast %cst_75 : f32 to vector<6x6x6xf32>
    %154 = arith.mulf %152, %153 : vector<6x6x6xf32>
    %155 = arith.addf %151, %154 : vector<6x6x6xf32>
    %156 = vector.extract_strided_slice %128 {offsets = [0, 7, 0], sizes = [6, 6, 6], strides = [1, 1, 1]} : vector<6x16x6xf32> to vector<6x6x6xf32>
    %cst_76 = arith.constant 0.109360687 : f32
    %157 = vector.broadcast %cst_76 : f32 to vector<6x6x6xf32>
    %158 = arith.mulf %156, %157 : vector<6x6x6xf32>
    %159 = arith.addf %155, %158 : vector<6x6x6xf32>
    %160 = vector.extract_strided_slice %128 {offsets = [0, 8, 0], sizes = [6, 6, 6], strides = [1, 1, 1]} : vector<6x16x6xf32> to vector<6x6x6xf32>
    %cst_77 = arith.constant 0.0360007733 : f32
    %161 = vector.broadcast %cst_77 : f32 to vector<6x6x6xf32>
    %162 = arith.mulf %160, %161 : vector<6x6x6xf32>
    %163 = arith.addf %159, %162 : vector<6x6x6xf32>
    %164 = vector.extract_strided_slice %128 {offsets = [0, 9, 0], sizes = [6, 6, 6], strides = [1, 1, 1]} : vector<6x16x6xf32> to vector<6x6x6xf32>
    %cst_78 = arith.constant 0.00759875635 : f32
    %165 = vector.broadcast %cst_78 : f32 to vector<6x6x6xf32>
    %166 = arith.mulf %164, %165 : vector<6x6x6xf32>
    %167 = arith.addf %163, %166 : vector<6x6x6xf32>
    %168 = vector.extract_strided_slice %128 {offsets = [0, 10, 0], sizes = [6, 6, 6], strides = [1, 1, 1]} : vector<6x16x6xf32> to vector<6x6x6xf32>
    %cst_79 = arith.constant 0.00102838036 : f32
    %169 = vector.broadcast %cst_79 : f32 to vector<6x6x6xf32>
    %170 = arith.mulf %168, %169 : vector<6x6x6xf32>
    %171 = arith.addf %167, %170 : vector<6x6x6xf32>
    %cst_80 = arith.constant dense<0.000000e+00> : vector<256x6xf32>
    %172 = tpu.matmul %83, %15, %cst_80 {dimension_numbers = #tpu.dot_dimension_numbers<[1], [0], [0], [1], [0, 0, 1, 1], [], []>} : vector<256x16xf32>, vector<16x6xf32>, vector<256x6xf32> -> vector<256x6xf32>
    %173 = vector.shape_cast %172 : vector<256x6xf32> to vector<16x16x6xf32>
    %174 = vector.extract_strided_slice %173 {offsets = [0, 0, 0], sizes = [6, 16, 6], strides = [1, 1, 1]} : vector<16x16x6xf32> to vector<6x16x6xf32>
    %cst_81 = arith.constant 0.00102838036 : f32
    %175 = vector.broadcast %cst_81 : f32 to vector<6x16x6xf32>
    %176 = arith.mulf %174, %175 : vector<6x16x6xf32>
    %177 = vector.extract_strided_slice %173 {offsets = [1, 0, 0], sizes = [6, 16, 6], strides = [1, 1, 1]} : vector<16x16x6xf32> to vector<6x16x6xf32>
    %cst_82 = arith.constant 0.00759875635 : f32
    %178 = vector.broadcast %cst_82 : f32 to vector<6x16x6xf32>
    %179 = arith.mulf %177, %178 : vector<6x16x6xf32>
    %180 = arith.addf %176, %179 : vector<6x16x6xf32>
    %181 = vector.extract_strided_slice %173 {offsets = [2, 0, 0], sizes = [6, 16, 6], strides = [1, 1, 1]} : vector<16x16x6xf32> to vector<6x16x6xf32>
    %cst_83 = arith.constant 0.0360007733 : f32
    %182 = vector.broadcast %cst_83 : f32 to vector<6x16x6xf32>
    %183 = arith.mulf %181, %182 : vector<6x16x6xf32>
    %184 = arith.addf %180, %183 : vector<6x16x6xf32>
    %185 = vector.extract_strided_slice %173 {offsets = [3, 0, 0], sizes = [6, 16, 6], strides = [1, 1, 1]} : vector<16x16x6xf32> to vector<6x16x6xf32>
    %cst_84 = arith.constant 0.109360687 : f32
    %186 = vector.broadcast %cst_84 : f32 to vector<6x16x6xf32>
    %187 = arith.mulf %185, %186 : vector<6x16x6xf32>
    %188 = arith.addf %184, %187 : vector<6x16x6xf32>
    %189 = vector.extract_strided_slice %173 {offsets = [4, 0, 0], sizes = [6, 16, 6], strides = [1, 1, 1]} : vector<16x16x6xf32> to vector<6x16x6xf32>
    %cst_85 = arith.constant 0.213005543 : f32
    %190 = vector.broadcast %cst_85 : f32 to vector<6x16x6xf32>
    %191 = arith.mulf %189, %190 : vector<6x16x6xf32>
    %192 = arith.addf %188, %191 : vector<6x16x6xf32>
    %193 = vector.extract_strided_slice %173 {offsets = [5, 0, 0], sizes = [6, 16, 6], strides = [1, 1, 1]} : vector<16x16x6xf32> to vector<6x16x6xf32>
    %cst_86 = arith.constant 0.266011745 : f32
    %194 = vector.broadcast %cst_86 : f32 to vector<6x16x6xf32>
    %195 = arith.mulf %193, %194 : vector<6x16x6xf32>
    %196 = arith.addf %192, %195 : vector<6x16x6xf32>
    %197 = vector.extract_strided_slice %173 {offsets = [6, 0, 0], sizes = [6, 16, 6], strides = [1, 1, 1]} : vector<16x16x6xf32> to vector<6x16x6xf32>
    %cst_87 = arith.constant 0.213005543 : f32
    %198 = vector.broadcast %cst_87 : f32 to vector<6x16x6xf32>
    %199 = arith.mulf %197, %198 : vector<6x16x6xf32>
    %200 = arith.addf %196, %199 : vector<6x16x6xf32>
    %201 = vector.extract_strided_slice %173 {offsets = [7, 0, 0], sizes = [6, 16, 6], strides = [1, 1, 1]} : vector<16x16x6xf32> to vector<6x16x6xf32>
    %cst_88 = arith.constant 0.109360687 : f32
    %202 = vector.broadcast %cst_88 : f32 to vector<6x16x6xf32>
    %203 = arith.mulf %201, %202 : vector<6x16x6xf32>
    %204 = arith.addf %200, %203 : vector<6x16x6xf32>
    %205 = vector.extract_strided_slice %173 {offsets = [8, 0, 0], sizes = [6, 16, 6], strides = [1, 1, 1]} : vector<16x16x6xf32> to vector<6x16x6xf32>
    %cst_89 = arith.constant 0.0360007733 : f32
    %206 = vector.broadcast %cst_89 : f32 to vector<6x16x6xf32>
    %207 = arith.mulf %205, %206 : vector<6x16x6xf32>
    %208 = arith.addf %204, %207 : vector<6x16x6xf32>
    %209 = vector.extract_strided_slice %173 {offsets = [9, 0, 0], sizes = [6, 16, 6], strides = [1, 1, 1]} : vector<16x16x6xf32> to vector<6x16x6xf32>
    %cst_90 = arith.constant 0.00759875635 : f32
    %210 = vector.broadcast %cst_90 : f32 to vector<6x16x6xf32>
    %211 = arith.mulf %209, %210 : vector<6x16x6xf32>
    %212 = arith.addf %208, %211 : vector<6x16x6xf32>
    %213 = vector.extract_strided_slice %173 {offsets = [10, 0, 0], sizes = [6, 16, 6], strides = [1, 1, 1]} : vector<16x16x6xf32> to vector<6x16x6xf32>
    %cst_91 = arith.constant 0.00102838036 : f32
    %214 = vector.broadcast %cst_91 : f32 to vector<6x16x6xf32>
    %215 = arith.mulf %213, %214 : vector<6x16x6xf32>
    %216 = arith.addf %212, %215 : vector<6x16x6xf32>
    %217 = vector.extract_strided_slice %216 {offsets = [0, 0, 0], sizes = [6, 6, 6], strides = [1, 1, 1]} : vector<6x16x6xf32> to vector<6x6x6xf32>
    %cst_92 = arith.constant 0.00102838036 : f32
    %218 = vector.broadcast %cst_92 : f32 to vector<6x6x6xf32>
    %219 = arith.mulf %217, %218 : vector<6x6x6xf32>
    %220 = vector.extract_strided_slice %216 {offsets = [0, 1, 0], sizes = [6, 6, 6], strides = [1, 1, 1]} : vector<6x16x6xf32> to vector<6x6x6xf32>
    %cst_93 = arith.constant 0.00759875635 : f32
    %221 = vector.broadcast %cst_93 : f32 to vector<6x6x6xf32>
    %222 = arith.mulf %220, %221 : vector<6x6x6xf32>
    %223 = arith.addf %219, %222 : vector<6x6x6xf32>
    %224 = vector.extract_strided_slice %216 {offsets = [0, 2, 0], sizes = [6, 6, 6], strides = [1, 1, 1]} : vector<6x16x6xf32> to vector<6x6x6xf32>
    %cst_94 = arith.constant 0.0360007733 : f32
    %225 = vector.broadcast %cst_94 : f32 to vector<6x6x6xf32>
    %226 = arith.mulf %224, %225 : vector<6x6x6xf32>
    %227 = arith.addf %223, %226 : vector<6x6x6xf32>
    %228 = vector.extract_strided_slice %216 {offsets = [0, 3, 0], sizes = [6, 6, 6], strides = [1, 1, 1]} : vector<6x16x6xf32> to vector<6x6x6xf32>
    %cst_95 = arith.constant 0.109360687 : f32
    %229 = vector.broadcast %cst_95 : f32 to vector<6x6x6xf32>
    %230 = arith.mulf %228, %229 : vector<6x6x6xf32>
    %231 = arith.addf %227, %230 : vector<6x6x6xf32>
    %232 = vector.extract_strided_slice %216 {offsets = [0, 4, 0], sizes = [6, 6, 6], strides = [1, 1, 1]} : vector<6x16x6xf32> to vector<6x6x6xf32>
    %cst_96 = arith.constant 0.213005543 : f32
    %233 = vector.broadcast %cst_96 : f32 to vector<6x6x6xf32>
    %234 = arith.mulf %232, %233 : vector<6x6x6xf32>
    %235 = arith.addf %231, %234 : vector<6x6x6xf32>
    %236 = vector.extract_strided_slice %216 {offsets = [0, 5, 0], sizes = [6, 6, 6], strides = [1, 1, 1]} : vector<6x16x6xf32> to vector<6x6x6xf32>
    %cst_97 = arith.constant 0.266011745 : f32
    %237 = vector.broadcast %cst_97 : f32 to vector<6x6x6xf32>
    %238 = arith.mulf %236, %237 : vector<6x6x6xf32>
    %239 = arith.addf %235, %238 : vector<6x6x6xf32>
    %240 = vector.extract_strided_slice %216 {offsets = [0, 6, 0], sizes = [6, 6, 6], strides = [1, 1, 1]} : vector<6x16x6xf32> to vector<6x6x6xf32>
    %cst_98 = arith.constant 0.213005543 : f32
    %241 = vector.broadcast %cst_98 : f32 to vector<6x6x6xf32>
    %242 = arith.mulf %240, %241 : vector<6x6x6xf32>
    %243 = arith.addf %239, %242 : vector<6x6x6xf32>
    %244 = vector.extract_strided_slice %216 {offsets = [0, 7, 0], sizes = [6, 6, 6], strides = [1, 1, 1]} : vector<6x16x6xf32> to vector<6x6x6xf32>
    %cst_99 = arith.constant 0.109360687 : f32
    %245 = vector.broadcast %cst_99 : f32 to vector<6x6x6xf32>
    %246 = arith.mulf %244, %245 : vector<6x6x6xf32>
    %247 = arith.addf %243, %246 : vector<6x6x6xf32>
    %248 = vector.extract_strided_slice %216 {offsets = [0, 8, 0], sizes = [6, 6, 6], strides = [1, 1, 1]} : vector<6x16x6xf32> to vector<6x6x6xf32>
    %cst_100 = arith.constant 0.0360007733 : f32
    %249 = vector.broadcast %cst_100 : f32 to vector<6x6x6xf32>
    %250 = arith.mulf %248, %249 : vector<6x6x6xf32>
    %251 = arith.addf %247, %250 : vector<6x6x6xf32>
    %252 = vector.extract_strided_slice %216 {offsets = [0, 9, 0], sizes = [6, 6, 6], strides = [1, 1, 1]} : vector<6x16x6xf32> to vector<6x6x6xf32>
    %cst_101 = arith.constant 0.00759875635 : f32
    %253 = vector.broadcast %cst_101 : f32 to vector<6x6x6xf32>
    %254 = arith.mulf %252, %253 : vector<6x6x6xf32>
    %255 = arith.addf %251, %254 : vector<6x6x6xf32>
    %256 = vector.extract_strided_slice %216 {offsets = [0, 10, 0], sizes = [6, 6, 6], strides = [1, 1, 1]} : vector<6x16x6xf32> to vector<6x6x6xf32>
    %cst_102 = arith.constant 0.00102838036 : f32
    %257 = vector.broadcast %cst_102 : f32 to vector<6x6x6xf32>
    %258 = arith.mulf %256, %257 : vector<6x6x6xf32>
    %259 = arith.addf %255, %258 : vector<6x6x6xf32>
    %260 = arith.mulf %77, %77 : vector<256x16xf32>
    %cst_103 = arith.constant dense<0.000000e+00> : vector<256x6xf32>
    %261 = tpu.matmul %260, %15, %cst_103 {dimension_numbers = #tpu.dot_dimension_numbers<[1], [0], [0], [1], [0, 0, 1, 1], [], []>} : vector<256x16xf32>, vector<16x6xf32>, vector<256x6xf32> -> vector<256x6xf32>
    %262 = vector.shape_cast %261 : vector<256x6xf32> to vector<16x16x6xf32>
    %263 = vector.extract_strided_slice %262 {offsets = [0, 0, 0], sizes = [6, 16, 6], strides = [1, 1, 1]} : vector<16x16x6xf32> to vector<6x16x6xf32>
    %cst_104 = arith.constant 0.00102838036 : f32
    %264 = vector.broadcast %cst_104 : f32 to vector<6x16x6xf32>
    %265 = arith.mulf %263, %264 : vector<6x16x6xf32>
    %266 = vector.extract_strided_slice %262 {offsets = [1, 0, 0], sizes = [6, 16, 6], strides = [1, 1, 1]} : vector<16x16x6xf32> to vector<6x16x6xf32>
    %cst_105 = arith.constant 0.00759875635 : f32
    %267 = vector.broadcast %cst_105 : f32 to vector<6x16x6xf32>
    %268 = arith.mulf %266, %267 : vector<6x16x6xf32>
    %269 = arith.addf %265, %268 : vector<6x16x6xf32>
    %270 = vector.extract_strided_slice %262 {offsets = [2, 0, 0], sizes = [6, 16, 6], strides = [1, 1, 1]} : vector<16x16x6xf32> to vector<6x16x6xf32>
    %cst_106 = arith.constant 0.0360007733 : f32
    %271 = vector.broadcast %cst_106 : f32 to vector<6x16x6xf32>
    %272 = arith.mulf %270, %271 : vector<6x16x6xf32>
    %273 = arith.addf %269, %272 : vector<6x16x6xf32>
    %274 = vector.extract_strided_slice %262 {offsets = [3, 0, 0], sizes = [6, 16, 6], strides = [1, 1, 1]} : vector<16x16x6xf32> to vector<6x16x6xf32>
    %cst_107 = arith.constant 0.109360687 : f32
    %275 = vector.broadcast %cst_107 : f32 to vector<6x16x6xf32>
    %276 = arith.mulf %274, %275 : vector<6x16x6xf32>
    %277 = arith.addf %273, %276 : vector<6x16x6xf32>
    %278 = vector.extract_strided_slice %262 {offsets = [4, 0, 0], sizes = [6, 16, 6], strides = [1, 1, 1]} : vector<16x16x6xf32> to vector<6x16x6xf32>
    %cst_108 = arith.constant 0.213005543 : f32
    %279 = vector.broadcast %cst_108 : f32 to vector<6x16x6xf32>
    %280 = arith.mulf %278, %279 : vector<6x16x6xf32>
    %281 = arith.addf %277, %280 : vector<6x16x6xf32>
    %282 = vector.extract_strided_slice %262 {offsets = [5, 0, 0], sizes = [6, 16, 6], strides = [1, 1, 1]} : vector<16x16x6xf32> to vector<6x16x6xf32>
    %cst_109 = arith.constant 0.266011745 : f32
    %283 = vector.broadcast %cst_109 : f32 to vector<6x16x6xf32>
    %284 = arith.mulf %282, %283 : vector<6x16x6xf32>
    %285 = arith.addf %281, %284 : vector<6x16x6xf32>
    %286 = vector.extract_strided_slice %262 {offsets = [6, 0, 0], sizes = [6, 16, 6], strides = [1, 1, 1]} : vector<16x16x6xf32> to vector<6x16x6xf32>
    %cst_110 = arith.constant 0.213005543 : f32
    %287 = vector.broadcast %cst_110 : f32 to vector<6x16x6xf32>
    %288 = arith.mulf %286, %287 : vector<6x16x6xf32>
    %289 = arith.addf %285, %288 : vector<6x16x6xf32>
    %290 = vector.extract_strided_slice %262 {offsets = [7, 0, 0], sizes = [6, 16, 6], strides = [1, 1, 1]} : vector<16x16x6xf32> to vector<6x16x6xf32>
    %cst_111 = arith.constant 0.109360687 : f32
    %291 = vector.broadcast %cst_111 : f32 to vector<6x16x6xf32>
    %292 = arith.mulf %290, %291 : vector<6x16x6xf32>
    %293 = arith.addf %289, %292 : vector<6x16x6xf32>
    %294 = vector.extract_strided_slice %262 {offsets = [8, 0, 0], sizes = [6, 16, 6], strides = [1, 1, 1]} : vector<16x16x6xf32> to vector<6x16x6xf32>
    %cst_112 = arith.constant 0.0360007733 : f32
    %295 = vector.broadcast %cst_112 : f32 to vector<6x16x6xf32>
    %296 = arith.mulf %294, %295 : vector<6x16x6xf32>
    %297 = arith.addf %293, %296 : vector<6x16x6xf32>
    %298 = vector.extract_strided_slice %262 {offsets = [9, 0, 0], sizes = [6, 16, 6], strides = [1, 1, 1]} : vector<16x16x6xf32> to vector<6x16x6xf32>
    %cst_113 = arith.constant 0.00759875635 : f32
    %299 = vector.broadcast %cst_113 : f32 to vector<6x16x6xf32>
    %300 = arith.mulf %298, %299 : vector<6x16x6xf32>
    %301 = arith.addf %297, %300 : vector<6x16x6xf32>
    %302 = vector.extract_strided_slice %262 {offsets = [10, 0, 0], sizes = [6, 16, 6], strides = [1, 1, 1]} : vector<16x16x6xf32> to vector<6x16x6xf32>
    %cst_114 = arith.constant 0.00102838036 : f32
    %303 = vector.broadcast %cst_114 : f32 to vector<6x16x6xf32>
    %304 = arith.mulf %302, %303 : vector<6x16x6xf32>
    %305 = arith.addf %301, %304 : vector<6x16x6xf32>
    %306 = vector.extract_strided_slice %305 {offsets = [0, 0, 0], sizes = [6, 6, 6], strides = [1, 1, 1]} : vector<6x16x6xf32> to vector<6x6x6xf32>
    %cst_115 = arith.constant 0.00102838036 : f32
    %307 = vector.broadcast %cst_115 : f32 to vector<6x6x6xf32>
    %308 = arith.mulf %306, %307 : vector<6x6x6xf32>
    %309 = vector.extract_strided_slice %305 {offsets = [0, 1, 0], sizes = [6, 6, 6], strides = [1, 1, 1]} : vector<6x16x6xf32> to vector<6x6x6xf32>
    %cst_116 = arith.constant 0.00759875635 : f32
    %310 = vector.broadcast %cst_116 : f32 to vector<6x6x6xf32>
    %311 = arith.mulf %309, %310 : vector<6x6x6xf32>
    %312 = arith.addf %308, %311 : vector<6x6x6xf32>
    %313 = vector.extract_strided_slice %305 {offsets = [0, 2, 0], sizes = [6, 6, 6], strides = [1, 1, 1]} : vector<6x16x6xf32> to vector<6x6x6xf32>
    %cst_117 = arith.constant 0.0360007733 : f32
    %314 = vector.broadcast %cst_117 : f32 to vector<6x6x6xf32>
    %315 = arith.mulf %313, %314 : vector<6x6x6xf32>
    %316 = arith.addf %312, %315 : vector<6x6x6xf32>
    %317 = vector.extract_strided_slice %305 {offsets = [0, 3, 0], sizes = [6, 6, 6], strides = [1, 1, 1]} : vector<6x16x6xf32> to vector<6x6x6xf32>
    %cst_118 = arith.constant 0.109360687 : f32
    %318 = vector.broadcast %cst_118 : f32 to vector<6x6x6xf32>
    %319 = arith.mulf %317, %318 : vector<6x6x6xf32>
    %320 = arith.addf %316, %319 : vector<6x6x6xf32>
    %321 = vector.extract_strided_slice %305 {offsets = [0, 4, 0], sizes = [6, 6, 6], strides = [1, 1, 1]} : vector<6x16x6xf32> to vector<6x6x6xf32>
    %cst_119 = arith.constant 0.213005543 : f32
    %322 = vector.broadcast %cst_119 : f32 to vector<6x6x6xf32>
    %323 = arith.mulf %321, %322 : vector<6x6x6xf32>
    %324 = arith.addf %320, %323 : vector<6x6x6xf32>
    %325 = vector.extract_strided_slice %305 {offsets = [0, 5, 0], sizes = [6, 6, 6], strides = [1, 1, 1]} : vector<6x16x6xf32> to vector<6x6x6xf32>
    %cst_120 = arith.constant 0.266011745 : f32
    %326 = vector.broadcast %cst_120 : f32 to vector<6x6x6xf32>
    %327 = arith.mulf %325, %326 : vector<6x6x6xf32>
    %328 = arith.addf %324, %327 : vector<6x6x6xf32>
    %329 = vector.extract_strided_slice %305 {offsets = [0, 6, 0], sizes = [6, 6, 6], strides = [1, 1, 1]} : vector<6x16x6xf32> to vector<6x6x6xf32>
    %cst_121 = arith.constant 0.213005543 : f32
    %330 = vector.broadcast %cst_121 : f32 to vector<6x6x6xf32>
    %331 = arith.mulf %329, %330 : vector<6x6x6xf32>
    %332 = arith.addf %328, %331 : vector<6x6x6xf32>
    %333 = vector.extract_strided_slice %305 {offsets = [0, 7, 0], sizes = [6, 6, 6], strides = [1, 1, 1]} : vector<6x16x6xf32> to vector<6x6x6xf32>
    %cst_122 = arith.constant 0.109360687 : f32
    %334 = vector.broadcast %cst_122 : f32 to vector<6x6x6xf32>
    %335 = arith.mulf %333, %334 : vector<6x6x6xf32>
    %336 = arith.addf %332, %335 : vector<6x6x6xf32>
    %337 = vector.extract_strided_slice %305 {offsets = [0, 8, 0], sizes = [6, 6, 6], strides = [1, 1, 1]} : vector<6x16x6xf32> to vector<6x6x6xf32>
    %cst_123 = arith.constant 0.0360007733 : f32
    %338 = vector.broadcast %cst_123 : f32 to vector<6x6x6xf32>
    %339 = arith.mulf %337, %338 : vector<6x6x6xf32>
    %340 = arith.addf %336, %339 : vector<6x6x6xf32>
    %341 = vector.extract_strided_slice %305 {offsets = [0, 9, 0], sizes = [6, 6, 6], strides = [1, 1, 1]} : vector<6x16x6xf32> to vector<6x6x6xf32>
    %cst_124 = arith.constant 0.00759875635 : f32
    %342 = vector.broadcast %cst_124 : f32 to vector<6x6x6xf32>
    %343 = arith.mulf %341, %342 : vector<6x6x6xf32>
    %344 = arith.addf %340, %343 : vector<6x6x6xf32>
    %345 = vector.extract_strided_slice %305 {offsets = [0, 10, 0], sizes = [6, 6, 6], strides = [1, 1, 1]} : vector<6x16x6xf32> to vector<6x6x6xf32>
    %cst_125 = arith.constant 0.00102838036 : f32
    %346 = vector.broadcast %cst_125 : f32 to vector<6x6x6xf32>
    %347 = arith.mulf %345, %346 : vector<6x6x6xf32>
    %348 = arith.addf %344, %347 : vector<6x6x6xf32>
    %349 = arith.mulf %83, %83 : vector<256x16xf32>
    %cst_126 = arith.constant dense<0.000000e+00> : vector<256x6xf32>
    %350 = tpu.matmul %349, %15, %cst_126 {dimension_numbers = #tpu.dot_dimension_numbers<[1], [0], [0], [1], [0, 0, 1, 1], [], []>} : vector<256x16xf32>, vector<16x6xf32>, vector<256x6xf32> -> vector<256x6xf32>
    %351 = vector.shape_cast %350 : vector<256x6xf32> to vector<16x16x6xf32>
    %352 = vector.extract_strided_slice %351 {offsets = [0, 0, 0], sizes = [6, 16, 6], strides = [1, 1, 1]} : vector<16x16x6xf32> to vector<6x16x6xf32>
    %cst_127 = arith.constant 0.00102838036 : f32
    %353 = vector.broadcast %cst_127 : f32 to vector<6x16x6xf32>
    %354 = arith.mulf %352, %353 : vector<6x16x6xf32>
    %355 = vector.extract_strided_slice %351 {offsets = [1, 0, 0], sizes = [6, 16, 6], strides = [1, 1, 1]} : vector<16x16x6xf32> to vector<6x16x6xf32>
    %cst_128 = arith.constant 0.00759875635 : f32
    %356 = vector.broadcast %cst_128 : f32 to vector<6x16x6xf32>
    %357 = arith.mulf %355, %356 : vector<6x16x6xf32>
    %358 = arith.addf %354, %357 : vector<6x16x6xf32>
    %359 = vector.extract_strided_slice %351 {offsets = [2, 0, 0], sizes = [6, 16, 6], strides = [1, 1, 1]} : vector<16x16x6xf32> to vector<6x16x6xf32>
    %cst_129 = arith.constant 0.0360007733 : f32
    %360 = vector.broadcast %cst_129 : f32 to vector<6x16x6xf32>
    %361 = arith.mulf %359, %360 : vector<6x16x6xf32>
    %362 = arith.addf %358, %361 : vector<6x16x6xf32>
    %363 = vector.extract_strided_slice %351 {offsets = [3, 0, 0], sizes = [6, 16, 6], strides = [1, 1, 1]} : vector<16x16x6xf32> to vector<6x16x6xf32>
    %cst_130 = arith.constant 0.109360687 : f32
    %364 = vector.broadcast %cst_130 : f32 to vector<6x16x6xf32>
    %365 = arith.mulf %363, %364 : vector<6x16x6xf32>
    %366 = arith.addf %362, %365 : vector<6x16x6xf32>
    %367 = vector.extract_strided_slice %351 {offsets = [4, 0, 0], sizes = [6, 16, 6], strides = [1, 1, 1]} : vector<16x16x6xf32> to vector<6x16x6xf32>
    %cst_131 = arith.constant 0.213005543 : f32
    %368 = vector.broadcast %cst_131 : f32 to vector<6x16x6xf32>
    %369 = arith.mulf %367, %368 : vector<6x16x6xf32>
    %370 = arith.addf %366, %369 : vector<6x16x6xf32>
    %371 = vector.extract_strided_slice %351 {offsets = [5, 0, 0], sizes = [6, 16, 6], strides = [1, 1, 1]} : vector<16x16x6xf32> to vector<6x16x6xf32>
    %cst_132 = arith.constant 0.266011745 : f32
    %372 = vector.broadcast %cst_132 : f32 to vector<6x16x6xf32>
    %373 = arith.mulf %371, %372 : vector<6x16x6xf32>
    %374 = arith.addf %370, %373 : vector<6x16x6xf32>
    %375 = vector.extract_strided_slice %351 {offsets = [6, 0, 0], sizes = [6, 16, 6], strides = [1, 1, 1]} : vector<16x16x6xf32> to vector<6x16x6xf32>
    %cst_133 = arith.constant 0.213005543 : f32
    %376 = vector.broadcast %cst_133 : f32 to vector<6x16x6xf32>
    %377 = arith.mulf %375, %376 : vector<6x16x6xf32>
    %378 = arith.addf %374, %377 : vector<6x16x6xf32>
    %379 = vector.extract_strided_slice %351 {offsets = [7, 0, 0], sizes = [6, 16, 6], strides = [1, 1, 1]} : vector<16x16x6xf32> to vector<6x16x6xf32>
    %cst_134 = arith.constant 0.109360687 : f32
    %380 = vector.broadcast %cst_134 : f32 to vector<6x16x6xf32>
    %381 = arith.mulf %379, %380 : vector<6x16x6xf32>
    %382 = arith.addf %378, %381 : vector<6x16x6xf32>
    %383 = vector.extract_strided_slice %351 {offsets = [8, 0, 0], sizes = [6, 16, 6], strides = [1, 1, 1]} : vector<16x16x6xf32> to vector<6x16x6xf32>
    %cst_135 = arith.constant 0.0360007733 : f32
    %384 = vector.broadcast %cst_135 : f32 to vector<6x16x6xf32>
    %385 = arith.mulf %383, %384 : vector<6x16x6xf32>
    %386 = arith.addf %382, %385 : vector<6x16x6xf32>
    %387 = vector.extract_strided_slice %351 {offsets = [9, 0, 0], sizes = [6, 16, 6], strides = [1, 1, 1]} : vector<16x16x6xf32> to vector<6x16x6xf32>
    %cst_136 = arith.constant 0.00759875635 : f32
    %388 = vector.broadcast %cst_136 : f32 to vector<6x16x6xf32>
    %389 = arith.mulf %387, %388 : vector<6x16x6xf32>
    %390 = arith.addf %386, %389 : vector<6x16x6xf32>
    %391 = vector.extract_strided_slice %351 {offsets = [10, 0, 0], sizes = [6, 16, 6], strides = [1, 1, 1]} : vector<16x16x6xf32> to vector<6x16x6xf32>
    %cst_137 = arith.constant 0.00102838036 : f32
    %392 = vector.broadcast %cst_137 : f32 to vector<6x16x6xf32>
    %393 = arith.mulf %391, %392 : vector<6x16x6xf32>
    %394 = arith.addf %390, %393 : vector<6x16x6xf32>
    %395 = vector.extract_strided_slice %394 {offsets = [0, 0, 0], sizes = [6, 6, 6], strides = [1, 1, 1]} : vector<6x16x6xf32> to vector<6x6x6xf32>
    %cst_138 = arith.constant 0.00102838036 : f32
    %396 = vector.broadcast %cst_138 : f32 to vector<6x6x6xf32>
    %397 = arith.mulf %395, %396 : vector<6x6x6xf32>
    %398 = vector.extract_strided_slice %394 {offsets = [0, 1, 0], sizes = [6, 6, 6], strides = [1, 1, 1]} : vector<6x16x6xf32> to vector<6x6x6xf32>
    %cst_139 = arith.constant 0.00759875635 : f32
    %399 = vector.broadcast %cst_139 : f32 to vector<6x6x6xf32>
    %400 = arith.mulf %398, %399 : vector<6x6x6xf32>
    %401 = arith.addf %397, %400 : vector<6x6x6xf32>
    %402 = vector.extract_strided_slice %394 {offsets = [0, 2, 0], sizes = [6, 6, 6], strides = [1, 1, 1]} : vector<6x16x6xf32> to vector<6x6x6xf32>
    %cst_140 = arith.constant 0.0360007733 : f32
    %403 = vector.broadcast %cst_140 : f32 to vector<6x6x6xf32>
    %404 = arith.mulf %402, %403 : vector<6x6x6xf32>
    %405 = arith.addf %401, %404 : vector<6x6x6xf32>
    %406 = vector.extract_strided_slice %394 {offsets = [0, 3, 0], sizes = [6, 6, 6], strides = [1, 1, 1]} : vector<6x16x6xf32> to vector<6x6x6xf32>
    %cst_141 = arith.constant 0.109360687 : f32
    %407 = vector.broadcast %cst_141 : f32 to vector<6x6x6xf32>
    %408 = arith.mulf %406, %407 : vector<6x6x6xf32>
    %409 = arith.addf %405, %408 : vector<6x6x6xf32>
    %410 = vector.extract_strided_slice %394 {offsets = [0, 4, 0], sizes = [6, 6, 6], strides = [1, 1, 1]} : vector<6x16x6xf32> to vector<6x6x6xf32>
    %cst_142 = arith.constant 0.213005543 : f32
    %411 = vector.broadcast %cst_142 : f32 to vector<6x6x6xf32>
    %412 = arith.mulf %410, %411 : vector<6x6x6xf32>
    %413 = arith.addf %409, %412 : vector<6x6x6xf32>
    %414 = vector.extract_strided_slice %394 {offsets = [0, 5, 0], sizes = [6, 6, 6], strides = [1, 1, 1]} : vector<6x16x6xf32> to vector<6x6x6xf32>
    %cst_143 = arith.constant 0.266011745 : f32
    %415 = vector.broadcast %cst_143 : f32 to vector<6x6x6xf32>
    %416 = arith.mulf %414, %415 : vector<6x6x6xf32>
    %417 = arith.addf %413, %416 : vector<6x6x6xf32>
    %418 = vector.extract_strided_slice %394 {offsets = [0, 6, 0], sizes = [6, 6, 6], strides = [1, 1, 1]} : vector<6x16x6xf32> to vector<6x6x6xf32>
    %cst_144 = arith.constant 0.213005543 : f32
    %419 = vector.broadcast %cst_144 : f32 to vector<6x6x6xf32>
    %420 = arith.mulf %418, %419 : vector<6x6x6xf32>
    %421 = arith.addf %417, %420 : vector<6x6x6xf32>
    %422 = vector.extract_strided_slice %394 {offsets = [0, 7, 0], sizes = [6, 6, 6], strides = [1, 1, 1]} : vector<6x16x6xf32> to vector<6x6x6xf32>
    %cst_145 = arith.constant 0.109360687 : f32
    %423 = vector.broadcast %cst_145 : f32 to vector<6x6x6xf32>
    %424 = arith.mulf %422, %423 : vector<6x6x6xf32>
    %425 = arith.addf %421, %424 : vector<6x6x6xf32>
    %426 = vector.extract_strided_slice %394 {offsets = [0, 8, 0], sizes = [6, 6, 6], strides = [1, 1, 1]} : vector<6x16x6xf32> to vector<6x6x6xf32>
    %cst_146 = arith.constant 0.0360007733 : f32
    %427 = vector.broadcast %cst_146 : f32 to vector<6x6x6xf32>
    %428 = arith.mulf %426, %427 : vector<6x6x6xf32>
    %429 = arith.addf %425, %428 : vector<6x6x6xf32>
    %430 = vector.extract_strided_slice %394 {offsets = [0, 9, 0], sizes = [6, 6, 6], strides = [1, 1, 1]} : vector<6x16x6xf32> to vector<6x6x6xf32>
    %cst_147 = arith.constant 0.00759875635 : f32
    %431 = vector.broadcast %cst_147 : f32 to vector<6x6x6xf32>
    %432 = arith.mulf %430, %431 : vector<6x6x6xf32>
    %433 = arith.addf %429, %432 : vector<6x6x6xf32>
    %434 = vector.extract_strided_slice %394 {offsets = [0, 10, 0], sizes = [6, 6, 6], strides = [1, 1, 1]} : vector<6x16x6xf32> to vector<6x6x6xf32>
    %cst_148 = arith.constant 0.00102838036 : f32
    %435 = vector.broadcast %cst_148 : f32 to vector<6x6x6xf32>
    %436 = arith.mulf %434, %435 : vector<6x6x6xf32>
    %437 = arith.addf %433, %436 : vector<6x6x6xf32>
    %438 = arith.mulf %77, %83 : vector<256x16xf32>
    %cst_149 = arith.constant dense<0.000000e+00> : vector<256x6xf32>
    %439 = tpu.matmul %438, %15, %cst_149 {dimension_numbers = #tpu.dot_dimension_numbers<[1], [0], [0], [1], [0, 0, 1, 1], [], []>} : vector<256x16xf32>, vector<16x6xf32>, vector<256x6xf32> -> vector<256x6xf32>
    %440 = vector.shape_cast %439 : vector<256x6xf32> to vector<16x16x6xf32>
    %441 = vector.extract_strided_slice %440 {offsets = [0, 0, 0], sizes = [6, 16, 6], strides = [1, 1, 1]} : vector<16x16x6xf32> to vector<6x16x6xf32>
    %cst_150 = arith.constant 0.00102838036 : f32
    %442 = vector.broadcast %cst_150 : f32 to vector<6x16x6xf32>
    %443 = arith.mulf %441, %442 : vector<6x16x6xf32>
    %444 = vector.extract_strided_slice %440 {offsets = [1, 0, 0], sizes = [6, 16, 6], strides = [1, 1, 1]} : vector<16x16x6xf32> to vector<6x16x6xf32>
    %cst_151 = arith.constant 0.00759875635 : f32
    %445 = vector.broadcast %cst_151 : f32 to vector<6x16x6xf32>
    %446 = arith.mulf %444, %445 : vector<6x16x6xf32>
    %447 = arith.addf %443, %446 : vector<6x16x6xf32>
    %448 = vector.extract_strided_slice %440 {offsets = [2, 0, 0], sizes = [6, 16, 6], strides = [1, 1, 1]} : vector<16x16x6xf32> to vector<6x16x6xf32>
    %cst_152 = arith.constant 0.0360007733 : f32
    %449 = vector.broadcast %cst_152 : f32 to vector<6x16x6xf32>
    %450 = arith.mulf %448, %449 : vector<6x16x6xf32>
    %451 = arith.addf %447, %450 : vector<6x16x6xf32>
    %452 = vector.extract_strided_slice %440 {offsets = [3, 0, 0], sizes = [6, 16, 6], strides = [1, 1, 1]} : vector<16x16x6xf32> to vector<6x16x6xf32>
    %cst_153 = arith.constant 0.109360687 : f32
    %453 = vector.broadcast %cst_153 : f32 to vector<6x16x6xf32>
    %454 = arith.mulf %452, %453 : vector<6x16x6xf32>
    %455 = arith.addf %451, %454 : vector<6x16x6xf32>
    %456 = vector.extract_strided_slice %440 {offsets = [4, 0, 0], sizes = [6, 16, 6], strides = [1, 1, 1]} : vector<16x16x6xf32> to vector<6x16x6xf32>
    %cst_154 = arith.constant 0.213005543 : f32
    %457 = vector.broadcast %cst_154 : f32 to vector<6x16x6xf32>
    %458 = arith.mulf %456, %457 : vector<6x16x6xf32>
    %459 = arith.addf %455, %458 : vector<6x16x6xf32>
    %460 = vector.extract_strided_slice %440 {offsets = [5, 0, 0], sizes = [6, 16, 6], strides = [1, 1, 1]} : vector<16x16x6xf32> to vector<6x16x6xf32>
    %cst_155 = arith.constant 0.266011745 : f32
    %461 = vector.broadcast %cst_155 : f32 to vector<6x16x6xf32>
    %462 = arith.mulf %460, %461 : vector<6x16x6xf32>
    %463 = arith.addf %459, %462 : vector<6x16x6xf32>
    %464 = vector.extract_strided_slice %440 {offsets = [6, 0, 0], sizes = [6, 16, 6], strides = [1, 1, 1]} : vector<16x16x6xf32> to vector<6x16x6xf32>
    %cst_156 = arith.constant 0.213005543 : f32
    %465 = vector.broadcast %cst_156 : f32 to vector<6x16x6xf32>
    %466 = arith.mulf %464, %465 : vector<6x16x6xf32>
    %467 = arith.addf %463, %466 : vector<6x16x6xf32>
    %468 = vector.extract_strided_slice %440 {offsets = [7, 0, 0], sizes = [6, 16, 6], strides = [1, 1, 1]} : vector<16x16x6xf32> to vector<6x16x6xf32>
    %cst_157 = arith.constant 0.109360687 : f32
    %469 = vector.broadcast %cst_157 : f32 to vector<6x16x6xf32>
    %470 = arith.mulf %468, %469 : vector<6x16x6xf32>
    %471 = arith.addf %467, %470 : vector<6x16x6xf32>
    %472 = vector.extract_strided_slice %440 {offsets = [8, 0, 0], sizes = [6, 16, 6], strides = [1, 1, 1]} : vector<16x16x6xf32> to vector<6x16x6xf32>
    %cst_158 = arith.constant 0.0360007733 : f32
    %473 = vector.broadcast %cst_158 : f32 to vector<6x16x6xf32>
    %474 = arith.mulf %472, %473 : vector<6x16x6xf32>
    %475 = arith.addf %471, %474 : vector<6x16x6xf32>
    %476 = vector.extract_strided_slice %440 {offsets = [9, 0, 0], sizes = [6, 16, 6], strides = [1, 1, 1]} : vector<16x16x6xf32> to vector<6x16x6xf32>
    %cst_159 = arith.constant 0.00759875635 : f32
    %477 = vector.broadcast %cst_159 : f32 to vector<6x16x6xf32>
    %478 = arith.mulf %476, %477 : vector<6x16x6xf32>
    %479 = arith.addf %475, %478 : vector<6x16x6xf32>
    %480 = vector.extract_strided_slice %440 {offsets = [10, 0, 0], sizes = [6, 16, 6], strides = [1, 1, 1]} : vector<16x16x6xf32> to vector<6x16x6xf32>
    %cst_160 = arith.constant 0.00102838036 : f32
    %481 = vector.broadcast %cst_160 : f32 to vector<6x16x6xf32>
    %482 = arith.mulf %480, %481 : vector<6x16x6xf32>
    %483 = arith.addf %479, %482 : vector<6x16x6xf32>
    %484 = vector.extract_strided_slice %483 {offsets = [0, 0, 0], sizes = [6, 6, 6], strides = [1, 1, 1]} : vector<6x16x6xf32> to vector<6x6x6xf32>
    %cst_161 = arith.constant 0.00102838036 : f32
    %485 = vector.broadcast %cst_161 : f32 to vector<6x6x6xf32>
    %486 = arith.mulf %484, %485 : vector<6x6x6xf32>
    %487 = vector.extract_strided_slice %483 {offsets = [0, 1, 0], sizes = [6, 6, 6], strides = [1, 1, 1]} : vector<6x16x6xf32> to vector<6x6x6xf32>
    %cst_162 = arith.constant 0.00759875635 : f32
    %488 = vector.broadcast %cst_162 : f32 to vector<6x6x6xf32>
    %489 = arith.mulf %487, %488 : vector<6x6x6xf32>
    %490 = arith.addf %486, %489 : vector<6x6x6xf32>
    %491 = vector.extract_strided_slice %483 {offsets = [0, 2, 0], sizes = [6, 6, 6], strides = [1, 1, 1]} : vector<6x16x6xf32> to vector<6x6x6xf32>
    %cst_163 = arith.constant 0.0360007733 : f32
    %492 = vector.broadcast %cst_163 : f32 to vector<6x6x6xf32>
    %493 = arith.mulf %491, %492 : vector<6x6x6xf32>
    %494 = arith.addf %490, %493 : vector<6x6x6xf32>
    %495 = vector.extract_strided_slice %483 {offsets = [0, 3, 0], sizes = [6, 6, 6], strides = [1, 1, 1]} : vector<6x16x6xf32> to vector<6x6x6xf32>
    %cst_164 = arith.constant 0.109360687 : f32
    %496 = vector.broadcast %cst_164 : f32 to vector<6x6x6xf32>
    %497 = arith.mulf %495, %496 : vector<6x6x6xf32>
    %498 = arith.addf %494, %497 : vector<6x6x6xf32>
    %499 = vector.extract_strided_slice %483 {offsets = [0, 4, 0], sizes = [6, 6, 6], strides = [1, 1, 1]} : vector<6x16x6xf32> to vector<6x6x6xf32>
    %cst_165 = arith.constant 0.213005543 : f32
    %500 = vector.broadcast %cst_165 : f32 to vector<6x6x6xf32>
    %501 = arith.mulf %499, %500 : vector<6x6x6xf32>
    %502 = arith.addf %498, %501 : vector<6x6x6xf32>
    %503 = vector.extract_strided_slice %483 {offsets = [0, 5, 0], sizes = [6, 6, 6], strides = [1, 1, 1]} : vector<6x16x6xf32> to vector<6x6x6xf32>
    %cst_166 = arith.constant 0.266011745 : f32
    %504 = vector.broadcast %cst_166 : f32 to vector<6x6x6xf32>
    %505 = arith.mulf %503, %504 : vector<6x6x6xf32>
    %506 = arith.addf %502, %505 : vector<6x6x6xf32>
    %507 = vector.extract_strided_slice %483 {offsets = [0, 6, 0], sizes = [6, 6, 6], strides = [1, 1, 1]} : vector<6x16x6xf32> to vector<6x6x6xf32>
    %cst_167 = arith.constant 0.213005543 : f32
    %508 = vector.broadcast %cst_167 : f32 to vector<6x6x6xf32>
    %509 = arith.mulf %507, %508 : vector<6x6x6xf32>
    %510 = arith.addf %506, %509 : vector<6x6x6xf32>
    %511 = vector.extract_strided_slice %483 {offsets = [0, 7, 0], sizes = [6, 6, 6], strides = [1, 1, 1]} : vector<6x16x6xf32> to vector<6x6x6xf32>
    %cst_168 = arith.constant 0.109360687 : f32
    %512 = vector.broadcast %cst_168 : f32 to vector<6x6x6xf32>
    %513 = arith.mulf %511, %512 : vector<6x6x6xf32>
    %514 = arith.addf %510, %513 : vector<6x6x6xf32>
    %515 = vector.extract_strided_slice %483 {offsets = [0, 8, 0], sizes = [6, 6, 6], strides = [1, 1, 1]} : vector<6x16x6xf32> to vector<6x6x6xf32>
    %cst_169 = arith.constant 0.0360007733 : f32
    %516 = vector.broadcast %cst_169 : f32 to vector<6x6x6xf32>
    %517 = arith.mulf %515, %516 : vector<6x6x6xf32>
    %518 = arith.addf %514, %517 : vector<6x6x6xf32>
    %519 = vector.extract_strided_slice %483 {offsets = [0, 9, 0], sizes = [6, 6, 6], strides = [1, 1, 1]} : vector<6x16x6xf32> to vector<6x6x6xf32>
    %cst_170 = arith.constant 0.00759875635 : f32
    %520 = vector.broadcast %cst_170 : f32 to vector<6x6x6xf32>
    %521 = arith.mulf %519, %520 : vector<6x6x6xf32>
    %522 = arith.addf %518, %521 : vector<6x6x6xf32>
    %523 = vector.extract_strided_slice %483 {offsets = [0, 10, 0], sizes = [6, 6, 6], strides = [1, 1, 1]} : vector<6x16x6xf32> to vector<6x6x6xf32>
    %cst_171 = arith.constant 0.00102838036 : f32
    %524 = vector.broadcast %cst_171 : f32 to vector<6x6x6xf32>
    %525 = arith.mulf %523, %524 : vector<6x6x6xf32>
    %526 = arith.addf %522, %525 : vector<6x6x6xf32>
    %527 = arith.mulf %171, %171 : vector<6x6x6xf32>
    %528 = arith.subf %348, %527 : vector<6x6x6xf32>
    %529 = arith.mulf %259, %259 : vector<6x6x6xf32>
    %530 = arith.subf %437, %529 : vector<6x6x6xf32>
    %531 = arith.mulf %171, %259 : vector<6x6x6xf32>
    %532 = arith.subf %526, %531 : vector<6x6x6xf32>
    %cst_172 = arith.constant 2.000000e+00 : f32
    %533 = vector.broadcast %cst_172 : f32 to vector<6x6x6xf32>
    %534 = arith.mulf %533, %171 : vector<6x6x6xf32>
    %535 = arith.mulf %534, %259 : vector<6x6x6xf32>
    %cst_173 = arith.constant 9.99999974E-5 : f32
    %536 = vector.broadcast %cst_173 : f32 to vector<6x6x6xf32>
    %537 = arith.addf %535, %536 : vector<6x6x6xf32>
    %cst_174 = arith.constant 2.000000e+00 : f32
    %538 = vector.broadcast %cst_174 : f32 to vector<6x6x6xf32>
    %539 = arith.mulf %538, %532 : vector<6x6x6xf32>
    %cst_175 = arith.constant 8.99999984E-4 : f32
    %540 = vector.broadcast %cst_175 : f32 to vector<6x6x6xf32>
    %541 = arith.addf %539, %540 : vector<6x6x6xf32>
    %542 = arith.mulf %537, %541 : vector<6x6x6xf32>
    %543 = arith.mulf %171, %171 : vector<6x6x6xf32>
    %544 = arith.mulf %259, %259 : vector<6x6x6xf32>
    %545 = arith.addf %543, %544 : vector<6x6x6xf32>
    %cst_176 = arith.constant 9.99999974E-5 : f32
    %546 = vector.broadcast %cst_176 : f32 to vector<6x6x6xf32>
    %547 = arith.addf %545, %546 : vector<6x6x6xf32>
    %548 = arith.addf %528, %530 : vector<6x6x6xf32>
    %cst_177 = arith.constant 8.99999984E-4 : f32
    %549 = vector.broadcast %cst_177 : f32 to vector<6x6x6xf32>
    %550 = arith.addf %548, %549 : vector<6x6x6xf32>
    %551 = arith.mulf %547, %550 : vector<6x6x6xf32>
    %552 = arith.divf %542, %551 : vector<6x6x6xf32>
    %cst_178 = arith.constant 1.000000e+00 : f32
    %553 = vector.broadcast %cst_178 : f32 to vector<6x6x6xf32>
    %554 = arith.subf %553, %552 : vector<6x6x6xf32>
    %c0_179 = arith.constant 0 : index
    %c0_180 = arith.constant 0 : index
    %555 = vector.load %arg9[%c0_179, %c0_180] : memref<6x6xf32, #tpu.memory_space<vmem>>, vector<6x6xf32>
    %cst_181 = arith.constant dense<0.000000e+00> : vector<6x6xf32>
    %556 = vector.multi_reduction <add>, %554, %cst_181 [0] : vector<6x6x6xf32> to vector<6x6xf32>
    %557 = arith.addf %555, %556 : vector<6x6xf32>
    %c0_182 = arith.constant 0 : index
    %c0_183 = arith.constant 0 : index
    %558 = vector.load %arg9[%c0_182, %c0_183] : memref<6x6xf32, #tpu.memory_space<vmem>>, vector<6x6xf32>
    tpu.vector_store %arg9[%c0_182, %c0_183], %557 {strides = array<i32>} : memref<6x6xf32, #tpu.memory_space<vmem>>, vector<6x6xf32>,
    %c1_i32_184 = arith.constant 1 : i32
    %c0_185 = arith.constant 0 : index
    %c0_186 = arith.constant 0 : index
    %559 = vector.load %arg9[%c0_185, %c0_186] : memref<6x6xf32, #tpu.memory_space<vmem>>, vector<6x6xf32>
    %560 = vector.shape_cast %559 : vector<6x6xf32> to vector<1x6x6xf32>
    %cst_187 = arith.constant dense<0.000000e+00> : vector<1xf32>
    %561 = vector.multi_reduction <add>, %560, %cst_187 [1, 2] : vector<1x6x6xf32> to vector<1xf32>
    %562 = vector.shape_cast %561 : vector<1xf32> to vector<1x1x1xf32>
    %563 = vector.extract %562[0, 0, 0] : f32 from vector<1x1x1xf32>
    %564 = vector.broadcast %563 : f32 to vector<128xf32>
    %c0_188 = arith.constant 0 : index
    %c0_189 = arith.constant 0 : index
    %c0_190 = arith.constant 0 : index
    %565 = vector.load %arg5[%c0_188, %c0_189, %c0_190] : memref<1x1x128xf32, #tpu.memory_space<vmem>>, vector<1x1x128xf32>
    %566 = vector.shape_cast %565 : vector<1x1x128xf32> to vector<128xf32>
    %567 = vector.shape_cast %564 : vector<128xf32> to vector<1x1x128xf32>
    tpu.vector_store %arg5[%c0_188, %c0_189, %c0_190], %567 {strides = array<i32>} : memref<1x1x128xf32, #tpu.memory_space<vmem>>, vector<1x1x128xf32>,
    return
  }
  func.func @transform_0(%arg0: i32) -> i32 {
    %c0_i32 = arith.constant 0 : i32
    %c0_i32_0 = arith.constant 0 : i32
    return %c0_i32 : i32
  }
  func.func @transform_1(%arg0: i32) -> (i32, i32) {
    %c0_i32 = arith.constant 0 : i32
    %c0_i32_0 = arith.constant 0 : i32
    %c0_i32_1 = arith.constant 0 : i32
    return %c0_i32, %c0_i32_0 : i32, i32
  }
  func.func @transform_4(%arg0: i32) -> (i32, i32, i32) {
    %c0_i32 = arith.constant 0 : i32
    %c0_i32_0 = arith.constant 0 : i32
    %c0_i32_1 = arith.constant 0 : i32
    return %arg0, %c0_i32, %c0_i32_0 : i32, i32, i32
  }
}

</mosaic_0001>

<bundles_post_ra>
// kernel: ssim_l1_loss.2
= control target key start
LH: loop header
LB: loop body
LE: loop exit
PB: predicated region body
PF: predicated region fallthrough
CT: control target
= control target key end

     0   :  { %s577_s9 = smov 0   ;;  %s579_s10 = smov 0   ;;  %s699_s0 = inlined_call_operand.vmem [shape: f32[2,64,128], index: 0, kind: input, shape index: {}]   ;;  %s700_s1 = inlined_call_operand.vmem [shape: f32[2,64,128], index: 1, kind: input, shape index: {}]   ;;  %s701_s2 = inlined_call_operand.vmem [shape: f32[2,6,1,128], index: 2, kind: output, shape index: {}]  }
   0x1   :  { %s581_s11 = smov 0  }
   0x2 LB: > { %s24_s12 = sadd.s32 1, %s555_s10  ;;  %p479_p0 = scmp.ge.s32.totalorder %s559_s11, 1  ;;  %s559_s11 = sphi %s581_s11, %s12_s11   ;;  %s555_s10 = sphi %s579_s10, %s703_s10   ;;  %s551_s9 = sphi %s577_s9, %s702_s9  }
   0x3   : > { %p26_p1 = scmp.ge.s32.totalorder %s24_s12, 2  ;;  %p148_p2 = scmp.lt.s32.totalorder %s559_s11, 3 }
   0x5   : > { %s705_s12 = smov (%p26_p1, %s24_s12), 0  ;;  %p149_p3 = pnand %p479_p0, %p148_p2 }
   0x6   : > { %p183_p4 = scmp.lt.s32.totalorder (!%p149_p3), %s551_s9, 1 }
   0x7   : > { %152 = sbr.rel (%p149_p3) target bundleno = 64 (0x40), region = 28 }
   0xc   : > { %s707_s9 = smov (!%p183_p4, %s551_s9), 1  ;;  %v561_v52 = vmov 0.0  }
   0xd   : > { %s509_s13 = sshll.u32 %s707_s9, 6  ;;  %s511_s20 = smul.u32 6, %s707_s9 }
   0xe   : > { %s190_s16 = scalar_lea.vmem %s699_s0, %s509_s13  ;;  %s200_s19 = scalar_lea.vmem %s700_s1, %s509_s13 }
   0xf   : > { %v601_v0 = vld [vmem:[%s190_s16] sm:$0xff]  ;;  %v603_v1 = vld [vmem:[%s190_s16 + $0x8] sm:$0xff]  ;;  %v605_v2 = vld [vmem:[%s190_s16 + $0x10] sm:$0xff]  ;;  %s662_s23 = scalar_lea.vmem %s701_s2, %s511_s20 }
  0x10   : > { %v607_v3 = vld [vmem:[%s190_s16 + $0x20] sm:$0xff]  ;;  %v609_v4 = vld [vmem:[%s190_s16 + $0x28] sm:$0xff]  ;;  %v611_v5 = vld [vmem:[%s190_s16 + $0x18] sm:$0xff] }
  0x11   : > { %v613_v6 = vld [vmem:[%s190_s16 + $0x30] sm:$0xff]  ;;  %v615_v7 = vld [vmem:[%s190_s16 + $0x38] sm:$0xff]  ;;  %v270_v8 = vmin.f32 %v601_v0, %v607_v3  ;;  %v271_v9 = vmin.f32 %v603_v1, %v609_v4  ;;  %v283_v10 = vmax.f32 %v601_v0, %v607_v3  ;;  %v284_v11 = vmax.f32 %v603_v1, %v609_v4  ;;  %v214_v20 = vld [vmem:[%s200_s19] sm:$0xff] }
  0x12   : > { %v272_v12 = vmin.f32 %v605_v2, %v613_v6  ;;  %v273_v13 = vmin.f32 %v611_v5, %v615_v7  ;;  %v285_v14 = vmax.f32 %v605_v2, %v613_v6  ;;  %v286_v15 = vmax.f32 %v611_v5, %v615_v7  ;;  %v636_v21 = vld [vmem:[%s200_s19 + $0x20] sm:$0xff]  ;;  %v215_v24 = vld [vmem:[%s200_s19 + $0x8] sm:$0xff]  ;;  %v216_v25 = vld [vmem:[%s200_s19 + $0x10] sm:$0xff] }
  0x13   : > { %v274_v16 = vmin.f32 %v270_v8, %v271_v9  ;;  %v287_v17 = vmax.f32 %v283_v10, %v284_v11  ;;  %v638_v26 = vld [vmem:[%s200_s19 + $0x28] sm:$0xff]  ;;  %v296_v27 = vmin.f32 %v214_v20, %v636_v21  ;;  %v217_v28 = vld [vmem:[%s200_s19 + $0x18] sm:$0xff]  ;;  %v641_v29 = vld [vmem:[%s200_s19 + $0x30] sm:$0xff]  ;;  %vm222_vm0 = vcmp.ne.f32.partialorder %v214_v20, 0.0 }
  0x14   : > { %v275_v18 = vmin.f32 %v272_v12, %v273_v13  ;;  %v288_v19 = vmax.f32 %v285_v14, %v286_v15  ;;  %v643_v30 = vld [vmem:[%s200_s19 + $0x38] sm:$0xff]  ;;  %vm223_vm1 = vcmp.ne.f32.partialorder %v215_v24, 0.0  ;;  %v297_v31 = vmin.f32 %v215_v24, %v638_v26 }
  0x15   : > { %v298_v34 = vmin.f32 %v216_v25, %v641_v29  ;;  %v299_v35 = vmin.f32 %v217_v28, %v643_v30  ;;  %v309_v37 = vmax.f32 %v214_v20, %v636_v21  ;;  %v310_v38 = vmax.f32 %v215_v24, %v638_v26 }
  0x16   : > { %v276_v22 = vmin.f32 %v274_v16, %v275_v18  ;;  %v289_v23 = vmax.f32 %v287_v17, %v288_v19  ;;  %v300_v36 = vmin.f32 %v296_v27, %v297_v31  ;;  %v311_v39 = vmax.f32 %v216_v25, %v641_v29 }
  0x17   : > { %v301_v42 = vmin.f32 %v298_v34, %v299_v35  ;;  %v312_v43 = vmax.f32 %v217_v28, %v643_v30  ;;  %v246_v44 = vsub.f32 %v601_v0, %v214_v20  ;;  %v247_v45 = vsub.f32 %v603_v1, %v215_v24 }
  0x18   : > { %v277_v32 = vrot.slane %v276_v22, 4  ;;  %v290_v33 = vrot.slane %v289_v23, 4  ;;  %v248_v46 = vsub.f32 %v605_v2, %v216_v25  ;;  %v313_v47 = vmax.f32 %v309_v37, %v310_v38 }
  0x19   : > { %v302_v50 = vmin.f32 %v300_v36, %v301_v42  ;;  %v314_v51 = vmax.f32 %v311_v39, %v312_v43  ;;  %vm224_vm2 = vcmp.ne.f32.partialorder %v216_v25, 0.0  ;;  %v484_v53 = vsel %vm222_vm0, 1.0, %v561_v52 }
  0x1a   : > { %v278_v40 = vmin.f32 %v276_v22, %v277_v32  ;;  %v291_v41 = vmax.f32 %v289_v23, %v290_v33  ;;  %v485_v54 = vsel %vm223_vm1, 1.0, %v561_v52  ;;  %v249_v59 = vsub.f32 %v611_v5, %v217_v28 }
  0x1b   : > { %v303_v57 = vrot.slane %v302_v50, 4  ;;  %v315_v58 = vmax.f32 %v313_v47, %v314_v51  ;;  %v254_v60 = vand.u32 2147483647, %v246_v44  ;;  %v255_v61 = vand.u32 2147483647, %v247_v45 }
  0x1c   : > { %v279_v48 = vrot.slane %v278_v40, 2  ;;  %v292_v49 = vrot.slane %v291_v41, 2  ;;  %v256_v62 = vand.u32 2147483647, %v248_v46  ;;  %vm225_vm3 = vcmp.ne.f32.partialorder %v217_v28, 0.0 }
  0x1d   : > { %v304_v1 = vmin.f32 %v302_v50, %v303_v57  ;;  %v316_v2 = vrot.slane %v315_v58, 4  ;;  %vm226_vm4 = vcmp.ne.f32.partialorder %v636_v21, 0.0  ;;  %v486_v8 = vsel %vm224_vm2, 1.0, %v561_v52 }
  0x1e   : > { %v280_v55 = vmin.f32 %v278_v40, %v279_v48  ;;  %v293_v56 = vmax.f32 %v291_v41, %v292_v49  ;;  %v250_v5 = vsub.f32 %v607_v3, %v636_v21  ;;  %vm227_vm5 = vcmp.ne.f32.partialorder %v638_v26, 0.0 }
  0x1f   : > { %v305_v11 = vrot.slane %v304_v1, 2  ;;  %v317_v12 = vmax.f32 %v315_v58, %v316_v2  ;;  %v251_v13 = vsub.f32 %v609_v4, %v638_v26  ;;  %v257_v14 = vand.u32 2147483647, %v249_v59 }
  0x20   : > { %v281_v63 = vrot.slane %v280_v55, 1  ;;  %v294_v0 = vrot.slane %v293_v56, 1  ;;  %v262_v15 = vmul.f32 %v484_v53, %v254_v60  ;;  %vm228_vm6 = vcmp.ne.f32.partialorder %v641_v29, 0.0 }
  0x21   : > { %v306_v16 = vmin.f32 %v304_v1, %v305_v11  ;;  %v318_v17 = vrot.slane %v317_v12, 2  ;;  %v487_v18 = vsel %vm225_vm3, 1.0, %v561_v52  ;;  %v252_v3 = vsub.f32 %v613_v6, %v641_v29 }
  0x22   : > { %v282_v9 = vmin.f32 %v280_v55, %v281_v63  ;;  %v295_v10 = vmax.f32 %v293_v56, %v294_v0  ;;  %v258_v19 = vand.u32 2147483647, %v250_v5  ;;  %v263_v20 = vmul.f32 %v485_v54, %v255_v61 }
  0x23   : > { %v264_v22 = vmul.f32 %v486_v8, %v256_v62  ;;  %v307_v23 = vrot.slane %v306_v16, 1  ;;  %v319_v24 = vmax.f32 %v317_v12, %v318_v17  ;;  %v488_v4 = vsel %vm226_vm4, 1.0, %v561_v52 }
  0x24   : > { %352 = vst [vmem:[%s662_s23] sm:$0x1] %v282_v9  ;;  %492 = vst [vmem:[%s662_s23 + $0x1] sm:$0x1] %v295_v10  ;;  %v253_v25 = vsub.f32 %v615_v7, %v643_v30  ;;  %v259_v27 = vand.u32 2147483647, %v251_v13  ;;  %v265_v31 = vmul.f32 %v487_v18, %v257_v14  ;;  %v322_v32 = vadd.f32 %v263_v20, %v262_v15 }
  0x25   : > { %v335_v28 = vadd.f32 %v485_v54, %v484_v53  ;;  %v308_v33 = vmin.f32 %v306_v16, %v307_v23  ;;  %v320_v34 = vrot.slane %v319_v24, 1  ;;  %vm229_vm7 = vcmp.ne.f32.partialorder %v643_v30, 0.0 }
  0x26   : > { %v489_v6 = vsel %vm227_vm5, 1.0, %v561_v52  ;;  %v260_v35 = vand.u32 2147483647, %v252_v3  ;;  %v266_v36 = vmul.f32 %v488_v4, %v258_v19  ;;  %v323_v37 = vadd.f32 %v322_v32, %v264_v22 }
  0x27   : > { %v336_v21 = vadd.f32 %v486_v8, %v335_v28  ;;  %493 = vst [vmem:[%s662_s23 + $0x2] sm:$0x1] %v308_v33  ;;  %v321_v38 = vmax.f32 %v319_v24, %v320_v34  ;;  %v490_v7 = vsel %vm228_vm6, 1.0, %v561_v52  ;;  %v261_v39 = vand.u32 2147483647, %v253_v25 }
  0x28   : > { %v267_v40 = vmul.f32 %v489_v6, %v259_v27  ;;  %v324_v41 = vadd.f32 %v323_v37, %v265_v31  ;;  %v491_v43 = vsel %vm229_vm7, 1.0, %v561_v52  ;;  %v268_v44 = vmul.f32 %v490_v7, %v260_v35 }
  0x29   : > { %v337_v42 = vadd.f32 %v487_v18, %v336_v21  ;;  %494 = vst [vmem:[%s662_s23 + $0x3] sm:$0x1] %v321_v38  ;;  %v269_v26 = vmul.f32 %v491_v43, %v261_v39 }
  0x2a   : > { %v325_v30 = vadd.f32 %v324_v41, %v266_v36 }
  0x2b   : > { %v338_v45 = vadd.f32 %v488_v4, %v337_v42 }
  0x2c   : > { %v326_v46 = vadd.f32 %v325_v30, %v267_v40 }
  0x2d   : > { %v339_v47 = vadd.f32 %v489_v6, %v338_v45 }
  0x2e   : > { %v327_v48 = vadd.f32 %v326_v46, %v268_v44 }
  0x2f   : > { %v340_v49 = vadd.f32 %v490_v7, %v339_v47 }
  0x30   : > { %v328_v50 = vadd.f32 %v327_v48, %v269_v26 }
  0x31   : > { %v341_v51 = vadd.f32 %v491_v43, %v340_v49 }
  0x32   : > { %v329_v29 = vrot.slane %v328_v50, 4 }
  0x33   : > { %v342_v53 = vrot.slane %v341_v51, 4 }
  0x34   : > { %v330_v54 = vadd.f32 %v329_v29, %v328_v50 }
  0x35   : > { %v343_v55 = vadd.f32 %v342_v53, %v341_v51 }
  0x36   : > { %v331_v56 = vrot.slane %v330_v54, 2 }
  0x37   : > { %v344_v57 = vrot.slane %v343_v55, 2 }
  0x38   : > { %v332_v58 = vadd.f32 %v331_v56, %v330_v54 }
  0x39   : > { %v345_v52 = vadd.f32 %v344_v57, %v343_v55 }
  0x3a   : > { %v333_v59 = vrot.slane %v332_v58, 1 }
  0x3b   : > { %v346_v60 = vrot.slane %v345_v52, 1 }
  0x3c   : > { %v334_v61 = vadd.f32 %v333_v59, %v332_v58 }
  0x3d   : > { %v347_v62 = vadd.f32 %v346_v60, %v345_v52 }
  0x3e   : > { %495 = vst [vmem:[%s662_s23 + $0x4] sm:$0x1] %v334_v61 }
  0x3f   : > { %496 = vst [vmem:[%s662_s23 + $0x5] sm:$0x1] %v347_v62 }
  0x40 PF: > { %s12_s11 = sadd.s32 1, %s559_s11   ;;  %s702_s9 = smov %s555_s10 }
  0x41   : > { %p9_p5 = scmp.ge.s32.totalorder %s12_s11, 4   ;;  %s703_s10 = smov %s705_s12 }
  0x43   :  { %11 = sbr.rel (!%p9_p5) target bundleno = 2 (0x2), region = 79 }

// kernel: ssim_l1_loss.3
= control target key start
LH: loop header
LB: loop body
LE: loop exit
PB: predicated region body
PF: predicated region fallthrough
CT: control target
= control target key end

     0   :  { %9 = vsyncpa [#allocation7], 0  ;;  %s6404_s15 = smov 0   ;;  %s10271_s0 = inlined_call_operand.vmem [shape: f32[16], index: 0, kind: input, shape index: {}]   ;;  %s10272_s1 = inlined_call_operand.vmem [shape: f32[16,6], index: 1, kind: input, shape index: {}]   ;;  %s10273_s2 = inlined_call_operand.vmem [shape: f32[4,16,16,16], index: 2, kind: input, shape index: {}]   ;;  %s10274_s3 = inlined_call_operand.vmem [shape: f32[4,16,16,16], index: 3, kind: input, shape index: {}]   ;;  %s10275_s4 = inlined_call_operand.vmem [shape: f32[4,1,128], index: 4, kind: output, shape index: {}]  }
   0x1 LB: > { %s6410_s16 = sadd.s32 4294967295, %s6375_s15   ;;  %p5674_p0 = scmp.ge.s32.totalorder %s6375_s15, 1  ;;  %s6375_s15 = sphi %s6404_s15, %s15_s15  }
   0x2   : > { %p88_p1 = scmp.lt.s32.totalorder %s6375_s15, 5  ;;  %s101_s19 = sshll.u32 %s10271_s0, 4  ;;  %s102_s19 = int_to_ptr.vmem [resolvable:$true] %s101_s19 }
   0x3   : > { %p6322_p3 = scmp.eq.s32.totalorder %s6410_s16, 0  ;;  %s6346_s21 = scalar_lea.vmem %s102_s19, 16 }
   0x4   : > { %p6417_p2 = pnand %p5674_p0, %p88_p1  ;;  %p6347_p6 = scmp.ne.s32.totalorder %s102_s19, %s6346_s21 }
   0x5   : > { %p6354_p10 = scmp.lt.s32.totalorder %s102_s19, %s102_s19  ;;  %p6355_p11 = scmp.lt.s32.totalorder %s6346_s21, %s6346_s21 }
   0x6   : > { %p6318_p4 = pneg %p6417_p2 }
   0x7   : > { %p6356_p12 = por %p6355_p11, %p6354_p10 }
   0x8   : > { %p6319_p5 = pnand %p6322_p3, %p6318_p4 }
   0xa   : > { %p6348_p7 = pneg %p6319_p5 }
   0xc   : > { %p6349_p8 = pnand %p6348_p7, %p6347_p6 }
   0xe   : > { %p6350_p9 = pneg %p6349_p8 }
  0x10   : > { %p6357_p13 = pnand %p6356_p12, %p6350_p9 }
  0x12   : > { %6360 = shalt.err (!%p6357_p13)
}
  0x13   : > { %s6377_s22 = smov [#allocation6]   ;;  %117 = sbr.rel (%p6417_p2) target bundleno = 1174 (0x496), region = 28 }
  0x14   : > { %6321 = dma.vmem_to_smem (!%p6319_p5), %s102_s19, 16, %s6377_s22, [#allocation7]  }
  0x18   : > { %6366 = dma.done.wait (%p6322_p3), [#allocation7], 16  }
  0x19   : > { %6368 = vsyncadd (%p6322_p3), [#allocation7], 4294967280 }
  0x1a   : > { %123 = sfence }
  0x1b   : > { %p133_p0 = scmp.lt.s32.totalorder %s6410_s16, 3  ;;  %s5678_s23 = sshll.u32 %s6410_s16, 2  ;;  %v6437_v0 = vld [vmem:[%s10272_s1] sm:$0xff]  ;;  %v6442_v1 = vld [vmem:[%s10272_s1 + $0x8] sm:$0xff] }
  0x1c   : > { %s6444_s28 = sld [smem:[#allocation6 + %s5678_s23]]  ;;  %s138_s29 = sadd.s32 1, %s5678_s23 }
  0x1d   : > { %s6447_s30 = scalar_select %p133_p0, %s6410_s16, 3 }
  0x1e   : > { %s6449_s5 = sld [smem:[#allocation6 + %s138_s29]]  ;;  %s140_s6 = sadd.s32 2, %s5678_s23 }
  0x1f   : > { %s135_s9 = scalar_lea.vmem %s10275_s4, %s6447_s30  ;;  %s6455_s10 = sld [smem:[#allocation6 + %s140_s6]] }
  0x20   : > { %s142_s11 = sadd.s32 3, %s5678_s23  ;;  %s5679_s12 = sshll.u32 %s6410_s16, 8 }
  0x21   : > { %s6458_s13 = sld [smem:[#allocation6 + %s142_s11]]  ;;  %s6465_s18 = scalar_lea.vmem %s10273_s2, %s5679_s12 }
  0x22   : > { %v6468_v2 = vld [vmem:[%s6465_s18] sm:$0xff]  ;;  %v6471_v3 = vld [vmem:[%s6465_s18 + $0x8] sm:$0xff]  ;;  %v6474_v4 = vld [vmem:[%s6465_s18 + $0x10] sm:$0xff] }
  0x23   : > { %v6477_v5 = vld [vmem:[%s6465_s18 + $0x18] sm:$0xff]  ;;  %v6480_v6 = vld [vmem:[%s6465_s18 + $0x20] sm:$0xff]  ;;  %v6483_v7 = vld [vmem:[%s6465_s18 + $0x28] sm:$0xff] }
  0x24   : > { %v6486_v8 = vld [vmem:[%s6465_s18 + $0x30] sm:$0xff]  ;;  %v6489_v9 = vld [vmem:[%s6465_s18 + $0x38] sm:$0xff]  ;;  %v6492_v10 = vld [vmem:[%s6465_s18 + $0x40] sm:$0xff] }
  0x25   : > { %v6495_v11 = vld [vmem:[%s6465_s18 + $0x48] sm:$0xff]  ;;  %v6498_v12 = vld [vmem:[%s6465_s18 + $0x50] sm:$0xff]  ;;  %v6501_v13 = vld [vmem:[%s6465_s18 + $0x58] sm:$0xff] }
  0x26   : > { %v6504_v14 = vld [vmem:[%s6465_s18 + $0x60] sm:$0xff]  ;;  %v6507_v15 = vld [vmem:[%s6465_s18 + $0x68] sm:$0xff]  ;;  %v6510_v16 = vld [vmem:[%s6465_s18 + $0x70] sm:$0xff] }
  0x27   : > { %10450 = vst [vmem:[#allocation13_spill] sm:$0xff] %v6507_v15  ;;  %10451 = vst [vmem:[#allocation14_spill] sm:$0xff] %v6510_v16  ;;  %v6513_v17 = vld [vmem:[%s6465_s18 + $0x78] sm:$0xff]  ;;  %v6516_v18 = vld [vmem:[%s6465_s18 + $0x80] sm:$0xff] }
  0x28   : > { %10452 = vst [vmem:[#allocation15_spill] sm:$0xff] %v6513_v17  ;;  %v6519_v19 = vld [vmem:[%s6465_s18 + $0x88] sm:$0xff]  ;;  %v6522_v20 = vld [vmem:[%s6465_s18 + $0x90] sm:$0xff]  ;;  %v6525_v21 = vld [vmem:[%s6465_s18 + $0x98] sm:$0xff] }
  0x29   : > { %v6528_v22 = vld [vmem:[%s6465_s18 + $0xa0] sm:$0xff]  ;;  %v6531_v23 = vld [vmem:[%s6465_s18 + $0xa8] sm:$0xff]  ;;  %v6534_v24 = vld [vmem:[%s6465_s18 + $0xb0] sm:$0xff] }
  0x2a   : > { %v6537_v25 = vld [vmem:[%s6465_s18 + $0xb8] sm:$0xff]  ;;  %v6540_v26 = vld [vmem:[%s6465_s18 + $0xc0] sm:$0xff]  ;;  %v6543_v27 = vld [vmem:[%s6465_s18 + $0xc8] sm:$0xff] }
  0x2b   : > { %v6546_v28 = vld [vmem:[%s6465_s18 + $0xd0] sm:$0xff]  ;;  %v6549_v29 = vld [vmem:[%s6465_s18 + $0xd8] sm:$0xff]  ;;  %v6552_v30 = vld [vmem:[%s6465_s18 + $0xe0] sm:$0xff] }
  0x2c   : > { %v6555_v31 = vld [vmem:[%s6465_s18 + $0xe8] sm:$0xff]  ;;  %v6558_v32 = vld [vmem:[%s6465_s18 + $0xf0] sm:$0xff]  ;;  %v6561_v33 = vld [vmem:[%s6465_s18 + $0xf8] sm:$0xff] }
  0x2d   : > { %10453 = vst [vmem:[#allocation16_spill] sm:$0xff] %v6555_v31  ;;  %10454 = vst [vmem:[#allocation17_spill] sm:$0xff] %v6558_v32 }
  0x2e   : > { %10455 = vst [vmem:[#allocation18_spill] sm:$0xff] %v6561_v33 }
  0x2f   : > { %252 = vsyncadd [#allocation4], 4096  ;;  %s6568_s21 = scalar_lea.vmem %s10274_s3, %s5679_s12 }
  0x30   : > { %v6571_v34 = vld [vmem:[%s6568_s21] sm:$0xff]  ;;  %v6574_v35 = vld [vmem:[%s6568_s21 + $0x8] sm:$0xff]  ;;  %v6577_v36 = vld [vmem:[%s6568_s21 + $0x10] sm:$0xff] }
  0x31   : > { %10456 = vst [vmem:[#allocation19_spill] sm:$0xff] %v6574_v35  ;;  %v6580_v37 = vld [vmem:[%s6568_s21 + $0x18] sm:$0xff]  ;;  %v6583_v38 = vld [vmem:[%s6568_s21 + $0x20] sm:$0xff]  ;;  %v6586_v39 = vld [vmem:[%s6568_s21 + $0x28] sm:$0xff] }
  0x32   : > { %v6589_v40 = vld [vmem:[%s6568_s21 + $0x30] sm:$0xff]  ;;  %v6592_v41 = vld [vmem:[%s6568_s21 + $0x38] sm:$0xff]  ;;  %v6595_v42 = vld [vmem:[%s6568_s21 + $0x40] sm:$0xff] }
  0x33   : > { %v6598_v43 = vld [vmem:[%s6568_s21 + $0x48] sm:$0xff]  ;;  %v6601_v44 = vld [vmem:[%s6568_s21 + $0x50] sm:$0xff]  ;;  %v6604_v45 = vld [vmem:[%s6568_s21 + $0x58] sm:$0xff] }
  0x34   : > { %v6607_v46 = vld [vmem:[%s6568_s21 + $0x60] sm:$0xff]  ;;  %v6610_v47 = vld [vmem:[%s6568_s21 + $0x68] sm:$0xff]  ;;  %v6613_v48 = vld [vmem:[%s6568_s21 + $0x70] sm:$0xff] }
  0x35   : > { %10457 = vst [vmem:[#allocation20_spill] sm:$0xff] %v6610_v47  ;;  %10458 = vst [vmem:[#allocation21_spill] sm:$0xff] %v6613_v48  ;;  %v6616_v49 = vld [vmem:[%s6568_s21 + $0x78] sm:$0xff]  ;;  %v6619_v50 = vld [vmem:[%s6568_s21 + $0x80] sm:$0xff] }
  0x36   : > { %10459 = vst [vmem:[#allocation22_spill] sm:$0xff] %v6616_v49  ;;  %10460 = vst [vmem:[#allocation23_spill] sm:$0xff] %v6619_v50  ;;  %v6622_v51 = vld [vmem:[%s6568_s21 + $0x88] sm:$0xff]  ;;  %v6625_v52 = vld [vmem:[%s6568_s21 + $0x90] sm:$0xff] }
  0x37   : > { %10461 = vst [vmem:[#allocation24_spill] sm:$0xff] %v6622_v51  ;;  %10462 = vst [vmem:[#allocation25_spill] sm:$0xff] %v6625_v52  ;;  %v6628_v53 = vld [vmem:[%s6568_s21 + $0x98] sm:$0xff]  ;;  %v6631_v54 = vld [vmem:[%s6568_s21 + $0xa0] sm:$0xff] }
  0x38   : > { %10463 = vst [vmem:[#allocation26_spill] sm:$0xff] %v6631_v54  ;;  %v6634_v55 = vld [vmem:[%s6568_s21 + $0xa8] sm:$0xff]  ;;  %v6637_v56 = vld [vmem:[%s6568_s21 + $0xb0] sm:$0xff]  ;;  %v6640_v57 = vld [vmem:[%s6568_s21 + $0xb8] sm:$0xff] }
  0x39   : > { %10464 = vst [vmem:[#allocation27_spill] sm:$0xff] %v6634_v55  ;;  %10465 = vst [vmem:[#allocation28_spill] sm:$0xff] %v6637_v56  ;;  %v6643_v58 = vld [vmem:[%s6568_s21 + $0xc0] sm:$0xff]  ;;  %v6646_v59 = vld [vmem:[%s6568_s21 + $0xc8] sm:$0xff] }
  0x3a   : > { %10466 = vst [vmem:[#allocation29_spill] sm:$0xff] %v6640_v57  ;;  %10467 = vst [vmem:[#allocation30_spill] sm:$0xff] %v6643_v58  ;;  %v6649_v60 = vld [vmem:[%s6568_s21 + $0xd0] sm:$0xff]  ;;  %v6652_v61 = vld [vmem:[%s6568_s21 + $0xd8] sm:$0xff] }
  0x3b   : > { %10468 = vst [vmem:[#allocation31_spill] sm:$0xff] %v6646_v59  ;;  %10469 = vst [vmem:[#allocation32_spill] sm:$0xff] %v6649_v60  ;;  %v6655_v62 = vld [vmem:[%s6568_s21 + $0xe0] sm:$0xff]  ;;  %v6658_v63 = vld [vmem:[%s6568_s21 + $0xe8] sm:$0xff] }
  0x3c   : > { %10470 = vst [vmem:[#allocation33_spill] sm:$0xff] %v6652_v61  ;;  %10471 = vst [vmem:[#allocation34_spill] sm:$0xff] %v6655_v62  ;;  %v6661_v33 = vld [vmem:[%s6568_s21 + $0xf0] sm:$0xff]  ;;  %v6664_v17 = vld [vmem:[%s6568_s21 + $0xf8] sm:$0xff] }
  0x3d   : > { %10472 = vst [vmem:[#allocation35_spill] sm:$0xff] %v6658_v63  ;;  %10473 = vst [vmem:[#allocation36_spill] sm:$0xff] %v6661_v33 }
  0x3e   : > { %10474 = vst [vmem:[#allocation37_spill] sm:$0xff] %v6664_v17 }
  0x3f   : > { %359 = vsyncadd [#allocation4 + $0x2], 4096  ;;  %vm360_vm0 = vcmask 46080   ;;  %v10278_v49 = vmov 0.0  }
  0x40   : > { %361 = vst.msk [vmem:[#allocation5] sm:$0x3f] %vm360_vm0, %v10278_v49 }
  0x41   : > { %6369 = dma.done.wait [#allocation4], 4096 }
  0x42   : > { %6370 = vsyncadd [#allocation4], 4294963200  ;;  %6308 = vmatprep.subr.mxu1 %v6442_v1  ;;  %6048 = vmatprep.subr.mxu0 %v6442_v1  ;;  %vm432_vm1 = vcmp.ne.f32.partialorder %v6571_v34, 0.0  ;;  %v6672_v32 = vstv %s6444_s28  ;;  %v6675_v33 = vstv %s6449_s5 }
  0x43   : > { %6371 = dma.done.wait [#allocation4 + $0x2], 4096 }
  0x44   : > { %6372 = vsyncadd [#allocation4 + $0x2], 4294963200  ;;  %6310 = vmatpush3.msra.mxu1 %v6442_v1  ;;  %6049 = vmatpush3.msra.mxu0 %v6442_v1  ;;  %v529_v49 = vsub.f32 %v6468_v2, %v6672_v32  ;;  %v10475_v17 = vmov 0.0   ;;  %vm448_vm2 = vcmp.ne.f32.partialorder %v6619_v50, 0.0  ;;  %v545_v48 = vsub.f32 %v6516_v18, %v6672_v32 }
  0x45   : > { %6309 = vmatprep.subr.mxu1 %v6437_v0  ;;  %6050 = vmatprep.subr.mxu0 %v6437_v0  ;;  %v6684_v16 = vsel %vm432_vm1, 1.0, %v10475_v17  ;;  %v6693_v2 = vstv %s6455_s10  ;;  %v6696_v63 = vsel %vm448_vm2, 1.0, %v10475_v17  ;;  %vm433_vm3 = vcmp.ne.f32.partialorder %v6574_v35, 0.0 }
  0x46   : > { %10476 = vst [vmem:[#allocation38_spill] sm:$0xff] %v6684_v16  ;;  %6311 = vmatpush3.msra.mxu1 %v6437_v0  ;;  %6051 = vmatpush3.msra.mxu0 %v6437_v0  ;;  %v562_v31 = vmul.f32 %v6675_v33, %v529_v49  ;;  %10477 = vst [vmem:[#allocation39_spill] sm:$0xff] %v6696_v63  ;;  %vm724_vm4 = vcmask 130048   ;;  %v578_v50 = vmul.f32 %v6675_v33, %v545_v48  ;;  %v6708_v49 = vsel %vm433_vm3, 1.0, %v10475_v17 }
  0x47   : > { %6100 = vmatprep.subr.mxu1 %v6442_v1  ;;  %v530_v18 = vsub.f32 %v6471_v3, %v6672_v32  ;;  %6152 = vmatprep.subr.mxu0 %v6442_v1  ;;  %vm449_vm5 = vcmp.ne.f32.partialorder %v6622_v51, 0.0  ;;  %v627_v35 = vsub.f32 %v6571_v34, %v6693_v2  ;;  %v6714_v47 = vstv %s6458_s13 }
  0x48   : > { %v6705_v15 = vmul.f32 %v6684_v16, %v562_v31  ;;  %v6717_v48 = vmul.f32 %v6696_v63, %v578_v50  ;;  %v6723_v31 = vsel %vm449_vm5, 1.0, %v10475_v17  ;;  %v546_v16 = vsub.f32 %v6519_v19, %v6672_v32 }
  0x49   : > { %v563_v3 = vmul.f32 %v6675_v33, %v530_v18  ;;  %10479 = vst [vmem:[#allocation41_spill] sm:$0xff] %v6723_v31  ;;  %vm434_vm6 = vcmp.ne.f32.partialorder %v6577_v36, 0.0  ;;  %v531_v34 = vsub.f32 %v6474_v4, %v6672_v32  ;;  %vm450_vm7 = vcmp.ne.f32.partialorder %v6625_v52, 0.0 }
  0x4a   : > { %10478 = vst [vmem:[#allocation40_spill] sm:$0xff] %v6717_v48  ;;  %6052 = vmatprep.mubr.msk.f32.mxu0 %vm724_vm4, %v6705_v15  ;;  %6076 = vmatprep.mubr.msk.f32.mxu1 %vm724_vm4, %v6717_v48  ;;  %v6736_v18 = vsel %vm434_vm6, 1.0, %v10475_v17  ;;  %v547_v63 = vsub.f32 %v6522_v20, %v6672_v32  ;;  %v579_v19 = vmul.f32 %v6675_v33, %v546_v16  ;;  %v6744_v4 = vsel %vm450_vm7, 1.0, %v10475_v17 }
  0x4b   : > { %v6733_v50 = vmul.f32 %v6708_v49, %v563_v3  ;;  %v564_v51 = vmul.f32 %v6675_v33, %v531_v34  ;;  %10481 = vst [vmem:[#allocation43_spill] sm:$0xff] %v6744_v4  ;;  %vm435_vm8 = vcmp.ne.f32.partialorder %v6580_v37, 0.0  ;;  %v532_v48 = vsub.f32 %v6477_v5, %v6672_v32 }
  0x4c   : > { %v580_v3 = vmul.f32 %v6675_v33, %v547_v63  ;;  %v6753_v52 = vmul.f32 %v6714_v47, %v627_v35  ;;  %v6756_v16 = vmul.f32 %v6723_v31, %v579_v19  ;;  %v6766_v63 = vsel %vm435_vm8, 1.0, %v10475_v17 }
  0x4d   : > { %10480 = vst [vmem:[#allocation42_spill] sm:$0xff] %v6733_v50  ;;  %6053 = vmatmul.mubr.msk.f32.vlgmr.msra.gmra.mxu0 %vm724_vm4, %v6733_v50  ;;  %v6759_v20 = vmul.f32 %v6736_v18, %v564_v51  ;;  %v565_v50 = vmul.f32 %v6675_v33, %v532_v48  ;;  %vm451_vm9 = vcmp.ne.f32.partialorder %v6628_v53, 0.0  ;;  %v548_v35 = vsub.f32 %v6525_v21, %v6672_v32 }
  0x4e   : > { %10482 = vst [vmem:[#allocation44_spill] sm:$0xff] %v6756_v16  ;;  %6153 = vmatpush3.msra.mxu0 %v6442_v1  ;;  %v6763_v34 = vmul.f32 %v6744_v4, %v580_v3  ;;  %6077 = vmatmul.mubr.msk.f32.vlgmr.msra.gmra.mxu1 %vm724_vm4, %v6756_v16  ;;  %v6776_v5 = vsel %vm451_vm9, 1.0, %v10475_v17  ;;  %vm436_vm10 = vcmp.ne.f32.partialorder %v6583_v38, 0.0  ;;  %v533_v51 = vsub.f32 %v6480_v6, %v6672_v32 }
  0x4f   : > { %6154 = vmatprep.subr.mxu0 %v6437_v0  ;;  %6055 = vmatprep.mubr.msk.f32.mxu0 %vm724_vm4, %v6759_v20  ;;  %10484 = vst [vmem:[#allocation46_spill] sm:$0xff] %v6776_v5  ;;  %v6787_v48 = vmul.f32 %v6766_v63, %v565_v50  ;;  %v6790_v19 = vsel %vm436_vm10, 1.0, %v10475_v17  ;;  %vm452_vm11 = vcmp.ne.f32.partialorder %v6631_v54, 0.0  ;;  %v549_v21 = vsub.f32 %v6528_v22, %v6672_v32  ;;  %v10518_v54 = vld [vmem:[#allocation37_spill] sm:$0xff] }
  0x50   : > { %10483 = vst [vmem:[#allocation45_spill] sm:$0xff] %v6763_v34  ;;  %6101 = vmatpush3.msra.mxu1 %v6442_v1  ;;  %6079 = vmatprep.mubr.msk.f32.mxu1 %vm724_vm4, %v6763_v34  ;;  %v581_v3 = vmul.f32 %v6675_v33, %v548_v35  ;;  %v566_v6 = vmul.f32 %v6675_v33, %v533_v51  ;;  %v6798_v4 = vsel %vm452_vm11, 1.0, %v10475_v17  ;;  %vm437_vm12 = vcmp.ne.f32.partialorder %v6586_v39, 0.0 }
  0x51   : > { %10485 = vst [vmem:[#allocation47_spill] sm:$0xff] %v6798_v4  ;;  %6102 = vmatprep.subr.mxu1 %v6437_v0  ;;  %6155 = vmatpush3.msra.mxu0 %v6437_v0  ;;  %v582_v50 = vmul.f32 %v6675_v33, %v549_v21  ;;  %v6807_v22 = vsel %vm437_vm12, 1.0, %v10475_v17  ;;  %v534_v35 = vsub.f32 %v6483_v7, %v6672_v32  ;;  %vm453_vm13 = vcmp.ne.f32.partialorder %v6634_v55, 0.0 }
  0x52   : > { %6056 = vmatmul.mubr.msk.f32.gmra.mxu0 %vm724_vm4, %v6787_v48  ;;  %6103 = vmatpush3.msra.mxu1 %v6437_v0  ;;  %v6814_v51 = vmul.f32 %v6776_v5, %v581_v3  ;;  %v6817_v31 = vmul.f32 %v6790_v19, %v566_v6  ;;  %v6820_v34 = vsel %vm453_vm13, 1.0, %v10475_v17  ;;  %v550_v21 = vsub.f32 %v6531_v23, %v6672_v32 }
  0x53   : > { %10487 = vst [vmem:[#allocation49_spill] sm:$0xff] %v6820_v34  ;;  %6204 = vmatprep.subr.mxu1 %v6442_v1  ;;  %6256 = vmatprep.subr.mxu0 %v6442_v1  ;;  %v6827_v7 = vmul.f32 %v6798_v4, %v582_v50  ;;  %v567_v55 = vmul.f32 %v6675_v33, %v534_v35  ;;  %vm438_vm14 = vcmp.ne.f32.partialorder %v6589_v40, 0.0  ;;  %vm454_vm15 = vcmp.ne.f32.partialorder %v6637_v56, 0.0 }
  0x54   : > { %10486 = vst [vmem:[#allocation48_spill] sm:$0xff] %v6814_v51  ;;  %v535_v3 = vsub.f32 %v6486_v8, %v6672_v32  ;;  %6080 = vmatmul.mubr.msk.f32.gmra.mxu1 %vm724_vm4, %v6814_v51  ;;  %6058 = vmatprep.mubr.msk.f32.mxu0 %vm724_vm4, %v6817_v31  ;;  %v583_v23 = vmul.f32 %v6675_v33, %v550_v21  ;;  %v6839_v6 = vsel %vm438_vm14, 1.0, %v10475_v17  ;;  %v6851_v4 = vsel %vm454_vm15, 1.0, %v10475_v17  ;;  %v10507_v51 = vld [vmem:[#allocation16_spill] sm:$0xff] }
  0x55   : > { %10488 = vst [vmem:[#allocation50_spill] sm:$0xff] %v6827_v7  ;;  %v551_v50 = vsub.f32 %v6534_v24, %v6672_v32  ;;  %6082 = vmatprep.mubr.msk.f32.mxu1 %vm724_vm4, %v6827_v7  ;;  %v6847_v8 = vmul.f32 %v6807_v22, %v567_v55  ;;  %10489 = vst [vmem:[#allocation51_spill] sm:$0xff] %v6851_v4  ;;  %vm439_vm1 = vcmp.ne.f32.partialorder %v6592_v41, 0.0  ;;  %vm455_vm2 = vcmp.ne.f32.partialorder %v6640_v57, 0.0 }
  0x56   : > { %v568_v35 = vmul.f32 %v6675_v33, %v535_v3  ;;  %v6855_v21 = vmul.f32 %v6820_v34, %v583_v23  ;;  %v6859_v24 = vsel %vm439_vm1, 1.0, %v10475_v17  ;;  %v536_v7 = vsub.f32 %v6489_v9, %v6672_v32 }
  0x57   : > { %v584_v5 = vmul.f32 %v6675_v33, %v551_v50  ;;  %6059 = vmatmul.mubr.msk.f32.gmra.mxu0 %vm724_vm4, %v6847_v8  ;;  %v552_v3 = vsub.f32 %v6537_v25, %v6672_v32  ;;  %vm440_vm3 = vcmp.ne.f32.partialorder %v6595_v42, 0.0  ;;  %v6879_v50 = vsel %vm455_vm2, 1.0, %v10475_v17 }
  0x58   : > { %10490 = vst [vmem:[#allocation52_spill] sm:$0xff] %v6855_v21  ;;  %v6866_v55 = vmul.f32 %v6839_v6, %v568_v35  ;;  %6083 = vmatmul.mubr.msk.f32.gmra.mxu1 %vm724_vm4, %v6855_v21  ;;  %v569_v9 = vmul.f32 %v6675_v33, %v536_v7  ;;  %10492 = vst [vmem:[#allocation54_spill] sm:$0xff] %v6879_v50  ;;  %v6882_v35 = vsel %vm440_vm3, 1.0, %v10475_v17  ;;  %vm456_vm5 = vcmp.ne.f32.partialorder %v6643_v58, 0.0 }
  0x59   : > { %v6875_v23 = vmul.f32 %v6851_v4, %v584_v5  ;;  %v585_v25 = vmul.f32 %v6675_v33, %v552_v3  ;;  %v537_v34 = vsub.f32 %v6492_v10, %v6672_v32  ;;  %v553_v5 = vsub.f32 %v6540_v26, %v6672_v32 }
  0x5a   : > { %6061 = vmatprep.mubr.msk.f32.mxu0 %vm724_vm4, %v6866_v55  ;;  %v6895_v7 = vmul.f32 %v6859_v24, %v569_v9  ;;  %v6898_v4 = vsel %vm456_vm5, 1.0, %v10475_v17  ;;  %vm441_vm6 = vcmp.ne.f32.partialorder %v6598_v43, 0.0  ;;  %v538_v3 = vsub.f32 %v6495_v11, %v6672_v32 }
  0x5b   : > { %10491 = vst [vmem:[#allocation53_spill] sm:$0xff] %v6875_v23  ;;  %6085 = vmatprep.mubr.msk.f32.mxu1 %vm724_vm4, %v6875_v23  ;;  %10493 = vst [vmem:[#allocation55_spill] sm:$0xff] %v6898_v4  ;;  %v6904_v10 = vmul.f32 %v6879_v50, %v585_v25  ;;  %v570_v21 = vmul.f32 %v6675_v33, %v537_v34  ;;  %v586_v26 = vmul.f32 %v6675_v33, %v553_v5 }
  0x5c   : > { %v6909_v23 = vsel %vm441_vm6, 1.0, %v10475_v17  ;;  %6062 = vmatmul.mubr.msk.f32.gmra.mxu0 %vm724_vm4, %v6895_v7  ;;  %v571_v9 = vmul.f32 %v6675_v33, %v538_v3  ;;  %vm457_vm7 = vcmp.ne.f32.partialorder %v6646_v59, 0.0  ;;  %v554_v11 = vsub.f32 %v6543_v27, %v6672_v32  ;;  %v10508_v59 = vld [vmem:[#allocation21_spill] sm:$0xff] }
  0x5d   : > { %10494 = vst [vmem:[#allocation56_spill] sm:$0xff] %v6904_v10  ;;  %vm442_vm8 = vcmp.ne.f32.partialorder %v6601_v44, 0.0  ;;  %6086 = vmatmul.mubr.msk.f32.gmra.mxu1 %vm724_vm4, %v6904_v10  ;;  %v6921_v34 = vmul.f32 %v6882_v35, %v570_v21  ;;  %v6924_v25 = vmul.f32 %v6898_v4, %v586_v26  ;;  %v6927_v5 = vsel %vm457_vm7, 1.0, %v10475_v17 }
  0x5e   : > { %10496 = vst [vmem:[#allocation58_spill] sm:$0xff] %v6927_v5  ;;  %v6930_v3 = vsel %vm442_vm8, 1.0, %v10475_v17  ;;  %v6933_v50 = vmul.f32 %v6909_v23, %v571_v9  ;;  %v587_v27 = vmul.f32 %v6675_v33, %v554_v11  ;;  %v539_v10 = vsub.f32 %v6498_v12, %v6672_v32 }
  0x5f   : > { %10495 = vst [vmem:[#allocation57_spill] sm:$0xff] %v6924_v25  ;;  %vm458_vm9 = vcmp.ne.f32.partialorder %v6649_v60, 0.0  ;;  %6064 = vmatprep.mubr.msk.f32.mxu0 %vm724_vm4, %v6921_v34  ;;  %6088 = vmatprep.mubr.msk.f32.mxu1 %vm724_vm4, %v6924_v25  ;;  %v555_v26 = vsub.f32 %v6546_v28, %v6672_v32  ;;  %vm443_vm10 = vcmp.ne.f32.partialorder %v6604_v45, 0.0  ;;  %v540_v9 = vsub.f32 %v6501_v13, %v6672_v32 }
  0x60   : > { %v6944_v21 = vsel %vm458_vm9, 1.0, %v10475_v17  ;;  %6065 = vmatmul.mubr.msk.f32.gmra.mxu0 %vm724_vm4, %v6933_v50  ;;  %v6954_v12 = vmul.f32 %v6927_v5, %v587_v27  ;;  %v572_v11 = vmul.f32 %v6675_v33, %v539_v10  ;;  %v6958_v25 = vsel %vm443_vm10, 1.0, %v10475_v17 }
  0x61   : > { %10497 = vst [vmem:[#allocation59_spill] sm:$0xff] %v6944_v21  ;;  %vm459_vm11 = vcmp.ne.f32.partialorder %v6652_v61, 0.0  ;;  %v588_v28 = vmul.f32 %v6675_v33, %v555_v26  ;;  %v573_v4 = vmul.f32 %v6675_v33, %v540_v9  ;;  %v556_v13 = vsub.f32 %v6549_v29, %v6672_v32 }
  0x62   : > { %10498 = vst [vmem:[#allocation60_spill] sm:$0xff] %v6954_v12  ;;  %v6964_v60 = vsel %vm459_vm11, 1.0, %v10475_v17  ;;  %6089 = vmatmul.mubr.msk.f32.gmra.mxu1 %vm724_vm4, %v6954_v12  ;;  %v6971_v10 = vmul.f32 %v6930_v3, %v572_v11  ;;  %vm444_vm12 = vcmp.ne.f32.partialorder %v6607_v46, 0.0  ;;  %v541_v27 = vsub.f32 %v6504_v14, %v6672_v32 }
  0x63   : > { %10499 = vst [vmem:[#allocation61_spill] sm:$0xff] %v6964_v60  ;;  %vm460_vm13 = vcmp.ne.f32.partialorder %v6655_v62, 0.0  ;;  %v6978_v26 = vmul.f32 %v6944_v21, %v588_v28  ;;  %v6981_v9 = vmul.f32 %v6958_v25, %v573_v4  ;;  %v589_v29 = vmul.f32 %v6675_v33, %v556_v13  ;;  %v10502_v21 = vld [vmem:[#allocation20_spill] sm:$0xff]  ;;  %v10505_v62 = vld [vmem:[#allocation35_spill] sm:$0xff] }
  0x64   : > { %v6985_v12 = vsel %vm444_vm12, 1.0, %v10475_v17  ;;  %6067 = vmatprep.mubr.msk.f32.mxu0 %vm724_vm4, %v6971_v10  ;;  %v574_v11 = vmul.f32 %v6675_v33, %v541_v27  ;;  %v6991_v14 = vsel %vm460_vm13, 1.0, %v10475_v17  ;;  %v557_v28 = vsub.f32 %v6552_v30, %v6672_v32  ;;  %v10504_v27 = vld [vmem:[#allocation13_spill] sm:$0xff] }
  0x65   : > { %10500 = vst [vmem:[#allocation62_spill] sm:$0xff] %v6978_v26  ;;  %10501 = vst [vmem:[#allocation63_spill] sm:$0xff] %v6991_v14  ;;  %vm445_vm14 = vcmp.ne.f32.partialorder %v10502_v21, 0.0  ;;  %6091 = vmatprep.mubr.msk.f32.mxu1 %vm724_vm4, %v6978_v26  ;;  %6068 = vmatmul.mubr.msk.f32.gmra.mxu0 %vm724_vm4, %v6981_v9  ;;  %v7001_v4 = vmul.f32 %v6964_v60, %v589_v29  ;;  %v542_v5 = vsub.f32 %v10504_v27, %v6672_v32  ;;  %v10509_v27 = vld [vmem:[#allocation14_spill] sm:$0xff]  ;;  %vm1431_vm6 = vcmask 1043456  }
  0x66   : > { %v7004_v13 = vsel %vm445_vm14, 1.0, %v10475_v17  ;;  %vm461_vm15 = vcmp.ne.f32.partialorder %v10505_v62, 0.0  ;;  %v7010_v30 = vmul.f32 %v6985_v12, %v574_v11  ;;  %v590_v61 = vmul.f32 %v6675_v33, %v557_v28  ;;  %v10510_v11 = vld [vmem:[#allocation36_spill] sm:$0xff]  ;;  %v10511_v28 = vld [vmem:[#allocation19_spill] sm:$0xff] }
  0x67   : > { %10503 = vst [vmem:[#allocation20_spill] sm:$0xff] %v7001_v4  ;;  %v7014_v26 = vsel %vm461_vm15, 1.0, %v10475_v17  ;;  %v558_v29 = vsub.f32 %v10507_v51, %v6672_v32  ;;  %6092 = vmatmul.mubr.msk.f32.gmra.mxu1 %vm724_vm4, %v7001_v4  ;;  %v575_v60 = vmul.f32 %v6675_v33, %v542_v5  ;;  %vm446_vm1 = vcmp.ne.f32.partialorder %v10508_v59, 0.0 }
  0x68   : > { %10506 = vst [vmem:[#allocation13_spill] sm:$0xff] %v7014_v26  ;;  %v543_v62 = vsub.f32 %v10509_v27, %v6672_v32  ;;  %vm462_vm2 = vcmp.ne.f32.partialorder %v10510_v11, 0.0  ;;  %v628_v58 = vsub.f32 %v10511_v28, %v6693_v2  ;;  %6070 = vmatprep.mubr.msk.f32.mxu0 %vm724_vm4, %v7010_v30  ;;  %v7030_v51 = vmul.f32 %v6991_v14, %v590_v61  ;;  %v10514_v11 = vld [vmem:[#allocation17_spill] sm:$0xff]  ;;  %v10515_v28 = vld [vmem:[#allocation22_spill] sm:$0xff]  ;;  %v10517_v14 = vld [vmem:[#allocation15_spill] sm:$0xff] }
  0x69   : > { %v591_v4 = vmul.f32 %v6675_v33, %v558_v29  ;;  %v7034_v5 = vsel %vm446_vm1, 1.0, %v10475_v17  ;;  %v7037_v57 = vmul.f32 %v7004_v13, %v575_v60  ;;  %v559_v56 = vsub.f32 %v10514_v11, %v6672_v32 }
  0x6a   : > { %10512 = vst [vmem:[#allocation16_spill] sm:$0xff] %v7030_v51  ;;  %v576_v27 = vmul.f32 %v6675_v33, %v543_v62  ;;  %vm447_vm3 = vcmp.ne.f32.partialorder %v10515_v28, 0.0  ;;  %6094 = vmatprep.mubr.msk.f32.mxu1 %vm724_vm4, %v7030_v51  ;;  %v7049_v29 = vsel %vm462_vm2, 1.0, %v10475_v17  ;;  %v544_v60 = vsub.f32 %v10517_v14, %v6672_v32 }
  0x6b   : > { %10513 = vst [vmem:[#allocation21_spill] sm:$0xff] %v7037_v57  ;;  %v7046_v61 = vmul.f32 %v7014_v26, %v591_v4  ;;  %vm463_vm5 = vcmp.ne.f32.partialorder %v10518_v54, 0.0  ;;  %6071 = vmatmul.mubr.msk.f32.gmra.mxu0 %vm724_vm4, %v7037_v57  ;;  %v592_v11 = vmul.f32 %v6675_v33, %v559_v56  ;;  %v7061_v51 = vsel %vm447_vm3, 1.0, %v10475_v17  ;;  %v10520_v4 = vld [vmem:[#allocation18_spill] sm:$0xff] }
  0x6c   : > { %v7057_v62 = vmul.f32 %v7034_v5, %v576_v27  ;;  %v560_v26 = vsub.f32 %v10520_v4, %v6672_v32  ;;  %v661_v16 = vmul.f32 %v6714_v47, %v628_v58  ;;  %v577_v14 = vmul.f32 %v6675_v33, %v544_v60 }
  0x6d   : > { %10516 = vst [vmem:[#allocation14_spill] sm:$0xff] %v7046_v61  ;;  %6095 = vmatmul.mubr.msk.f32.gmra.mxu1 %vm724_vm4, %v7046_v61  ;;  %v7070_v54 = vsel %vm463_vm5, 1.0, %v10475_v17  ;;  %v629_v27 = vsub.f32 %v6577_v36, %v6693_v2  ;;  %v7077_v56 = vmul.f32 %v7049_v29, %v592_v11  ;;  %v2572_v58 = vmul.f32 %v6705_v15, %v6705_v15  ;;  %v10521_v17 = vld [vmem:[#allocation38_spill] sm:$0xff] }
  0x6e   : > { %10519 = vst [vmem:[#allocation19_spill] sm:$0xff] %v7057_v62  ;;  %6073 = vmatprep.mubr.msk.f32.mxu0 %vm724_vm4, %v7057_v62  ;;  %v593_v32 = vmul.f32 %v6675_v33, %v560_v26  ;;  %v630_v60 = vsub.f32 %v6580_v37, %v6693_v2  ;;  %v7086_v4 = vmul.f32 %v10521_v17, %v6753_v52  ;;  %v10523_v26 = vld [vmem:[#allocation42_spill] sm:$0xff]  ;;  %vm1486_vm7 = vcmask 1042432  }
  0x6f   : > { %v7089_v36 = vmul.f32 %v7061_v51, %v577_v14  ;;  %v662_v61 = vmul.f32 %v6714_v47, %v629_v27  ;;  %v631_v11 = vsub.f32 %v6583_v38, %v6693_v2  ;;  %6097 = vmatprep.mubr.msk.f32.mxu1 %vm724_vm4, %v7077_v56  ;;  %v7100_v37 = vmul.f32 %v6708_v49, %v661_v16 }
  0x70   : > { %v7097_v33 = vmul.f32 %v7070_v54, %v593_v32  ;;  %v2573_v52 = vmul.f32 %v10523_v26, %v10523_v26  ;;  %v2574_v38 = vmul.f32 %v6759_v20, %v6759_v20  ;;  %v663_v14 = vmul.f32 %v6714_v47, %v630_v60 }
  0x71   : > { %10522 = vst [vmem:[#allocation17_spill] sm:$0xff] %v7089_v36  ;;  %6074 = vmatmul.mubr.msk.f32.gmra.mxu0 %vm724_vm4, %v7089_v36  ;;  %v632_v49 = vsub.f32 %v6586_v39, %v6693_v2  ;;  %v7117_v16 = vmul.f32 %v6736_v18, %v662_v61  ;;  %v664_v27 = vmul.f32 %v6714_v47, %v631_v11  ;;  %vm1517_vm8 = vcmask 1041408  }
  0x72   : > { %6098 = vmatmul.mubr.msk.f32.gmra.mxu1 %vm724_vm4, %v7097_v33  ;;  %6156 = vmatprep.mubr.msk.f32.mxu0 %vm724_vm4, %v2572_v58  ;;  %v633_v32 = vsub.f32 %v6589_v40, %v6693_v2  ;;  %v2575_v58 = vmul.f32 %v6787_v48, %v6787_v48  ;;  %v2576_v60 = vmul.f32 %v6817_v31, %v6817_v31  ;;  %vm1548_vm9 = vcmask 1040384  }
  0x73   : > { %6104 = vmatprep.mubr.msk.f32.mxu1 %vm724_vm4, %v7086_v4  ;;  %v7131_v39 = vmul.f32 %v6766_v63, %v663_v14  ;;  %v665_v18 = vmul.f32 %v6714_v47, %v632_v49  ;;  %v634_v40 = vsub.f32 %v6592_v41, %v6693_v2  ;;  %v7140_v61 = vmul.f32 %v6790_v19, %v664_v27 }
  0x74   : > { %v666_v17 = vmul.f32 %v6714_v47, %v633_v32  ;;  %v635_v11 = vsub.f32 %v6595_v42, %v6693_v2  ;;  %v2577_v41 = vmul.f32 %v6847_v8, %v6847_v8  ;;  %v2578_v63 = vmul.f32 %v6866_v55, %v6866_v55 }
  0x75   : > { %6157 = vmatmul.mubr.msk.f32.vlgmr.msra.gmra.mxu0 %vm724_vm4, %v2573_v52  ;;  %v7155_v19 = vmul.f32 %v6807_v22, %v665_v18  ;;  %v667_v42 = vmul.f32 %v6714_v47, %v634_v40  ;;  %v637_v14 = vsub.f32 %v6601_v44, %v6693_v2  ;;  %v2579_v22 = vmul.f32 %v6895_v7, %v6895_v7 }
  0x76   : > { %6105 = vmatmul.mubr.msk.f32.vlgmr.msra.gmra.mxu1 %vm724_vm4, %v7100_v37  ;;  %6159 = vmatprep.mubr.msk.f32.mxu0 %vm724_vm4, %v2574_v38  ;;  %v7163_v52 = vmul.f32 %v6839_v6, %v666_v17  ;;  %v668_v38 = vmul.f32 %v6714_v47, %v635_v11  ;;  %v638_v49 = vsub.f32 %v6604_v45, %v6693_v2 }
  0x77   : > { %6205 = vmatpush3.msra.mxu1 %v6442_v1  ;;  %6107 = vmatprep.mubr.msk.f32.mxu1 %vm724_vm4, %v7117_v16  ;;  %v7179_v6 = vmul.f32 %v6859_v24, %v667_v42  ;;  %v670_v32 = vmul.f32 %v6714_v47, %v637_v14  ;;  %v2581_v24 = vmul.f32 %v6933_v50, %v6933_v50 }
  0x78   : > { %6257 = vmatpush3.msra.mxu0 %v6442_v1  ;;  %v636_v1 = vsub.f32 %v6598_v43, %v6693_v2  ;;  %6206 = vmatprep.subr.mxu1 %v6437_v0  ;;  %v2580_v43 = vmul.f32 %v6921_v34, %v6921_v34  ;;  %v7187_v27 = vmul.f32 %v6882_v35, %v668_v38 }
  0x79   : > { %6160 = vmatmul.mubr.msk.f32.gmra.mxu0 %vm724_vm4, %v2575_v58  ;;  %6207 = vmatpush3.msra.mxu1 %v6437_v0  ;;  %v639_v58 = vsub.f32 %v6607_v46, %v6693_v2  ;;  %v2582_v45 = vmul.f32 %v6971_v10, %v6971_v10  ;;  %v671_v46 = vmul.f32 %v6714_v47, %v638_v49 }
  0x7a   : > { %6108 = vmatmul.mubr.msk.f32.gmra.mxu1 %vm724_vm4, %v7131_v39  ;;  %6162 = vmatprep.mubr.msk.f32.mxu0 %vm724_vm4, %v2576_v60  ;;  %v669_v44 = vmul.f32 %v6714_v47, %v636_v1  ;;  %v640_v60 = vsub.f32 %v10502_v21, %v6693_v2  ;;  %v7210_v18 = vmul.f32 %v6930_v3, %v670_v32  ;;  %v10529_v32 = vld [vmem:[#allocation39_spill] sm:$0xff] }
  0x7b   : > { %6110 = vmatprep.mubr.msk.f32.mxu1 %vm724_vm4, %v7140_v61  ;;  %6258 = vmatprep.subr.mxu0 %v6437_v0  ;;  %v672_v40 = vmul.f32 %v6714_v47, %v639_v58  ;;  %v641_v17 = vsub.f32 %v10508_v59, %v6693_v2  ;;  %v2583_v21 = vmul.f32 %v6981_v9, %v6981_v9 }
  0x7c   : > { %v7202_v35 = vmul.f32 %v6909_v23, %v669_v44  ;;  %6259 = vmatpush3.msra.mxu0 %v6437_v0  ;;  %v10524_v23 = vld [vmem:[#allocation23_spill] sm:$0xff]  ;;  %v7227_v59 = vmul.f32 %v6958_v25, %v671_v46  ;;  %v673_v0 = vmul.f32 %v6714_v47, %v640_v60  ;;  %v642_v3 = vsub.f32 %v10515_v28, %v6693_v2  ;;  %v10525_v28 = vld [vmem:[#allocation24_spill] sm:$0xff] }
  0x7d   : > { %6163 = vmatmul.mubr.msk.f32.gmra.mxu0 %vm724_vm4, %v2577_v41  ;;  %v643_v11 = vsub.f32 %v10524_v23, %v6693_v2  ;;  %v2584_v41 = vmul.f32 %v7010_v30, %v7010_v30  ;;  %v674_v42 = vmul.f32 %v6714_v47, %v641_v17  ;;  %v2585_v25 = vmul.f32 %v7037_v57, %v7037_v57  ;;  %v10533_v17 = vld [vmem:[#allocation44_spill] sm:$0xff] }
  0x7e   : > { %6111 = vmatmul.mubr.msk.f32.gmra.mxu1 %vm724_vm4, %v7155_v19  ;;  %6165 = vmatprep.mubr.msk.f32.mxu0 %vm724_vm4, %v2578_v63  ;;  %v7235_v63 = vmul.f32 %v6985_v12, %v672_v40  ;;  %v2586_v38 = vmul.f32 %v7057_v62, %v7057_v62  ;;  %v644_v14 = vsub.f32 %v10525_v28, %v6693_v2  ;;  %v10558_v62 = vld [vmem:[#allocation55_spill] sm:$0xff] }
  0x7f   : > { %6113 = vmatprep.mubr.msk.f32.mxu1 %vm724_vm4, %v7163_v52  ;;  %v676_v1 = vmul.f32 %v6714_v47, %v643_v11  ;;  %v7250_v12 = vmul.f32 %v7004_v13, %v673_v0  ;;  %v7258_v49 = vmul.f32 %v7034_v5, %v674_v42  ;;  %v2587_v13 = vmul.f32 %v7089_v36, %v7089_v36  ;;  %v10534_v11 = vld [vmem:[#allocation26_spill] sm:$0xff]  ;;  %v10537_v42 = vld [vmem:[#allocation45_spill] sm:$0xff] }
  0x80   : > { %v677_v46 = vmul.f32 %v6714_v47, %v644_v14  ;;  %v646_v40 = vsub.f32 %v6628_v53, %v6693_v2  ;;  %v2589_v23 = vmul.f32 %v10533_v17, %v10533_v17  ;;  %v10538_v53 = vld [vmem:[#allocation29_spill] sm:$0xff]  ;;  %v10540_v14 = vld [vmem:[#allocation31_spill] sm:$0xff] }
  0x81   : > { %6166 = vmatmul.mubr.msk.f32.gmra.mxu0 %vm724_vm4, %v2579_v22  ;;  %10526 = vst [vmem:[#allocation22_spill] sm:$0xff] %v7250_v12  ;;  %v675_v22 = vmul.f32 %v6714_v47, %v642_v3  ;;  %10528 = vst [vmem:[#allocation15_spill] sm:$0xff] %v7258_v49  ;;  %v7261_v58 = vmul.f32 %v10529_v32, %v676_v1  ;;  %v2590_v1 = vmul.f32 %v10537_v42, %v10537_v42  ;;  %v10543_v32 = vld [vmem:[#allocation48_spill] sm:$0xff]  ;;  %v10545_v42 = vld [vmem:[#allocation33_spill] sm:$0xff] }
  0x82   : > { %6114 = vmatmul.mubr.msk.f32.gmra.mxu1 %vm724_vm4, %v7179_v6  ;;  %6168 = vmatprep.mubr.msk.f32.mxu0 %vm724_vm4, %v2580_v43  ;;  %v10527_v43 = vld [vmem:[#allocation25_spill] sm:$0xff]  ;;  %v10548_v17 = vld [vmem:[#allocation35_spill] sm:$0xff] }
  0x83   : > { %6116 = vmatprep.mubr.msk.f32.mxu1 %vm724_vm4, %v7187_v27  ;;  %v645_v44 = vsub.f32 %v10527_v43, %v6693_v2  ;;  %10530 = vst [vmem:[#allocation18_spill] sm:$0xff] %v7261_v58  ;;  %v7273_v5 = vmul.f32 %v7061_v51, %v675_v22  ;;  %v10536_v51 = vld [vmem:[#allocation28_spill] sm:$0xff]  ;;  %v652_v22 = vsub.f32 %v10540_v14, %v6693_v2  ;;  %v10541_v43 = vld [vmem:[#allocation41_spill] sm:$0xff] }
  0x84   : > { %v649_v3 = vsub.f32 %v10536_v51, %v6693_v2 }
  0x85   : > { %6169 = vmatmul.mubr.msk.f32.gmra.mxu0 %vm724_vm4, %v2581_v24  ;;  %v10531_v24 = vld [vmem:[#allocation40_spill] sm:$0xff]  ;;  %10532 = vst [vmem:[#allocation38_spill] sm:$0xff] %v7273_v5  ;;  %v678_v60 = vmul.f32 %v6714_v47, %v645_v44  ;;  %v7298_v44 = vmul.f32 %v10541_v43, %v677_v46  ;;  %v10547_v46 = vld [vmem:[#allocation34_spill] sm:$0xff] }
  0x86   : > { %6117 = vmatmul.mubr.msk.f32.gmra.mxu1 %vm724_vm4, %v7202_v35  ;;  %6171 = vmatprep.mubr.msk.f32.mxu0 %vm724_vm4, %v2582_v45  ;;  %v2588_v45 = vmul.f32 %v10531_v24, %v10531_v24  ;;  %v655_v43 = vsub.f32 %v10547_v46, %v6693_v2  ;;  %v10549_v46 = vld [vmem:[#allocation37_spill] sm:$0xff] }
  0x87   : > { %6119 = vmatprep.mubr.msk.f32.mxu1 %vm724_vm4, %v7210_v18  ;;  %10542 = vst [vmem:[#allocation42_spill] sm:$0xff] %v7298_v44  ;;  %v658_v24 = vsub.f32 %v10549_v46, %v6693_v2 }
  0x88   : > { %v688_v46 = vmul.f32 %v6714_v47, %v655_v43  ;;  %v10559_v43 = vld [vmem:[#allocation58_spill] sm:$0xff] }
  0x89   : > { %6172 = vmatmul.mubr.msk.f32.gmra.mxu0 %vm724_vm4, %v2583_v21  ;;  %v647_v21 = vsub.f32 %v10534_v11, %v6693_v2  ;;  %v2591_v11 = vmul.f32 %v10543_v32, %v10543_v32  ;;  %v682_v32 = vmul.f32 %v6714_v47, %v649_v3 }
  0x8a   : > { %6120 = vmatmul.mubr.msk.f32.gmra.mxu1 %vm724_vm4, %v7227_v59  ;;  %6174 = vmatprep.mubr.msk.f32.mxu0 %vm724_vm4, %v2584_v41  ;;  %v10535_v41 = vld [vmem:[#allocation27_spill] sm:$0xff] }
  0x8b   : > { %6122 = vmatprep.mubr.msk.f32.mxu1 %vm724_vm4, %v7235_v63  ;;  %v648_v0 = vsub.f32 %v10535_v41, %v6693_v2  ;;  %v10544_v41 = vld [vmem:[#allocation32_spill] sm:$0xff] }
  0x8c   : > { %v653_v51 = vsub.f32 %v10544_v41, %v6693_v2  ;;  %v680_v41 = vmul.f32 %v6714_v47, %v647_v21 }
  0x8d   : > { %6175 = vmatmul.mubr.msk.f32.gmra.mxu0 %vm724_vm4, %v2585_v25  ;;  %v650_v25 = vsub.f32 %v10538_v53, %v6693_v2  ;;  %v654_v53 = vsub.f32 %v10545_v42, %v6693_v2  ;;  %v681_v42 = vmul.f32 %v6714_v47, %v648_v0  ;;  %v10551_v0 = vld [vmem:[#allocation52_spill] sm:$0xff] }
  0x8e   : > { %6123 = vmatmul.mubr.msk.f32.gmra.mxu1 %vm724_vm4, %v7250_v12  ;;  %6177 = vmatprep.mubr.msk.f32.mxu0 %vm724_vm4, %v2586_v38  ;;  %v10539_v38 = vld [vmem:[#allocation30_spill] sm:$0xff]  ;;  %v2593_v3 = vmul.f32 %v10551_v0, %v10551_v0 }
  0x8f   : > { %6125 = vmatprep.mubr.msk.f32.mxu1 %vm724_vm4, %v7258_v49  ;;  %v651_v28 = vsub.f32 %v10539_v38, %v6693_v2  ;;  %v10546_v38 = vld [vmem:[#allocation43_spill] sm:$0xff] }
  0x90   : > { %v7310_v14 = vmul.f32 %v10546_v38, %v678_v60  ;;  %v683_v60 = vmul.f32 %v6714_v47, %v650_v25  ;;  %v10552_v25 = vld [vmem:[#allocation46_spill] sm:$0xff] }
  0x91   : > { %6178 = vmatmul.mubr.msk.f32.gmra.mxu0 %vm724_vm4, %v2587_v13  ;;  %v679_v13 = vmul.f32 %v6714_v47, %v646_v40  ;;  %v684_v38 = vmul.f32 %v6714_v47, %v651_v28  ;;  %v685_v40 = vmul.f32 %v6714_v47, %v652_v22  ;;  %v10553_v22 = vld [vmem:[#allocation53_spill] sm:$0xff] }
  0x92   : > { %6126 = vmatmul.mubr.msk.f32.gmra.mxu1 %vm724_vm4, %v7273_v5  ;;  %6180 = vmatprep.mubr.msk.f32.mxu0 %vm724_vm4, %v2588_v45  ;;  %v656_v45 = vsub.f32 %v10548_v17, %v6693_v2  ;;  %v686_v5 = vmul.f32 %v6714_v47, %v653_v51  ;;  %v687_v17 = vmul.f32 %v6714_v47, %v654_v53  ;;  %v10555_v53 = vld [vmem:[#allocation49_spill] sm:$0xff] }
  0x93   : > { %6128 = vmatprep.mubr.msk.f32.mxu1 %vm724_vm4, %v7261_v58  ;;  %v10550_v58 = vld [vmem:[#allocation50_spill] sm:$0xff]  ;;  %v7338_v28 = vmul.f32 %v10552_v25, %v679_v13  ;;  %v7349_v36 = vmul.f32 %v10555_v53, %v681_v42  ;;  %v7359_v12 = vmul.f32 %v10558_v62, %v684_v38  ;;  %v7362_v57 = vmul.f32 %v10559_v43, %v685_v40  ;;  %v10564_v38 = vld [vmem:[#allocation57_spill] sm:$0xff]  ;;  %v10569_v43 = vld [vmem:[#allocation20_spill] sm:$0xff] }
  0x94   : > { %v2592_v21 = vmul.f32 %v10550_v58, %v10550_v58  ;;  %v10554_v58 = vld [vmem:[#allocation47_spill] sm:$0xff]  ;;  %v10557_v13 = vld [vmem:[#allocation54_spill] sm:$0xff] }
  0x95   : > { %6181 = vmatmul.mubr.msk.f32.gmra.mxu0 %vm724_vm4, %v2589_v23  ;;  %v2594_v23 = vmul.f32 %v10553_v22, %v10553_v22  ;;  %v7346_v51 = vmul.f32 %v10554_v58, %v680_v41  ;;  %v7356_v25 = vmul.f32 %v10557_v13, %v683_v60  ;;  %v691_v58 = vmul.f32 %v6714_v47, %v658_v24  ;;  %v10560_v41 = vld [vmem:[#allocation59_spill] sm:$0xff] }
  0x96   : > { %6129 = vmatmul.mubr.msk.f32.gmra.mxu1 %vm724_vm4, %v7298_v44  ;;  %6183 = vmatprep.mubr.msk.f32.mxu0 %vm724_vm4, %v2590_v1  ;;  %v10556_v44 = vld [vmem:[#allocation51_spill] sm:$0xff]  ;;  %v689_v1 = vmul.f32 %v6714_v47, %v656_v45  ;;  %v7367_v42 = vmul.f32 %v10560_v41, %v686_v5  ;;  %v7374_v45 = vmul.f32 %v7349_v36, %v10551_v0  ;;  %v10563_v5 = vld [vmem:[#allocation56_spill] sm:$0xff]  ;;  %v10565_v0 = vld [vmem:[#allocation13_spill] sm:$0xff] }
  0x97   : > { %6131 = vmatprep.mubr.msk.f32.mxu1 %vm724_vm4, %v7310_v14  ;;  %v7352_v49 = vmul.f32 %v10556_v44, %v682_v32  ;;  %v10561_v44 = vld [vmem:[#allocation61_spill] sm:$0xff]  ;;  %v10562_v24 = vld [vmem:[#allocation63_spill] sm:$0xff]  ;;  %v7388_v60 = vmul.f32 %v7356_v25, %v10563_v5  ;;  %v7392_v40 = vmul.f32 %v7359_v12, %v10564_v38  ;;  %v7408_v13 = vmul.f32 %v7070_v54, %v691_v58 }
  0x98   : > { %v7370_v32 = vmul.f32 %v10561_v44, %v687_v17  ;;  %v7397_v17 = vmul.f32 %v10565_v0, %v689_v1  ;;  %v10570_v44 = vld [vmem:[#allocation16_spill] sm:$0xff]  ;;  %v2595_v1 = vmul.f32 %v10563_v5, %v10563_v5  ;;  %v10571_v0 = vld [vmem:[#allocation14_spill] sm:$0xff]  ;;  %v2596_v54 = vmul.f32 %v10564_v38, %v10564_v38 }
  0x99   : > { %6184 = vmatmul.mubr.msk.f32.gmra.mxu0 %vm724_vm4, %v2591_v11  ;;  %v7378_v62 = vmul.f32 %v7352_v49, %v10553_v22  ;;  %v7384_v11 = vmul.f32 %v10562_v24, %v688_v46  ;;  %v10566_v22 = vld [vmem:[#allocation60_spill] sm:$0xff]  ;;  %v10568_v46 = vld [vmem:[#allocation62_spill] sm:$0xff]  ;;  %v7432_v58 = vmul.f32 %v7408_v13, %v7097_v33 }
  0x9a   : > { %6132 = vmatmul.mubr.msk.f32.gmra.mxu1 %vm724_vm4, %v7338_v28  ;;  %6186 = vmatprep.mubr.msk.f32.mxu0 %vm724_vm4, %v2592_v21  ;;  %v7401_v21 = vmul.f32 %v7362_v57, %v10566_v22  ;;  %v7405_v53 = vmul.f32 %v7367_v42, %v10568_v46  ;;  %v7412_v41 = vmul.f32 %v7370_v32, %v10569_v43  ;;  %v10572_v5 = vld [vmem:[#allocation36_spill] sm:$0xff] }
  0x9b   : > { %6134 = vmatprep.mubr.msk.f32.mxu1 %vm724_vm4, %v7346_v51  ;;  %v7416_v24 = vmul.f32 %v7384_v11, %v10570_v44  ;;  %v657_v38 = vsub.f32 %v10572_v5, %v6693_v2  ;;  %v2601_v2 = vmul.f32 %v10571_v0, %v10571_v0  ;;  %v10575_v5 = vld [vmem:[#allocation19_spill] sm:$0xff] }
  0x9c   : > { %10567 = vst [vmem:[#allocation23_spill] sm:$0xff] %v7401_v21  ;;  %v7423_v21 = vmul.f32 %v7397_v17, %v10571_v0  ;;  %v4478_v0 = vmul.f32 %v7086_v4, %v6705_v15  ;;  %v4480_v15 = vmul.f32 %v7117_v16, %v6759_v20  ;;  %v4482_v20 = vmul.f32 %v7140_v61, %v6817_v31 }
  0x9d   : > { %6187 = vmatmul.mubr.msk.f32.gmra.mxu0 %vm724_vm4, %v2593_v3  ;;  %v2597_v3 = vmul.f32 %v10566_v22, %v10566_v22  ;;  %v2600_v22 = vmul.f32 %v10570_v44, %v10570_v44  ;;  %v4484_v31 = vmul.f32 %v7163_v52, %v6866_v55  ;;  %v4486_v55 = vmul.f32 %v7187_v27, %v6921_v34 }
  0x9e   : > { %6135 = vmatmul.mubr.msk.f32.gmra.mxu1 %vm724_vm4, %v7349_v36  ;;  %6189 = vmatprep.mubr.msk.f32.mxu0 %vm724_vm4, %v2594_v23  ;;  %v2598_v23 = vmul.f32 %v10568_v46, %v10568_v46  ;;  %v690_v46 = vmul.f32 %v6714_v47, %v657_v38  ;;  %v2603_v47 = vmul.f32 %v7097_v33, %v7097_v33  ;;  %v10576_v38 = vld [vmem:[#allocation15_spill] sm:$0xff] }
  0x9f   : > { %6137 = vmatprep.mubr.msk.f32.mxu1 %vm724_vm4, %v7352_v49  ;;  %v3526_v33 = vmul.f32 %v7100_v37, %v7100_v37  ;;  %v4488_v34 = vmul.f32 %v7210_v18, %v6971_v10  ;;  %v4490_v10 = vmul.f32 %v7235_v63, %v7010_v30  ;;  %v4492_v30 = vmul.f32 %v10576_v38, %v10575_v5 }
  0xa0   : > { %v7470_v44 = vmul.f32 %v7049_v29, %v690_v46  ;;  %v3525_v29 = vmul.f32 %v7086_v4, %v7086_v4  ;;  %v3527_v4 = vmul.f32 %v7117_v16, %v7117_v16  ;;  %v3529_v16 = vmul.f32 %v7140_v61, %v7140_v61 }
  0xa1   : > { %6190 = vmatmul.mubr.msk.f32.gmra.mxu0 %vm724_vm4, %v2595_v1  ;;  %v2599_v1 = vmul.f32 %v10569_v43, %v10569_v43  ;;  %v2602_v43 = vmul.f32 %v7077_v56, %v7077_v56  ;;  %v3531_v61 = vmul.f32 %v7163_v52, %v7163_v52  ;;  %v3533_v52 = vmul.f32 %v7187_v27, %v7187_v27 }
  0xa2   : > { %6138 = vmatmul.mubr.msk.f32.gmra.mxu1 %vm724_vm4, %v7356_v25  ;;  %6192 = vmatprep.mubr.msk.f32.mxu0 %vm724_vm4, %v2596_v54  ;;  %v4479_v54 = vmul.f32 %v7100_v37, %v10523_v26  ;;  %v4481_v26 = vmul.f32 %v7131_v39, %v6787_v48  ;;  %v3528_v37 = vmul.f32 %v7131_v39, %v7131_v39 }
  0xa3   : > { %6140 = vmatprep.mubr.msk.f32.mxu1 %vm724_vm4, %v7359_v12  ;;  %v4483_v48 = vmul.f32 %v7155_v19, %v6847_v8  ;;  %v3530_v39 = vmul.f32 %v7155_v19, %v7155_v19  ;;  %v4485_v8 = vmul.f32 %v7179_v6, %v6895_v7  ;;  %v3532_v19 = vmul.f32 %v7179_v6, %v7179_v6 }
  0xa4   : > { %v4487_v7 = vmul.f32 %v7202_v35, %v6933_v50  ;;  %v3534_v6 = vmul.f32 %v7202_v35, %v7202_v35  ;;  %v3535_v27 = vmul.f32 %v7210_v18, %v7210_v18  ;;  %v4489_v50 = vmul.f32 %v7227_v59, %v6981_v9 }
  0xa5   : > { %6193 = vmatmul.mubr.msk.f32.gmra.mxu0 %vm724_vm4, %v2597_v3  ;;  %v3536_v35 = vmul.f32 %v7227_v59, %v7227_v59  ;;  %v3537_v18 = vmul.f32 %v7235_v63, %v7235_v63  ;;  %v10573_v3 = vld [vmem:[#allocation21_spill] sm:$0xff]  ;;  %v3539_v63 = vmul.f32 %v10576_v38, %v10576_v38 }
  0xa6   : > { %6141 = vmatmul.mubr.msk.f32.gmra.mxu1 %vm724_vm4, %v7362_v57  ;;  %6195 = vmatprep.mubr.msk.f32.mxu0 %vm724_vm4, %v2598_v23  ;;  %v10574_v23 = vld [vmem:[#allocation22_spill] sm:$0xff] }
  0xa7   : > { %6143 = vmatprep.mubr.msk.f32.mxu1 %vm724_vm4, %v7367_v42  ;;  %v4491_v9 = vmul.f32 %v10574_v23, %v10573_v3  ;;  %v3538_v59 = vmul.f32 %v10574_v23, %v10574_v23 }
  0xa9   : > { %6196 = vmatmul.mubr.msk.f32.gmra.mxu0 %vm724_vm4, %v2599_v1  ;;  %v10577_v1 = vld [vmem:[#allocation17_spill] sm:$0xff] }
  0xaa   : > { %6144 = vmatmul.mubr.msk.f32.gmra.mxu1 %vm724_vm4, %v7370_v32  ;;  %6198 = vmatprep.mubr.msk.f32.mxu0 %vm724_vm4, %v2600_v22  ;;  %v10578_v22 = vld [vmem:[#allocation38_spill] sm:$0xff] }
  0xab   : > { %6146 = vmatprep.mubr.msk.f32.mxu1 %vm724_vm4, %v7384_v11  ;;  %v4493_v46 = vmul.f32 %v10578_v22, %v10577_v1 }
  0xad   : > { %6199 = vmatmul.mubr.msk.f32.gmra.mxu0 %vm724_vm4, %v2601_v2  ;;  %v3540_v2 = vmul.f32 %v10578_v22, %v10578_v22 }
  0xae   : > { %6147 = vmatmul.mubr.msk.f32.gmra.mxu1 %vm724_vm4, %v7397_v17  ;;  %6201 = vmatprep.mubr.msk.f32.mxu0 %vm724_vm4, %v2602_v43  ;;  %v10579_v43 = vld [vmem:[#allocation40_spill] sm:$0xff] }
  0xaf   : > { %6149 = vmatprep.mubr.msk.f32.mxu1 %vm724_vm4, %v7470_v44 }
  0xb1   : > { %6202 = vmatmul.mubr.msk.f32.gmra.mxu0 %vm724_vm4, %v2603_v47  ;;  %v10580_v47 = vld [vmem:[#allocation18_spill] sm:$0xff] }
  0xb2   : > { %6150 = vmatmul.mubr.msk.f32.gmra.mxu1 %vm724_vm4, %v7408_v13  ;;  %6260 = vmatprep.mubr.msk.f32.mxu0 %vm724_vm4, %v4478_v0  ;;  %v4494_v0 = vmul.f32 %v10580_v47, %v10579_v43 }
  0xb3   : > { %6208 = vmatprep.mubr.msk.f32.mxu1 %vm724_vm4, %v3525_v29  ;;  %v3541_v29 = vmul.f32 %v10580_v47, %v10580_v47 }
  0xb5   : > { %6261 = vmatmul.mubr.msk.f32.vlgmr.msra.gmra.mxu0 %vm724_vm4, %v4479_v54  ;;  %v10581_v54 = vld [vmem:[#allocation44_spill] sm:$0xff] }
  0xb6   : > { %6209 = vmatmul.mubr.msk.f32.vlgmr.msra.gmra.mxu1 %vm724_vm4, %v3526_v33  ;;  %6263 = vmatprep.mubr.msk.f32.mxu0 %vm724_vm4, %v4480_v15  ;;  %v10582_v33 = vld [vmem:[#allocation42_spill] sm:$0xff] }
  0xb7   : > { %6211 = vmatprep.mubr.msk.f32.mxu1 %vm724_vm4, %v3527_v4  ;;  %v4495_v15 = vmul.f32 %v10582_v33, %v10581_v54  ;;  %v3542_v4 = vmul.f32 %v10582_v33, %v10582_v33 }
  0xb9   : > { %6264 = vmatmul.mubr.msk.f32.gmra.mxu0 %vm724_vm4, %v4481_v26  ;;  %v10583_v26 = vld [vmem:[#allocation45_spill] sm:$0xff] }
  0xba   : > { %6212 = vmatmul.mubr.msk.f32.gmra.mxu1 %vm724_vm4, %v3528_v37  ;;  %6266 = vmatprep.mubr.msk.f32.mxu0 %vm724_vm4, %v4482_v20  ;;  %v4496_v37 = vmul.f32 %v7310_v14, %v10583_v26  ;;  %v3543_v20 = vmul.f32 %v7310_v14, %v7310_v14  ;;  %v3545_v14 = vmul.f32 %v7346_v51, %v7346_v51 }
  0xbb   : > { %6214 = vmatprep.mubr.msk.f32.mxu1 %vm724_vm4, %v3529_v16  ;;  %v10584_v16 = vld [vmem:[#allocation48_spill] sm:$0xff] }
  0xbd   : > { %6267 = vmatmul.mubr.msk.f32.gmra.mxu0 %vm724_vm4, %v4483_v48  ;;  %v4497_v48 = vmul.f32 %v7338_v28, %v10584_v16 }
  0xbe   : > { %6215 = vmatmul.mubr.msk.f32.gmra.mxu1 %vm724_vm4, %v3530_v39  ;;  %6269 = vmatprep.mubr.msk.f32.mxu0 %vm724_vm4, %v4484_v31  ;;  %v3544_v39 = vmul.f32 %v7338_v28, %v7338_v28  ;;  %v10585_v31 = vld [vmem:[#allocation50_spill] sm:$0xff]  ;;  %v3547_v28 = vmul.f32 %v7352_v49, %v7352_v49  ;;  %v3550_v49 = vmul.f32 %v7362_v57, %v7362_v57 }
  0xbf   : > { %6217 = vmatprep.mubr.msk.f32.mxu1 %vm724_vm4, %v3531_v61  ;;  %v4498_v61 = vmul.f32 %v7346_v51, %v10585_v31  ;;  %v3548_v51 = vmul.f32 %v7356_v25, %v7356_v25  ;;  %v3551_v25 = vmul.f32 %v7367_v42, %v7367_v42  ;;  %v3553_v57 = vmul.f32 %v7384_v11, %v7384_v11 }
  0xc0   : > { %v3554_v42 = vmul.f32 %v7397_v17, %v7397_v17  ;;  %v3556_v11 = vmul.f32 %v7408_v13, %v7408_v13 }
  0xc1   : > { %6270 = vmatmul.mubr.msk.f32.gmra.mxu0 %vm724_vm4, %v4485_v8  ;;  %v3546_v8 = vmul.f32 %v7349_v36, %v7349_v36  ;;  %v3549_v36 = vmul.f32 %v7359_v12, %v7359_v12  ;;  %v3552_v12 = vmul.f32 %v7370_v32, %v7370_v32  ;;  %v3555_v32 = vmul.f32 %v7470_v44, %v7470_v44 }
  0xc2   : > { %6218 = vmatmul.mubr.msk.f32.gmra.mxu1 %vm724_vm4, %v3532_v19  ;;  %6272 = vmatprep.mubr.msk.f32.mxu0 %vm724_vm4, %v4486_v55 }
  0xc3   : > { %6220 = vmatprep.mubr.msk.f32.mxu1 %vm724_vm4, %v3533_v52 }
  0xc5   : > { %6273 = vmatmul.mubr.msk.f32.gmra.mxu0 %vm724_vm4, %v4487_v7 }
  0xc6   : > { %6221 = vmatmul.mubr.msk.f32.gmra.mxu1 %vm724_vm4, %v3534_v6  ;;  %6275 = vmatprep.mubr.msk.f32.mxu0 %vm724_vm4, %v4488_v34 }
  0xc7   : > { %6223 = vmatprep.mubr.msk.f32.mxu1 %vm724_vm4, %v3535_v27 }
  0xc9   : > { %6276 = vmatmul.mubr.msk.f32.gmra.mxu0 %vm724_vm4, %v4489_v50 }
  0xca   : > { %6224 = vmatmul.mubr.msk.f32.gmra.mxu1 %vm724_vm4, %v3536_v35  ;;  %6278 = vmatprep.mubr.msk.f32.mxu0 %vm724_vm4, %v4490_v10 }
  0xcb   : > { %6226 = vmatprep.mubr.msk.f32.mxu1 %vm724_vm4, %v3537_v18 }
  0xcd   : > { %6279 = vmatmul.mubr.msk.f32.gmra.mxu0 %vm724_vm4, %v4491_v9 }
  0xce   : > { %6227 = vmatmul.mubr.msk.f32.gmra.mxu1 %vm724_vm4, %v3538_v59  ;;  %6281 = vmatprep.mubr.msk.f32.mxu0 %vm724_vm4, %v4492_v30 }
  0xcf   : > { %6229 = vmatprep.mubr.msk.f32.mxu1 %vm724_vm4, %v3539_v63 }
  0xd1   : > { %6282 = vmatmul.mubr.msk.f32.gmra.mxu0 %vm724_vm4, %v4493_v46 }
  0xd2   : > { %6230 = vmatmul.mubr.msk.f32.gmra.mxu1 %vm724_vm4, %v3540_v2  ;;  %6284 = vmatprep.mubr.msk.f32.mxu0 %vm724_vm4, %v4494_v0 }
  0xd3   : > { %6232 = vmatprep.mubr.msk.f32.mxu1 %vm724_vm4, %v3541_v29 }
  0xd5   : > { %6285 = vmatmul.mubr.msk.f32.gmra.mxu0 %vm724_vm4, %v4495_v15 }
  0xd6   : > { %6233 = vmatmul.mubr.msk.f32.gmra.mxu1 %vm724_vm4, %v3542_v4  ;;  %6287 = vmatprep.mubr.msk.f32.mxu0 %vm724_vm4, %v4496_v37 }
  0xd7   : > { %6235 = vmatprep.mubr.msk.f32.mxu1 %vm724_vm4, %v3543_v20 }
  0xd9   : > { %6288 = vmatmul.mubr.msk.f32.gmra.mxu0 %vm724_vm4, %v4497_v48 }
  0xda   : > { %6236 = vmatmul.mubr.msk.f32.gmra.mxu1 %vm724_vm4, %v3544_v39  ;;  %6290 = vmatprep.mubr.msk.f32.mxu0 %vm724_vm4, %v4498_v61 }
  0xdb   : > { %6238 = vmatprep.mubr.msk.f32.mxu1 %vm724_vm4, %v3545_v14 }
  0xdd   : > { %6291 = vmatmul.mubr.msk.f32.gmra.mxu0 %vm724_vm4, %v7374_v45  ;;  %v10586_v45 = vld [vmem:[#allocation23_spill] sm:$0xff] }
  0xde   : > { %6239 = vmatmul.mubr.msk.f32.gmra.mxu1 %vm724_vm4, %v3546_v8  ;;  %6293 = vmatprep.mubr.msk.f32.mxu0 %vm724_vm4, %v7378_v62  ;;  %v4508_v62 = vmul.f32 %v7470_v44, %v7077_v56 }
  0xdf   : > { %6241 = vmatprep.mubr.msk.f32.mxu1 %vm724_vm4, %v3547_v28 }
  0xe1   : > { %6294 = vmatmul.mubr.msk.f32.gmra.mxu0 %vm724_vm4, %v7388_v60 }
  0xe2   : > { %6242 = vmatmul.mubr.msk.f32.gmra.mxu1 %vm724_vm4, %v3548_v51  ;;  %6296 = vmatprep.mubr.msk.f32.mxu0 %vm724_vm4, %v7392_v40 }
  0xe3   : > { %6244 = vmatprep.mubr.msk.f32.mxu1 %vm724_vm4, %v3549_v36 }
  0xe5   : > { %6297 = vmatmul.mubr.msk.f32.gmra.mxu0 %vm724_vm4, %v10586_v45 }
  0xe6   : > { %6245 = vmatmul.mubr.msk.f32.gmra.mxu1 %vm724_vm4, %v3550_v49  ;;  %6299 = vmatprep.mubr.msk.f32.mxu0 %vm724_vm4, %v7405_v53 }
  0xe7   : > { %6247 = vmatprep.mubr.msk.f32.mxu1 %vm724_vm4, %v3551_v25 }
  0xe9   : > { %6300 = vmatmul.mubr.msk.f32.gmra.mxu0 %vm724_vm4, %v7412_v41 }
  0xea   : > { %6248 = vmatmul.mubr.msk.f32.gmra.mxu1 %vm724_vm4, %v3552_v12  ;;  %6302 = vmatprep.mubr.msk.f32.mxu0 %vm724_vm4, %v7416_v24 }
  0xeb   : > { %6250 = vmatprep.mubr.msk.f32.mxu1 %vm724_vm4, %v3553_v57 }
  0xed   : > { %6303 = vmatmul.mubr.msk.f32.gmra.mxu0 %vm724_vm4, %v7423_v21 }
  0xee   : > { %6251 = vmatmul.mubr.msk.f32.gmra.mxu1 %vm724_vm4, %v3554_v42  ;;  %6305 = vmatprep.mubr.msk.f32.mxu0 %vm724_vm4, %v4508_v62 }
  0xef   : > { %6253 = vmatprep.mubr.msk.f32.mxu1 %vm724_vm4, %v3555_v32 }
  0xf1   : > { %6306 = vmatmul.mubr.msk.f32.gmra.mxu0 %vm724_vm4, %v7432_v58 }
  0xf2   : > { %6254 = vmatmul.mubr.msk.f32.gmra.mxu1 %vm724_vm4, %v3556_v11  ;;  %vm1376_vm4 = vcmask 1044480  }
 0x10d   : > { %v6054_v56 = vpop.f32.mrf.mxu0 }
 0x10e   : > { %v6078_v40 = vpop.f32.mrf.mxu1  ;;  %v1047_v17 = vmul.f32 0.0010283804, %v6054_v56 }
 0x10f   : > { %v887_v60 = vpop.f32.mrf.mxu0  ;;  %v7665_v13 = vmul.f32 0.10936069, %v6078_v40  ;;  %v7667_v7 = vmul.f32 0.21300554, %v6078_v40  ;;  %v7669_v6 = vmul.f32 0.26601174, %v6078_v40 }
 0x110   : > { %v967_v53 = vpop.f32.mrf.mxu1  ;;  %v1046_v41 = vmul.f32 0.0010283804, %v887_v60  ;;  %v7671_v58 = vmul.f32 0.036000773, %v6078_v40 }
 0x111   : > { %v7673_v34 = vmul.f32 0.10936069, %v967_v53  ;;  %v7675_v35 = vmul.f32 0.21300554, %v967_v53  ;;  %v7677_v10 = vmul.f32 0.26601174, %v967_v53 }
 0x112   : > { %v6057_v21 = vpop.f32.mrf.mxu0  ;;  %v7679_v23 = vmul.f32 0.036000773, %v967_v53 }
 0x113   : > { %v1059_v24 = vmul.f32 0.0075987563, %v6057_v21  ;;  %10587 = vst [vmem:[#allocation24_spill] sm:$0xff] %v7673_v34  ;;  %10588 = vst [vmem:[#allocation25_spill] sm:$0xff] %v7675_v35  ;;  %v1049_v18 = vmul.f32 0.0010283804, %v6057_v21 }
 0x114   : > { %v897_v44 = vpop.f32.mrf.mxu0  ;;  %v6081_v55 = vpop.f32.mrf.mxu1  ;;  %10589 = vst [vmem:[#allocation39_spill] sm:$0xff] %v7677_v10  ;;  %10590 = vst [vmem:[#allocation26_spill] sm:$0xff] %v7679_v23 }
 0x115   : > { %v1071_v19 = vadd.f32 %v1059_v24, %v1047_v17  ;;  %v1058_v52 = vmul.f32 0.0075987563, %v897_v44  ;;  %v7681_v9 = vmul.f32 0.21300554, %v6081_v55  ;;  %v1048_v59 = vmul.f32 0.0010283804, %v897_v44 }
 0x116   : > { %v977_v50 = vpop.f32.mrf.mxu1  ;;  %v7683_v38 = vmul.f32 0.26601174, %v6081_v55  ;;  %v7685_v22 = vmul.f32 0.10936069, %v6081_v55  ;;  %v7687_v46 = vmul.f32 0.036000773, %v6081_v55 }
 0x117   : > { %v1070_v27 = vadd.f32 %v1058_v52, %v1046_v41  ;;  %v6060_v3 = vpop.f32.mrf.mxu0  ;;  %v7689_v2 = vmul.f32 0.0075987563, %v6081_v55  ;;  %v7691_v43 = vmul.f32 0.21300554, %v977_v50  ;;  %v7693_v47 = vmul.f32 0.26601174, %v977_v50 }
 0x118   : > { %v6084_v5 = vpop.f32.mrf.mxu1  ;;  %v1061_v30 = vmul.f32 0.0075987563, %v6060_v3  ;;  %v1083_v63 = vmul.f32 0.036000773, %v6060_v3  ;;  %v7695_v54 = vmul.f32 0.10936069, %v977_v50 }
 0x119   : > { %v907_v1 = vpop.f32.mrf.mxu0  ;;  %10591 = vst [vmem:[#allocation27_spill] sm:$0xff] %v7691_v43  ;;  %10592 = vst [vmem:[#allocation28_spill] sm:$0xff] %v7693_v47  ;;  %v7697_v37 = vmul.f32 0.036000773, %v977_v50  ;;  %v7699_v20 = vmul.f32 0.0075987563, %v977_v50 }
 0x11a   : > { %v1073_v0 = vadd.f32 %v1061_v30, %v1049_v18  ;;  %v1095_v29 = vadd.f32 %v1083_v63, %v1071_v19  ;;  %10593 = vst [vmem:[#allocation29_spill] sm:$0xff] %v7695_v54  ;;  %v1060_v33 = vmul.f32 0.0075987563, %v907_v1  ;;  %v1082_v15 = vmul.f32 0.036000773, %v907_v1  ;;  %v987_v4 = vpop.f32.mrf.mxu1 }
 0x11b   : > { %10594 = vst [vmem:[#allocation30_spill] sm:$0xff] %v7697_v37  ;;  %10595 = vst [vmem:[#allocation31_spill] sm:$0xff] %v7699_v20  ;;  %v1051_v16 = vmul.f32 0.0010283804, %v6060_v3  ;;  %v7701_v48 = vmul.f32 0.26601174, %v6084_v5 }
 0x11c   : > { %v6063_v26 = vpop.f32.mrf.mxu0  ;;  %v7703_v39 = vmul.f32 0.21300554, %v6084_v5  ;;  %v1072_v31 = vadd.f32 %v1060_v33, %v1048_v59  ;;  %v1094_v61 = vadd.f32 %v1082_v15, %v1070_v27  ;;  %v7705_v8 = vmul.f32 0.10936069, %v6084_v5 }
 0x11d   : > { %v7707_v28 = vmul.f32 0.036000773, %v6084_v5  ;;  %v1063_v51 = vmul.f32 0.0075987563, %v6063_v26  ;;  %v7709_v36 = vmul.f32 0.0075987563, %v6084_v5  ;;  %v6087_v45 = vpop.f32.mrf.mxu1 }
 0x11e   : > { %v917_v14 = vpop.f32.mrf.mxu0  ;;  %v1085_v49 = vmul.f32 0.036000773, %v6063_v26  ;;  %v1107_v25 = vmul.f32 0.10936069, %v6063_v26  ;;  %v7711_v57 = vmul.f32 0.0010283804, %v6084_v5 }
 0x11f   : > { %v1050_v42 = vmul.f32 0.0010283804, %v907_v1  ;;  %v7713_v62 = vmul.f32 0.26601174, %v987_v4  ;;  %v1075_v32 = vadd.f32 %v1063_v51, %v1051_v16  ;;  %v7715_v11 = vmul.f32 0.21300554, %v987_v4  ;;  %v997_v55 = vpop.f32.mrf.mxu1 }
 0x120   : > { %v6066_v12 = vpop.f32.mrf.mxu0  ;;  %v7717_v56 = vmul.f32 0.10936069, %v987_v4  ;;  %v1097_v60 = vadd.f32 %v1085_v49, %v1073_v0  ;;  %v1119_v40 = vadd.f32 %v1107_v25, %v1095_v29  ;;  %v1062_v53 = vmul.f32 0.0075987563, %v917_v14 }
 0x121   : > { %10596 = vst [vmem:[#allocation41_spill] sm:$0xff] %v7713_v62  ;;  %10597 = vst [vmem:[#allocation32_spill] sm:$0xff] %v7715_v11  ;;  %v1084_v21 = vmul.f32 0.036000773, %v917_v14  ;;  %v1106_v41 = vmul.f32 0.10936069, %v917_v14 }
 0x122   : > { %10598 = vst [vmem:[#allocation33_spill] sm:$0xff] %v7717_v56  ;;  %v927_v17 = vpop.f32.mrf.mxu0  ;;  %v7719_v24 = vmul.f32 0.036000773, %v987_v4  ;;  %v7721_v44 = vmul.f32 0.0075987563, %v987_v4  ;;  %v1074_v27 = vadd.f32 %v1062_v53, %v1050_v42 }
 0x123   : > { %v1053_v19 = vmul.f32 0.0010283804, %v6063_v26  ;;  %v7723_v52 = vmul.f32 0.0010283804, %v987_v4  ;;  %v1096_v50 = vadd.f32 %v1084_v21, %v1072_v31  ;;  %v1118_v18 = vadd.f32 %v1106_v41, %v1094_v61  ;;  %v6090_v26 = vpop.f32.mrf.mxu1 }
 0x124   : > { %10599 = vst [vmem:[#allocation43_spill] sm:$0xff] %v7719_v24  ;;  %10600 = vst [vmem:[#allocation34_spill] sm:$0xff] %v7721_v44  ;;  %v7727_v59 = vmul.f32 0.21300554, %v6087_v45  ;;  %v7729_v5 = vmul.f32 0.10936069, %v6087_v45 }
 0x125   : > { %10601 = vst [vmem:[#allocation35_spill] sm:$0xff] %v7723_v52  ;;  %v7725_v3 = vpop.f32.mrf.mxu0  ;;  %v1065_v30 = vmul.f32 0.0075987563, %v6066_v12  ;;  %v1087_v63 = vmul.f32 0.036000773, %v6066_v12 }
 0x126   : > { %v1109_v1 = vmul.f32 0.10936069, %v6066_v12  ;;  %v1131_v0 = vmul.f32 0.21300554, %v6066_v12  ;;  %v7731_v29 = vmul.f32 0.036000773, %v6087_v45 }
 0x127   : > { %v7733_v33 = vmul.f32 0.0075987563, %v6087_v45  ;;  %v1052_v15 = vmul.f32 0.0010283804, %v917_v14  ;;  %v1077_v4 = vadd.f32 %v1065_v30, %v1053_v19  ;;  %v7735_v16 = vpop.f32.mrf.mxu0  ;;  %v7737_v31 = vmul.f32 0.0010283804, %v6087_v45  ;;  %v1007_v45 = vpop.f32.mrf.mxu1 }
 0x128   : > { %v1099_v61 = vadd.f32 %v1087_v63, %v1075_v32  ;;  %v1121_v51 = vadd.f32 %v1109_v1, %v1097_v60  ;;  %v1143_v49 = vadd.f32 %v1131_v0, %v1119_v40  ;;  %v7739_v25 = vmul.f32 0.21300554, %v997_v55 }
 0x129   : > { %v1064_v42 = vmul.f32 0.0075987563, %v927_v17  ;;  %v1086_v53 = vmul.f32 0.036000773, %v927_v17  ;;  %v1055_v21 = vmul.f32 0.0010283804, %v6066_v12 }
 0x12a   : > { %10602 = vst [vmem:[#allocation37_spill] sm:$0xff] %v7739_v25  ;;  %v1108_v41 = vmul.f32 0.10936069, %v927_v17  ;;  %v1130_v52 = vmul.f32 0.21300554, %v927_v17 }
 0x12b   : > { %v7741_v44 = vmul.f32 0.10936069, %v997_v55  ;;  %v7743_v20 = vmul.f32 0.036000773, %v997_v55  ;;  %v7745_v14 = vadd.f32 %v1064_v42, %v1052_v15  ;;  %v7747_v19 = vadd.f32 %v1086_v53, %v1074_v27  ;;  %v6072_v30 = vpop.f32.mrf.mxu0 }
 0x12c   : > { %v7749_v32 = vmul.f32 0.0075987563, %v997_v55  ;;  %v7751_v60 = vadd.f32 %v1108_v41, %v1096_v50  ;;  %v7753_v40 = vadd.f32 %v1130_v52, %v1118_v18  ;;  %v1067_v12 = vmul.f32 0.0075987563, %v7725_v3  ;;  %v6093_v52 = vpop.f32.mrf.mxu1 }
 0x12d   : > { %10603 = vst [vmem:[#allocation52_spill] sm:$0xff] %v7741_v44  ;;  %10604 = vst [vmem:[#allocation46_spill] sm:$0xff] %v7743_v20  ;;  %v1089_v63 = vmul.f32 0.036000773, %v7725_v3  ;;  %v1111_v1 = vmul.f32 0.10936069, %v7725_v3  ;;  %v7767_v41 = vpop.f32.mrf.mxu0 }
 0x12e   : > { %10605 = vst [vmem:[#allocation53_spill] sm:$0xff] %v7749_v32  ;;  %10606 = vst [vmem:[#allocation47_spill] sm:$0xff] %v7751_v60  ;;  %v1133_v0 = vmul.f32 0.21300554, %v7725_v3  ;;  %v7759_v15 = vmul.f32 0.0010283804, %v997_v55  ;;  %v1079_v53 = vadd.f32 %v1067_v12, %v1055_v21 }
 0x12f   : > { %10607 = vst [vmem:[#allocation49_spill] sm:$0xff] %v7753_v40  ;;  %v7761_v27 = vmul.f32 0.10936069, %v6090_v26  ;;  %v1155_v42 = vmul.f32 0.26601174, %v7725_v3  ;;  %v1101_v20 = vadd.f32 %v1089_v63, %v1077_v4 }
 0x130   : > { %10608 = vst [vmem:[#allocation51_spill] sm:$0xff] %v7759_v15  ;;  %v7764_v32 = vmul.f32 0.036000773, %v6090_v26  ;;  %v1054_v50 = vmul.f32 0.0010283804, %v927_v17  ;;  %v1123_v15 = vadd.f32 %v1111_v1, %v1099_v61  ;;  %v1145_v17 = vadd.f32 %v1133_v0, %v1121_v51 }
 0x131   : > { %v1066_v18 = vmul.f32 0.0075987563, %v7735_v16  ;;  %v7769_v24 = vmul.f32 0.0075987563, %v6090_v26  ;;  %v7771_v37 = vmul.f32 0.0010283804, %v6090_v26  ;;  %v1167_v25 = vadd.f32 %v1155_v42, %v1143_v49  ;;  %v6075_v11 = vpop.f32.mrf.mxu0 }
 0x132   : > { %v7773_v55 = vmul.f32 0.10936069, %v1007_v45  ;;  %v7775_v23 = vmul.f32 0.036000773, %v1007_v45  ;;  %v7777_v44 = vmul.f32 0.0075987563, %v1007_v45 }
 0x133   : > { %v7779_v21 = vmul.f32 0.0010283804, %v1007_v45  ;;  %v7781_v12 = vmul.f32 0.036000773, %v6093_v52  ;;  %v1091_v56 = vmul.f32 0.036000773, %v6072_v30 }
 0x134   : > { %10609 = vst [vmem:[#allocation54_spill] sm:$0xff] %v7773_v55  ;;  %10610 = vst [vmem:[#allocation55_spill] sm:$0xff] %v7775_v23  ;;  %v1113_v54 = vmul.f32 0.10936069, %v6072_v30  ;;  %v7783_v4 = vmul.f32 0.0075987563, %v6093_v52  ;;  %v1078_v55 = vadd.f32 %v1066_v18, %v1054_v50 }
 0x135   : > { %10611 = vst [vmem:[#allocation58_spill] sm:$0xff] %v7777_v44  ;;  %10612 = vst [vmem:[#allocation59_spill] sm:$0xff] %v7779_v21  ;;  %v7785_v63 = vmul.f32 0.0010283804, %v6093_v52  ;;  %v1157_v26 = vmul.f32 0.26601174, %v6072_v30  ;;  %v1103_v44 = vadd.f32 %v1091_v56, %v1079_v53  ;;  %v7798_v53 = vpop.f32.mrf.mxu0 }
 0x136   : > { %10613 = vst [vmem:[#allocation61_spill] sm:$0xff] %v7781_v12  ;;  %v1088_v61 = vmul.f32 0.036000773, %v7735_v16  ;;  %v1069_v1 = vmul.f32 0.0075987563, %v6072_v30  ;;  %v1125_v49 = vadd.f32 %v1113_v54, %v1101_v20 }
 0x137   : > { %v1135_v23 = vmul.f32 0.21300554, %v6072_v30  ;;  %v1110_v45 = vmul.f32 0.10936069, %v7735_v16  ;;  %v7790_v51 = vmul.f32 0.21300554, %v7735_v16  ;;  %v1169_v56 = vadd.f32 %v1157_v26, %v1145_v17 }
 0x138   : > { %v7793_v0 = vmul.f32 0.26601174, %v7735_v16  ;;  %v1068_v42 = vmul.f32 0.0075987563, %v7767_v41  ;;  %v1090_v52 = vmul.f32 0.036000773, %v7767_v41 }
 0x139   : > { %10614 = vst [vmem:[#allocation63_spill] sm:$0xff] %v7790_v51  ;;  %v1057_v50 = vmul.f32 0.0010283804, %v7725_v3  ;;  %v1147_v18 = vadd.f32 %v1135_v23, %v1123_v15  ;;  %v1093_v21 = vmul.f32 0.036000773, %v6075_v11  ;;  %v1183_v43 = vadd.f32 %v1167_v25, %v1135_v23 }
 0x13a   : > { %10615 = vst [vmem:[#allocation56_spill] sm:$0xff] %v7793_v0  ;;  %v1115_v62 = vmul.f32 0.10936069, %v6075_v11  ;;  %v1137_v30 = vmul.f32 0.21300554, %v6075_v11  ;;  %v1017_v0 = vpop.f32.mrf.mxu1 }
 0x13b   : > { %v1112_v47 = vmul.f32 0.10936069, %v7767_v41  ;;  %v1081_v10 = vadd.f32 %v1069_v1, %v1057_v50  ;;  %v1159_v40 = vmul.f32 0.26601174, %v6075_v11  ;;  %v1056_v12 = vmul.f32 0.0010283804, %v7735_v16 }
 0x13c   : > { %v1127_v54 = vadd.f32 %v1115_v62, %v1103_v44  ;;  %v1149_v20 = vadd.f32 %v1137_v30, %v1125_v49  ;;  %v1185_v35 = vadd.f32 %v1169_v56, %v1137_v30  ;;  %v1203_v15 = vadd.f32 %v1183_v43, %v1115_v62 }
 0x13d   : > { %v1105_v51 = vadd.f32 %v1093_v21, %v1081_v10  ;;  %v1171_v3 = vadd.f32 %v1159_v40, %v1147_v18  ;;  %v1092_v60 = vmul.f32 0.036000773, %v7798_v53  ;;  %v1080_v1 = vadd.f32 %v1068_v42, %v1056_v12  ;;  %v6096_v10 = vpop.f32.mrf.mxu1 }
 0x13e   : > { %v1151_v17 = vadd.f32 %v7667_v7, %v1127_v54  ;;  %v1173_v26 = vadd.f32 %v7669_v6, %v1149_v20  ;;  %v1205_v34 = vadd.f32 %v1185_v35, %v7665_v13  ;;  %v1227_v44 = vadd.f32 %v7671_v58, %v1203_v15 }
 0x13f   : > { %v1129_v23 = vadd.f32 %v7665_v13, %v1105_v51  ;;  %v1187_v11 = vadd.f32 %v1171_v3, %v7667_v7  ;;  %v1100_v16 = vadd.f32 %v1088_v61, %v7745_v14  ;;  %v1102_v40 = vadd.f32 %v1090_v52, %v1078_v55 }
 0x140   : > { %v1175_v43 = vadd.f32 %v7683_v38, %v1151_v17  ;;  %v1189_v62 = vadd.f32 %v1173_v26, %v7681_v9  ;;  %v1229_v25 = vadd.f32 %v7687_v46, %v1205_v34  ;;  %v1251_v13 = vadd.f32 %v7689_v2, %v1227_v44  ;;  %v1027_v46 = vpop.f32.mrf.mxu1 }
 0x141   : > { %v1153_v6 = vadd.f32 %v7681_v9, %v1129_v23  ;;  %v1207_v35 = vadd.f32 %v7685_v22, %v1187_v11  ;;  %v1104_v21 = vadd.f32 %v1092_v60, %v1080_v1  ;;  %v7816_v7 = vmul.f32 0.036000773, %v1017_v0 }
 0x142   : > { %v1191_v58 = vadd.f32 %v7703_v39, %v1175_v43  ;;  %v1209_v14 = vadd.f32 %v7705_v8, %v1189_v62  ;;  %v1253_v38 = vadd.f32 %v7709_v36, %v1229_v25  ;;  %v7823_v34 = vadd.f32 %v7711_v57, %v1251_v13  ;;  %v6099_v49 = vpop.f32.mrf.mxu1 }
 0x143   : > { %v1231_v12 = vadd.f32 %v7707_v28, %v1207_v35  ;;  %v1177_v9 = vadd.f32 %v7701_v48, %v1153_v6  ;;  %v1122_v22 = vadd.f32 %v1110_v45, %v7747_v19  ;;  %v1124_v8 = vadd.f32 %v1112_v47, %v1100_v16  ;;  %v10629_v6 = vld [vmem:[#allocation24_spill] sm:$0xff] }
 0x144   : > { %v1211_v2 = vadd.f32 %v7729_v5, %v1191_v58  ;;  %v1233_v60 = vadd.f32 %v7731_v29, %v1209_v14  ;;  %v7830_v39 = vadd.f32 %v7737_v31, %v1253_v38  ;;  %v7832_v55 = vmul.f32 0.0075987563, %v1017_v0  ;;  %v10630_v58 = vld [vmem:[#allocation47_spill] sm:$0xff] }
 0x145   : > { %v7834_v36 = vmul.f32 0.0010283804, %v1017_v0  ;;  %v1249_v28 = vmul.f32 0.0075987563, %v6096_v10  ;;  %v1255_v57 = vadd.f32 %v7733_v33, %v1231_v12  ;;  %v1271_v61 = vmul.f32 0.0010283804, %v6096_v10 }
 0x146   : > { %10616 = vst [vmem:[#allocation57_spill] sm:$0xff] %v7830_v39  ;;  %v1134_v48 = vmul.f32 0.21300554, %v7767_v41  ;;  %v1235_v19 = vadd.f32 %v7764_v32, %v1211_v2  ;;  %v1257_v5 = vadd.f32 %v7769_v24, %v1233_v60  ;;  %v1156_v29 = vmul.f32 0.26601174, %v7767_v41  ;;  %v10631_v14 = vld [vmem:[#allocation63_spill] sm:$0xff] }
 0x147   : > { %v7841_v45 = vmul.f32 0.0075987563, %v1027_v46  ;;  %v7843_v31 = vmul.f32 0.0010283804, %v1027_v46  ;;  %v7846_v47 = vadd.f32 %v7771_v37, %v1255_v57  ;;  %v7853_v0 = vmul.f32 0.10936069, %v7823_v34  ;;  %v1037_v57 = vpop.f32.mrf.mxu1 }
 0x148   : > { %v1259_v51 = vadd.f32 %v7783_v4, %v1235_v19  ;;  %v7850_v33 = vadd.f32 %v7785_v63, %v1257_v5  ;;  %v7856_v32 = vmul.f32 0.21300554, %v7823_v34  ;;  %v7859_v24 = vmul.f32 0.10936069, %v7830_v39  ;;  %v10633_v19 = vld [vmem:[#allocation25_spill] sm:$0xff]  ;;  %v10637_v12 = vld [vmem:[#allocation39_spill] sm:$0xff] }
 0x149   : > { %10617 = vst [vmem:[#allocation13_spill] sm:$0xff] %v7846_v47  ;;  %10619 = vst [vmem:[#allocation62_spill] sm:$0xff] %v7853_v0  ;;  %v7862_v41 = vmul.f32 0.21300554, %v7830_v39  ;;  %v7865_v37 = vmul.f32 0.26601174, %v7823_v34  ;;  %v1193_v4 = vadd.f32 %v7727_v59, %v1177_v9  ;;  %v1128_v35 = vadd.f32 %v10629_v6, %v1104_v21 }
 0x14a   : > { %10618 = vst [vmem:[#allocation60_spill] sm:$0xff] %v7850_v33  ;;  %10620 = vst [vmem:[#allocation20_spill] sm:$0xff] %v7859_v24  ;;  %v7868_v63 = vadd.f32 %v1271_v61, %v1259_v51  ;;  %v7871_v42 = vmul.f32 0.10936069, %v7846_v47  ;;  %v7874_v52 = vmul.f32 0.21300554, %v7846_v47  ;;  %v1144_v38 = vadd.f32 %v10631_v14, %v10630_v58 }
 0x14b   : > { %10621 = vst [vmem:[#allocation16_spill] sm:$0xff] %v7862_v41  ;;  %v7877_v50 = vmul.f32 0.26601174, %v7830_v39  ;;  %v7880_v18 = vmul.f32 0.10936069, %v7850_v33  ;;  %v1378_v59 = vrot.slane %v7853_v0, 3  ;;  %v1213_v62 = vadd.f32 %v7761_v27, %v1193_v4 }
 0x14c   : > { %10622 = vst [vmem:[#allocation14_spill] sm:$0xff] %v7868_v63  ;;  %10623 = vst [vmem:[#allocation36_spill] sm:$0xff] %v7871_v42  ;;  %v7883_v30 = vmul.f32 0.21300554, %v7850_v33  ;;  %v7886_v56 = vmul.f32 0.26601174, %v7846_v47  ;;  %v1146_v2 = vadd.f32 %v1134_v48, %v1122_v22  ;;  %v1168_v58 = vadd.f32 %v1156_v29, %v1144_v38 }
 0x14d   : > { %10624 = vst [vmem:[#allocation21_spill] sm:$0xff] %v7874_v52  ;;  %10625 = vst [vmem:[#allocation22_spill] sm:$0xff] %v7880_v18  ;;  %v1273_v54 = vmul.f32 0.0010283804, %v6099_v49  ;;  %v1114_v20 = vmul.f32 0.10936069, %v7798_v53 }
 0x14e   : > { %10626 = vst [vmem:[#allocation19_spill] sm:$0xff] %v7883_v30  ;;  %10627 = vst [vmem:[#allocation15_spill] sm:$0xff] %v7886_v56  ;;  %v1381_v3 = vrot.slane %v7859_v24, 3  ;;  %v7894_v26 = vmul.f32 0.26601174, %v7850_v33  ;;  %v1384_v1 = vrot.slane %v7871_v42, 3 }
 0x14f   : > { %v1126_v25 = vadd.f32 %v1114_v20, %v1102_v40  ;;  %v1136_v13 = vmul.f32 0.21300554, %v7798_v53  ;;  %v10632_v9 = vld [vmem:[#allocation61_spill] sm:$0xff]  ;;  %v1158_v60 = vmul.f32 0.26601174, %v7798_v53  ;;  %v10634_v27 = vld [vmem:[#allocation27_spill] sm:$0xff] }
 0x150   : > { %10628 = vst [vmem:[#allocation17_spill] sm:$0xff] %v7894_v26  ;;  %v1237_v46 = vadd.f32 %v10632_v9, %v1213_v62  ;;  %v1152_v40 = vadd.f32 %v10634_v27, %v1128_v35  ;;  %v10635_v51 = vld [vmem:[#allocation49_spill] sm:$0xff]  ;;  %v10636_v21 = vld [vmem:[#allocation56_spill] sm:$0xff] }
 0x151   : > { %v1148_v61 = vadd.f32 %v1136_v13, %v1124_v8  ;;  %v1150_v5 = vadd.f32 %v10633_v19, %v1126_v25  ;;  %v1166_v49 = vadd.f32 %v10636_v21, %v10635_v51  ;;  %v1170_v14 = vadd.f32 %v1158_v60, %v1146_v2  ;;  %v10638_v62 = vld [vmem:[#allocation28_spill] sm:$0xff]  ;;  %v10639_v53 = vld [vmem:[#allocation41_spill] sm:$0xff]  ;;  %v6106_v51 = vpop.f32.mrf.mxu1  ;;  %v10654_v60 = vld [vmem:[#allocation54_spill] sm:$0xff] }
 0x152   : > { %v1261_v43 = vadd.f32 %v1249_v28, %v1237_v46  ;;  %v1176_v23 = vadd.f32 %v10639_v53, %v1152_v40  ;;  %v7920_v8 = vmul.f32 0.0075987563, %v7823_v34  ;;  %v1184_v35 = vadd.f32 %v1168_v58, %v1136_v13  ;;  %v10641_v28 = vld [vmem:[#allocation32_spill] sm:$0xff]  ;;  %v10642_v46 = vld [vmem:[#allocation37_spill] sm:$0xff]  ;;  %v10651_v53 = vld [vmem:[#allocation30_spill] sm:$0xff] }
 0x153   : > { %v1172_v10 = vadd.f32 %v10637_v12, %v1148_v61  ;;  %v1174_v22 = vadd.f32 %v10638_v62, %v1150_v5  ;;  %v1182_v9 = vadd.f32 %v1166_v49, %v1134_v48  ;;  %v1186_v16 = vadd.f32 %v1170_v14, %v10633_v19  ;;  %v10648_v40 = vld [vmem:[#allocation33_spill] sm:$0xff]  ;;  %v10649_v62 = vld [vmem:[#allocation52_spill] sm:$0xff]  ;;  %v10655_v48 = vld [vmem:[#allocation55_spill] sm:$0xff] }
 0x154   : > { %10640 = vst [vmem:[#allocation38_spill] sm:$0xff] %v7920_v8  ;;  %v1285_v25 = vadd.f32 %v1273_v54, %v1261_v43  ;;  %v1192_v12 = vadd.f32 %v10642_v46, %v1176_v23  ;;  %v1204_v61 = vadd.f32 %v1184_v35, %v10629_v6  ;;  %v7933_v13 = vmul.f32 0.036000773, %v7823_v34 }
 0x155   : > { %v1188_v21 = vadd.f32 %v1172_v10, %v10634_v27  ;;  %v1190_v29 = vadd.f32 %v10641_v28, %v1174_v22  ;;  %v1202_v38 = vadd.f32 %v1182_v9, %v1114_v20  ;;  %v10644_v10 = vld [vmem:[#allocation29_spill] sm:$0xff]  ;;  %v7937_v20 = vmul.f32 0.036000773, %v7830_v39  ;;  %v1813_v27 = vpop.f32.mrf.mxu1  ;;  %v10650_v9 = vld [vmem:[#allocation26_spill] sm:$0xff]  ;;  %v10652_v28 = vld [vmem:[#allocation43_spill] sm:$0xff] }
 0x156   : > { %10643 = vst [vmem:[#allocation40_spill] sm:$0xff] %v7933_v13  ;;  %v1206_v19 = vadd.f32 %v10644_v10, %v1186_v16  ;;  %v7940_v23 = vmul.f32 0.0075987563, %v7830_v39  ;;  %v7943_v5 = vmul.f32 0.0010283804, %v7823_v34  ;;  %v1228_v35 = vadd.f32 %v10651_v53, %v1204_v61  ;;  %v10653_v34 = vld [vmem:[#allocation46_spill] sm:$0xff] }
 0x157   : > { %10645 = vst [vmem:[#allocation18_spill] sm:$0xff] %v7937_v20  ;;  %v1208_v49 = vadd.f32 %v10648_v40, %v1188_v21  ;;  %v1272_v58 = vmul.f32 0.0010283804, %v1037_v57  ;;  %v1973_v14 = vmul.f32 0.0010283804, %v6106_v51  ;;  %v1210_v22 = vadd.f32 %v10649_v62, %v1190_v29  ;;  %v10656_v57 = vld [vmem:[#allocation31_spill] sm:$0xff] }
 0x158   : > { %10646 = vst [vmem:[#allocation44_spill] sm:$0xff] %v7940_v23  ;;  %10647 = vst [vmem:[#allocation42_spill] sm:$0xff] %v7943_v5  ;;  %v1226_v16 = vadd.f32 %v10650_v9, %v1202_v38  ;;  %v1230_v46 = vadd.f32 %v10652_v28, %v1206_v19  ;;  %v7951_v10 = vmul.f32 0.10936069, %v1285_v25  ;;  %v7953_v43 = vmul.f32 0.21300554, %v1285_v25  ;;  %v6109_v9 = vpop.f32.mrf.mxu1 }
 0x159   : > { %v1232_v54 = vadd.f32 %v10653_v34, %v1208_v49  ;;  %v1212_v6 = vadd.f32 %v10654_v60, %v1192_v12  ;;  %v1234_v21 = vadd.f32 %v10655_v48, %v1210_v22  ;;  %v10657_v40 = vld [vmem:[#allocation34_spill] sm:$0xff]  ;;  %v10658_v62 = vld [vmem:[#allocation53_spill] sm:$0xff]  ;;  %v7961_v61 = vmul.f32 0.26601174, %v1285_v25  ;;  %v10661_v12 = vld [vmem:[#allocation35_spill] sm:$0xff] }
 0x15a   : > { %v1250_v51 = vadd.f32 %v10656_v57, %v1226_v16  ;;  %v1252_v29 = vadd.f32 %v10657_v40, %v1228_v35  ;;  %v1254_v38 = vadd.f32 %v10658_v62, %v1230_v46  ;;  %v7963_v19 = vmul.f32 0.036000773, %v1285_v25  ;;  %v10660_v53 = vld [vmem:[#allocation58_spill] sm:$0xff]  ;;  %v10662_v48 = vld [vmem:[#allocation51_spill] sm:$0xff]  ;;  %v1823_v8 = vpop.f32.mrf.mxu1 }
 0x15b   : > { %v1256_v28 = vadd.f32 %v10660_v53, %v1232_v54  ;;  %v1236_v2 = vadd.f32 %v7816_v7, %v1212_v6  ;;  %v1258_v49 = vadd.f32 %v7832_v55, %v1234_v21  ;;  %v10663_v16 = vld [vmem:[#allocation59_spill] sm:$0xff]  ;;  %v7977_v46 = vmul.f32 0.0075987563, %v1285_v25 }
 0x15c   : > { %10659 = vst [vmem:[#allocation45_spill] sm:$0xff] %v7963_v19  ;;  %v7969_v60 = vadd.f32 %v10661_v12, %v1250_v51  ;;  %v7972_v22 = vadd.f32 %v10662_v48, %v1252_v29  ;;  %v7975_v35 = vadd.f32 %v10663_v16, %v1254_v38  ;;  %v1985_v57 = vmul.f32 0.0075987563, %v6109_v9  ;;  %v6158_v51 = vpop.f32.mrf.mxu0 }
 0x15d   : > { %10664 = vst [vmem:[#allocation48_spill] sm:$0xff] %v7977_v46  ;;  %v7980_v34 = vadd.f32 %v7834_v36, %v1256_v28  ;;  %v1260_v54 = vadd.f32 %v7841_v45, %v1236_v2  ;;  %v7985_v6 = vmul.f32 0.0010283804, %v1285_v25  ;;  %v7988_v21 = vadd.f32 %v7843_v31, %v1258_v49 }
 0x15e   : > { %v1292_v29 = vmul.f32 0.0075987563, %v7969_v60  ;;  %v1293_v36 = vmul.f32 0.0075987563, %v7972_v22  ;;  %v1286_v45 = vmul.f32 0.0010283804, %v7969_v60  ;;  %v7998_v38 = vadd.f32 %v1985_v57, %v1973_v14 }
 0x15f   : > { %10665 = vst [vmem:[#allocation50_spill] sm:$0xff] %v7985_v6  ;;  %10666 = vst [vmem:[#allocation23_spill] sm:$0xff] %v7988_v21  ;;  %v7993_v62 = vadd.f32 %v1272_v58, %v1260_v54  ;;  %v1287_v2 = vmul.f32 0.0010283804, %v7972_v22  ;;  %v1294_v25 = vmul.f32 0.0075987563, %v7975_v35  ;;  %v2766_v54 = vpop.f32.mrf.mxu0 }
 0x160   : > { %v1288_v31 = vmul.f32 0.0010283804, %v7975_v35  ;;  %v1304_v53 = vrot.slane %v1292_v29, 1  ;;  %v1305_v28 = vrot.slane %v1293_v36, 1  ;;  %v1322_v49 = vmul.f32 0.036000773, %v7969_v60 }
 0x161   : > { %v1306_v48 = vrot.slane %v1294_v25, 1  ;;  %v1323_v58 = vmul.f32 0.036000773, %v7972_v22  ;;  %v1324_v16 = vmul.f32 0.036000773, %v7975_v35  ;;  %v10686_v13 = vrot.slane %v7951_v10, 3 }
 0x162   : > { %v1316_v57 = vadd.f32 %v1304_v53, %v1286_v45  ;;  %v1317_v55 = vadd.f32 %v1305_v28, %v1287_v2  ;;  %v8007_v29 = vmul.f32 0.0010283804, %v6158_v51  ;;  %v8009_v36 = vmul.f32 0.0010283804, %v1813_v27  ;;  %v6161_v27 = vpop.f32.mrf.mxu0 }
 0x163   : > { %v1318_v7 = vadd.f32 %v1306_v48, %v1288_v31  ;;  %v8011_v44 = vmul.f32 0.0010283804, %v2766_v54  ;;  %v1334_v25 = vrot.slane %v1322_v49, 2  ;;  %v1335_v12 = vrot.slane %v1323_v58, 2 }
 0x164   : > { %v1336_v4 = vrot.slane %v1324_v16, 2  ;;  %v8014_v11 = vmul.f32 0.10936069, %v7969_v60  ;;  %v8017_v40 = vmul.f32 0.10936069, %v7972_v22  ;;  %v10687_v47 = vrot.slane %v7953_v43, 4 }
 0x165   : > { %v8020_v45 = vmul.f32 0.10936069, %v7975_v35  ;;  %v8022_v51 = vmul.f32 0.0010283804, %v6109_v9  ;;  %v1346_v2 = vadd.f32 %v1334_v25, %v1316_v57  ;;  %v1347_v31 = vadd.f32 %v1335_v12, %v1317_v55 }
 0x166   : > { %10667 = vst [vmem:[#allocation24_spill] sm:$0xff] %v8014_v11  ;;  %10668 = vst [vmem:[#allocation47_spill] sm:$0xff] %v8017_v40  ;;  %v1348_v53 = vadd.f32 %v1336_v4, %v1318_v7  ;;  %v8024_v28 = vmul.f32 0.0010283804, %v6161_v27  ;;  %v1377_v49 = vrot.slane %v8014_v11, 3  ;;  %v1380_v48 = vrot.slane %v8017_v40, 3 }
 0x167   : > { %10669 = vst [vmem:[#allocation63_spill] sm:$0xff] %v8020_v45  ;;  %v1383_v58 = vrot.slane %v8020_v45, 3  ;;  %v1407_v16 = vmul.f32 0.21300554, %v7969_v60  ;;  %v8031_v54 = vmul.f32 0.0010283804, %v7980_v34 }
 0x168   : > { %v8034_v9 = vmul.f32 0.0075987563, %v7980_v34  ;;  %v8037_v57 = vmul.f32 0.21300554, %v7972_v22  ;;  %v8040_v4 = vmul.f32 0.0075987563, %v7988_v21  ;;  %v1379_v7 = vsel %vm1376_vm4, %v1377_v49, %v1378_v59 }
 0x169   : > { %v1382_v55 = vsel %vm1376_vm4, %v1380_v48, %v1381_v3  ;;  %v1385_v12 = vsel %vm1376_vm4, %v1383_v58, %v1384_v1  ;;  %v1401_v25 = vadd.f32 %v1379_v7, %v1346_v2  ;;  %v1432_v15 = vrot.slane %v1407_v16, 4 }
 0x16a   : > { %10670 = vst [vmem:[#allocation61_spill] sm:$0xff] %v8037_v57  ;;  %10671 = vst [vmem:[#allocation25_spill] sm:$0xff] %v8040_v4  ;;  %v1402_v14 = vadd.f32 %v1382_v55, %v1347_v31  ;;  %v8051_v17 = vadd.f32 %v1385_v12, %v1348_v53  ;;  %v8055_v39 = vmul.f32 0.036000773, %v7980_v34  ;;  %v1435_v59 = vrot.slane %v8037_v57, 4 }
 0x16b   : > { %v1462_v49 = vmul.f32 0.26601174, %v7969_v60  ;;  %v8060_v3 = vmul.f32 0.036000773, %v7988_v21  ;;  %v8063_v48 = vmul.f32 0.10936069, %v7980_v34 }
 0x16c   : > { %10672 = vst [vmem:[#allocation27_spill] sm:$0xff] %v8051_v17  ;;  %v10675_v1 = vrot.slane %v7856_v32, 4  ;;  %v1464_v31 = vmul.f32 0.26601174, %v7972_v22  ;;  %v10676_v53 = vrot.slane %v7862_v41, 4  ;;  %v1518_v12 = vrot.slane %v1407_v16, 6 }
 0x16d   : > { %10673 = vst [vmem:[#allocation49_spill] sm:$0xff] %v8060_v3  ;;  %10674 = vst [vmem:[#allocation56_spill] sm:$0xff] %v8063_v48  ;;  %v1487_v55 = vrot.slane %v1462_v49, 5  ;;  %v8073_v60 = vmul.f32 0.0010283804, %v7988_v21  ;;  %v1307_v5 = vrot.slane %v8034_v9, 1 }
 0x16e   : > { %v1434_v2 = vsel %vm1431_vm6, %v1432_v15, %v10675_v1  ;;  %v1437_v58 = vsel %vm1431_vm6, %v1435_v59, %v10676_v53  ;;  %v1490_v46 = vrot.slane %v1464_v31, 5  ;;  %v10679_v1 = vrot.slane %v7865_v37, 5 }
 0x16f   : > { %v1456_v7 = vadd.f32 %v1434_v2, %v1401_v25  ;;  %10677 = vst [vmem:[#allocation39_spill] sm:$0xff] %v8073_v60  ;;  %v8076_v6 = vadd.f32 %v1437_v58, %v1402_v14  ;;  %v10680_v16 = vrot.slane %v7856_v32, 6  ;;  %v10682_v49 = vrot.slane %v7877_v50, 5 }
 0x170   : > { %v1489_v25 = vsel %vm1486_vm7, %v1487_v55, %v10679_v1  ;;  %v8098_v37 = vmul.f32 0.21300554, %v7975_v35  ;;  %v1297_v53 = vmul.f32 0.0075987563, %v7993_v62  ;;  %v1327_v32 = vmul.f32 0.036000773, %v7993_v62  ;;  %v6112_v1 = vpop.f32.mrf.mxu1 }
 0x171   : > { %10678 = vst [vmem:[#allocation28_spill] sm:$0xff] %v8076_v6  ;;  %v8086_v59 = vsel %vm1517_vm8, %v1518_v12, %v10680_v16  ;;  %v8093_v2 = vsel %vm1486_vm7, %v1490_v46, %v10682_v49  ;;  %v8095_v31 = vadd.f32 %v1489_v25, %v1456_v7  ;;  %v1362_v58 = vmul.f32 0.10936069, %v7993_v62  ;;  %v2776_v25 = vpop.f32.mrf.mxu0 }
 0x172   : > { %10681 = vst [vmem:[#allocation41_spill] sm:$0xff] %v8086_v59  ;;  %10683 = vst [vmem:[#allocation32_spill] sm:$0xff] %v8093_v2  ;;  %v1417_v55 = vmul.f32 0.21300554, %v7993_v62  ;;  %v1472_v12 = vmul.f32 0.26601174, %v7993_v62 }
 0x173   : > { %10684 = vst [vmem:[#allocation37_spill] sm:$0xff] %v8095_v31  ;;  %10685 = vst [vmem:[#allocation29_spill] sm:$0xff] %v8098_v37  ;;  %v1291_v50 = vmul.f32 0.0010283804, %v7993_v62  ;;  %v1309_v46 = vrot.slane %v1297_v53, 1  ;;  %v1339_v16 = vrot.slane %v1327_v32, 2 }
 0x174   : > { %v2938_v7 = vmul.f32 0.0075987563, %v6161_v27  ;;  %v1392_v49 = vrot.slane %v1362_v58, 3  ;;  %v1447_v14 = vrot.slane %v1417_v55, 4  ;;  %v1502_v9 = vrot.slane %v1472_v12, 5 }
 0x175   : > { %v1533_v15 = vrot.slane %v1417_v55, 6  ;;  %v1321_v22 = vadd.f32 %v1309_v46, %v1291_v50  ;;  %v1564_v23 = vrot.slane %v1362_v58, 7  ;;  %v1984_v20 = vmul.f32 0.0075987563, %v1823_v8  ;;  %v1833_v58 = vpop.f32.mrf.mxu1 }
 0x176   : > { %v2950_v19 = vadd.f32 %v2938_v7, %v8007_v29  ;;  %v1394_v33 = vsel %vm1376_vm4, %v1392_v49, %v10686_v13  ;;  %v1449_v62 = vsel %vm1431_vm6, %v1447_v14, %v10687_v47  ;;  %v10688_v27 = vrot.slane %v7961_v61, 5  ;;  %v6164_v14 = vpop.f32.mrf.mxu0 }
 0x177   : > { %v10689_v32 = vrot.slane %v7953_v43, 6  ;;  %v8120_v29 = vmul.f32 0.21300554, %v7980_v34  ;;  %v1351_v12 = vadd.f32 %v1339_v16, %v1321_v22  ;;  %v10691_v50 = vrot.slane %v7951_v10, 7 }
 0x178   : > { %v1504_v53 = vsel %vm1486_vm7, %v1502_v9, %v10688_v27  ;;  %v1996_v47 = vadd.f32 %v1984_v20, %v8009_v36  ;;  %v1319_v61 = vadd.f32 %v1307_v5, %v8031_v54  ;;  %v8130_v9 = vmul.f32 0.26601174, %v7975_v35  ;;  %v2786_v54 = vpop.f32.mrf.mxu0 }
 0x179   : > { %v1535_v55 = vsel %vm1517_vm8, %v1533_v15, %v10689_v32  ;;  %10690 = vst [vmem:[#allocation33_spill] sm:$0xff] %v8120_v29  ;;  %v8125_v13 = vsel %vm1548_vm9, %v1564_v23, %v10691_v50  ;;  %v2937_v43 = vmul.f32 0.0075987563, %v2776_v25  ;;  %v1987_v15 = vmul.f32 0.0075987563, %v6112_v1  ;;  %v6115_v32 = vpop.f32.mrf.mxu1 }
 0x17a   : > { %10692 = vst [vmem:[#allocation52_spill] sm:$0xff] %v8125_v13  ;;  %10693 = vst [vmem:[#allocation26_spill] sm:$0xff] %v8130_v9  ;;  %v1406_v46 = vadd.f32 %v1394_v33, %v1351_v12  ;;  %v1974_v7 = vmul.f32 0.0010283804, %v1823_v8  ;;  %v2009_v49 = vmul.f32 0.036000773, %v6112_v1 }
 0x17b   : > { %v2940_v27 = vmul.f32 0.0075987563, %v6164_v14  ;;  %v2927_v22 = vmul.f32 0.0010283804, %v2776_v25  ;;  %v2949_v10 = vadd.f32 %v2937_v43, %v8011_v44  ;;  %v1999_v23 = vadd.f32 %v1987_v15, %v8022_v51 }
 0x17c   : > { %v2962_v16 = vmul.f32 0.036000773, %v6164_v14  ;;  %v1461_v20 = vadd.f32 %v1449_v62, %v1406_v46  ;;  %v2021_v36 = vadd.f32 %v2009_v49, %v7998_v38  ;;  %v1986_v35 = vmul.f32 0.0075987563, %v1833_v58  ;;  %v1843_v46 = vpop.f32.mrf.mxu1 }
 0x17d   : > { %v2952_v5 = vadd.f32 %v2940_v27, %v8024_v28  ;;  %v8137_v50 = vmul.f32 0.26601174, %v7980_v34  ;;  %v2008_v8 = vmul.f32 0.036000773, %v1833_v58  ;;  %v2939_v12 = vmul.f32 0.0075987563, %v2786_v54  ;;  %v6167_v34 = vpop.f32.mrf.mxu0 }
 0x17e   : > { %v2974_v33 = vadd.f32 %v2962_v16, %v2950_v19  ;;  %v1516_v25 = vadd.f32 %v1504_v53, %v1461_v20  ;;  %v1977_v13 = vmul.f32 0.0010283804, %v6112_v1  ;;  %v1998_v44 = vadd.f32 %v1986_v35, %v1974_v7  ;;  %v6118_v16 = vpop.f32.mrf.mxu1 }
 0x17f   : > { %10694 = vst [vmem:[#allocation30_spill] sm:$0xff] %v8137_v50  ;;  %v2961_v43 = vmul.f32 0.036000773, %v2786_v54  ;;  %v2020_v51 = vadd.f32 %v2008_v8, %v1996_v47  ;;  %v2951_v15 = vadd.f32 %v2939_v12, %v2927_v22  ;;  %v1989_v42 = vmul.f32 0.0075987563, %v6115_v32  ;;  %v2796_v19 = vpop.f32.mrf.mxu0 }
 0x180   : > { %v2011_v62 = vmul.f32 0.036000773, %v6115_v32  ;;  %v8140_v28 = vadd.f32 %v1535_v55, %v1516_v25  ;;  %v2033_v27 = vmul.f32 0.10936069, %v6115_v32  ;;  %v1976_v47 = vmul.f32 0.0010283804, %v1833_v58 }
 0x181   : > { %v2973_v49 = vadd.f32 %v2961_v43, %v2949_v10  ;;  %v2001_v53 = vadd.f32 %v1989_v42, %v1977_v13  ;;  %v1988_v20 = vmul.f32 0.0075987563, %v1843_v46  ;;  %v2010_v55 = vmul.f32 0.036000773, %v1843_v46  ;;  %v6170_v0 = vpop.f32.mrf.mxu0 }
 0x182   : > { %10695 = vst [vmem:[#allocation43_spill] sm:$0xff] %v8140_v28  ;;  %v2023_v1 = vadd.f32 %v2011_v62, %v1999_v23  ;;  %v2045_v22 = vadd.f32 %v2033_v27, %v2021_v36  ;;  %v2032_v12 = vmul.f32 0.10936069, %v1843_v46  ;;  %v2930_v25 = vmul.f32 0.0010283804, %v6164_v14 }
 0x183   : > { %v2942_v43 = vmul.f32 0.0075987563, %v6167_v34  ;;  %v2000_v38 = vadd.f32 %v1988_v20, %v1976_v47  ;;  %v2964_v42 = vmul.f32 0.036000773, %v6167_v34  ;;  %v2986_v13 = vmul.f32 0.10936069, %v6167_v34 }
 0x184   : > { %v2022_v23 = vadd.f32 %v2010_v55, %v1998_v44  ;;  %v2044_v62 = vadd.f32 %v2032_v12, %v2020_v51  ;;  %v2929_v27 = vmul.f32 0.0010283804, %v2786_v54  ;;  %v2941_v35 = vmul.f32 0.0075987563, %v2796_v19  ;;  %v1853_v44 = vpop.f32.mrf.mxu1 }
 0x185   : > { %v10696_v8 = vrot.slane %v8055_v39, 2  ;;  %v1979_v10 = vmul.f32 0.0010283804, %v6115_v32  ;;  %v2963_v14 = vmul.f32 0.036000773, %v2796_v19  ;;  %v2954_v20 = vadd.f32 %v2942_v43, %v2930_v25 }
 0x186   : > { %v2985_v28 = vmul.f32 0.10936069, %v2796_v19  ;;  %v2932_v47 = vmul.f32 0.0010283804, %v6167_v34  ;;  %v1978_v24 = vmul.f32 0.0010283804, %v1843_v46  ;;  %v2976_v51 = vadd.f32 %v2964_v42, %v2952_v5  ;;  %v2806_v46 = vpop.f32.mrf.mxu0  ;;  %v8154_v43 = vpop.f32.mrf.mxu1 }
 0x187   : > { %v8152_v7 = vadd.f32 %v10696_v8, %v1319_v61  ;;  %v1991_v11 = vmul.f32 0.0075987563, %v6118_v16  ;;  %v2998_v55 = vadd.f32 %v2986_v13, %v2974_v33  ;;  %v2931_v12 = vmul.f32 0.0010283804, %v2796_v19 }
 0x188   : > { %v2013_v58 = vmul.f32 0.036000773, %v6118_v16  ;;  %v2953_v36 = vadd.f32 %v2941_v35, %v2929_v27  ;;  %v1981_v54 = vmul.f32 0.0010283804, %v6118_v16  ;;  %v2035_v45 = vmul.f32 0.10936069, %v6118_v16 }
 0x189   : > { %10697 = vst [vmem:[#allocation46_spill] sm:$0xff] %v8152_v7  ;;  %v2057_v40 = vmul.f32 0.21300554, %v6118_v16  ;;  %v2975_v39 = vadd.f32 %v2963_v14, %v2951_v15  ;;  %v2997_v61 = vadd.f32 %v2985_v28, %v2973_v49  ;;  %v2944_v8 = vmul.f32 0.0075987563, %v6170_v0 }
 0x18a   : > { %v2966_v32 = vmul.f32 0.036000773, %v6170_v0  ;;  %v2003_v59 = vadd.f32 %v1991_v11, %v1979_v10  ;;  %v2988_v31 = vmul.f32 0.10936069, %v6170_v0  ;;  %v3010_v34 = vmul.f32 0.21300554, %v6170_v0 }
 0x18b   : > { %v1990_v25 = vmul.f32 0.0075987563, %v1853_v44  ;;  %v2025_v57 = vadd.f32 %v2013_v58, %v2001_v53  ;;  %v8156_v5 = vmul.f32 0.0010283804, %v6170_v0  ;;  %v2012_v33 = vmul.f32 0.036000773, %v1853_v44  ;;  %v8170_v58 = vpop.f32.mrf.mxu0 }
 0x18c   : > { %v2034_v19 = vmul.f32 0.10936069, %v1853_v44  ;;  %v2047_v35 = vadd.f32 %v2035_v45, %v2023_v1  ;;  %v2069_v42 = vadd.f32 %v2057_v40, %v2045_v22  ;;  %v2056_v13 = vmul.f32 0.21300554, %v1853_v44  ;;  %v8172_v45 = vpop.f32.mrf.mxu1 }
 0x18d   : > { %v2943_v16 = vmul.f32 0.0075987563, %v2806_v46  ;;  %v8158_v15 = vadd.f32 %v2944_v8, %v2932_v47  ;;  %v8160_v28 = vadd.f32 %v2966_v32, %v2954_v20  ;;  %v8162_v11 = vmul.f32 0.0010283804, %v1853_v44  ;;  %v8196_v32 = vpop.f32.mrf.mxu0 }
 0x18e   : > { %v2965_v49 = vmul.f32 0.036000773, %v2806_v46  ;;  %v8164_v10 = vadd.f32 %v2988_v31, %v2976_v51  ;;  %v8166_v27 = vadd.f32 %v3010_v34, %v2998_v55  ;;  %v8168_v53 = vadd.f32 %v1990_v25, %v1978_v24  ;;  %v6124_v34 = vpop.f32.mrf.mxu1 }
 0x18f   : > { %v2987_v0 = vmul.f32 0.10936069, %v2806_v46  ;;  %v8174_v40 = vadd.f32 %v2012_v33, %v2000_v38  ;;  %v8176_v1 = vadd.f32 %v2034_v19, %v2022_v23  ;;  %v8178_v22 = vmul.f32 0.0010283804, %v2806_v46 }
 0x190   : > { %v3009_v14 = vmul.f32 0.21300554, %v2806_v46  ;;  %v8180_v47 = vadd.f32 %v2056_v13, %v2044_v62  ;;  %v8182_v31 = vadd.f32 %v2943_v16, %v2931_v12  ;;  %v1993_v20 = vmul.f32 0.0075987563, %v8154_v43 }
 0x191   : > { %v2015_v24 = vmul.f32 0.036000773, %v8154_v43  ;;  %v8186_v44 = vadd.f32 %v2965_v49, %v2953_v36  ;;  %v2037_v51 = vmul.f32 0.10936069, %v8154_v43  ;;  %v2059_v38 = vmul.f32 0.21300554, %v8154_v43 }
 0x192   : > { %v2081_v23 = vmul.f32 0.26601174, %v8154_v43  ;;  %v8191_v55 = vadd.f32 %v2987_v0, %v2975_v39  ;;  %v2946_v8 = vmul.f32 0.0075987563, %v8170_v58  ;;  %v2968_v62 = vmul.f32 0.036000773, %v8170_v58 }
 0x193   : > { %v2990_v12 = vmul.f32 0.10936069, %v8170_v58  ;;  %v8198_v25 = vadd.f32 %v3009_v14, %v2997_v61  ;;  %v3012_v36 = vmul.f32 0.21300554, %v8170_v58  ;;  %v3034_v46 = vmul.f32 0.26601174, %v8170_v58 }
 0x194   : > { %10698 = vst [vmem:[#allocation54_spill] sm:$0xff] %v8191_v55  ;;  %v8203_v33 = vmul.f32 0.0075987563, %v8172_v45  ;;  %v8206_v39 = vmul.f32 0.036000773, %v8172_v45  ;;  %v2005_v16 = vadd.f32 %v1993_v20, %v1981_v54  ;;  %v2027_v14 = vadd.f32 %v2015_v24, %v2003_v59  ;;  %v6176_v54 = vpop.f32.mrf.mxu0  ;;  %v1873_v20 = vpop.f32.mrf.mxu1 }
 0x195   : > { %10699 = vst [vmem:[#allocation55_spill] sm:$0xff] %v8198_v25  ;;  %v8209_v19 = vmul.f32 0.10936069, %v8172_v45  ;;  %v8212_v13 = vmul.f32 0.21300554, %v8172_v45  ;;  %v2049_v50 = vadd.f32 %v2037_v51, %v2025_v57  ;;  %v2071_v63 = vadd.f32 %v2059_v38, %v2047_v35 }
 0x196   : > { %v8215_v61 = vmul.f32 0.26601174, %v8172_v45  ;;  %v8218_v49 = vmul.f32 0.0075987563, %v8196_v32  ;;  %v8221_v0 = vmul.f32 0.036000773, %v8196_v32  ;;  %v2093_v59 = vadd.f32 %v2081_v23, %v2069_v42  ;;  %v2826_v3 = vpop.f32.mrf.mxu0  ;;  %v6127_v4 = vpop.f32.mrf.mxu1 }
 0x197   : > { %v8224_v41 = vmul.f32 0.10936069, %v8196_v32  ;;  %v8227_v2 = vmul.f32 0.21300554, %v8196_v32  ;;  %v8230_v6 = vmul.f32 0.26601174, %v8196_v32  ;;  %v2958_v52 = vadd.f32 %v2946_v8, %v8156_v5 }
 0x198   : > { %v1995_v26 = vmul.f32 0.0075987563, %v6124_v34  ;;  %v2017_v9 = vmul.f32 0.036000773, %v6124_v34  ;;  %v2039_v56 = vmul.f32 0.10936069, %v6124_v34  ;;  %v2980_v57 = vadd.f32 %v2968_v62, %v8158_v15  ;;  %v6179_v55 = vpop.f32.mrf.mxu0 }
 0x199   : > { %10700 = vst [vmem:[#allocation31_spill] sm:$0xff] %v8227_v2  ;;  %10701 = vst [vmem:[#allocation34_spill] sm:$0xff] %v8230_v6  ;;  %v2061_v21 = vmul.f32 0.21300554, %v6124_v34  ;;  %v2083_v17 = vmul.f32 0.26601174, %v6124_v34 }
 0x19a   : > { %v2948_v29 = vmul.f32 0.0075987563, %v6176_v54  ;;  %v2970_v24 = vmul.f32 0.036000773, %v6176_v54  ;;  %v2992_v30 = vmul.f32 0.10936069, %v6176_v54  ;;  %v2029_v38 = vadd.f32 %v2017_v9, %v2005_v16 }
 0x19b   : > { %v3014_v37 = vmul.f32 0.21300554, %v6176_v54  ;;  %v3036_v7 = vmul.f32 0.26601174, %v6176_v54  ;;  %v1994_v48 = vmul.f32 0.0075987563, %v1873_v20  ;;  %v2051_v23 = vadd.f32 %v2039_v56, %v2027_v14 }
 0x19c   : > { %v2016_v18 = vmul.f32 0.036000773, %v1873_v20  ;;  %v2038_v51 = vmul.f32 0.10936069, %v1873_v20  ;;  %v8234_v60 = vmul.f32 0.21300554, %v1873_v20  ;;  %v2073_v25 = vadd.f32 %v2061_v21, %v2049_v50 }
 0x19d   : > { %v8236_v35 = vmul.f32 0.26601174, %v1873_v20  ;;  %v8238_v34 = vmul.f32 0.0075987563, %v2826_v3  ;;  %v8240_v42 = vmul.f32 0.036000773, %v2826_v3  ;;  %v2095_v2 = vadd.f32 %v2083_v17, %v2071_v63 }
 0x19e   : > { %v2936_v5 = vmul.f32 0.0010283804, %v8170_v58  ;;  %v8243_v8 = vmul.f32 0.10936069, %v2826_v3  ;;  %v8245_v54 = vmul.f32 0.21300554, %v2826_v3  ;;  %v2109_v16 = vadd.f32 %v2093_v59, %v2061_v21 }
 0x19f   : > { %10702 = vst [vmem:[#allocation53_spill] sm:$0xff] %v8236_v35  ;;  %10703 = vst [vmem:[#allocation58_spill] sm:$0xff] %v8238_v34  ;;  %v2041_v6 = vmul.f32 0.10936069, %v6127_v4  ;;  %v8247_v15 = vmul.f32 0.26601174, %v2826_v3  ;;  %v3024_v56 = vadd.f32 %v3012_v36, %v8164_v10  ;;  %v2982_v34 = vadd.f32 %v2970_v24, %v2958_v52 }
 0x1a0   : > { %10704 = vst [vmem:[#allocation35_spill] sm:$0xff] %v8240_v42  ;;  %10705 = vst [vmem:[#allocation51_spill] sm:$0xff] %v8243_v8  ;;  %v1983_v62 = vmul.f32 0.0010283804, %v8154_v43  ;;  %v2063_v20 = vmul.f32 0.21300554, %v6127_v4  ;;  %v3002_v42 = vadd.f32 %v2990_v12, %v8160_v28  ;;  %v2960_v14 = vadd.f32 %v2948_v29, %v2936_v5  ;;  %v1883_v29 = vpop.f32.mrf.mxu1 }
 0x1a1   : > { %10706 = vst [vmem:[#allocation59_spill] sm:$0xff] %v8245_v54  ;;  %v2019_v9 = vmul.f32 0.036000773, %v6127_v4  ;;  %v2085_v58 = vmul.f32 0.26601174, %v6127_v4  ;;  %v8252_v35 = vadd.f32 %v2041_v6, %v2029_v38  ;;  %v3004_v3 = vadd.f32 %v2992_v30, %v2980_v57 }
 0x1a2   : > { %v2972_v8 = vmul.f32 0.036000773, %v6179_v55  ;;  %v2007_v54 = vadd.f32 %v1995_v26, %v1983_v62  ;;  %v3046_v50 = vadd.f32 %v3034_v46, %v8166_v27  ;;  %v8255_v43 = vadd.f32 %v2063_v20, %v2051_v23 }
 0x1a3   : > { %v2994_v63 = vmul.f32 0.10936069, %v6179_v55  ;;  %v3026_v17 = vadd.f32 %v3014_v37, %v3002_v42  ;;  %v3038_v21 = vmul.f32 0.26601174, %v6179_v55  ;;  %v8257_v59 = vadd.f32 %v2095_v2, %v2063_v20  ;;  %v10711_v20 = vld [vmem:[#allocation54_spill] sm:$0xff] }
 0x1a4   : > { %v8259_v28 = vadd.f32 %v2109_v16, %v2041_v6  ;;  %v3016_v10 = vmul.f32 0.21300554, %v6179_v55  ;;  %v3048_v4 = vadd.f32 %v3036_v7, %v3024_v56  ;;  %v2031_v12 = vadd.f32 %v2019_v9, %v2007_v54  ;;  %v10712_v9 = vld [vmem:[#allocation31_spill] sm:$0xff] }
 0x1a5   : > { %v8261_v52 = vadd.f32 %v2085_v58, %v2073_v25  ;;  %v8263_v26 = vadd.f32 %v2972_v8, %v2960_v14  ;;  %v8265_v30 = vadd.f32 %v2994_v63, %v2982_v34  ;;  %v3062_v36 = vadd.f32 %v3046_v50, %v3014_v37 }
 0x1a6   : > { %v8267_v27 = vadd.f32 %v3016_v10, %v3004_v3  ;;  %v1982_v46 = vmul.f32 0.0010283804, %v8172_v45  ;;  %v2004_v2 = vadd.f32 %v8203_v33, %v8162_v11  ;;  %v8272_v6 = vadd.f32 %v3038_v21, %v3026_v17  ;;  %v10707_v8 = vld [vmem:[#allocation53_spill] sm:$0xff] }
 0x1a7   : > { %v2018_v55 = vmul.f32 0.036000773, %v1883_v29  ;;  %v2026_v7 = vadd.f32 %v8206_v39, %v8168_v53  ;;  %v2040_v25 = vmul.f32 0.10936069, %v1883_v29  ;;  %v8276_v24 = vadd.f32 %v3048_v4, %v3016_v10  ;;  %v10709_v54 = vld [vmem:[#allocation35_spill] sm:$0xff]  ;;  %v10715_v10 = vld [vmem:[#allocation34_spill] sm:$0xff] }
 0x1a8   : > { %v8278_v57 = vadd.f32 %v3062_v36, %v2994_v63  ;;  %v2006_v38 = vadd.f32 %v1994_v48, %v1982_v46  ;;  %v2062_v34 = vmul.f32 0.21300554, %v1883_v29  ;;  %v2028_v42 = vadd.f32 %v2016_v18, %v2004_v2 }
 0x1a9   : > { %v2935_v37 = vmul.f32 0.0010283804, %v8196_v32  ;;  %v2957_v45 = vadd.f32 %v8218_v49, %v8178_v22  ;;  %v2979_v11 = vadd.f32 %v8221_v0, %v8182_v31  ;;  %v2048_v33 = vadd.f32 %v8209_v19, %v8174_v40  ;;  %v2836_v22 = vpop.f32.mrf.mxu0  ;;  %v6130_v49 = vpop.f32.mrf.mxu1 }
 0x1aa   : > { %v2050_v53 = vadd.f32 %v2038_v51, %v2026_v7  ;;  %v2070_v39 = vadd.f32 %v8212_v13, %v8176_v1  ;;  %v3001_v48 = vadd.f32 %v8224_v41, %v8186_v44  ;;  %v2030_v23 = vadd.f32 %v2018_v55, %v2006_v38  ;;  %v10708_v1 = vld [vmem:[#allocation58_spill] sm:$0xff]  ;;  %v10710_v44 = vld [vmem:[#allocation51_spill] sm:$0xff] }
 0x1ab   : > { %v2052_v18 = vadd.f32 %v2040_v25, %v2028_v42  ;;  %v2084_v5 = vmul.f32 0.26601174, %v1883_v29  ;;  %v2092_v32 = vadd.f32 %v8215_v61, %v8180_v47  ;;  %v2072_v31 = vadd.f32 %v8234_v60, %v2048_v33  ;;  %v10713_v47 = vld [vmem:[#allocation59_spill] sm:$0xff]  ;;  %v6182_v36 = vpop.f32.mrf.mxu0 }
 0x1ac   : > { %v2074_v0 = vadd.f32 %v2062_v34, %v2050_v53  ;;  %v2094_v40 = vadd.f32 %v10707_v8, %v2070_v39  ;;  %v2971_v19 = vmul.f32 0.036000773, %v2836_v22  ;;  %v2959_v13 = vadd.f32 %v10708_v1, %v2935_v37 }
 0x1ad   : > { %v2108_v51 = vadd.f32 %v2092_v32, %v8234_v60  ;;  %v2981_v41 = vadd.f32 %v10709_v54, %v2957_v45  ;;  %v3003_v62 = vadd.f32 %v10710_v44, %v2979_v11  ;;  %v3023_v16 = vadd.f32 %v10712_v9, %v10711_v20  ;;  %v10714_v60 = vld [vmem:[#allocation55_spill] sm:$0xff]  ;;  %v1893_v11 = vpop.f32.mrf.mxu1  ;;  %v2846_v8 = vpop.f32.mrf.mxu0 }
 0x1ae   : > { %v3025_v61 = vadd.f32 %v10713_v47, %v3001_v48  ;;  %v3037_v56 = vmul.f32 0.26601174, %v2836_v22  ;;  %v2043_v58 = vmul.f32 0.10936069, %v6130_v49  ;;  %v2096_v14 = vadd.f32 %v2084_v5, %v2072_v31 }
 0x1af   : > { %v2993_v3 = vmul.f32 0.10936069, %v2836_v22  ;;  %v3015_v50 = vmul.f32 0.21300554, %v2836_v22  ;;  %v2065_v63 = vmul.f32 0.21300554, %v6130_v49  ;;  %v2110_v17 = vadd.f32 %v2094_v40, %v2062_v34 }
 0x1b0   : > { %v2128_v21 = vadd.f32 %v2108_v51, %v2040_v25  ;;  %v3045_v4 = vadd.f32 %v10715_v10, %v10714_v60  ;;  %v2087_v29 = vmul.f32 0.26601174, %v6130_v49  ;;  %v2983_v46 = vadd.f32 %v2971_v19, %v2959_v13  ;;  %v6133_v51 = vpop.f32.mrf.mxu1 }
 0x1b1   : > { %v3005_v2 = vadd.f32 %v2993_v3, %v2981_v41  ;;  %v3027_v55 = vadd.f32 %v3015_v50, %v3003_v62  ;;  %v2141_v7 = vmul.f32 0.036000773, %v6130_v49  ;;  %v3047_v38 = vadd.f32 %v8247_v15, %v3023_v16 }
 0x1b2   : > { %v3049_v42 = vadd.f32 %v3037_v56, %v3025_v61  ;;  %v3061_v37 = vadd.f32 %v3045_v4, %v10713_v47  ;;  %v2055_v45 = vadd.f32 %v2043_v58, %v2031_v12  ;;  %v2077_v33 = vadd.f32 %v2065_v63, %v8252_v35 }
 0x1b3   : > { %v2996_v34 = vmul.f32 0.10936069, %v6182_v36  ;;  %v3018_v25 = vmul.f32 0.21300554, %v6182_v36  ;;  %v3040_v53 = vmul.f32 0.26601174, %v6182_v36  ;;  %v3063_v39 = vadd.f32 %v3047_v38, %v3015_v50 }
 0x1b4   : > { %v2099_v48 = vadd.f32 %v2087_v29, %v8255_v43  ;;  %v2113_v5 = vadd.f32 %v8261_v52, %v2065_v63  ;;  %v3094_v32 = vmul.f32 0.036000773, %v6182_v36  ;;  %v2131_v22 = vadd.f32 %v8257_v59, %v2043_v58  ;;  %v1903_v63 = vpop.f32.mrf.mxu1 }
 0x1b5   : > { %v2153_v15 = vadd.f32 %v2141_v7, %v8259_v28  ;;  %v2042_v49 = vmul.f32 0.10936069, %v1893_v11  ;;  %v2064_v31 = vmul.f32 0.21300554, %v1893_v11  ;;  %v3081_v12 = vadd.f32 %v3061_v37, %v2993_v3 }
 0x1b6   : > { %v3008_v40 = vadd.f32 %v2996_v34, %v8263_v26  ;;  %v2086_v35 = vmul.f32 0.26601174, %v1893_v11  ;;  %v2140_v19 = vmul.f32 0.036000773, %v1893_v11  ;;  %v3030_v1 = vadd.f32 %v3018_v25, %v8265_v30 }
 0x1b7   : > { %v3052_v43 = vadd.f32 %v3040_v53, %v8267_v27  ;;  %v3066_v52 = vadd.f32 %v8272_v6, %v3018_v25  ;;  %v3084_v13 = vadd.f32 %v8276_v24, %v2996_v34  ;;  %v3106_v59 = vadd.f32 %v3094_v32, %v8278_v57  ;;  %v6185_v6 = vpop.f32.mrf.mxu0 }
 0x1b8   : > { %v2995_v28 = vmul.f32 0.10936069, %v2846_v8  ;;  %v3017_v54 = vmul.f32 0.21300554, %v2846_v8  ;;  %v3039_v41 = vmul.f32 0.26601174, %v2846_v8  ;;  %v2054_v44 = vadd.f32 %v2042_v49, %v2030_v23 }
 0x1b9   : > { %v2076_v62 = vadd.f32 %v2064_v31, %v2052_v18  ;;  %v3093_v20 = vmul.f32 0.036000773, %v2846_v8  ;;  %v2067_v26 = vmul.f32 0.21300554, %v6133_v51  ;;  %v2098_v9 = vadd.f32 %v2086_v35, %v2074_v0 }
 0x1ba   : > { %v2112_v16 = vadd.f32 %v2096_v14, %v2064_v31  ;;  %v2130_v47 = vadd.f32 %v2110_v17, %v2042_v49  ;;  %v2152_v61 = vadd.f32 %v2140_v19, %v2128_v21  ;;  %v3007_v30 = vadd.f32 %v2995_v28, %v2983_v46  ;;  %v6136_v49 = vpop.f32.mrf.mxu1 }
 0x1bb   : > { %v3029_v56 = vadd.f32 %v3017_v54, %v3005_v2  ;;  %v2089_v27 = vmul.f32 0.26601174, %v6133_v51  ;;  %v2121_v58 = vmul.f32 0.10936069, %v6133_v51  ;;  %v3051_v3 = vadd.f32 %v3039_v41, %v3027_v55  ;;  %v2856_v2 = vpop.f32.mrf.mxu0 }
 0x1bc   : > { %v3065_v24 = vadd.f32 %v3049_v42, %v3017_v54  ;;  %v8317_v50 = vadd.f32 %v3063_v39, %v2995_v28  ;;  %v2143_v57 = vmul.f32 0.036000773, %v6133_v51  ;;  %v3105_v60 = vadd.f32 %v3093_v20, %v3081_v12 }
 0x1bd   : > { %v8319_v23 = vadd.f32 %v2067_v26, %v2055_v45  ;;  %v2165_v18 = vmul.f32 0.0075987563, %v6133_v51  ;;  %v3042_v10 = vmul.f32 0.26601174, %v6185_v6  ;;  %v8321_v0 = vadd.f32 %v2099_v48, %v2067_v26 }
 0x1be   : > { %v3020_v14 = vmul.f32 0.21300554, %v6185_v6  ;;  %v3074_v17 = vmul.f32 0.10936069, %v6185_v6  ;;  %v3096_v21 = vmul.f32 0.036000773, %v6185_v6  ;;  %v8323_v4 = vadd.f32 %v2089_v27, %v2077_v33 }
 0x1bf   : > { %v8325_v29 = vadd.f32 %v2121_v58, %v2113_v5  ;;  %v3118_v36 = vmul.f32 0.0075987563, %v6185_v6  ;;  %v2066_v46 = vmul.f32 0.21300554, %v1903_v63  ;;  %v8327_v55 = vadd.f32 %v2143_v57, %v2131_v22 }
 0x1c0   : > { %v2088_v7 = vmul.f32 0.26601174, %v1903_v63  ;;  %v2120_v38 = vmul.f32 0.10936069, %v1903_v63  ;;  %v2142_v42 = vmul.f32 0.036000773, %v1903_v63  ;;  %v2177_v37 = vadd.f32 %v2165_v18, %v2153_v15 }
 0x1c1   : > { %v8329_v45 = vadd.f32 %v3020_v14, %v3008_v40  ;;  %v8331_v11 = vadd.f32 %v3042_v10, %v3030_v1  ;;  %v2164_v34 = vmul.f32 0.0075987563, %v1903_v63  ;;  %v8333_v25 = vadd.f32 %v3052_v43, %v3020_v14  ;;  %v6188_v1 = vpop.f32.mrf.mxu0 }
 0x1c2   : > { %v8335_v33 = vadd.f32 %v3074_v17, %v3066_v52  ;;  %v8337_v53 = vadd.f32 %v3096_v21, %v3084_v13  ;;  %v3019_v39 = vmul.f32 0.21300554, %v2856_v2  ;;  %v3130_v48 = vadd.f32 %v3118_v36, %v3106_v59 }
 0x1c3   : > { %v8339_v5 = vadd.f32 %v2066_v46, %v2054_v44  ;;  %v3041_v32 = vmul.f32 0.26601174, %v2856_v2  ;;  %v3117_v22 = vmul.f32 0.0075987563, %v2856_v2  ;;  %v8341_v31 = vadd.f32 %v2088_v7, %v2076_v62 }
 0x1c4   : > { %v8343_v15 = vadd.f32 %v2098_v9, %v2066_v46  ;;  %v8345_v8 = vadd.f32 %v2120_v38, %v2112_v16  ;;  %v8347_v12 = vadd.f32 %v2142_v42, %v2130_v47  ;;  %v2176_v40 = vadd.f32 %v2164_v34, %v2152_v61  ;;  %v1913_v16 = vpop.f32.mrf.mxu1 }
 0x1c5   : > { %v3073_v35 = vmul.f32 0.10936069, %v2856_v2  ;;  %v3095_v19 = vmul.f32 0.036000773, %v2856_v2  ;;  %v8349_v51 = vadd.f32 %v3117_v22, %v3105_v60  ;;  %v8351_v43 = vadd.f32 %v3019_v39, %v3007_v30 }
 0x1c6   : > { %v8353_v52 = vadd.f32 %v3051_v3, %v3019_v39  ;;  %v2091_v13 = vmul.f32 0.26601174, %v6136_v49  ;;  %v2189_v59 = vmul.f32 0.0010283804, %v6136_v49  ;;  %v8355_v28 = vadd.f32 %v3041_v32, %v3029_v56 }
 0x1c7   : > { %10716 = vst [vmem:[#allocation53_spill] sm:$0xff] %v8351_v43  ;;  %v8357_v54 = vmul.f32 0.21300554, %v6136_v49  ;;  %v8359_v41 = vmul.f32 0.10936069, %v6136_v49  ;;  %v8367_v47 = vadd.f32 %v3073_v35, %v3065_v24  ;;  %v8382_v57 = vadd.f32 %v3095_v19, %v8317_v50 }
 0x1c8   : > { %10717 = vst [vmem:[#allocation58_spill] sm:$0xff] %v8353_v52  ;;  %10718 = vst [vmem:[#allocation35_spill] sm:$0xff] %v8355_v28  ;;  %v8361_v44 = vmul.f32 0.036000773, %v6136_v49  ;;  %v2167_v62 = vmul.f32 0.0075987563, %v6136_v49  ;;  %v8363_v20 = vadd.f32 %v2189_v59, %v2177_v37  ;;  %v8394_v17 = vadd.f32 %v2091_v13, %v8319_v23 }
 0x1c9   : > { %v8365_v26 = vmul.f32 0.26601174, %v6188_v1  ;;  %v3142_v9 = vmul.f32 0.0010283804, %v6188_v1  ;;  %v8369_v61 = vmul.f32 0.21300554, %v6188_v1 }
 0x1ca   : > { %10719 = vst [vmem:[#allocation51_spill] sm:$0xff] %v8363_v20  ;;  %v8371_v30 = vmul.f32 0.10936069, %v6188_v1  ;;  %v8373_v56 = vmul.f32 0.036000773, %v6188_v1 }
 0x1cb   : > { %v8376_v27 = vmul.f32 0.10936069, %v8363_v20  ;;  %v8379_v58 = vmul.f32 0.21300554, %v8363_v20  ;;  %v3120_v6 = vmul.f32 0.0075987563, %v6188_v1  ;;  %v3154_v3 = vadd.f32 %v3142_v9, %v3130_v48 }
 0x1cc   : > { %v2387_v24 = vmul.f32 0.26601174, %v8363_v20  ;;  %v8385_v63 = vmul.f32 0.26601174, %v1913_v16  ;;  %v2188_v60 = vmul.f32 0.0010283804, %v1913_v16  ;;  %v2179_v1 = vadd.f32 %v2167_v62, %v8327_v55  ;;  %v2866_v62 = vpop.f32.mrf.mxu0 }
 0x1cd   : > { %10720 = vst [vmem:[#allocation54_spill] sm:$0xff] %v8376_v27  ;;  %10721 = vst [vmem:[#allocation31_spill] sm:$0xff] %v8379_v58  ;;  %v8387_v18 = vmul.f32 0.21300554, %v1913_v16  ;;  %v8389_v10 = vmul.f32 0.10936069, %v1913_v16 }
 0x1ce   : > { %v8391_v14 = vmul.f32 0.036000773, %v1913_v16  ;;  %v8396_v21 = vmul.f32 0.10936069, %v3154_v3  ;;  %v8398_v36 = vmul.f32 0.21300554, %v3154_v3  ;;  %v2200_v46 = vadd.f32 %v2188_v60, %v2176_v40 }
 0x1cf   : > { %10722 = vst [vmem:[#allocation59_spill] sm:$0xff] %v8389_v10  ;;  %v2166_v50 = vmul.f32 0.0075987563, %v1913_v16  ;;  %v2303_v2 = vrot.slane %v8376_v27, 3  ;;  %v2357_v7 = vrot.slane %v8379_v58, 4  ;;  %v2411_v37 = vrot.slane %v2387_v24, 5  ;;  %v6139_v27 = vpop.f32.mrf.mxu1 }
 0x1d0   : > { %v8403_v38 = vmul.f32 0.036000773, %v8363_v20  ;;  %v8406_v42 = vmul.f32 0.0075987563, %v8363_v20  ;;  %v8410_v39 = vmul.f32 0.26601174, %v3154_v3  ;;  %v3132_v16 = vadd.f32 %v3120_v6, %v8337_v53 }
 0x1d1   : > { %v8414_v22 = vmul.f32 0.036000773, %v3154_v3  ;;  %v8416_v49 = vmul.f32 0.0075987563, %v3154_v3  ;;  %v2218_v40 = vmul.f32 0.0075987563, %v2200_v46 }
 0x1d2   : > { %10723 = vst [vmem:[#allocation55_spill] sm:$0xff] %v8403_v38  ;;  %10724 = vst [vmem:[#allocation34_spill] sm:$0xff] %v8406_v42  ;;  %v2248_v35 = vmul.f32 0.036000773, %v2200_v46  ;;  %v8418_v19 = vmul.f32 0.10936069, %v2200_v46 }
 0x1d3   : > { %10725 = vst [vmem:[#allocation64_spill] sm:$0xff] %v8416_v49  ;;  %v8421_v13 = vmul.f32 0.0010283804, %v3154_v3  ;;  %v8423_v59 = vmul.f32 0.21300554, %v2200_v46  ;;  %v3394_v24 = vrot.slane %v8398_v36, 6 }
 0x1d4   : > { %10726 = vst [vmem:[#allocation65_spill] sm:$0xff] %v8418_v19  ;;  %v2386_v9 = vmul.f32 0.26601174, %v2200_v46  ;;  %v2212_v60 = vmul.f32 0.0010283804, %v2200_v46  ;;  %v2230_v34 = vrot.slane %v2218_v40, 1 }
 0x1d5   : > { %10727 = vst [vmem:[#allocation66_spill] sm:$0xff] %v8421_v13  ;;  %10728 = vst [vmem:[#allocation67_spill] sm:$0xff] %v8423_v59  ;;  %v2302_v23 = vrot.slane %v8418_v19, 3  ;;  %v3364_v32 = vrot.slane %v8410_v39, 5  ;;  %v3424_v48 = vrot.slane %v8396_v21, 7  ;;  %v2356_v38 = vrot.slane %v8423_v59, 4 }
 0x1d6   : > { %v2410_v55 = vrot.slane %v2386_v9, 5  ;;  %v2242_v20 = vadd.f32 %v2230_v34, %v2212_v60  ;;  %v2260_v42 = vrot.slane %v2248_v35, 2  ;;  %v8440_v28 = vmul.f32 0.26601174, %v2866_v62 }
 0x1d7   : > { %v2304_v53 = vsel %vm1376_vm4, %v2302_v23, %v2303_v2  ;;  %v2358_v46 = vsel %vm1431_vm6, %v2356_v38, %v2357_v7  ;;  %v3141_v3 = vmul.f32 0.0010283804, %v2866_v62  ;;  %v8442_v34 = vmul.f32 0.21300554, %v2866_v62  ;;  %v6191_v23 = vpop.f32.mrf.mxu0 }
 0x1d8   : > { %v8436_v40 = vsel %vm1486_vm7, %v2410_v55, %v2411_v37  ;;  %v2272_v58 = vadd.f32 %v2260_v42, %v2242_v20  ;;  %10730 = vst [vmem:[#allocation69_spill] sm:$0xff] %v8440_v28  ;;  %v8444_v35 = vmul.f32 0.10936069, %v2866_v62  ;;  %v8446_v2 = vmul.f32 0.036000773, %v2866_v62 }
 0x1d9   : > { %10729 = vst [vmem:[#allocation68_spill] sm:$0xff] %v8436_v40  ;;  %10731 = vst [vmem:[#allocation70_spill] sm:$0xff] %v8442_v34  ;;  %v8449_v7 = vadd.f32 %v2166_v50, %v8347_v12  ;;  %v3119_v37 = vmul.f32 0.0075987563, %v2866_v62  ;;  %v3153_v60 = vadd.f32 %v3141_v3, %v8349_v51  ;;  %v2191_v20 = vmul.f32 0.0010283804, %v6139_v27 }
 0x1da   : > { %10732 = vst [vmem:[#allocation71_spill] sm:$0xff] %v8444_v35  ;;  %v2326_v38 = vadd.f32 %v2304_v53, %v2272_v58  ;;  %v8452_v42 = vmul.f32 0.21300554, %v6139_v27  ;;  %v8454_v55 = vmul.f32 0.10936069, %v6139_v27  ;;  %v2157_v39 = vadd.f32 %v8361_v44, %v8325_v29 }
 0x1db   : > { %v8456_v6 = vmul.f32 0.036000773, %v6139_v27  ;;  %v3171_v13 = vmul.f32 0.0075987563, %v3153_v60  ;;  %v3201_v49 = vmul.f32 0.036000773, %v3153_v60  ;;  %v3110_v51 = vadd.f32 %v8373_v56, %v8335_v33 }
 0x1dc   : > { %v8460_v9 = vadd.f32 %v2358_v46, %v2326_v38  ;;  %v3144_v12 = vmul.f32 0.0010283804, %v6191_v23  ;;  %v3231_v50 = vmul.f32 0.10936069, %v3153_v60  ;;  %v3285_v58 = vmul.f32 0.21300554, %v3153_v60 }
 0x1dd   : > { %v3339_v62 = vmul.f32 0.26601174, %v3153_v60  ;;  %v3165_v3 = vmul.f32 0.0010283804, %v3153_v60  ;;  %v3183_v53 = vrot.slane %v3171_v13, 1  ;;  %v2203_v59 = vadd.f32 %v2191_v20, %v2179_v1 }
 0x1de   : > { %10733 = vst [vmem:[#allocation72_spill] sm:$0xff] %v8460_v9  ;;  %v2169_v19 = vmul.f32 0.0075987563, %v6139_v27  ;;  %v3255_v40 = vrot.slane %v3231_v50, 3  ;;  %v3309_v34 = vrot.slane %v3285_v58, 4  ;;  %v3393_v43 = vrot.slane %v3285_v58, 6 }
 0x1df   : > { %v3363_v28 = vrot.slane %v3339_v62, 5  ;;  %v3195_v29 = vadd.f32 %v3183_v53, %v3165_v3  ;;  %v3213_v44 = vrot.slane %v3201_v49, 2  ;;  %v3423_v46 = vrot.slane %v3231_v50, 7 }
 0x1e0   : > { %v3156_v38 = vadd.f32 %v3144_v12, %v3132_v16  ;;  %v10734_v9 = vrot.slane %v8396_v21, 3  ;;  %v10735_v52 = vrot.slane %v8398_v36, 4  ;;  %v3395_v27 = vsel %vm1517_vm8, %v3393_v43, %v3394_v24 }
 0x1e1   : > { %v3365_v56 = vsel %vm1486_vm7, %v3363_v28, %v3364_v32  ;;  %v3225_v1 = vadd.f32 %v3213_v44, %v3195_v29  ;;  %v3425_v13 = vsel %vm1548_vm9, %v3423_v46, %v3424_v48  ;;  %v8473_v60 = vmul.f32 0.10936069, %v2203_v59 }
 0x1e2   : > { %v3257_v35 = vsel %vm1376_vm4, %v3255_v40, %v10734_v9  ;;  %v3311_v33 = vsel %vm1431_vm6, %v3309_v34, %v10735_v52  ;;  %v8475_v49 = vmul.f32 0.21300554, %v2203_v59  ;;  %v8477_v16 = vmul.f32 0.21300554, %v6191_v23 }
 0x1e3   : > { %10736 = vst [vmem:[#allocation73_spill] sm:$0xff] %v8473_v60  ;;  %v8479_v21 = vmul.f32 0.10936069, %v6191_v23  ;;  %v8481_v40 = vmul.f32 0.036000773, %v6191_v23  ;;  %v8485_v52 = vadd.f32 %v8391_v14, %v8345_v8  ;;  %v3279_v28 = vadd.f32 %v3257_v35, %v3225_v1  ;;  %v8514_v1 = vpop.f32.mrf.mxu0 }
 0x1e4   : > { %v8487_v36 = vmul.f32 0.26601174, %v2203_v59  ;;  %v8489_v43 = vmul.f32 0.0075987563, %v2203_v59  ;;  %v8491_v48 = vmul.f32 0.0010283804, %v2203_v59  ;;  %v3131_v34 = vadd.f32 %v3119_v37, %v8382_v57 }
 0x1e5   : > { %v3122_v32 = vmul.f32 0.0075987563, %v6191_v23  ;;  %v8493_v24 = vmul.f32 0.10936069, %v3156_v38  ;;  %v8495_v9 = vmul.f32 0.21300554, %v3156_v38  ;;  %v3333_v20 = vadd.f32 %v3311_v33, %v3279_v28  ;;  %v1923_v23 = vpop.f32.mrf.mxu1 }
 0x1e6   : > { %10737 = vst [vmem:[#allocation74_spill] sm:$0xff] %v8489_v43  ;;  %10738 = vst [vmem:[#allocation75_spill] sm:$0xff] %v8491_v48  ;;  %v2306_v12 = vrot.slane %v8473_v60, 3  ;;  %v2360_v8 = vrot.slane %v8475_v49, 4  ;;  %v8500_v14 = vmul.f32 0.26601174, %v3156_v38  ;;  %v2181_v62 = vadd.f32 %v2169_v19, %v2157_v39 }
 0x1e7   : > { %v2444_v35 = vrot.slane %v8475_v49, 6  ;;  %v8504_v58 = vmul.f32 0.036000773, %v2203_v59  ;;  %v3387_v3 = vadd.f32 %v3365_v56, %v3333_v20  ;;  %v2414_v53 = vrot.slane %v8487_v36, 5  ;;  %v6142_v44 = vpop.f32.mrf.mxu1 }
 0x1e8   : > { %v8512_v33 = vmul.f32 0.0075987563, %v3156_v38  ;;  %v3367_v19 = vrot.slane %v8500_v14, 5  ;;  %v3397_v39 = vrot.slane %v8495_v9, 6  ;;  %v2190_v56 = vmul.f32 0.0010283804, %v1923_v23 }
 0x1e9   : > { %10739 = vst [vmem:[#allocation76_spill] sm:$0xff] %v8504_v58  ;;  %v3417_v59 = vadd.f32 %v3395_v27, %v3387_v3  ;;  %v8518_v49 = vmul.f32 0.036000773, %v3156_v38  ;;  %v8520_v28 = vmul.f32 0.0010283804, %v3156_v38  ;;  %v8524_v20 = vadd.f32 %v3122_v32, %v3110_v51 }
 0x1ea   : > { %v8522_v36 = vmul.f32 0.21300554, %v1923_v23  ;;  %v8526_v57 = vmul.f32 0.10936069, %v1923_v23  ;;  %v2202_v50 = vadd.f32 %v2190_v56, %v8449_v7  ;;  %v3143_v27 = vmul.f32 0.0010283804, %v8514_v1 }
 0x1eb   : > { %10740 = vst [vmem:[#allocation77_spill] sm:$0xff] %v8520_v28  ;;  %v3447_v37 = vadd.f32 %v3425_v13, %v3417_v59  ;;  %v8531_v3 = vmul.f32 0.036000773, %v1923_v23  ;;  %v2168_v46 = vmul.f32 0.0075987563, %v1923_v23  ;;  %v8535_v38 = vadd.f32 %v8446_v2, %v8367_v47 }
 0x1ec   : > { %10741 = vst [vmem:[#allocation78_spill] sm:$0xff] %v8522_v36  ;;  %10742 = vst [vmem:[#allocation79_spill] sm:$0xff] %v8526_v57  ;;  %v2219_v13 = vmul.f32 0.0075987563, %v2202_v50  ;;  %v2249_v32 = vmul.f32 0.036000773, %v2202_v50  ;;  %v3155_v29 = vadd.f32 %v3143_v27, %v3131_v34 }
 0x1ed   : > { %10743 = vst [vmem:[#allocation80_spill] sm:$0xff] %v8531_v3  ;;  %v8538_v51 = vadd.f32 %v8414_v22, %v3447_v37  ;;  %v8541_v59 = vmul.f32 0.21300554, %v8514_v1  ;;  %v8543_v7 = vmul.f32 0.10936069, %v2202_v50 }
 0x1ee   : > { %v2334_v56 = vmul.f32 0.21300554, %v2202_v50  ;;  %v2388_v14 = vmul.f32 0.26601174, %v2202_v50  ;;  %v2213_v48 = vmul.f32 0.0010283804, %v2202_v50 }
 0x1ef   : > { %10744 = vst [vmem:[#allocation81_spill] sm:$0xff] %v8538_v51  ;;  %10745 = vst [vmem:[#allocation82_spill] sm:$0xff] %v8541_v59  ;;  %v2231_v43 = vrot.slane %v2219_v13, 1  ;;  %v2193_v58 = vmul.f32 0.0010283804, %v6142_v44  ;;  %v2305_v47 = vrot.slane %v8543_v7, 3 }
 0x1f0   : > { %10746 = vst [vmem:[#allocation83_spill] sm:$0xff] %v8543_v7  ;;  %v2359_v2 = vrot.slane %v2334_v56, 4  ;;  %v2413_v22 = vrot.slane %v2388_v14, 5  ;;  %v2443_v37 = vrot.slane %v2334_v56, 6  ;;  %v2261_v60 = vrot.slane %v2249_v32, 2 }
 0x1f1   : > { %v2243_v51 = vadd.f32 %v2231_v43, %v2213_v48  ;;  %v3166_v3 = vmul.f32 0.0010283804, %v3155_v29  ;;  %v3172_v57 = vmul.f32 0.0075987563, %v3155_v29  ;;  %v2307_v59 = vsel %vm1376_vm4, %v2305_v47, %v2306_v12 }
 0x1f2   : > { %v2361_v36 = vsel %vm1431_vm6, %v2359_v2, %v2360_v8  ;;  %v2415_v34 = vsel %vm1486_vm7, %v2413_v22, %v2414_v53  ;;  %v8551_v27 = vsel %vm1517_vm8, %v2443_v37, %v2444_v35  ;;  %v3202_v23 = vmul.f32 0.036000773, %v3155_v29 }
 0x1f3   : > { %10747 = vst [vmem:[#allocation84_spill] sm:$0xff] %v8551_v27  ;;  %v2273_v50 = vadd.f32 %v2261_v60, %v2243_v51  ;;  %v3184_v13 = vrot.slane %v3172_v57, 1  ;;  %v3233_v28 = vmul.f32 0.10936069, %v3155_v29  ;;  %v8554_v14 = vmul.f32 0.10936069, %v8514_v1 }
 0x1f4   : > { %v3287_v43 = vmul.f32 0.21300554, %v3155_v29  ;;  %v3341_v48 = vmul.f32 0.26601174, %v3155_v29  ;;  %v2205_v32 = vadd.f32 %v2193_v58, %v2181_v62  ;;  %v3214_v12 = vrot.slane %v3202_v23, 2 }
 0x1f5   : > { %10748 = vst [vmem:[#allocation85_spill] sm:$0xff] %v8554_v14  ;;  %v2327_v56 = vadd.f32 %v2307_v59, %v2273_v50  ;;  %v3196_v10 = vadd.f32 %v3184_v13, %v3166_v3  ;;  %v3258_v47 = vrot.slane %v3233_v28, 3  ;;  %v3426_v22 = vrot.slane %v3233_v28, 7 }
 0x1f6   : > { %v3312_v8 = vrot.slane %v3287_v43, 4  ;;  %v3366_v2 = vrot.slane %v3341_v48, 5  ;;  %v3396_v53 = vrot.slane %v3287_v43, 6  ;;  %v8557_v60 = vmul.f32 0.036000773, %v8514_v1 }
 0x1f7   : > { %v2381_v35 = vadd.f32 %v2361_v36, %v2327_v56  ;;  %v3226_v57 = vadd.f32 %v3214_v12, %v3196_v10  ;;  %v10750_v51 = vrot.slane %v8493_v24, 3  ;;  %v10751_v29 = vrot.slane %v8495_v9, 4  ;;  %v6194_v36 = vpop.f32.mrf.mxu0 }
 0x1f8   : > { %10749 = vst [vmem:[#allocation86_spill] sm:$0xff] %v8557_v60  ;;  %v3368_v62 = vsel %vm1486_vm7, %v3366_v2, %v3367_v19  ;;  %v3398_v3 = vsel %vm1517_vm8, %v3396_v53, %v3397_v39  ;;  %v10752_v59 = vrot.slane %v8493_v24, 7  ;;  %v3121_v10 = vmul.f32 0.0075987563, %v8514_v1 }
 0x1f9   : > { %v3260_v37 = vsel %vm1376_vm4, %v3258_v47, %v10750_v51  ;;  %v3314_v58 = vsel %vm1431_vm6, %v3312_v8, %v10751_v29  ;;  %v8570_v23 = vadd.f32 %v2415_v34, %v2381_v35  ;;  %v8573_v13 = vmul.f32 0.10936069, %v2205_v32  ;;  %v1933_v8 = vpop.f32.mrf.mxu1 }
 0x1fa   : > { %v3428_v28 = vsel %vm1548_vm9, %v3426_v22, %v10752_v59  ;;  %v3280_v50 = vadd.f32 %v3260_v37, %v3226_v57  ;;  %v8575_v43 = vmul.f32 0.10936069, %v6142_v44  ;;  %v8577_v9 = vmul.f32 0.036000773, %v6142_v44 }
 0x1fb   : > { %10753 = vst [vmem:[#allocation87_spill] sm:$0xff] %v8570_v23  ;;  %v8579_v48 = vmul.f32 0.21300554, %v2205_v32  ;;  %v2180_v19 = vadd.f32 %v2168_v46, %v8485_v52  ;;  %v8583_v56 = vmul.f32 0.0075987563, %v6142_v44  ;;  %v8593_v2 = vadd.f32 %v8357_v54, %v8323_v4 }
 0x1fc   : > { %v3334_v39 = vadd.f32 %v3314_v58, %v3280_v50  ;;  %v8585_v34 = vmul.f32 0.10936069, %v6194_v36  ;;  %v2391_v12 = vmul.f32 0.26601174, %v2205_v32  ;;  %v8587_v1 = vmul.f32 0.0075987563, %v2205_v32  ;;  %v8607_v58 = vpop.f32.mrf.mxu0 }
 0x1fd   : > { %v8589_v47 = vmul.f32 0.036000773, %v6194_v36  ;;  %v2309_v52 = vrot.slane %v8573_v13, 3  ;;  %v2477_v46 = vrot.slane %v8573_v13, 7  ;;  %v3146_v22 = vmul.f32 0.0010283804, %v6194_v36 }
 0x1fe   : > { %10754 = vst [vmem:[#allocation88_spill] sm:$0xff] %v8587_v1  ;;  %v3388_v53 = vadd.f32 %v3368_v62, %v3334_v39  ;;  %v2363_v44 = vrot.slane %v8579_v48, 4  ;;  %v8598_v35 = vmul.f32 0.036000773, %v2205_v32  ;;  %v8600_v57 = vmul.f32 0.0010283804, %v2205_v32 }
 0x1ff   : > { %v3133_v51 = vadd.f32 %v3121_v10, %v8535_v38  ;;  %v2447_v29 = vrot.slane %v8579_v48, 6  ;;  %v8605_v4 = vadd.f32 %v3146_v22, %v8524_v20  ;;  %v2192_v54 = vmul.f32 0.0010283804, %v1933_v8 }
 0x200   : > { %10755 = vst [vmem:[#allocation89_spill] sm:$0xff] %v8598_v35  ;;  %10756 = vst [vmem:[#allocation90_spill] sm:$0xff] %v8600_v57  ;;  %v3418_v37 = vadd.f32 %v3398_v3, %v3388_v53  ;;  %v2417_v62 = vrot.slane %v2391_v12, 5  ;;  %v8610_v50 = vmul.f32 0.0075987563, %v6194_v36  ;;  %v8614_v32 = vadd.f32 %v8452_v42, %v8394_v17 }
 0x201   : > { %v8617_v38 = vmul.f32 0.10936069, %v8605_v4  ;;  %v8620_v3 = vmul.f32 0.21300554, %v8605_v4  ;;  %v3344_v20 = vmul.f32 0.26601174, %v8605_v4  ;;  %v2204_v39 = vadd.f32 %v2192_v54, %v2180_v19 }
 0x202   : > { %v3448_v13 = vadd.f32 %v3428_v28, %v3418_v37  ;;  %v8624_v48 = vmul.f32 0.10936069, %v1933_v8  ;;  %v3145_v36 = vmul.f32 0.0010283804, %v8607_v58  ;;  %v8628_v17 = vmul.f32 0.036000773, %v1933_v8 }
 0x203   : > { %v8630_v42 = vmul.f32 0.0075987563, %v1933_v8  ;;  %v2135_v28 = vadd.f32 %v8359_v41, %v8321_v0  ;;  %v3262_v53 = vrot.slane %v8617_v38, 3  ;;  %v3316_v22 = vrot.slane %v8620_v3, 4 }
 0x204   : > { %v3460_v12 = vadd.f32 %v8518_v49, %v3448_v13  ;;  %v8637_v37 = vmul.f32 0.0075987563, %v8605_v4  ;;  %v8640_v19 = vmul.f32 0.10936069, %v8607_v58  ;;  %v10759_v54 = vrot.slane %v8512_v33, 1 }
 0x205   : > { %10757 = vst [vmem:[#allocation91_spill] sm:$0xff] %v8630_v42  ;;  %v3370_v13 = vrot.slane %v3344_v20, 5  ;;  %v2220_v8 = vmul.f32 0.0075987563, %v2204_v39  ;;  %v2250_v10 = vmul.f32 0.036000773, %v2204_v39  ;;  %v3157_v41 = vadd.f32 %v3145_v36, %v3133_v51 }
 0x206   : > { %10758 = vst [vmem:[#allocation92_spill] sm:$0xff] %v8640_v19  ;;  %v8644_v49 = vadd.f32 %v10759_v54, %v3460_v12  ;;  %v2282_v59 = vmul.f32 0.10936069, %v2204_v39  ;;  %v2336_v24 = vmul.f32 0.21300554, %v2204_v39  ;;  %v3400_v57 = vrot.slane %v8620_v3, 6 }
 0x207   : > { %v2390_v0 = vmul.f32 0.26601174, %v2204_v39  ;;  %v2214_v1 = vmul.f32 0.0010283804, %v2204_v39  ;;  %v2232_v35 = vrot.slane %v2220_v8, 1  ;;  %v2262_v7 = vrot.slane %v2250_v10, 2 }
 0x208   : > { %10760 = vst [vmem:[#allocation93_spill] sm:$0xff] %v8644_v49  ;;  %v2308_v27 = vrot.slane %v2282_v59, 3  ;;  %v2362_v23 = vrot.slane %v2336_v24, 4  ;;  %v2446_v19 = vrot.slane %v2336_v24, 6  ;;  %v2476_v33 = vrot.slane %v2282_v59, 7 }
 0x209   : > { %v2416_v14 = vrot.slane %v2390_v0, 5  ;;  %v2244_v60 = vadd.f32 %v2232_v35, %v2214_v1  ;;  %v3167_v12 = vmul.f32 0.0010283804, %v3157_v41  ;;  %v3173_v54 = vmul.f32 0.0075987563, %v3157_v41 }
 0x20a   : > { %v2310_v20 = vsel %vm1376_vm4, %v2308_v27, %v2309_v52  ;;  %v2364_v49 = vsel %vm1431_vm6, %v2362_v23, %v2363_v44  ;;  %v2448_v51 = vsel %vm1517_vm8, %v2446_v19, %v2447_v29  ;;  %v8652_v39 = vsel %vm1548_vm9, %v2476_v33, %v2477_v46  ;;  %v6145_v19 = vpop.f32.mrf.mxu1 }
 0x20b   : > { %v2418_v42 = vsel %vm1486_vm7, %v2416_v14, %v2417_v62  ;;  %v2274_v3 = vadd.f32 %v2262_v7, %v2244_v60  ;;  %10761 = vst [vmem:[#allocation94_spill] sm:$0xff] %v8652_v39  ;;  %v3185_v10 = vrot.slane %v3173_v54, 1  ;;  %v3203_v36 = vmul.f32 0.036000773, %v3157_v41 }
 0x20c   : > { %v3235_v8 = vmul.f32 0.10936069, %v3157_v41  ;;  %v3289_v24 = vmul.f32 0.21300554, %v3157_v41  ;;  %v3343_v1 = vmul.f32 0.26601174, %v3157_v41  ;;  %v2137_v35 = vadd.f32 %v8454_v55, %v8593_v2 }
 0x20d   : > { %v3430_v27 = vrot.slane %v8617_v38, 7  ;;  %v2328_v52 = vadd.f32 %v2310_v20, %v2274_v3  ;;  %v3197_v23 = vadd.f32 %v3185_v10, %v3167_v12  ;;  %v3215_v44 = vrot.slane %v3203_v36, 2 }
 0x20e   : > { %v3261_v14 = vrot.slane %v3235_v8, 3  ;;  %v3315_v62 = vrot.slane %v3289_v24, 4  ;;  %v3369_v29 = vrot.slane %v3343_v1, 5  ;;  %v3399_v7 = vrot.slane %v3289_v24, 6 }
 0x20f   : > { %v2382_v60 = vadd.f32 %v2364_v49, %v2328_v52  ;;  %v3227_v46 = vadd.f32 %v3215_v44, %v3197_v23  ;;  %v3429_v59 = vrot.slane %v3235_v8, 7  ;;  %v2159_v0 = vadd.f32 %v8456_v6, %v2135_v28 }
 0x210   : > { %v3263_v41 = vsel %vm1376_vm4, %v3261_v14, %v3262_v53  ;;  %v3317_v33 = vsel %vm1431_vm6, %v3315_v62, %v3316_v22  ;;  %v3371_v55 = vsel %vm1486_vm7, %v3369_v29, %v3370_v13  ;;  %v3401_v2 = vsel %vm1517_vm8, %v3399_v7, %v3400_v57 }
 0x211   : > { %v8663_v38 = vmul.f32 0.0010283804, %v8605_v4  ;;  %v2436_v12 = vadd.f32 %v2418_v42, %v2382_v60  ;;  %v3281_v54 = vadd.f32 %v3263_v41, %v3227_v46  ;;  %v3431_v49 = vsel %vm1548_vm9, %v3429_v59, %v3430_v27  ;;  %v6197_v27 = vpop.f32.mrf.mxu0 }
 0x212   : > { %v2151_v20 = vmul.f32 0.036000773, %v6145_v19  ;;  %v2173_v3 = vmul.f32 0.0075987563, %v6145_v19  ;;  %v2183_v10 = vadd.f32 %v8583_v56, %v2159_v0  ;;  %v2195_v6 = vmul.f32 0.0010283804, %v6145_v19 }
 0x213   : > { %10762 = vst [vmem:[#allocation95_spill] sm:$0xff] %v8663_v38  ;;  %v8667_v28 = vadd.f32 %v2448_v51, %v2436_v12  ;;  %v8670_v53 = vmul.f32 0.036000773, %v8607_v58  ;;  %v8673_v22 = vmul.f32 0.0075987563, %v8607_v58  ;;  %v3335_v57 = vadd.f32 %v3317_v33, %v3281_v54  ;;  %v1943_v33 = vpop.f32.mrf.mxu1 }
 0x214   : > { %v2139_v42 = vadd.f32 %v8575_v43, %v8614_v32  ;;  %v2161_v13 = vadd.f32 %v8577_v9, %v2137_v35  ;;  %v2207_v36 = vadd.f32 %v2195_v6, %v2183_v10  ;;  %v3056_v8 = vadd.f32 %v8365_v26, %v8329_v45  ;;  %v10769_v6 = vld [vmem:[#allocation78_spill] sm:$0xff] }
 0x215   : > { %10763 = vst [vmem:[#allocation96_spill] sm:$0xff] %v8667_v28  ;;  %v3455_v56 = vmul.f32 0.036000773, %v8605_v4  ;;  %v3479_v51 = vrot.slane %v8637_v37, 1  ;;  %v3389_v1 = vadd.f32 %v3371_v55, %v3335_v57  ;;  %v3070_v43 = vadd.f32 %v8369_v61, %v8331_v11 }
 0x216   : > { %v8683_v58 = vadd.f32 %v2151_v20, %v2139_v42  ;;  %v8685_v52 = vadd.f32 %v2173_v3, %v2161_v13  ;;  %v3088_v9 = vadd.f32 %v8371_v30, %v8333_v25  ;;  %v8691_v45 = vmul.f32 0.10936069, %v2207_v36  ;;  %v10770_v42 = vld [vmem:[#allocation79_spill] sm:$0xff] }
 0x217   : > { %v3419_v32 = vadd.f32 %v3401_v2, %v3389_v1  ;;  %v8693_v26 = vmul.f32 0.21300554, %v2207_v36  ;;  %v8695_v4 = vmul.f32 0.26601174, %v2207_v36  ;;  %v8697_v37 = vmul.f32 0.0075987563, %v2207_v36 }
 0x218   : > { %v3072_v35 = vadd.f32 %v8477_v16, %v3056_v8  ;;  %v3112_v23 = vadd.f32 %v8481_v40, %v3088_v9  ;;  %v3148_v44 = vmul.f32 0.0010283804, %v6197_v27  ;;  %v8701_v62 = vmul.f32 0.0010283804, %v2207_v36 }
 0x219   : > { %10764 = vst [vmem:[#allocation97_spill] sm:$0xff] %v8697_v37  ;;  %v3449_v14 = vadd.f32 %v3431_v49, %v3419_v32  ;;  %v3090_v11 = vadd.f32 %v8479_v21, %v3070_v43  ;;  %v3104_v25 = vmul.f32 0.036000773, %v6197_v27  ;;  %v8704_v61 = vmul.f32 0.036000773, %v2207_v36  ;;  %v10768_v49 = vld [vmem:[#allocation59_spill] sm:$0xff]  ;;  %v2896_v32 = vpop.f32.mrf.mxu0 }
 0x21a   : > { %10765 = vst [vmem:[#allocation98_spill] sm:$0xff] %v8701_v62  ;;  %v3092_v30 = vadd.f32 %v8585_v34, %v3072_v35  ;;  %v3126_v29 = vmul.f32 0.0075987563, %v6197_v27  ;;  %v3136_v7 = vadd.f32 %v8610_v50, %v3112_v23  ;;  %v2312_v46 = vrot.slane %v8691_v45, 3  ;;  %v10773_v43 = vld [vmem:[#allocation91_spill] sm:$0xff] }
 0x21b   : > { %10766 = vst [vmem:[#allocation99_spill] sm:$0xff] %v8704_v61  ;;  %v3461_v60 = vadd.f32 %v3455_v56, %v3449_v14  ;;  %v2366_v16 = vrot.slane %v8693_v26, 4  ;;  %v2420_v40 = vrot.slane %v8695_v4, 5  ;;  %v2450_v59 = vrot.slane %v8693_v26, 6  ;;  %v6200_v4 = vpop.f32.mrf.mxu0 }
 0x21c   : > { %v2480_v19 = vrot.slane %v8691_v45, 7  ;;  %v3160_v0 = vadd.f32 %v3148_v44, %v3136_v7  ;;  %v2102_v50 = vadd.f32 %v8385_v63, %v8339_v5  ;;  %v2116_v55 = vadd.f32 %v8387_v18, %v8341_v31  ;;  %v10772_v18 = vld [vmem:[#allocation80_spill] sm:$0xff] }
 0x21d   : > { %v8714_v41 = vadd.f32 %v3479_v51, %v3461_v60  ;;  %v3114_v2 = vadd.f32 %v8589_v47, %v3090_v11  ;;  %v8722_v12 = vadd.f32 %v3104_v25, %v3092_v30  ;;  %v2134_v20 = vadd.f32 %v10768_v49, %v8343_v15  ;;  %v10774_v30 = vld [vmem:[#allocation58_spill] sm:$0xff] }
 0x21e   : > { %v8724_v54 = vmul.f32 0.10936069, %v3160_v0  ;;  %v8728_v3 = vmul.f32 0.21300554, %v3160_v0  ;;  %v8730_v10 = vmul.f32 0.26601174, %v3160_v0  ;;  %v2118_v57 = vadd.f32 %v10769_v6, %v2102_v50 }
 0x21f   : > { %10767 = vst [vmem:[#allocation100_spill] sm:$0xff] %v8714_v41  ;;  %v2136_v5 = vadd.f32 %v10770_v42, %v2116_v55  ;;  %v8734_v63 = vmul.f32 0.0075987563, %v3160_v0  ;;  %v8736_v31 = vmul.f32 0.0010283804, %v3160_v0  ;;  %v2158_v47 = vadd.f32 %v10772_v18, %v2134_v20  ;;  %v10778_v6 = vld [vmem:[#allocation86_spill] sm:$0xff] }
 0x220   : > { %v2194_v13 = vmul.f32 0.0010283804, %v1943_v33  ;;  %v8739_v36 = vadd.f32 %v3126_v29, %v3114_v2  ;;  %v2138_v8 = vadd.f32 %v8624_v48, %v2118_v57  ;;  %v2150_v15 = vmul.f32 0.036000773, %v1943_v33  ;;  %v10775_v29 = vld [vmem:[#allocation71_spill] sm:$0xff]  ;;  %v6148_v2 = vpop.f32.mrf.mxu1  ;;  %v10811_v41 = vld [vmem:[#allocation49_spill] sm:$0xff] }
 0x221   : > { %10771 = vst [vmem:[#allocation59_spill] sm:$0xff] %v8736_v31  ;;  %v2172_v56 = vmul.f32 0.0075987563, %v1943_v33  ;;  %v3265_v51 = vrot.slane %v8724_v54, 3  ;;  %v8743_v1 = vmul.f32 0.036000773, %v3160_v0  ;;  %v2160_v27 = vadd.f32 %v8628_v17, %v2136_v5 }
 0x222   : > { %v2182_v9 = vadd.f32 %v10773_v43, %v2158_v47  ;;  %v3319_v35 = vrot.slane %v8728_v3, 4  ;;  %v3373_v23 = vrot.slane %v8730_v10, 5  ;;  %v3403_v44 = vrot.slane %v8728_v3, 6  ;;  %v10776_v0 = vld [vmem:[#allocation53_spill] sm:$0xff]  ;;  %v10780_v43 = vld [vmem:[#allocation70_spill] sm:$0xff] }
 0x223   : > { %v3433_v14 = vrot.slane %v8724_v54, 7  ;;  %v3480_v48 = vrot.slane %v8734_v63, 1  ;;  %v3087_v7 = vadd.f32 %v10775_v29, %v10774_v30  ;;  %v8755_v17 = vadd.f32 %v2150_v15, %v2138_v8  ;;  %v10777_v33 = vld [vmem:[#allocation69_spill] sm:$0xff] }
 0x224   : > { %v2206_v25 = vadd.f32 %v2194_v13, %v2182_v9  ;;  %v8757_v60 = vadd.f32 %v2172_v56, %v2160_v27  ;;  %v3055_v50 = vadd.f32 %v10777_v33, %v10776_v0  ;;  %v3103_v55 = vmul.f32 0.036000773, %v2896_v32  ;;  %v10779_v13 = vld [vmem:[#allocation35_spill] sm:$0xff] }
 0x225   : > { %v3111_v57 = vadd.f32 %v10778_v6, %v3087_v7  ;;  %v3147_v42 = vmul.f32 0.0010283804, %v2896_v32  ;;  %v3069_v9 = vadd.f32 %v10780_v43, %v10779_v13  ;;  %v2197_v27 = vmul.f32 0.0010283804, %v6148_v2 }
 0x226   : > { %v2221_v49 = vmul.f32 0.0075987563, %v2206_v25  ;;  %v2251_v20 = vmul.f32 0.036000773, %v2206_v25  ;;  %v2284_v5 = vmul.f32 0.10936069, %v2206_v25 }
 0x227   : > { %v2338_v18 = vmul.f32 0.21300554, %v2206_v25  ;;  %v2392_v47 = vmul.f32 0.26601174, %v2206_v25  ;;  %v2215_v8 = vmul.f32 0.0010283804, %v2206_v25  ;;  %v3135_v56 = vadd.f32 %v8673_v22, %v3111_v57 }
 0x228   : > { %v2233_v15 = vrot.slane %v2221_v49, 1  ;;  %v2311_v30 = vrot.slane %v2284_v5, 3  ;;  %v2263_v24 = vrot.slane %v2251_v20, 2  ;;  %v2479_v34 = vrot.slane %v2284_v5, 7  ;;  %v10782_v5 = vld [vmem:[#allocation82_spill] sm:$0xff] }
 0x229   : > { %v2365_v29 = vrot.slane %v2338_v18, 4  ;;  %v2419_v0 = vrot.slane %v2392_v47, 5  ;;  %v2449_v33 = vrot.slane %v2338_v18, 6  ;;  %v3159_v7 = vadd.f32 %v3147_v42, %v3135_v56 }
 0x22a   : > { %v2245_v11 = vadd.f32 %v2233_v15, %v2215_v8  ;;  %v2313_v6 = vsel %vm1376_vm4, %v2311_v30, %v2312_v46  ;;  %v8780_v20 = vsel %vm1548_vm9, %v2479_v34, %v2480_v19  ;;  %v3125_v42 = vmul.f32 0.0075987563, %v2896_v32  ;;  %v10783_v15 = vld [vmem:[#allocation85_spill] sm:$0xff]  ;;  %v10784_v30 = vld [vmem:[#allocation92_spill] sm:$0xff] }
 0x22b   : > { %v2367_v25 = vsel %vm1431_vm6, %v2365_v29, %v2366_v16  ;;  %v2421_v22 = vsel %vm1486_vm7, %v2419_v0, %v2420_v40  ;;  %v2451_v49 = vsel %vm1517_vm8, %v2449_v33, %v2450_v59  ;;  %10781 = vst [vmem:[#allocation78_spill] sm:$0xff] %v8780_v20  ;;  %v3174_v46 = vmul.f32 0.0075987563, %v3159_v7 }
 0x22c   : > { %v2275_v57 = vadd.f32 %v2263_v24, %v2245_v11  ;;  %v3071_v18 = vadd.f32 %v10782_v5, %v3055_v50  ;;  %v3204_v47 = vmul.f32 0.036000773, %v3159_v7  ;;  %v3237_v16 = vmul.f32 0.10936069, %v3159_v7 }
 0x22d   : > { %v3291_v13 = vmul.f32 0.21300554, %v3159_v7  ;;  %v3168_v40 = vmul.f32 0.0010283804, %v3159_v7  ;;  %v3186_v8 = vrot.slane %v3174_v46, 1  ;;  %v3089_v59 = vadd.f32 %v10783_v15, %v3069_v9 }
 0x22e   : > { %v2329_v43 = vadd.f32 %v2313_v6, %v2275_v57  ;;  %v3345_v26 = vmul.f32 0.26601174, %v3159_v7  ;;  %v3264_v24 = vrot.slane %v3237_v16, 3  ;;  %v2175_v11 = vmul.f32 0.0075987563, %v6148_v2 }
 0x22f   : > { %v2209_v45 = vadd.f32 %v2197_v27, %v8685_v52  ;;  %v3198_v34 = vadd.f32 %v3186_v8, %v3168_v40  ;;  %v3216_v32 = vrot.slane %v3204_v47, 2  ;;  %v3128_v56 = vmul.f32 0.0075987563, %v6200_v4 }
 0x230   : > { %v2383_v19 = vadd.f32 %v2367_v25, %v2329_v43  ;;  %v3091_v50 = vadd.f32 %v10784_v30, %v3071_v18  ;;  %v3318_v29 = vrot.slane %v3291_v13, 4  ;;  %v3402_v0 = vrot.slane %v3291_v13, 6 }
 0x231   : > { %v3150_v33 = vmul.f32 0.0010283804, %v6200_v4  ;;  %v3113_v6 = vadd.f32 %v8670_v53, %v3089_v59  ;;  %v3228_v57 = vadd.f32 %v3216_v32, %v3198_v34  ;;  %v3372_v7 = vrot.slane %v3345_v26, 5 }
 0x232   : > { %v2437_v5 = vadd.f32 %v2421_v22, %v2383_v19  ;;  %v8787_v46 = vadd.f32 %v3103_v55, %v3091_v50  ;;  %v3266_v52 = vsel %vm1376_vm4, %v3264_v24, %v3265_v51  ;;  %v3432_v2 = vrot.slane %v3237_v16, 7  ;;  %v1953_v16 = vpop.f32.mrf.mxu1 }
 0x233   : > { %v8792_v9 = vmul.f32 0.10936069, %v2209_v45  ;;  %v3137_v25 = vadd.f32 %v3125_v42, %v3113_v6  ;;  %v3282_v18 = vadd.f32 %v3266_v52, %v3228_v57  ;;  %v8797_v47 = vadd.f32 %v2175_v11, %v8683_v58 }
 0x234   : > { %v8794_v27 = vadd.f32 %v2451_v49, %v2437_v5  ;;  %v3320_v53 = vsel %vm1431_vm6, %v3318_v29, %v3319_v35  ;;  %v3404_v55 = vsel %vm1517_vm8, %v3402_v0, %v3403_v44  ;;  %v8805_v22 = vmul.f32 0.21300554, %v2209_v45  ;;  %v6151_v30 = vpop.f32.mrf.mxu1 }
 0x235   : > { %v8807_v51 = vmul.f32 0.26601174, %v2209_v45  ;;  %v3336_v49 = vadd.f32 %v3320_v53, %v3282_v18  ;;  %v3374_v42 = vsel %vm1486_vm7, %v3372_v7, %v3373_v23  ;;  %v8812_v58 = vmul.f32 0.0075987563, %v2209_v45 }
 0x236   : > { %10785 = vst [vmem:[#allocation79_spill] sm:$0xff] %v8794_v27  ;;  %v3162_v13 = vadd.f32 %v3150_v33, %v8739_v36  ;;  %v3434_v3 = vsel %vm1548_vm9, %v3432_v2, %v3433_v14  ;;  %v2315_v35 = vrot.slane %v8792_v9, 3  ;;  %v8820_v4 = vmul.f32 0.0010283804, %v2209_v45  ;;  %v2906_v14 = vpop.f32.mrf.mxu0 }
 0x237   : > { %10786 = vst [vmem:[#allocation80_spill] sm:$0xff] %v8812_v58  ;;  %v3390_v43 = vadd.f32 %v3374_v42, %v3336_v49  ;;  %v8822_v40 = vmul.f32 0.036000773, %v2209_v45  ;;  %v2196_v23 = vmul.f32 0.0010283804, %v1953_v16  ;;  %v2369_v8 = vrot.slane %v8805_v22, 4  ;;  %v1963_v49 = vpop.f32.mrf.mxu1 }
 0x238   : > { %10787 = vst [vmem:[#allocation91_spill] sm:$0xff] %v8820_v4  ;;  %v8824_v10 = vmul.f32 0.10936069, %v3162_v13  ;;  %v2423_v36 = vrot.slane %v8807_v51, 5  ;;  %v8828_v26 = vmul.f32 0.21300554, %v3162_v13  ;;  %v8835_v24 = vadd.f32 %v3128_v56, %v8722_v12  ;;  %v6203_v18 = vpop.f32.mrf.mxu0 }
 0x239   : > { %10788 = vst [vmem:[#allocation58_spill] sm:$0xff] %v8822_v40  ;;  %v8830_v54 = vmul.f32 0.26601174, %v3162_v13  ;;  %v2453_v15 = vrot.slane %v8805_v22, 6  ;;  %v2174_v11 = vmul.f32 0.0075987563, %v1953_v16  ;;  %v3420_v45 = vadd.f32 %v3404_v55, %v3390_v43 }
 0x23a   : > { %v8838_v34 = vmul.f32 0.036000773, %v3162_v13  ;;  %v8840_v32 = vmul.f32 0.0075987563, %v3162_v13  ;;  %v3268_v50 = vrot.slane %v8824_v10, 3  ;;  %v2208_v0 = vadd.f32 %v2196_v23, %v8757_v60  ;;  %v2916_v22 = vpop.f32.mrf.mxu0 }
 0x23b   : > { %v8843_v29 = vmul.f32 0.0010283804, %v3162_v13  ;;  %v3149_v33 = vmul.f32 0.0010283804, %v2906_v14  ;;  %v3322_v5 = vrot.slane %v8828_v26, 4  ;;  %v8851_v57 = vadd.f32 %v2174_v11, %v8755_v17 }
 0x23c   : > { %v2222_v7 = vmul.f32 0.0075987563, %v2208_v0  ;;  %v2252_v52 = vmul.f32 0.036000773, %v2208_v0  ;;  %v3127_v2 = vmul.f32 0.0075987563, %v2906_v14  ;;  %v3450_v53 = vadd.f32 %v3434_v3, %v3420_v45 }
 0x23d   : > { %10789 = vst [vmem:[#allocation71_spill] sm:$0xff] %v8843_v29  ;;  %v2286_v55 = vmul.f32 0.10936069, %v2208_v0  ;;  %v2340_v16 = vmul.f32 0.21300554, %v2208_v0  ;;  %v3161_v23 = vadd.f32 %v3149_v33, %v3137_v25 }
 0x23e   : > { %v2394_v60 = vmul.f32 0.26601174, %v2208_v0  ;;  %v2216_v13 = vmul.f32 0.0010283804, %v2208_v0  ;;  %v2234_v43 = vrot.slane %v2222_v7, 1  ;;  %v2264_v6 = vrot.slane %v2252_v52, 2 }
 0x23f   : > { %v2314_v59 = vrot.slane %v2286_v55, 3  ;;  %v2199_v21 = vmul.f32 0.0010283804, %v6151_v30  ;;  %v3152_v17 = vmul.f32 0.0010283804, %v6203_v18  ;;  %v3462_v3 = vadd.f32 %v8743_v1, %v3450_v53 }
 0x240   : > { %v2246_v11 = vadd.f32 %v2234_v43, %v2216_v13  ;;  %v3175_v56 = vmul.f32 0.0075987563, %v3161_v23  ;;  %v2198_v14 = vmul.f32 0.0010283804, %v1963_v49  ;;  %v2368_v45 = vrot.slane %v2340_v16, 4 }
 0x241   : > { %v2422_v12 = vrot.slane %v2394_v60, 5  ;;  %v8857_v44 = vadd.f32 %v3127_v2, %v8787_v46  ;;  %v3169_v0 = vmul.f32 0.0010283804, %v3161_v23  ;;  %v3205_v25 = vmul.f32 0.036000773, %v3161_v23 }
 0x242   : > { %v2276_v42 = vadd.f32 %v2264_v6, %v2246_v11  ;;  %v3187_v7 = vrot.slane %v3175_v56, 1  ;;  %v2316_v33 = vsel %vm1376_vm4, %v2314_v59, %v2315_v35  ;;  %v3239_v19 = vmul.f32 0.10936069, %v3161_v23 }
 0x243   : > { %v3293_v30 = vmul.f32 0.21300554, %v3161_v23  ;;  %v3347_v18 = vmul.f32 0.26601174, %v3161_v23  ;;  %v3217_v43 = vrot.slane %v3205_v25, 2  ;;  %v2211_v49 = vadd.f32 %v2199_v21, %v8797_v47 }
 0x244   : > { %v2330_v13 = vadd.f32 %v2316_v33, %v2276_v42  ;;  %v3199_v52 = vadd.f32 %v3187_v7, %v3169_v0  ;;  %v8863_v1 = vadd.f32 %v3480_v48, %v3462_v3  ;;  %v2452_v46 = vrot.slane %v2340_v16, 6 }
 0x245   : > { %v3267_v2 = vrot.slane %v3239_v19, 3  ;;  %v3321_v6 = vrot.slane %v3293_v30, 4  ;;  %v2370_v56 = vsel %vm1431_vm6, %v2368_v45, %v2369_v8  ;;  %v2482_v35 = vrot.slane %v2286_v55, 7 }
 0x246   : > { %10790 = vst [vmem:[#allocation53_spill] sm:$0xff] %v8863_v1  ;;  %v3229_v59 = vadd.f32 %v3217_v43, %v3199_v52  ;;  %v3375_v53 = vrot.slane %v3347_v18, 5  ;;  %v2384_v60 = vadd.f32 %v2370_v56, %v2330_v13  ;;  %v3405_v23 = vrot.slane %v3293_v30, 6 }
 0x247   : > { %v3269_v42 = vsel %vm1376_vm4, %v3267_v2, %v3268_v50  ;;  %v3435_v11 = vrot.slane %v3239_v19, 7  ;;  %v2424_v21 = vsel %vm1486_vm7, %v2422_v12, %v2423_v36  ;;  %v8872_v48 = vmul.f32 0.10936069, %v2211_v49 }
 0x248   : > { %v3283_v63 = vadd.f32 %v3269_v42, %v3229_v59  ;;  %v3164_v47 = vadd.f32 %v3152_v17, %v8835_v24  ;;  %v2454_v8 = vsel %vm1517_vm8, %v2452_v46, %v2453_v15  ;;  %v3323_v55 = vsel %vm1431_vm6, %v3321_v6, %v3322_v5  ;;  %v6210_v15 = vpop.f32.mrf.mxu1  ;;  %v6262_v6 = vpop.f32.mrf.mxu0 }
 0x249   : > { %10791 = vst [vmem:[#allocation69_spill] sm:$0xff] %v8872_v48  ;;  %v8879_v16 = vmul.f32 0.21300554, %v2211_v49  ;;  %v8881_v50 = vmul.f32 0.26601174, %v2211_v49  ;;  %v10792_v19 = vrot.slane %v8792_v9, 7  ;;  %v2438_v3 = vadd.f32 %v2424_v21, %v2384_v60 }
 0x24a   : > { %v3337_v36 = vadd.f32 %v3323_v55, %v3283_v63  ;;  %v10794_v12 = vrot.slane %v8830_v54, 5  ;;  %v8891_v17 = vmul.f32 0.0075987563, %v2211_v49  ;;  %v10796_v5 = vrot.slane %v8828_v26, 6  ;;  %v3719_v56 = vpop.f32.mrf.mxu1 }
 0x24b   : > { %v8886_v51 = vsel %vm1548_vm9, %v2482_v35, %v10792_v19  ;;  %v10797_v0 = vrot.slane %v8824_v10, 7  ;;  %v8899_v7 = vmul.f32 0.0010283804, %v2211_v49  ;;  %v2318_v54 = vrot.slane %v8872_v48, 3 }
 0x24c   : > { %10793 = vst [vmem:[#allocation86_spill] sm:$0xff] %v8886_v51  ;;  %v3377_v24 = vsel %vm1486_vm7, %v3375_v53, %v10794_v12  ;;  %10795 = vst [vmem:[#allocation35_spill] sm:$0xff] %v8891_v17  ;;  %v3407_v45 = vsel %vm1517_vm8, %v3405_v23, %v10796_v5  ;;  %v8902_v33 = vmul.f32 0.10936069, %v3164_v47  ;;  %v2210_v30 = vadd.f32 %v2198_v14, %v8851_v57  ;;  %v4672_v12 = vpop.f32.mrf.mxu0  ;;  %v10807_v57 = vld [vmem:[#allocation25_spill] sm:$0xff] }
 0x24d   : > { %v3437_v9 = vsel %vm1548_vm9, %v3435_v11, %v10797_v0  ;;  %10798 = vst [vmem:[#allocation70_spill] sm:$0xff] %v8899_v7  ;;  %v3391_v25 = vadd.f32 %v3377_v24, %v3337_v36  ;;  %v2372_v18 = vrot.slane %v8879_v16, 4  ;;  %v8908_v52 = vmul.f32 0.036000773, %v2211_v49  ;;  %v6213_v24 = vpop.f32.mrf.mxu1 }
 0x24e   : > { %v2456_v43 = vrot.slane %v8879_v16, 6  ;;  %v8912_v2 = vmul.f32 0.21300554, %v3164_v47  ;;  %v8916_v14 = vmul.f32 0.26601174, %v3164_v47  ;;  %v8922_v23 = vadd.f32 %v2454_v8, %v2438_v3 }
 0x24f   : > { %10799 = vst [vmem:[#allocation82_spill] sm:$0xff] %v8908_v52  ;;  %v3421_v10 = vadd.f32 %v3407_v45, %v3391_v25  ;;  %v8918_v59 = vmul.f32 0.036000773, %v3164_v47  ;;  %v8920_v49 = vmul.f32 0.0075987563, %v3164_v47  ;;  %v10803_v35 = vrot.slane %v8840_v32, 1 }
 0x250   : > { %v2223_v60 = vmul.f32 0.0075987563, %v2210_v30  ;;  %v2253_v42 = vmul.f32 0.036000773, %v2210_v30  ;;  %10800 = vst [vmem:[#allocation85_spill] sm:$0xff] %v8922_v23  ;;  %v3325_v16 = vrot.slane %v8912_v2, 4 }
 0x251   : > { %v3451_v53 = vadd.f32 %v3437_v9, %v3421_v10  ;;  %v8924_v11 = vmul.f32 0.0010283804, %v3164_v47  ;;  %v8926_v21 = vmul.f32 0.10936069, %v2210_v30  ;;  %v2342_v63 = vmul.f32 0.21300554, %v2210_v30 }
 0x252   : > { %v2217_v19 = vmul.f32 0.0010283804, %v2210_v30  ;;  %v2235_v36 = vrot.slane %v2223_v60, 1  ;;  %v2396_v0 = vmul.f32 0.26601174, %v2210_v30  ;;  %v3409_v8 = vrot.slane %v8912_v2, 6 }
 0x253   : > { %10801 = vst [vmem:[#allocation92_spill] sm:$0xff] %v8924_v11  ;;  %10802 = vst [vmem:[#allocation101_spill] sm:$0xff] %v8926_v21  ;;  %v3463_v55 = vadd.f32 %v8838_v34, %v3451_v53  ;;  %v2317_v5 = vrot.slane %v8926_v21, 3  ;;  %v2371_v45 = vrot.slane %v2342_v63, 4  ;;  %v2455_v9 = vrot.slane %v2342_v63, 6  ;;  %v6265_v63 = vpop.f32.mrf.mxu0  ;;  %v10806_v30 = vld [vmem:[#allocation39_spill] sm:$0xff] }
 0x254   : > { %v2247_v47 = vadd.f32 %v2235_v36, %v2217_v19  ;;  %v2265_v3 = vrot.slane %v2253_v42, 2  ;;  %v3151_v25 = vmul.f32 0.0010283804, %v2916_v22  ;;  %v3379_v10 = vrot.slane %v8916_v14, 5  ;;  %v3729_v42 = vpop.f32.mrf.mxu1 }
 0x255   : > { %v3439_v34 = vrot.slane %v8902_v33, 7  ;;  %v8938_v46 = vadd.f32 %v10803_v35, %v3463_v55  ;;  %v2319_v22 = vsel %vm1376_vm4, %v2317_v5, %v2318_v54  ;;  %v2373_v14 = vsel %vm1431_vm6, %v2371_v45, %v2372_v18  ;;  %v4682_v18 = vpop.f32.mrf.mxu0 }
 0x256   : > { %v2277_v26 = vadd.f32 %v2265_v3, %v2247_v47  ;;  %v3163_v2 = vadd.f32 %v3151_v25, %v8857_v44  ;;  %v2425_v19 = vrot.slane %v2396_v0, 5  ;;  %v8945_v36 = vsel %vm1517_vm8, %v2455_v9, %v2456_v43  ;;  %v6216_v45 = vpop.f32.mrf.mxu1 }
 0x257   : > { %10804 = vst [vmem:[#allocation102_spill] sm:$0xff] %v8938_v46  ;;  %10805 = vst [vmem:[#allocation103_spill] sm:$0xff] %v8945_v36  ;;  %v3879_v35 = vmul.f32 0.0010283804, %v6210_v15  ;;  %v10808_v44 = vrot.slane %v10807_v57, 1  ;;  %v10809_v31 = vrot.slane %v8881_v50, 5 }
 0x258   : > { %v2331_v60 = vadd.f32 %v2319_v22, %v2277_v26  ;;  %v3176_v53 = vmul.f32 0.0075987563, %v3163_v2  ;;  %v3206_v32 = vmul.f32 0.036000773, %v3163_v2  ;;  %v3241_v55 = vmul.f32 0.10936069, %v3163_v2  ;;  %v3739_v38 = vpop.f32.mrf.mxu1 }
 0x259   : > { %v3295_v47 = vmul.f32 0.21300554, %v3163_v2  ;;  %v3349_v3 = vmul.f32 0.26601174, %v3163_v2  ;;  %v1320_v25 = vadd.f32 %v10808_v44, %v10806_v30  ;;  %v3170_v11 = vmul.f32 0.0010283804, %v3163_v2  ;;  %v6268_v44 = vpop.f32.mrf.mxu0 }
 0x25a   : > { %v2385_v13 = vadd.f32 %v2373_v14, %v2331_v60  ;;  %v3188_v54 = vrot.slane %v3176_v53, 1  ;;  %v3891_v5 = vmul.f32 0.0075987563, %v6213_v24  ;;  %v3270_v0 = vrot.slane %v3241_v55, 3 }
 0x25b   : > { %v3324_v43 = vrot.slane %v3295_v47, 4  ;;  %v3378_v9 = vrot.slane %v3349_v3, 5  ;;  %v4832_v26 = vmul.f32 0.0010283804, %v6262_v6  ;;  %v3218_v29 = vrot.slane %v3206_v32, 2 }
 0x25c   : > { %v3200_v22 = vadd.f32 %v3188_v54, %v3170_v11  ;;  %v3408_v15 = vrot.slane %v3295_v47, 6  ;;  %v3878_v46 = vmul.f32 0.0010283804, %v3719_v56  ;;  %v2427_v1 = vsel %vm1486_vm7, %v2425_v19, %v10809_v31  ;;  %v4692_v54 = vpop.f32.mrf.mxu0 }
 0x25d   : > { %v3438_v57 = vrot.slane %v3241_v55, 7  ;;  %v4831_v30 = vmul.f32 0.0010283804, %v4672_v12  ;;  %v3881_v60 = vmul.f32 0.0010283804, %v6213_v24  ;;  %v8953_v2 = vadd.f32 %v2427_v1, %v2385_v13 }
 0x25e   : > { %v3230_v53 = vadd.f32 %v3218_v29, %v3200_v22  ;;  %v3903_v14 = vadd.f32 %v3891_v5, %v3879_v35  ;;  %v10812_v3 = vrot.slane %v10811_v41, 2  ;;  %v10814_v11 = vrot.slane %v8902_v33, 3  ;;  %v6219_v5 = vpop.f32.mrf.mxu1 }
 0x25f   : > { %10810 = vst [vmem:[#allocation39_spill] sm:$0xff] %v8953_v2  ;;  %v3326_v50 = vsel %vm1431_vm6, %v3324_v43, %v3325_v16  ;;  %v3380_v31 = vsel %vm1486_vm7, %v3378_v9, %v3379_v10  ;;  %v4844_v12 = vmul.f32 0.0075987563, %v6265_v63  ;;  %v3410_v1 = vsel %vm1517_vm8, %v3408_v15, %v3409_v8 }
 0x260   : > { %v8957_v6 = vadd.f32 %v10812_v3, %v1320_v25  ;;  %v3272_v56 = vsel %vm1376_vm4, %v3270_v0, %v10814_v11  ;;  %v3890_v29 = vmul.f32 0.0075987563, %v3729_v42  ;;  %v4843_v13 = vmul.f32 0.0075987563, %v4682_v18 }
 0x261   : > { %v3284_v24 = vadd.f32 %v3272_v56, %v3230_v53  ;;  %v3440_v19 = vsel %vm1548_vm9, %v3438_v57, %v3439_v34  ;;  %v4834_v32 = vmul.f32 0.0010283804, %v6265_v63  ;;  %v3893_v41 = vmul.f32 0.0075987563, %v6216_v45 }
 0x262   : > { %10813 = vst [vmem:[#allocation25_spill] sm:$0xff] %v8957_v6  ;;  %v3915_v35 = vmul.f32 0.036000773, %v6216_v45  ;;  %v3880_v47 = vmul.f32 0.0010283804, %v3729_v42  ;;  %v4856_v16 = vadd.f32 %v4844_v12, %v4832_v26  ;;  %v3902_v22 = vadd.f32 %v3890_v29, %v3878_v46 }
 0x263   : > { %v3338_v55 = vadd.f32 %v3326_v50, %v3284_v24  ;;  %v4833_v33 = vmul.f32 0.0010283804, %v4682_v18  ;;  %v4846_v25 = vmul.f32 0.0075987563, %v6268_v44  ;;  %v3883_v0 = vmul.f32 0.0010283804, %v6216_v45  ;;  %v6271_v18 = vpop.f32.mrf.mxu0  ;;  %v3749_v50 = vpop.f32.mrf.mxu1 }
 0x264   : > { %v4868_v10 = vmul.f32 0.036000773, %v6268_v44  ;;  %v3892_v43 = vmul.f32 0.0075987563, %v3739_v38  ;;  %v4855_v8 = vadd.f32 %v4843_v13, %v4831_v30  ;;  %v4836_v15 = vmul.f32 0.0010283804, %v6268_v44 }
 0x265   : > { %v3392_v9 = vadd.f32 %v3380_v31, %v3338_v55  ;;  %v3905_v53 = vadd.f32 %v3893_v41, %v3881_v60  ;;  %v3927_v3 = vadd.f32 %v3915_v35, %v3903_v14  ;;  %v3914_v34 = vmul.f32 0.036000773, %v3739_v38  ;;  %v6222_v41 = vpop.f32.mrf.mxu1 }
 0x266   : > { %v4845_v63 = vmul.f32 0.0075987563, %v4692_v54  ;;  %v4858_v11 = vadd.f32 %v4846_v25, %v4834_v32  ;;  %v3882_v56 = vmul.f32 0.0010283804, %v3739_v38  ;;  %v4867_v42 = vmul.f32 0.036000773, %v4692_v54  ;;  %v4702_v32 = vpop.f32.mrf.mxu0 }
 0x267   : > { %v3422_v57 = vadd.f32 %v3410_v1, %v3392_v9  ;;  %v4880_v24 = vadd.f32 %v4868_v10, %v4856_v16  ;;  %v3904_v7 = vadd.f32 %v3892_v43, %v3880_v47  ;;  %v4835_v26 = vmul.f32 0.0010283804, %v4692_v54 }
 0x268   : > { %v3895_v45 = vmul.f32 0.0075987563, %v6219_v5  ;;  %v3917_v4 = vmul.f32 0.036000773, %v6219_v5  ;;  %v3939_v31 = vmul.f32 0.10936069, %v6219_v5  ;;  %v3926_v30 = vadd.f32 %v3914_v34, %v3902_v22 }
 0x269   : > { %v3452_v12 = vadd.f32 %v3440_v19, %v3422_v57  ;;  %v4848_v46 = vmul.f32 0.0075987563, %v6271_v18  ;;  %v4857_v44 = vadd.f32 %v4845_v63, %v4833_v33  ;;  %v3885_v60 = vmul.f32 0.0010283804, %v6219_v5  ;;  %v6274_v57 = vpop.f32.mrf.mxu0 }
 0x26a   : > { %v4870_v14 = vmul.f32 0.036000773, %v6271_v18  ;;  %v4879_v1 = vadd.f32 %v4867_v42, %v4855_v8  ;;  %v4892_v13 = vmul.f32 0.10936069, %v6271_v18  ;;  %v3894_v38 = vmul.f32 0.0075987563, %v3749_v50 }
 0x26b   : > { %v3464_v29 = vadd.f32 %v8918_v59, %v3452_v12  ;;  %v3907_v35 = vadd.f32 %v3895_v45, %v3883_v0  ;;  %v4838_v55 = vmul.f32 0.0010283804, %v6271_v18  ;;  %v3916_v47 = vmul.f32 0.036000773, %v3749_v50  ;;  %v3759_v0 = vpop.f32.mrf.mxu1 }
 0x26c   : > { %v3938_v25 = vmul.f32 0.10936069, %v3749_v50  ;;  %v3929_v54 = vadd.f32 %v3917_v4, %v3905_v53  ;;  %v3951_v19 = vadd.f32 %v3939_v31, %v3927_v3  ;;  %v4860_v16 = vadd.f32 %v4848_v46, %v4836_v15 }
 0x26d   : > { %v4847_v10 = vmul.f32 0.0075987563, %v4702_v32  ;;  %v4882_v43 = vadd.f32 %v4870_v14, %v4858_v11  ;;  %v3884_v9 = vmul.f32 0.0010283804, %v3749_v50  ;;  %v4869_v33 = vmul.f32 0.036000773, %v4702_v32 }
 0x26e   : > { %v4891_v5 = vmul.f32 0.10936069, %v4702_v32  ;;  %v10815_v22 = vrot.slane %v8920_v49, 1  ;;  %v4904_v8 = vadd.f32 %v4892_v13, %v4880_v24  ;;  %v3906_v34 = vadd.f32 %v3894_v38, %v3882_v56  ;;  %v4712_v56 = vpop.f32.mrf.mxu0  ;;  %v8971_v13 = vpop.f32.mrf.mxu1 }
 0x26f   : > { %v3897_v63 = vmul.f32 0.0075987563, %v6222_v41  ;;  %v3928_v42 = vadd.f32 %v3916_v47, %v3904_v7  ;;  %v3950_v18 = vadd.f32 %v3938_v25, %v3926_v30  ;;  %v4837_v45 = vmul.f32 0.0010283804, %v4702_v32 }
 0x270   : > { %v8969_v59 = vadd.f32 %v10815_v22, %v3464_v29  ;;  %v3919_v4 = vmul.f32 0.036000773, %v6222_v41  ;;  %v4859_v53 = vadd.f32 %v4847_v10, %v4835_v26  ;;  %v3941_v15 = vmul.f32 0.10936069, %v6222_v41 }
 0x271   : > { %v3963_v3 = vmul.f32 0.21300554, %v6222_v41  ;;  %v4850_v11 = vmul.f32 0.0075987563, %v6274_v57  ;;  %v4881_v50 = vadd.f32 %v4869_v33, %v4857_v44  ;;  %v4903_v12 = vadd.f32 %v4891_v5, %v4879_v1 }
 0x272   : > { %10816 = vst [vmem:[#allocation49_spill] sm:$0xff] %v8969_v59  ;;  %v3887_v31 = vmul.f32 0.0010283804, %v6222_v41  ;;  %v4872_v46 = vmul.f32 0.036000773, %v6274_v57  ;;  %v3909_v49 = vadd.f32 %v3897_v63, %v3885_v60  ;;  %v3931_v38 = vadd.f32 %v3919_v4, %v3907_v35  ;;  %v8987_v63 = vpop.f32.mrf.mxu0 }
 0x273   : > { %v4894_v14 = vmul.f32 0.10936069, %v6274_v57  ;;  %v4916_v29 = vmul.f32 0.21300554, %v6274_v57  ;;  %v3896_v24 = vmul.f32 0.0075987563, %v3759_v0  ;;  %v3953_v26 = vadd.f32 %v3941_v15, %v3929_v54  ;;  %v8989_v54 = vpop.f32.mrf.mxu1 }
 0x274   : > { %v8973_v7 = vmul.f32 0.0010283804, %v6274_v57  ;;  %v3918_v30 = vmul.f32 0.036000773, %v3759_v0  ;;  %v3940_v32 = vmul.f32 0.10936069, %v3759_v0  ;;  %v3975_v47 = vadd.f32 %v3963_v3, %v3951_v19 }
 0x275   : > { %v8975_v25 = vadd.f32 %v4850_v11, %v4838_v55  ;;  %v3962_v44 = vmul.f32 0.21300554, %v3759_v0  ;;  %v8977_v1 = vadd.f32 %v4872_v46, %v4860_v16  ;;  %v8979_v41 = vmul.f32 0.0010283804, %v3759_v0  ;;  %v9015_v46 = vpop.f32.mrf.mxu0 }
 0x276   : > { %v4849_v60 = vmul.f32 0.0075987563, %v4712_v56  ;;  %v4871_v10 = vmul.f32 0.036000773, %v4712_v56  ;;  %v8981_v33 = vadd.f32 %v4894_v14, %v4882_v43  ;;  %v8983_v5 = vadd.f32 %v4916_v29, %v4904_v8  ;;  %v6228_v14 = vpop.f32.mrf.mxu1 }
 0x277   : > { %v8985_v35 = vadd.f32 %v3896_v24, %v3884_v9  ;;  %v4893_v22 = vmul.f32 0.10936069, %v4712_v56  ;;  %v8991_v55 = vadd.f32 %v3918_v30, %v3906_v34  ;;  %v8993_v19 = vadd.f32 %v3940_v32, %v3928_v42 }
 0x278   : > { %v8995_v16 = vmul.f32 0.0010283804, %v4712_v56  ;;  %v4915_v57 = vmul.f32 0.21300554, %v4712_v56  ;;  %v8997_v0 = vadd.f32 %v3962_v44, %v3950_v18  ;;  %v8999_v43 = vadd.f32 %v4849_v60, %v4837_v45 }
 0x279   : > { %v3899_v8 = vmul.f32 0.0075987563, %v8971_v13  ;;  %v3921_v9 = vmul.f32 0.036000773, %v8971_v13  ;;  %v9003_v4 = vadd.f32 %v4871_v10, %v4859_v53  ;;  %v3943_v15 = vmul.f32 0.10936069, %v8971_v13 }
 0x27a   : > { %v3965_v34 = vmul.f32 0.21300554, %v8971_v13  ;;  %v3987_v42 = vmul.f32 0.26601174, %v8971_v13  ;;  %v9008_v3 = vadd.f32 %v4893_v22, %v4881_v50  ;;  %v4852_v11 = vmul.f32 0.0075987563, %v8987_v63 }
 0x27b   : > { %v4874_v18 = vmul.f32 0.036000773, %v8987_v63  ;;  %v9013_v45 = vmul.f32 0.10936069, %v8987_v63  ;;  %v9017_v53 = vadd.f32 %v4915_v57, %v4903_v12  ;;  %v9020_v29 = vmul.f32 0.21300554, %v8987_v63 }
 0x27c   : > { %10817 = vst [vmem:[#allocation104_spill] sm:$0xff] %v9008_v3  ;;  %v9023_v24 = vmul.f32 0.26601174, %v8987_v63  ;;  %v9026_v50 = vmul.f32 0.0075987563, %v8989_v54  ;;  %v3911_v12 = vadd.f32 %v3899_v8, %v3887_v31  ;;  %v3933_v22 = vadd.f32 %v3921_v9, %v3909_v49  ;;  %v6280_v31 = vpop.f32.mrf.mxu0  ;;  %v3779_v8 = vpop.f32.mrf.mxu1 }
 0x27d   : > { %10818 = vst [vmem:[#allocation105_spill] sm:$0xff] %v9017_v53  ;;  %v9029_v56 = vmul.f32 0.036000773, %v8989_v54  ;;  %v9032_v30 = vmul.f32 0.10936069, %v8989_v54  ;;  %v3955_v17 = vadd.f32 %v3943_v15, %v3931_v38  ;;  %v3977_v40 = vadd.f32 %v3965_v34, %v3953_v26 }
 0x27e   : > { %v9035_v32 = vmul.f32 0.21300554, %v8989_v54  ;;  %v9038_v44 = vmul.f32 0.26601174, %v8989_v54  ;;  %v9041_v60 = vmul.f32 0.0075987563, %v9015_v46  ;;  %v3999_v49 = vadd.f32 %v3987_v42, %v3975_v47  ;;  %v6231_v36 = vpop.f32.mrf.mxu1  ;;  %v4732_v26 = vpop.f32.mrf.mxu0 }
 0x27f   : > { %v9044_v10 = vmul.f32 0.036000773, %v9015_v46  ;;  %v9047_v57 = vmul.f32 0.10936069, %v9015_v46  ;;  %v9050_v59 = vmul.f32 0.21300554, %v9015_v46  ;;  %v4864_v39 = vadd.f32 %v4852_v11, %v8973_v7 }
 0x280   : > { %v9053_v62 = vmul.f32 0.26601174, %v9015_v46  ;;  %v3901_v58 = vmul.f32 0.0075987563, %v6228_v14  ;;  %v3923_v37 = vmul.f32 0.036000773, %v6228_v14  ;;  %v4886_v2 = vadd.f32 %v4874_v18, %v8975_v25 }
 0x281   : > { %10819 = vst [vmem:[#allocation106_spill] sm:$0xff] %v9047_v57  ;;  %10820 = vst [vmem:[#allocation107_spill] sm:$0xff] %v9050_v59  ;;  %v3945_v52 = vmul.f32 0.10936069, %v6228_v14  ;;  %v3967_v61 = vmul.f32 0.21300554, %v6228_v14 }
 0x282   : > { %10821 = vst [vmem:[#allocation108_spill] sm:$0xff] %v9053_v62  ;;  %v3989_v51 = vmul.f32 0.26601174, %v6228_v14  ;;  %v4854_v23 = vmul.f32 0.0075987563, %v6280_v31  ;;  %v3935_v34 = vadd.f32 %v3923_v37, %v3911_v12 }
 0x283   : > { %v4876_v9 = vmul.f32 0.036000773, %v6280_v31  ;;  %v4898_v20 = vmul.f32 0.10936069, %v6280_v31  ;;  %v4920_v27 = vmul.f32 0.21300554, %v6280_v31  ;;  %v3957_v7 = vadd.f32 %v3945_v52, %v3933_v22 }
 0x284   : > { %v4942_v28 = vmul.f32 0.26601174, %v6280_v31  ;;  %v3900_v21 = vmul.f32 0.0075987563, %v3779_v8  ;;  %v3922_v48 = vmul.f32 0.036000773, %v3779_v8  ;;  %v3979_v53 = vadd.f32 %v3967_v61, %v3955_v17 }
 0x285   : > { %v3944_v38 = vmul.f32 0.10936069, %v3779_v8  ;;  %v9057_v15 = vmul.f32 0.21300554, %v3779_v8  ;;  %v9059_v6 = vmul.f32 0.26601174, %v3779_v8  ;;  %v4001_v8 = vadd.f32 %v3989_v51, %v3977_v40 }
 0x286   : > { %v9061_v14 = vmul.f32 0.0075987563, %v4732_v26  ;;  %v9063_v47 = vmul.f32 0.036000773, %v4732_v26  ;;  %v9065_v42 = vmul.f32 0.10936069, %v4732_v26  ;;  %v4015_v3 = vadd.f32 %v3999_v49, %v3967_v61 }
 0x287   : > { %10822 = vst [vmem:[#allocation109_spill] sm:$0xff] %v9059_v6  ;;  %v3889_v11 = vmul.f32 0.0010283804, %v8971_v13  ;;  %v3947_v31 = vmul.f32 0.10936069, %v6231_v36  ;;  %v6283_v6 = vpop.f32.mrf.mxu0  ;;  %v4908_v17 = vadd.f32 %v9013_v45, %v8977_v1  ;;  %v4930_v40 = vadd.f32 %v9020_v29, %v8981_v33 }
 0x288   : > { %10823 = vst [vmem:[#allocation110_spill] sm:$0xff] %v9063_v47  ;;  %10824 = vst [vmem:[#allocation111_spill] sm:$0xff] %v9065_v42  ;;  %v3969_v62 = vmul.f32 0.21300554, %v6231_v36  ;;  %v9068_v25 = vmul.f32 0.21300554, %v4732_v26  ;;  %v4888_v47 = vadd.f32 %v4876_v9, %v4864_v39  ;;  %v4952_v39 = vadd.f32 %v9023_v24, %v8983_v5 }
 0x289   : > { %v9070_v18 = vmul.f32 0.26601174, %v4732_v26  ;;  %v4842_v59 = vmul.f32 0.0010283804, %v8987_v63  ;;  %v3913_v37 = vadd.f32 %v3901_v58, %v3889_v11  ;;  %v3925_v12 = vmul.f32 0.036000773, %v6231_v36  ;;  %v3789_v63 = vpop.f32.mrf.mxu1 }
 0x28a   : > { %v9073_v57 = vadd.f32 %v3947_v31, %v3935_v34  ;;  %v3991_v52 = vmul.f32 0.26601174, %v6231_v36  ;;  %v4878_v13 = vmul.f32 0.036000773, %v6283_v6  ;;  %v9075_v42 = vadd.f32 %v3969_v62, %v3957_v7 }
 0x28b   : > { %v4866_v22 = vadd.f32 %v4854_v23, %v4842_v59  ;;  %v4910_v26 = vadd.f32 %v4898_v20, %v4886_v2  ;;  %v9081_v51 = vadd.f32 %v4001_v8, %v3969_v62  ;;  %v4900_v58 = vmul.f32 0.10936069, %v6283_v6  ;;  %v4742_v8 = vpop.f32.mrf.mxu0 }
 0x28c   : > { %v4944_v61 = vmul.f32 0.26601174, %v6283_v6  ;;  %v9085_v36 = vadd.f32 %v4015_v3, %v3947_v31  ;;  %v4922_v23 = vmul.f32 0.21300554, %v6283_v6  ;;  %v4932_v59 = vadd.f32 %v4920_v27, %v4908_v17  ;;  %v10829_v17 = vld [vmem:[#allocation104_spill] sm:$0xff] }
 0x28d   : > { %v4954_v49 = vadd.f32 %v4942_v28, %v4930_v40  ;;  %v3937_v9 = vadd.f32 %v3925_v12, %v3913_v37  ;;  %v9087_v34 = vadd.f32 %v3991_v52, %v3979_v53  ;;  %v9089_v20 = vadd.f32 %v4878_v13, %v4866_v22  ;;  %v6234_v37 = vpop.f32.mrf.mxu1 }
 0x28e   : > { %v9091_v2 = vadd.f32 %v4900_v58, %v4888_v47  ;;  %v9093_v62 = vadd.f32 %v4922_v23, %v4910_v26  ;;  %v4968_v1 = vadd.f32 %v4952_v39, %v4920_v27  ;;  %v3888_v33 = vmul.f32 0.0010283804, %v8989_v54  ;;  %v10826_v12 = vld [vmem:[#allocation109_spill] sm:$0xff]  ;;  %v10830_v26 = vld [vmem:[#allocation107_spill] sm:$0xff] }
 0x28f   : > { %v3924_v45 = vmul.f32 0.036000773, %v3789_v63  ;;  %v9096_v5 = vadd.f32 %v4944_v61, %v4932_v59  ;;  %v3910_v6 = vadd.f32 %v9026_v50, %v8979_v41  ;;  %v3932_v28 = vadd.f32 %v9029_v56, %v8985_v35  ;;  %v10827_v52 = vld [vmem:[#allocation110_spill] sm:$0xff]  ;;  %v10828_v13 = vld [vmem:[#allocation111_spill] sm:$0xff]  ;;  %v10831_v59 = vld [vmem:[#allocation105_spill] sm:$0xff] }
 0x290   : > { %v3946_v3 = vmul.f32 0.10936069, %v3789_v63  ;;  %v9102_v53 = vadd.f32 %v4954_v49, %v4922_v23  ;;  %v9104_v29 = vadd.f32 %v4968_v1, %v4900_v58  ;;  %v3912_v24 = vadd.f32 %v3900_v21, %v3888_v33  ;;  %v6286_v1 = vpop.f32.mrf.mxu0 }
 0x291   : > { %v3968_v47 = vmul.f32 0.21300554, %v3789_v63  ;;  %v3934_v7 = vadd.f32 %v3922_v48, %v3910_v6  ;;  %v3954_v27 = vadd.f32 %v9032_v30, %v8991_v55  ;;  %v3956_v54 = vadd.f32 %v3944_v38, %v3932_v28 }
 0x292   : > { %v4841_v11 = vmul.f32 0.0010283804, %v9015_v46  ;;  %v9109_v31 = vadd.f32 %v3924_v45, %v3912_v24  ;;  %v3976_v41 = vadd.f32 %v9035_v32, %v8993_v19  ;;  %v3990_v35 = vmul.f32 0.26601174, %v3789_v63  ;;  %v10825_v19 = vld [vmem:[#allocation106_spill] sm:$0xff]  ;;  %v3799_v24 = vpop.f32.mrf.mxu1 }
 0x293   : > { %v4863_v50 = vadd.f32 %v9041_v60, %v8995_v16  ;;  %v3958_v56 = vadd.f32 %v3946_v3, %v3934_v7  ;;  %v3978_v21 = vadd.f32 %v9057_v15, %v3954_v27  ;;  %v3998_v48 = vadd.f32 %v9038_v44, %v8997_v0 }
 0x294   : > { %v4885_v55 = vadd.f32 %v9044_v10, %v8999_v43  ;;  %v3980_v46 = vadd.f32 %v3968_v47, %v3956_v54  ;;  %v4865_v30 = vadd.f32 %v9061_v14, %v4841_v11  ;;  %v4877_v38 = vmul.f32 0.036000773, %v4742_v8 }
 0x295   : > { %v4907_v32 = vadd.f32 %v10825_v19, %v9003_v4  ;;  %v4000_v16 = vadd.f32 %v10826_v12, %v3976_v41  ;;  %v4014_v60 = vadd.f32 %v3998_v48, %v9057_v15  ;;  %v4887_v22 = vadd.f32 %v10827_v52, %v4863_v50  ;;  %v10832_v15 = vld [vmem:[#allocation108_spill] sm:$0xff]  ;;  %v4752_v19 = vpop.f32.mrf.mxu0 }
 0x296   : > { %v4909_v0 = vadd.f32 %v10828_v13, %v4885_v55  ;;  %v4899_v44 = vmul.f32 0.10936069, %v4742_v8  ;;  %v4929_v43 = vadd.f32 %v10830_v26, %v10829_v17  ;;  %v4943_v14 = vmul.f32 0.26601174, %v4742_v8 }
 0x297   : > { %v4931_v10 = vadd.f32 %v9068_v25, %v4907_v32  ;;  %v4002_v40 = vadd.f32 %v3990_v35, %v3978_v21  ;;  %v4921_v58 = vmul.f32 0.21300554, %v4742_v8  ;;  %v3949_v61 = vmul.f32 0.10936069, %v6234_v37 }
 0x298   : > { %v3971_v4 = vmul.f32 0.21300554, %v6234_v37  ;;  %v4016_v39 = vadd.f32 %v4000_v16, %v3968_v47  ;;  %v4034_v63 = vadd.f32 %v4014_v60, %v3946_v3  ;;  %v4889_v23 = vadd.f32 %v4877_v38, %v4865_v30 }
 0x299   : > { %v4951_v49 = vadd.f32 %v10832_v15, %v10831_v59  ;;  %v4911_v33 = vadd.f32 %v4899_v44, %v4887_v22  ;;  %v4933_v45 = vadd.f32 %v4921_v58, %v4909_v0  ;;  %v3993_v6 = vmul.f32 0.26601174, %v6234_v37 }
 0x29a   : > { %v4047_v28 = vmul.f32 0.036000773, %v6234_v37  ;;  %v4953_v7 = vadd.f32 %v9070_v18, %v4929_v43  ;;  %v4955_v27 = vadd.f32 %v4943_v14, %v4931_v10  ;;  %v3961_v11 = vadd.f32 %v3949_v61, %v3937_v9  ;;  %v6237_v37 = vpop.f32.mrf.mxu1  ;;  %v6289_v10 = vpop.f32.mrf.mxu0 }
 0x29b   : > { %v4967_v54 = vadd.f32 %v4951_v49, %v9068_v25  ;;  %v3983_v41 = vadd.f32 %v3971_v4, %v9073_v57  ;;  %v4902_v47 = vmul.f32 0.10936069, %v6286_v1  ;;  %v4924_v3 = vmul.f32 0.21300554, %v6286_v1 }
 0x29c   : > { %v4946_v35 = vmul.f32 0.26601174, %v6286_v1  ;;  %v4969_v50 = vadd.f32 %v4953_v7, %v4921_v58  ;;  %v4019_v21 = vadd.f32 %v9087_v34, %v3971_v4  ;;  %v5000_v48 = vmul.f32 0.036000773, %v6286_v1  ;;  %v3809_v15 = vpop.f32.mrf.mxu1  ;;  %v4762_v7 = vpop.f32.mrf.mxu0 }
 0x29d   : > { %v3948_v8 = vmul.f32 0.10936069, %v3799_v24  ;;  %v4005_v55 = vadd.f32 %v3993_v6, %v9075_v42  ;;  %v4037_v30 = vadd.f32 %v9081_v51, %v3949_v61  ;;  %v4059_v18 = vadd.f32 %v4047_v28, %v9085_v36 }
 0x29e   : > { %v3970_v38 = vmul.f32 0.21300554, %v3799_v24  ;;  %v4987_v25 = vadd.f32 %v4967_v54, %v4899_v44  ;;  %v4914_v9 = vadd.f32 %v4902_v47, %v9089_v20  ;;  %v4936_v57 = vadd.f32 %v4924_v3, %v9091_v2 }
 0x29f   : > { %v4958_v32 = vadd.f32 %v4946_v35, %v9093_v62  ;;  %v4972_v34 = vadd.f32 %v9096_v5, %v4924_v3  ;;  %v4990_v12 = vadd.f32 %v9102_v53, %v4902_v47  ;;  %v3992_v16 = vmul.f32 0.26601174, %v3799_v24 }
 0x2a0   : > { %v4046_v42 = vmul.f32 0.036000773, %v3799_v24  ;;  %v5012_v51 = vadd.f32 %v5000_v48, %v9104_v29  ;;  %v3960_v36 = vadd.f32 %v3948_v8, %v9109_v31  ;;  %v4923_v60 = vmul.f32 0.21300554, %v4752_v19 }
 0x2a1   : > { %v4945_v52 = vmul.f32 0.26601174, %v4752_v19  ;;  %v3982_v22 = vadd.f32 %v3970_v38, %v3958_v56  ;;  %v4901_v13 = vmul.f32 0.10936069, %v4752_v19  ;;  %v4999_v20 = vmul.f32 0.036000773, %v4752_v19 }
 0x2a2   : > { %v3973_v0 = vmul.f32 0.21300554, %v6237_v37  ;;  %v4004_v2 = vadd.f32 %v3992_v16, %v3980_v46  ;;  %v4018_v44 = vadd.f32 %v4002_v40, %v3970_v38  ;;  %v4036_v62 = vadd.f32 %v4016_v39, %v3948_v8 }
 0x2a3   : > { %v4058_v17 = vadd.f32 %v4046_v42, %v4034_v63  ;;  %v4913_v26 = vadd.f32 %v4901_v13, %v4889_v23  ;;  %v4935_v5 = vadd.f32 %v4923_v60, %v4911_v33  ;;  %v4957_v43 = vadd.f32 %v4945_v52, %v4933_v45 }
 0x2a4   : > { %v3995_v53 = vmul.f32 0.26601174, %v6237_v37  ;;  %v4971_v14 = vadd.f32 %v4955_v27, %v4923_v60  ;;  %v4027_v58 = vmul.f32 0.10936069, %v6237_v37  ;;  %v4049_v29 = vmul.f32 0.036000773, %v6237_v37 }
 0x2a5   : > { %v4071_v61 = vmul.f32 0.0075987563, %v6237_v37  ;;  %v4989_v31 = vadd.f32 %v4969_v50, %v4901_v13  ;;  %v5011_v4 = vadd.f32 %v4999_v20, %v4987_v25  ;;  %v3985_v59 = vadd.f32 %v3973_v0, %v3961_v11 }
 0x2a6   : > { %v4948_v56 = vmul.f32 0.26601174, %v6289_v10  ;;  %v9146_v49 = vadd.f32 %v4005_v55, %v3973_v0  ;;  %v4926_v46 = vmul.f32 0.21300554, %v6289_v10  ;;  %v4980_v40 = vmul.f32 0.10936069, %v6289_v10 }
 0x2a7   : > { %v5002_v39 = vmul.f32 0.036000773, %v6289_v10  ;;  %v9148_v63 = vadd.f32 %v3995_v53, %v3983_v41  ;;  %v9150_v23 = vadd.f32 %v4027_v58, %v4019_v21  ;;  %v4061_v1 = vadd.f32 %v4049_v29, %v4037_v30  ;;  %v6240_v30 = vpop.f32.mrf.mxu1 }
 0x2a8   : > { %v4083_v33 = vadd.f32 %v4071_v61, %v4059_v18  ;;  %v9152_v45 = vadd.f32 %v4926_v46, %v4914_v9  ;;  %v5024_v6 = vmul.f32 0.0075987563, %v6289_v10  ;;  %v3972_v28 = vmul.f32 0.21300554, %v3809_v15 }
 0x2a9   : > { %v3994_v24 = vmul.f32 0.26601174, %v3809_v15  ;;  %v9154_v27 = vadd.f32 %v4948_v56, %v4936_v57  ;;  %v4026_v54 = vmul.f32 0.10936069, %v3809_v15  ;;  %v4048_v11 = vmul.f32 0.036000773, %v3809_v15  ;;  %v3819_v13 = vpop.f32.mrf.mxu1 }
 0x2aa   : > { %v4070_v47 = vmul.f32 0.0075987563, %v3809_v15  ;;  %v9156_v3 = vadd.f32 %v4958_v32, %v4926_v46  ;;  %v9158_v35 = vadd.f32 %v4980_v40, %v4972_v34  ;;  %v5014_v41 = vadd.f32 %v5002_v39, %v4990_v12  ;;  %v6292_v34 = vpop.f32.mrf.mxu0 }
 0x2ab   : > { %v5036_v50 = vadd.f32 %v5024_v6, %v5012_v51  ;;  %v9160_v21 = vadd.f32 %v3972_v28, %v3960_v36  ;;  %v9162_v48 = vadd.f32 %v3994_v24, %v3982_v22  ;;  %v9164_v8 = vadd.f32 %v4004_v2, %v3972_v28 }
 0x2ac   : > { %v4925_v55 = vmul.f32 0.21300554, %v4762_v7  ;;  %v9166_v18 = vadd.f32 %v4026_v54, %v4018_v44  ;;  %v4947_v38 = vmul.f32 0.26601174, %v4762_v7  ;;  %v4979_v19 = vmul.f32 0.10936069, %v4762_v7  ;;  %v4772_v54 = vpop.f32.mrf.mxu0 }
 0x2ad   : > { %10833 = vst [vmem:[#allocation106_spill] sm:$0xff] %v9164_v8  ;;  %v5001_v25 = vmul.f32 0.036000773, %v4762_v7  ;;  %v4060_v9 = vadd.f32 %v4048_v11, %v4036_v62  ;;  %v4082_v57 = vadd.f32 %v4070_v47, %v4058_v17  ;;  %v5023_v37 = vmul.f32 0.0075987563, %v4762_v7 }
 0x2ae   : > { %v9168_v32 = vadd.f32 %v4925_v55, %v4913_v26  ;;  %v9170_v12 = vadd.f32 %v4947_v38, %v4935_v5  ;;  %v9172_v16 = vadd.f32 %v4957_v43, %v4925_v55  ;;  %v3997_v42 = vmul.f32 0.26601174, %v6240_v30 }
 0x2af   : > { %v9174_v51 = vmul.f32 0.21300554, %v6240_v30  ;;  %v9176_v36 = vadd.f32 %v4979_v19, %v4971_v14  ;;  %v9178_v60 = vmul.f32 0.10936069, %v6240_v30  ;;  %v4051_v52 = vmul.f32 0.036000773, %v6240_v30 }
 0x2b0   : > { %10834 = vst [vmem:[#allocation109_spill] sm:$0xff] %v9168_v32  ;;  %10835 = vst [vmem:[#allocation110_spill] sm:$0xff] %v9170_v12  ;;  %v4073_v22 = vmul.f32 0.0075987563, %v6240_v30  ;;  %v5013_v20 = vadd.f32 %v5001_v25, %v4989_v31  ;;  %v4095_v0 = vmul.f32 0.0010283804, %v6240_v30  ;;  %v9184_v62 = vadd.f32 %v5023_v37, %v5011_v4 }
 0x2b1   : > { %10836 = vst [vmem:[#allocation111_spill] sm:$0xff] %v9172_v16  ;;  %v9180_v2 = vmul.f32 0.26601174, %v6292_v34  ;;  %v9182_v44 = vmul.f32 0.21300554, %v6292_v34  ;;  %v9194_v31 = vadd.f32 %v3997_v42, %v3985_v59  ;;  %v9237_v37 = vadd.f32 %v4051_v52, %v9150_v23 }
 0x2b2   : > { %v9186_v17 = vmul.f32 0.10936069, %v6292_v34  ;;  %v5004_v26 = vmul.f32 0.036000773, %v6292_v34  ;;  %v5026_v5 = vmul.f32 0.0075987563, %v6292_v34  ;;  %v4107_v43 = vadd.f32 %v4095_v0, %v4083_v33 }
 0x2b3   : > { %v5048_v53 = vmul.f32 0.0010283804, %v6292_v34  ;;  %v9188_v10 = vmul.f32 0.26601174, %v3819_v13  ;;  %v9190_v14 = vmul.f32 0.21300554, %v3819_v13  ;;  %v9206_v6 = vadd.f32 %v4073_v22, %v4061_v1 }
 0x2b4   : > { %v9192_v58 = vmul.f32 0.10936069, %v3819_v13  ;;  %v4050_v29 = vmul.f32 0.036000773, %v3819_v13  ;;  %v4072_v61 = vmul.f32 0.0075987563, %v3819_v13  ;;  %v9221_v19 = vadd.f32 %v5026_v5, %v5014_v41 }
 0x2b5   : > { %10837 = vst [vmem:[#allocation104_spill] sm:$0xff] %v9190_v14  ;;  %v9196_v56 = vmul.f32 0.10936069, %v4107_v43  ;;  %v4239_v4 = vmul.f32 0.21300554, %v4107_v43  ;;  %v9198_v46 = vadd.f32 %v5048_v53, %v5036_v50  ;;  %v9240_v0 = vadd.f32 %v5004_v26, %v9158_v35 }
 0x2b6   : > { %10838 = vst [vmem:[#allocation107_spill] sm:$0xff] %v9192_v58  ;;  %v4293_v15 = vmul.f32 0.26601174, %v4107_v43  ;;  %v9200_v40 = vmul.f32 0.036000773, %v4107_v43  ;;  %v9234_v5 = vadd.f32 %v4072_v61, %v4060_v9  ;;  %v9245_v9 = vadd.f32 %v4050_v29, %v9166_v18 }
 0x2b7   : > { %10839 = vst [vmem:[#allocation105_spill] sm:$0xff] %v9198_v46  ;;  %v9202_v39 = vmul.f32 0.0075987563, %v4107_v43  ;;  %v9204_v33 = vmul.f32 0.0010283804, %v4107_v43  ;;  %v4209_v28 = vrot.slane %v9196_v56, 3 }
 0x2b8   : > { %10840 = vst [vmem:[#allocation108_spill] sm:$0xff] %v9200_v40  ;;  %v4263_v24 = vrot.slane %v4239_v4, 4  ;;  %v4317_v7 = vrot.slane %v4293_v15, 5  ;;  %v4347_v59 = vrot.slane %v4239_v4, 6  ;;  %v4377_v11 = vrot.slane %v9196_v56, 7 }
 0x2b9   : > { %10841 = vst [vmem:[#allocation112_spill] sm:$0xff] %v9202_v39  ;;  %10842 = vst [vmem:[#allocation113_spill] sm:$0xff] %v9204_v33  ;;  %v9213_v55 = vmul.f32 0.10936069, %v9198_v46  ;;  %v9216_v30 = vmul.f32 0.21300554, %v9198_v46 }
 0x2ba   : > { %v9219_v1 = vmul.f32 0.26601174, %v9198_v46  ;;  %v4094_v38 = vmul.f32 0.0010283804, %v3819_v13  ;;  %v9225_v34 = vmul.f32 0.26601174, %v4772_v54 }
 0x2bb   : > { %10843 = vst [vmem:[#allocation114_spill] sm:$0xff] %v9213_v55  ;;  %10844 = vst [vmem:[#allocation115_spill] sm:$0xff] %v9216_v30  ;;  %v5162_v25 = vrot.slane %v9213_v55, 3  ;;  %v9227_v42 = vmul.f32 0.21300554, %v4772_v54  ;;  %v5216_v22 = vrot.slane %v9216_v30, 4 }
 0x2bc   : > { %10845 = vst [vmem:[#allocation116_spill] sm:$0xff] %v9219_v1  ;;  %10846 = vst [vmem:[#allocation117_spill] sm:$0xff] %v9225_v34  ;;  %v4106_v53 = vadd.f32 %v4094_v38, %v4082_v57  ;;  %v9232_v56 = vmul.f32 0.10936069, %v4772_v54  ;;  %v5003_v13 = vmul.f32 0.036000773, %v4772_v54  ;;  %v6243_v38 = vpop.f32.mrf.mxu1 }
 0x2bd   : > { %10847 = vst [vmem:[#allocation118_spill] sm:$0xff] %v9227_v42  ;;  %v5025_v41 = vmul.f32 0.0075987563, %v4772_v54  ;;  %v5047_v57 = vmul.f32 0.0010283804, %v4772_v54 }
 0x2be   : > { %10848 = vst [vmem:[#allocation119_spill] sm:$0xff] %v9232_v56  ;;  %v4118_v4 = vmul.f32 0.0010283804, %v4106_v53  ;;  %v4124_v15 = vmul.f32 0.0075987563, %v4106_v53 }
 0x2bf   : > { %v4154_v50 = vmul.f32 0.036000773, %v4106_v53  ;;  %v4184_v47 = vmul.f32 0.10936069, %v4106_v53  ;;  %v4238_v33 = vmul.f32 0.21300554, %v4106_v53  ;;  %v9242_v55 = vadd.f32 %v5025_v41, %v5013_v20 }
 0x2c0   : > { %v4292_v46 = vmul.f32 0.26601174, %v4106_v53  ;;  %v4136_v43 = vrot.slane %v4124_v15, 1  ;;  %v5059_v53 = vadd.f32 %v5047_v57, %v9184_v62  ;;  %v9250_v54 = vmul.f32 0.21300554, %v6243_v38  ;;  %v6295_v57 = vpop.f32.mrf.mxu0 }
 0x2c1   : > { %v4208_v61 = vrot.slane %v4184_v47, 3  ;;  %v4262_v30 = vrot.slane %v4238_v33, 4  ;;  %v4346_v39 = vrot.slane %v4238_v33, 6  ;;  %v4166_v52 = vrot.slane %v4154_v50, 2 }
 0x2c2   : > { %v4316_v1 = vrot.slane %v4292_v46, 5  ;;  %v4148_v23 = vadd.f32 %v4136_v43, %v4118_v4  ;;  %v4376_v40 = vrot.slane %v4184_v47, 7  ;;  %v9252_v20 = vmul.f32 0.10936069, %v6243_v38 }
 0x2c3   : > { %v4210_v35 = vsel %vm1376_vm4, %v4208_v61, %v4209_v28  ;;  %v4264_v26 = vsel %vm1431_vm6, %v4262_v30, %v4263_v24  ;;  %v4348_v29 = vsel %vm1517_vm8, %v4346_v39, %v4347_v59  ;;  %v5077_v46 = vmul.f32 0.0075987563, %v5059_v53 }
 0x2c4   : > { %v4178_v41 = vadd.f32 %v4166_v52, %v4148_v23  ;;  %v4318_v18 = vsel %vm1486_vm7, %v4316_v1, %v4317_v7  ;;  %v4378_v33 = vsel %vm1548_vm9, %v4376_v40, %v4377_v11  ;;  %v5107_v50 = vmul.f32 0.036000773, %v5059_v53 }
 0x2c5   : > { %v9257_v47 = vmul.f32 0.10936069, %v5059_v53  ;;  %v9259_v62 = vmul.f32 0.21300554, %v5059_v53  ;;  %v5071_v43 = vmul.f32 0.0010283804, %v5059_v53  ;;  %v9268_v39 = vadd.f32 %v5003_v13, %v9176_v36 }
 0x2c6   : > { %v4232_v28 = vadd.f32 %v4210_v35, %v4178_v41  ;;  %v5089_v24 = vrot.slane %v5077_v46, 1  ;;  %v9261_v30 = vmul.f32 0.26601174, %v5059_v53  ;;  %v9265_v7 = vmul.f32 0.036000773, %v6243_v38  ;;  %v3829_v35 = vpop.f32.mrf.mxu1 }
 0x2c7   : > { %10849 = vst [vmem:[#allocation120_spill] sm:$0xff] %v9257_v47  ;;  %10850 = vst [vmem:[#allocation121_spill] sm:$0xff] %v9259_v62  ;;  %v5161_v4 = vrot.slane %v9257_v47, 3  ;;  %v5215_v15 = vrot.slane %v9259_v62, 4  ;;  %v5119_v11 = vrot.slane %v5107_v50, 2 }
 0x2c8   : > { %10851 = vst [vmem:[#allocation122_spill] sm:$0xff] %v9261_v30  ;;  %v4286_v40 = vadd.f32 %v4264_v26, %v4232_v28  ;;  %v5101_v59 = vadd.f32 %v5089_v24, %v5071_v43  ;;  %v4097_v53 = vmul.f32 0.0010283804, %v6243_v38  ;;  %v4075_v36 = vmul.f32 0.0075987563, %v6243_v38 }
 0x2c9   : > { %v5163_v61 = vsel %vm1376_vm4, %v5161_v4, %v5162_v25  ;;  %v9275_v56 = vsel %vm1431_vm6, %v5215_v15, %v5216_v22  ;;  %v9278_v26 = vmul.f32 0.21300554, %v6295_v57  ;;  %v9280_v50 = vmul.f32 0.10936069, %v6295_v57 }
 0x2ca   : > { %v4340_v41 = vadd.f32 %v4318_v18, %v4286_v40  ;;  %v5131_v46 = vadd.f32 %v5119_v11, %v5101_v59  ;;  %10852 = vst [vmem:[#allocation123_spill] sm:$0xff] %v9275_v56  ;;  %v4109_v13 = vadd.f32 %v4097_v53, %v9206_v6  ;;  %v5050_v28 = vmul.f32 0.0010283804, %v6295_v57 }
 0x2cb   : > { %v9282_v43 = vmul.f32 0.036000773, %v6295_v57  ;;  %v5028_v24 = vmul.f32 0.0075987563, %v6295_v57  ;;  %v9284_v4 = vmul.f32 0.21300554, %v3829_v35 }
 0x2cc   : > { %v4370_v25 = vadd.f32 %v4348_v29, %v4340_v41  ;;  %v9286_v52 = vmul.f32 0.10936069, %v4109_v13  ;;  %v9288_v18 = vmul.f32 0.21300554, %v4109_v13  ;;  %v9290_v22 = vmul.f32 0.26601174, %v4109_v13 }
 0x2cd   : > { %10853 = vst [vmem:[#allocation124_spill] sm:$0xff] %v9284_v4  ;;  %v9293_v38 = vadd.f32 %v5050_v28, %v9221_v19  ;;  %v9295_v6 = vadd.f32 %v5163_v61, %v5131_v46  ;;  %v9297_v15 = vmul.f32 0.0075987563, %v4109_v13  ;;  %v9299_v40 = vmul.f32 0.0010283804, %v4109_v13  ;;  %v4782_v28 = vpop.f32.mrf.mxu0 }
 0x2ce   : > { %v9301_v29 = vmul.f32 0.10936069, %v3829_v35  ;;  %v9303_v59 = vadd.f32 %v4378_v33, %v4370_v25  ;;  %v4212_v11 = vrot.slane %v9286_v52, 3  ;;  %v4266_v57 = vrot.slane %v9288_v18, 4 }
 0x2cf   : > { %10854 = vst [vmem:[#allocation125_spill] sm:$0xff] %v9293_v38  ;;  %10855 = vst [vmem:[#allocation126_spill] sm:$0xff] %v9295_v6  ;;  %v9307_v53 = vmul.f32 0.036000773, %v4109_v13  ;;  %v4320_v41 = vrot.slane %v9290_v22, 5  ;;  %v9339_v6 = vpop.f32.mrf.mxu0  ;;  %v4087_v33 = vadd.f32 %v4075_v36, %v9237_v37 }
 0x2d0   : > { %10856 = vst [vmem:[#allocation127_spill] sm:$0xff] %v9297_v15  ;;  %10857 = vst [vmem:[#allocation128_spill] sm:$0xff] %v9299_v40  ;;  %v9313_v46 = vmul.f32 0.10936069, %v9293_v38  ;;  %v9318_v25 = vmul.f32 0.21300554, %v9293_v38  ;;  %v6246_v40 = vpop.f32.mrf.mxu1 }
 0x2d1   : > { %10858 = vst [vmem:[#allocation129_spill] sm:$0xff] %v9301_v29  ;;  %10859 = vst [vmem:[#allocation130_spill] sm:$0xff] %v9303_v59  ;;  %v9321_v13 = vmul.f32 0.26601174, %v9293_v38  ;;  %v9326_v61 = vmul.f32 0.036000773, %v9293_v38 }
 0x2d2   : > { %10860 = vst [vmem:[#allocation131_spill] sm:$0xff] %v9313_v46  ;;  %10861 = vst [vmem:[#allocation132_spill] sm:$0xff] %v9318_v25  ;;  %v9329_v19 = vmul.f32 0.0075987563, %v9293_v38  ;;  %v9333_v47 = vmul.f32 0.036000773, %v3829_v35 }
 0x2d3   : > { %10862 = vst [vmem:[#allocation133_spill] sm:$0xff] %v9326_v61  ;;  %v4074_v62 = vmul.f32 0.0075987563, %v3829_v35  ;;  %v4096_v56 = vmul.f32 0.0010283804, %v3829_v35 }
 0x2d4   : > { %10863 = vst [vmem:[#allocation134_spill] sm:$0xff] %v9329_v19  ;;  %10864 = vst [vmem:[#allocation135_spill] sm:$0xff] %v9333_v47  ;;  %v9337_v23 = vmul.f32 0.21300554, %v4782_v28  ;;  %v9341_v61 = vmul.f32 0.10936069, %v4782_v28 }
 0x2d5   : > { %v9343_v38 = vmul.f32 0.036000773, %v4782_v28  ;;  %v5027_v1 = vmul.f32 0.0075987563, %v4782_v28  ;;  %v4108_v15 = vadd.f32 %v4096_v56, %v9234_v5  ;;  %v5049_v59 = vmul.f32 0.0010283804, %v4782_v28 }
 0x2d6   : > { %10865 = vst [vmem:[#allocation136_spill] sm:$0xff] %v9337_v23  ;;  %10866 = vst [vmem:[#allocation137_spill] sm:$0xff] %v9341_v61  ;;  %v9347_v16 = vmul.f32 0.10936069, %v6246_v40  ;;  %v9349_v30 = vmul.f32 0.036000773, %v6246_v40  ;;  %v9357_v61 = vadd.f32 %v5028_v24, %v9240_v0  ;;  %v9361_v28 = vadd.f32 %v4074_v62, %v9245_v9 }
 0x2d7   : > { %10867 = vst [vmem:[#allocation138_spill] sm:$0xff] %v9343_v38  ;;  %v9351_v22 = vmul.f32 0.0075987563, %v6246_v40  ;;  %v4099_v35 = vmul.f32 0.0010283804, %v6246_v40  ;;  %v5061_v37 = vadd.f32 %v5049_v59, %v9242_v55  ;;  %v9366_v9 = vadd.f32 %v5027_v1, %v9268_v39 }
 0x2d8   : > { %v9354_v19 = vmul.f32 0.10936069, %v9339_v6  ;;  %v4119_v38 = vmul.f32 0.0010283804, %v4108_v15  ;;  %v4125_v23 = vmul.f32 0.0075987563, %v4108_v15 }
 0x2d9   : > { %v4155_v42 = vmul.f32 0.036000773, %v4108_v15  ;;  %v4186_v56 = vmul.f32 0.10936069, %v4108_v15  ;;  %v4240_v5 = vmul.f32 0.21300554, %v4108_v15  ;;  %v4111_v32 = vadd.f32 %v4099_v35, %v4087_v33 }
 0x2da   : > { %v4294_v36 = vmul.f32 0.26601174, %v4108_v15  ;;  %v4137_v12 = vrot.slane %v4125_v23, 1  ;;  %v5078_v40 = vmul.f32 0.0075987563, %v5061_v37  ;;  %v10868_v35 = vrot.slane %v9288_v18, 6 }
 0x2db   : > { %v4167_v34 = vrot.slane %v4155_v42, 2  ;;  %v4211_v47 = vrot.slane %v4186_v56, 3  ;;  %v4265_v29 = vrot.slane %v4240_v5, 4  ;;  %v4349_v0 = vrot.slane %v4240_v5, 6 }
 0x2dc   : > { %v4319_v4 = vrot.slane %v4294_v36, 5  ;;  %v4149_v24 = vadd.f32 %v4137_v12, %v4119_v38  ;;  %v5072_v58 = vmul.f32 0.0010283804, %v5061_v37  ;;  %v5090_v8 = vrot.slane %v5078_v40, 1 }
 0x2dd   : > { %v5108_v14 = vmul.f32 0.036000773, %v5061_v37  ;;  %v4213_v55 = vsel %vm1376_vm4, %v4211_v47, %v4212_v11  ;;  %v4267_v59 = vsel %vm1431_vm6, %v4265_v29, %v4266_v57  ;;  %v4379_v15 = vrot.slane %v4186_v56, 7  ;;  %v10902_v40 = vld [vmem:[#allocation137_spill] sm:$0xff] }
 0x2de   : > { %v4179_v62 = vadd.f32 %v4167_v34, %v4149_v24  ;;  %v4321_v42 = vsel %vm1486_vm7, %v4319_v4, %v4320_v41  ;;  %v5102_v23 = vadd.f32 %v5090_v8, %v5072_v58  ;;  %v4351_v12 = vsel %vm1517_vm8, %v4349_v0, %v10868_v35 }
 0x2df   : > { %v5120_v33 = vrot.slane %v5108_v14, 2  ;;  %v9372_v38 = vmul.f32 0.10936069, %v5061_v37  ;;  %v9374_v5 = vmul.f32 0.21300554, %v5061_v37  ;;  %v10871_v34 = vrot.slane %v9286_v52, 7 }
 0x2e0   : > { %v5247_v47 = vmul.f32 0.26601174, %v5061_v37  ;;  %v4233_v11 = vadd.f32 %v4213_v55, %v4179_v62  ;;  %v9376_v57 = vmul.f32 0.10936069, %v4111_v32  ;;  %v9378_v39 = vmul.f32 0.21300554, %v4111_v32 }
 0x2e1   : > { %10869 = vst [vmem:[#allocation139_spill] sm:$0xff] %v9372_v38  ;;  %10870 = vst [vmem:[#allocation140_spill] sm:$0xff] %v9374_v5  ;;  %v5132_v29 = vadd.f32 %v5120_v33, %v5102_v23  ;;  %v4381_v8 = vsel %vm1548_vm9, %v4379_v15, %v10871_v34  ;;  %v5164_v14 = vrot.slane %v9372_v38, 3  ;;  %v5218_v58 = vrot.slane %v9374_v5, 4  ;;  %v3839_v34 = vpop.f32.mrf.mxu1 }
 0x2e2   : > { %v5272_v1 = vrot.slane %v5247_v47, 5  ;;  %v4287_v4 = vadd.f32 %v4267_v59, %v4233_v11  ;;  %v4023_v37 = vadd.f32 %v9174_v51, %v9148_v63  ;;  %v10872_v56 = vrot.slane %v9313_v46, 3 }
 0x2e3   : > { %v9394_v0 = vmul.f32 0.26601174, %v4111_v32  ;;  %v10873_v59 = vrot.slane %v9318_v25, 4  ;;  %v10874_v62 = vrot.slane %v9321_v13, 5  ;;  %v9405_v35 = vmul.f32 0.0075987563, %v4111_v32  ;;  %v6249_v46 = vpop.f32.mrf.mxu1 }
 0x2e4   : > { %v5166_v36 = vsel %vm1376_vm4, %v5164_v14, %v10872_v56  ;;  %v4341_v24 = vadd.f32 %v4321_v42, %v4287_v4  ;;  %v9407_v42 = vmul.f32 0.036000773, %v4111_v32  ;;  %v9413_v13 = vmul.f32 0.036000773, %v9339_v6 }
 0x2e5   : > { %v5186_v55 = vadd.f32 %v5166_v36, %v5132_v29  ;;  %v5220_v15 = vsel %vm1431_vm6, %v5218_v58, %v10873_v59  ;;  %v5274_v63 = vsel %vm1486_vm7, %v5272_v1, %v10874_v62  ;;  %v9409_v29 = vmul.f32 0.0010283804, %v4111_v32  ;;  %v4792_v1 = vpop.f32.mrf.mxu0 }
 0x2e6   : > { %v4371_v47 = vadd.f32 %v4351_v12, %v4341_v24  ;;  %v5052_v58 = vmul.f32 0.0010283804, %v9339_v6  ;;  %v4025_v4 = vadd.f32 %v9250_v54, %v9194_v31  ;;  %v9420_v36 = vmul.f32 0.0075987563, %v9339_v6 }
 0x2e7   : > { %v5240_v11 = vadd.f32 %v5220_v15, %v5186_v55  ;;  %10875 = vst [vmem:[#allocation141_spill] sm:$0xff] %v9409_v29  ;;  %v4041_v32 = vadd.f32 %v9178_v60, %v9146_v49  ;;  %v9425_v55 = vmul.f32 0.10936069, %v3839_v34  ;;  %v9427_v59 = vmul.f32 0.036000773, %v3839_v34 }
 0x2e8   : > { %v4401_v56 = vadd.f32 %v4381_v8, %v4371_v47  ;;  %v5064_v24 = vadd.f32 %v5052_v58, %v9357_v61  ;;  %v4098_v15 = vmul.f32 0.0010283804, %v3839_v34  ;;  %v9431_v41 = vmul.f32 0.0075987563, %v3839_v34 }
 0x2e9   : > { %v9429_v62 = vadd.f32 %v5274_v63, %v5240_v11  ;;  %v9433_v31 = vmul.f32 0.10936069, %v4792_v1  ;;  %v9435_v54 = vmul.f32 0.036000773, %v4792_v1  ;;  %v9451_v11 = vmul.f32 0.0075987563, %v4792_v1 }
 0x2ea   : > { %v9437_v6 = vmul.f32 0.10936069, %v5064_v24  ;;  %v9439_v8 = vmul.f32 0.21300554, %v5064_v24  ;;  %v9441_v49 = vmul.f32 0.26601174, %v5064_v24  ;;  %v4110_v60 = vadd.f32 %v4098_v15, %v9361_v28 }
 0x2eb   : > { %10876 = vst [vmem:[#allocation142_spill] sm:$0xff] %v9429_v62  ;;  %v9445_v61 = vadd.f32 %v9307_v53, %v4401_v56  ;;  %v9447_v47 = vmul.f32 0.036000773, %v5064_v24  ;;  %v9449_v63 = vmul.f32 0.0075987563, %v5064_v24  ;;  %v4043_v51 = vadd.f32 %v9252_v20, %v4023_v37 }
 0x2ec   : > { %10877 = vst [vmem:[#allocation143_spill] sm:$0xff] %v9437_v6  ;;  %v5168_v34 = vrot.slane %v9437_v6, 3  ;;  %v5222_v58 = vrot.slane %v9439_v8, 4  ;;  %v5276_v18 = vrot.slane %v9441_v49, 5  ;;  %v9456_v12 = vmul.f32 0.0010283804, %v5064_v24 }
 0x2ed   : > { %10878 = vst [vmem:[#allocation144_spill] sm:$0xff] %v9447_v47  ;;  %10879 = vst [vmem:[#allocation145_spill] sm:$0xff] %v9449_v63  ;;  %v5306_v14 = vrot.slane %v9439_v8, 6  ;;  %v4120_v53 = vmul.f32 0.0010283804, %v4110_v60  ;;  %v10881_v25 = vrot.slane %v9376_v57, 3  ;;  %v4045_v20 = vadd.f32 %v9347_v16, %v4025_v4 }
 0x2ee   : > { %10880 = vst [vmem:[#allocation146_spill] sm:$0xff] %v9456_v12  ;;  %v4126_v56 = vmul.f32 0.0075987563, %v4110_v60  ;;  %v4156_v15 = vmul.f32 0.036000773, %v4110_v60 }
 0x2ef   : > { %v4188_v33 = vmul.f32 0.10936069, %v4110_v60  ;;  %v4242_v23 = vmul.f32 0.21300554, %v4110_v60  ;;  %v4296_v47 = vmul.f32 0.26601174, %v4110_v60  ;;  %v4065_v60 = vadd.f32 %v9265_v7, %v4041_v32 }
 0x2f0   : > { %v4138_v52 = vrot.slane %v4126_v56, 1  ;;  %v5051_v38 = vmul.f32 0.0010283804, %v4792_v1  ;;  %v4168_v49 = vrot.slane %v4156_v15, 2  ;;  %v4057_v37 = vmul.f32 0.036000773, %v6249_v46 }
 0x2f1   : > { %v4214_v24 = vrot.slane %v4188_v33, 3  ;;  %v4268_v12 = vrot.slane %v4242_v23, 4  ;;  %v4352_v62 = vrot.slane %v4242_v23, 6  ;;  %v4322_v5 = vrot.slane %v4296_v47, 5 }
 0x2f2   : > { %v4150_v8 = vadd.f32 %v4138_v52, %v4120_v53  ;;  %v4382_v28 = vrot.slane %v4188_v33, 7  ;;  %v5063_v6 = vadd.f32 %v5051_v38, %v9366_v9  ;;  %v10882_v56 = vrot.slane %v9378_v39, 4 }
 0x2f3   : > { %v4216_v29 = vsel %vm1376_vm4, %v4214_v24, %v10881_v25  ;;  %v10883_v52 = vrot.slane %v9394_v0, 5  ;;  %v10884_v9 = vrot.slane %v9378_v39, 6  ;;  %v10885_v25 = vrot.slane %v9376_v57, 7 }
 0x2f4   : > { %v4180_v1 = vadd.f32 %v4168_v49, %v4150_v8  ;;  %v4270_v15 = vsel %vm1431_vm6, %v4268_v12, %v10882_v56  ;;  %v5079_v33 = vmul.f32 0.0075987563, %v5063_v6  ;;  %v5109_v4 = vmul.f32 0.036000773, %v5063_v6 }
 0x2f5   : > { %v4324_v23 = vsel %vm1486_vm7, %v4322_v5, %v10883_v52  ;;  %v4354_v38 = vsel %vm1517_vm8, %v4352_v62, %v10884_v9  ;;  %v4384_v16 = vsel %vm1548_vm9, %v4382_v28, %v10885_v25  ;;  %v9480_v7 = vmul.f32 0.10936069, %v5063_v6 }
 0x2f6   : > { %v4234_v32 = vadd.f32 %v4216_v29, %v4180_v1  ;;  %v5073_v47 = vmul.f32 0.0010283804, %v5063_v6  ;;  %v5195_v53 = vmul.f32 0.21300554, %v5063_v6  ;;  %v5249_v12 = vmul.f32 0.26601174, %v5063_v6 }
 0x2f7   : > { %v5091_v49 = vrot.slane %v5079_v33, 1  ;;  %v5167_v0 = vrot.slane %v9480_v7, 3  ;;  %v4067_v5 = vadd.f32 %v9349_v30, %v4043_v51  ;;  %v9484_v39 = vadd.f32 %v4057_v37, %v4045_v20  ;;  %v6301_v33 = vpop.f32.mrf.mxu0 }
 0x2f8   : > { %v4288_v62 = vadd.f32 %v4270_v15, %v4234_v32  ;;  %v5221_v24 = vrot.slane %v5195_v53, 4  ;;  %v5275_v57 = vrot.slane %v5249_v12, 5  ;;  %v5305_v8 = vrot.slane %v5195_v53, 6 }
 0x2f9   : > { %v5103_v28 = vadd.f32 %v5091_v49, %v5073_v47  ;;  %v5121_v56 = vrot.slane %v5109_v4, 2  ;;  %v4079_v9 = vmul.f32 0.0075987563, %v6249_v46  ;;  %v5169_v1 = vsel %vm1376_vm4, %v5167_v0, %v5168_v34 }
 0x2fa   : > { %v4342_v29 = vadd.f32 %v4324_v23, %v4288_v62  ;;  %v5223_v6 = vsel %vm1431_vm6, %v5221_v24, %v5222_v58  ;;  %v4089_v25 = vadd.f32 %v9351_v22, %v4065_v60  ;;  %v5277_v51 = vsel %vm1486_vm7, %v5275_v57, %v5276_v18  ;;  %v3849_v24 = vpop.f32.mrf.mxu1 }
 0x2fb   : > { %v5133_v30 = vadd.f32 %v5121_v56, %v5103_v28  ;;  %v4101_v20 = vmul.f32 0.0010283804, %v6249_v46  ;;  %v4962_v37 = vadd.f32 %v9180_v2, %v9152_v45  ;;  %v9494_v4 = vsel %vm1517_vm8, %v5305_v8, %v5306_v14 }
 0x2fc   : > { %v4372_v15 = vadd.f32 %v4354_v38, %v4342_v29  ;;  %v9496_v32 = vadd.f32 %v4079_v9, %v4067_v5  ;;  %v4976_v34 = vadd.f32 %v9182_v44, %v9154_v27  ;;  %v4994_v22 = vadd.f32 %v9186_v17, %v9156_v3  ;;  %v10886_v9 = vld [vmem:[#allocation104_spill] sm:$0xff] }
 0x2fd   : > { %v5187_v58 = vadd.f32 %v5169_v1, %v5133_v30  ;;  %v4113_v23 = vadd.f32 %v4101_v20, %v4089_v25  ;;  %v5010_v60 = vmul.f32 0.036000773, %v6301_v33  ;;  %v4978_v46 = vadd.f32 %v9278_v26, %v4962_v37  ;;  %v10887_v1 = vld [vmem:[#allocation106_spill] sm:$0xff] }
 0x2fe   : > { %v4402_v18 = vadd.f32 %v4384_v16, %v4372_v15  ;;  %v4996_v45 = vadd.f32 %v9280_v50, %v4976_v34  ;;  %v5032_v2 = vmul.f32 0.0075987563, %v6301_v33  ;;  %v5018_v3 = vadd.f32 %v9282_v43, %v4994_v22  ;;  %v10890_v15 = vld [vmem:[#allocation129_spill] sm:$0xff]  ;;  %v10906_v43 = vld [vmem:[#allocation56_spill] sm:$0xff] }
 0x2ff   : > { %v5241_v38 = vadd.f32 %v5223_v6, %v5187_v58  ;;  %v9504_v14 = vmul.f32 0.10936069, %v4113_v23  ;;  %v9506_v47 = vmul.f32 0.21300554, %v4113_v23  ;;  %v9508_v53 = vmul.f32 0.26601174, %v4113_v23 }
 0x300   : > { %v9510_v27 = vmul.f32 0.0075987563, %v4113_v23  ;;  %v9512_v44 = vmul.f32 0.0010283804, %v4113_v23  ;;  %v5054_v17 = vmul.f32 0.0010283804, %v6301_v33  ;;  %v9516_v16 = vadd.f32 %v9407_v42, %v4402_v18 }
 0x301   : > { %v9518_v26 = vadd.f32 %v5277_v51, %v5241_v38  ;;  %v4218_v50 = vrot.slane %v9504_v14, 3  ;;  %v9521_v12 = vmul.f32 0.036000773, %v4113_v23  ;;  %v4272_v49 = vrot.slane %v9506_v47, 4  ;;  %v10888_v6 = vld [vmem:[#allocation107_spill] sm:$0xff] }
 0x302   : > { %v4326_v0 = vrot.slane %v9508_v53, 5  ;;  %v4356_v5 = vrot.slane %v9506_v47, 6  ;;  %v4386_v62 = vrot.slane %v9504_v14, 7  ;;  %v4998_v57 = vadd.f32 %v9354_v19, %v4978_v46  ;;  %v10889_v19 = vld [vmem:[#allocation124_spill] sm:$0xff]  ;;  %v10894_v46 = vld [vmem:[#allocation109_spill] sm:$0xff] }
 0x303   : > { %v5042_v8 = vadd.f32 %v9420_v36, %v5018_v3  ;;  %v5020_v28 = vadd.f32 %v9413_v13, %v4996_v45  ;;  %v4008_v56 = vadd.f32 %v9188_v10, %v9160_v21  ;;  %v4022_v29 = vadd.f32 %v10886_v9, %v9162_v48  ;;  %v10891_v10 = vld [vmem:[#allocation135_spill] sm:$0xff]  ;;  %v10895_v45 = vld [vmem:[#allocation117_spill] sm:$0xff] }
 0x304   : > { %v4040_v25 = vadd.f32 %v10888_v6, %v10887_v1  ;;  %v9538_v33 = vadd.f32 %v5010_v60, %v4998_v57  ;;  %v4056_v51 = vmul.f32 0.036000773, %v3849_v24  ;;  %v4078_v20 = vmul.f32 0.0075987563, %v3849_v24  ;;  %v4802_v57 = vpop.f32.mrf.mxu0  ;;  %v10897_v1 = vld [vmem:[#allocation110_spill] sm:$0xff] }
 0x305   : > { %v5066_v30 = vadd.f32 %v5054_v17, %v5042_v8  ;;  %v9540_v37 = vadd.f32 %v5032_v2, %v5020_v28  ;;  %v4024_v36 = vadd.f32 %v10889_v19, %v4008_v56  ;;  %v4042_v13 = vadd.f32 %v10890_v15, %v4022_v29  ;;  %v10898_v6 = vld [vmem:[#allocation118_spill] sm:$0xff]  ;;  %v10900_v19 = vld [vmem:[#allocation119_spill] sm:$0xff] }
 0x306   : > { %v4100_v34 = vmul.f32 0.0010283804, %v3849_v24  ;;  %v4064_v23 = vadd.f32 %v10891_v10, %v4040_v25  ;;  %v4961_v2 = vadd.f32 %v10895_v45, %v10894_v46  ;;  %v4975_v25 = vadd.f32 %v10898_v6, %v10897_v1  ;;  %v10901_v10 = vld [vmem:[#allocation136_spill] sm:$0xff]  ;;  %v10904_v1 = vld [vmem:[#allocation22_spill] sm:$0xff] }
 0x307   : > { %v9544_v58 = vmul.f32 0.10936069, %v5066_v30  ;;  %v9546_v21 = vmul.f32 0.21300554, %v5066_v30  ;;  %v9548_v48 = vmul.f32 0.26601174, %v5066_v30  ;;  %v4044_v18 = vadd.f32 %v9425_v55, %v4024_v36 }
 0x308   : > { %v9551_v22 = vmul.f32 0.036000773, %v5066_v30  ;;  %v9553_v60 = vmul.f32 0.0075987563, %v5066_v30  ;;  %v9560_v17 = vmul.f32 0.0010283804, %v5066_v30  ;;  %v4066_v24 = vadd.f32 %v9427_v59, %v4042_v13  ;;  %v6252_v59 = vpop.f32.mrf.mxu1 }
 0x309   : > { %v4088_v55 = vadd.f32 %v9431_v41, %v4064_v23  ;;  %v9568_v29 = vadd.f32 %v4056_v51, %v4044_v18  ;;  %v10899_v30 = vld [vmem:[#allocation111_spill] sm:$0xff]  ;;  %v4977_v46 = vadd.f32 %v10901_v10, %v4961_v2  ;;  %v5009_v45 = vmul.f32 0.036000773, %v4802_v57  ;;  %v10903_v41 = vld [vmem:[#allocation138_spill] sm:$0xff] }
 0x30a   : > { %10892 = vst [vmem:[#allocation104_spill] sm:$0xff] %v9551_v22  ;;  %10893 = vst [vmem:[#allocation106_spill] sm:$0xff] %v9553_v60  ;;  %v4993_v36 = vadd.f32 %v10900_v19, %v10899_v30  ;;  %v9574_v15 = vadd.f32 %v4078_v20, %v4066_v24  ;;  %v4995_v56 = vadd.f32 %v10902_v40, %v4975_v25  ;;  %v5031_v9 = vmul.f32 0.0075987563, %v4802_v57 }
 0x30b   : > { %10896 = vst [vmem:[#allocation107_spill] sm:$0xff] %v9560_v17  ;;  %v4112_v13 = vadd.f32 %v4100_v34, %v4088_v55  ;;  %v5053_v51 = vmul.f32 0.0010283804, %v4802_v57  ;;  %v4081_v42 = vmul.f32 0.0075987563, %v6252_v59  ;;  %v10905_v6 = vrot.slane %v10904_v1, 3 }
 0x30c   : > { %v5017_v23 = vadd.f32 %v10903_v41, %v4993_v36  ;;  %v10907_v30 = vrot.slane %v10906_v43, 3  ;;  %v4997_v2 = vadd.f32 %v9433_v31, %v4977_v46  ;;  %v5019_v25 = vadd.f32 %v9435_v54, %v4995_v56 }
 0x30d   : > { %v4127_v18 = vmul.f32 0.0075987563, %v4112_v13  ;;  %v4157_v52 = vmul.f32 0.036000773, %v4112_v13  ;;  %v4190_v24 = vmul.f32 0.10936069, %v4112_v13 }
 0x30e   : > { %v1388_v20 = vsel %vm1376_vm4, %v10907_v30, %v10905_v6  ;;  %v4244_v34 = vmul.f32 0.21300554, %v4112_v13  ;;  %v4298_v55 = vmul.f32 0.26601174, %v4112_v13  ;;  %v4121_v19 = vmul.f32 0.0010283804, %v4112_v13 }
 0x30f   : > { %v4139_v40 = vrot.slane %v4127_v18, 1  ;;  %v5041_v57 = vadd.f32 %v9451_v11, %v5017_v23  ;;  %v4217_v36 = vrot.slane %v4190_v24, 3  ;;  %v4169_v3 = vrot.slane %v4157_v52, 2 }
 0x310   : > { %v4271_v10 = vrot.slane %v4244_v34, 4  ;;  %v4325_v41 = vrot.slane %v4298_v55, 5  ;;  %v4355_v8 = vrot.slane %v4244_v34, 6  ;;  %v9587_v38 = vadd.f32 %v5009_v45, %v4997_v2  ;;  %v6304_v34 = vpop.f32.mrf.mxu0 }
 0x311   : > { %v4151_v28 = vadd.f32 %v4139_v40, %v4121_v19  ;;  %v5065_v6 = vadd.f32 %v5053_v51, %v5041_v57  ;;  %v4219_v30 = vsel %vm1376_vm4, %v4217_v36, %v4218_v50  ;;  %v4385_v54 = vrot.slane %v4190_v24, 7  ;;  %v3859_v40 = vpop.f32.mrf.mxu1 }
 0x312   : > { %v4273_v31 = vsel %vm1431_vm6, %v4271_v10, %v4272_v49  ;;  %v9595_v56 = vadd.f32 %v5031_v9, %v5019_v25  ;;  %v4327_v13 = vsel %vm1486_vm7, %v4325_v41, %v4326_v0  ;;  %v4357_v45 = vsel %vm1517_vm8, %v4355_v8, %v4356_v5 }
 0x313   : > { %v4181_v11 = vadd.f32 %v4169_v3, %v4151_v28  ;;  %v5074_v52 = vmul.f32 0.0010283804, %v5065_v6  ;;  %v5080_v46 = vmul.f32 0.0075987563, %v5065_v6  ;;  %v5110_v23 = vmul.f32 0.036000773, %v5065_v6 }
 0x314   : > { %v9603_v50 = vmul.f32 0.10936069, %v5065_v6  ;;  %v5197_v51 = vmul.f32 0.21300554, %v5065_v6  ;;  %v5251_v24 = vmul.f32 0.26601174, %v5065_v6  ;;  %v4387_v53 = vsel %vm1548_vm9, %v4385_v54, %v4386_v62 }
 0x315   : > { %v4235_v18 = vadd.f32 %v4219_v30, %v4181_v11  ;;  %v5092_v49 = vrot.slane %v5080_v46, 1  ;;  %v4103_v9 = vmul.f32 0.0010283804, %v6252_v59  ;;  %v5122_v5 = vrot.slane %v5110_v23, 2 }
 0x316   : > { %v5170_v0 = vrot.slane %v9603_v50, 3  ;;  %v5224_v3 = vrot.slane %v5197_v51, 4  ;;  %v5308_v28 = vrot.slane %v5197_v51, 6  ;;  %v9610_v8 = vadd.f32 %v4081_v42, %v9484_v39 }
 0x317   : > { %v4289_v47 = vadd.f32 %v4273_v31, %v4235_v18  ;;  %v5104_v55 = vadd.f32 %v5092_v49, %v5074_v52  ;;  %v10908_v2 = vrot.slane %v9544_v58, 3  ;;  %v5278_v59 = vrot.slane %v5251_v24, 5  ;;  %v4812_v31 = vpop.f32.mrf.mxu0  ;;  %v6255_v49 = vpop.f32.mrf.mxu1 }
 0x318   : > { %v4115_v62 = vadd.f32 %v4103_v9, %v9496_v32  ;;  %v10909_v36 = vrot.slane %v9546_v21, 4  ;;  %v10910_v41 = vrot.slane %v9546_v21, 6  ;;  %v10911_v32 = vld [vmem:[#allocation46_spill] sm:$0xff]  ;;  %v5034_v46 = vmul.f32 0.0075987563, %v6304_v34 }
 0x319   : > { %v5172_v19 = vsel %vm1376_vm4, %v5170_v0, %v10908_v2  ;;  %v4343_v25 = vadd.f32 %v4327_v13, %v4289_v47  ;;  %v5134_v57 = vadd.f32 %v5122_v5, %v5104_v55  ;;  %v9632_v54 = vadd.f32 %v1388_v20, %v10911_v32  ;;  %v6307_v5 = vpop.f32.mrf.mxu0 }
 0x31a   : > { %v5226_v10 = vsel %vm1431_vm6, %v5224_v3, %v10909_v36  ;;  %v9623_v39 = vsel %vm1517_vm8, %v5308_v28, %v10910_v41  ;;  %v9625_v42 = vmul.f32 0.10936069, %v4115_v62  ;;  %v9627_v6 = vmul.f32 0.21300554, %v4115_v62 }
 0x31b   : > { %v9629_v30 = vmul.f32 0.26601174, %v4115_v62  ;;  %v4373_v11 = vadd.f32 %v4357_v45, %v4343_v25  ;;  %v5188_v13 = vadd.f32 %v5172_v19, %v5134_v57  ;;  %v9634_v52 = vmul.f32 0.0075987563, %v4115_v62 }
 0x31c   : > { %v4221_v21 = vrot.slane %v9625_v42, 3  ;;  %v9639_v18 = vmul.f32 0.036000773, %v4115_v62  ;;  %v4359_v0 = vrot.slane %v9627_v6, 6  ;;  %v10912_v45 = vrot.slane %v9548_v48, 5 }
 0x31d   : > { %v4403_v24 = vadd.f32 %v4387_v53, %v4373_v11  ;;  %v5242_v9 = vadd.f32 %v5226_v10, %v5188_v13  ;;  %v9646_v28 = vmul.f32 0.0010283804, %v4115_v62  ;;  %v5056_v47 = vmul.f32 0.0010283804, %v6304_v34 }
 0x31e   : > { %v5280_v3 = vsel %vm1486_vm7, %v5278_v59, %v10912_v45  ;;  %v4080_v55 = vmul.f32 0.0075987563, %v3859_v40  ;;  %v5046_v53 = vadd.f32 %v5034_v46, %v9538_v33  ;;  %v4102_v25 = vmul.f32 0.0010283804, %v3859_v40  ;;  %v3869_v59 = vpop.f32.mrf.mxu1 }
 0x31f   : > { %v9649_v2 = vadd.f32 %v9521_v12, %v4403_v24  ;;  %v9653_v57 = vadd.f32 %v5280_v3, %v5242_v9  ;;  %v5068_v36 = vadd.f32 %v5056_v47, %v9540_v37  ;;  %v5033_v48 = vmul.f32 0.0075987563, %v4812_v31 }
 0x320   : > { %v5055_v10 = vmul.f32 0.0010283804, %v4812_v31  ;;  %v4114_v34 = vadd.f32 %v4102_v25, %v9574_v15  ;;  %v4105_v41 = vmul.f32 0.0010283804, %v6255_v49  ;;  %v5058_v32 = vmul.f32 0.0010283804, %v6307_v5 }
 0x321   : > { %v9658_v12 = vmul.f32 0.10936069, %v5068_v36  ;;  %v9660_v11 = vmul.f32 0.21300554, %v5068_v36  ;;  %v9662_v13 = vmul.f32 0.26601174, %v5068_v36  ;;  %v4092_v33 = vadd.f32 %v4080_v55, %v9568_v29 }
 0x322   : > { %v9665_v40 = vmul.f32 0.036000773, %v5068_v36  ;;  %v9667_v37 = vmul.f32 0.0075987563, %v5068_v36  ;;  %v5067_v31 = vadd.f32 %v5055_v10, %v9595_v56  ;;  %v4104_v46 = vmul.f32 0.0010283804, %v3869_v59 }
 0x323   : > { %10913 = vst [vmem:[#allocation124_spill] sm:$0xff] %v9658_v12  ;;  %v5174_v24 = vrot.slane %v9658_v12, 3  ;;  %v5228_v15 = vrot.slane %v9660_v11, 4  ;;  %v5282_v49 = vrot.slane %v9662_v13, 5  ;;  %v9673_v9 = vmul.f32 0.0010283804, %v5068_v36 }
 0x324   : > { %10914 = vst [vmem:[#allocation129_spill] sm:$0xff] %v9665_v40  ;;  %10915 = vst [vmem:[#allocation135_spill] sm:$0xff] %v9667_v37  ;;  %v5312_v45 = vrot.slane %v9660_v11, 6  ;;  %v4128_v47 = vmul.f32 0.0075987563, %v4114_v34  ;;  %v4117_v56 = vadd.f32 %v4105_v41, %v9610_v8  ;;  %v9679_v62 = vadd.f32 %v5058_v32, %v5046_v53 }
 0x325   : > { %10916 = vst [vmem:[#allocation109_spill] sm:$0xff] %v9673_v9  ;;  %v4158_v55 = vmul.f32 0.036000773, %v4114_v34  ;;  %v4192_v5 = vmul.f32 0.10936069, %v4114_v34  ;;  %v9682_v37 = vadd.f32 %v4104_v46, %v4092_v33  ;;  %v10918_v41 = vrot.slane %v9627_v6, 4 }
 0x326   : > { %v4246_v25 = vmul.f32 0.21300554, %v4114_v34  ;;  %v4122_v10 = vmul.f32 0.0010283804, %v4114_v34  ;;  %v4140_v59 = vrot.slane %v4128_v47, 1  ;;  %10917 = vst [vmem:[#allocation117_spill] sm:$0xff] %v9679_v62 }
 0x327   : > { %v4300_v14 = vmul.f32 0.26601174, %v4114_v34  ;;  %v4220_v13 = vrot.slane %v4192_v5, 3  ;;  %v5075_v20 = vmul.f32 0.0010283804, %v5067_v31  ;;  %v4170_v51 = vrot.slane %v4158_v55, 2 }
 0x328   : > { %v4274_v36 = vrot.slane %v4246_v25, 4  ;;  %v4358_v19 = vrot.slane %v4246_v25, 6  ;;  %v4152_v11 = vadd.f32 %v4140_v59, %v4122_v10  ;;  %v5081_v23 = vmul.f32 0.0075987563, %v5067_v31 }
 0x329   : > { %v4328_v3 = vrot.slane %v4300_v14, 5  ;;  %v4222_v29 = vsel %vm1376_vm4, %v4220_v13, %v4221_v21  ;;  %v4388_v9 = vrot.slane %v4192_v5, 7  ;;  %v5111_v17 = vmul.f32 0.036000773, %v5067_v31 }
 0x32a   : > { %v4182_v8 = vadd.f32 %v4170_v51, %v4152_v11  ;;  %v4276_v53 = vsel %vm1431_vm6, %v4274_v36, %v10918_v41  ;;  %v4360_v34 = vsel %vm1517_vm8, %v4358_v19, %v4359_v0  ;;  %v5093_v32 = vrot.slane %v5081_v23, 1 }
 0x32b   : > { %v10919_v47 = vrot.slane %v9629_v30, 5  ;;  %v5123_v14 = vrot.slane %v5111_v17, 2  ;;  %v9691_v25 = vmul.f32 0.10936069, %v5067_v31  ;;  %v5199_v21 = vmul.f32 0.21300554, %v5067_v31 }
 0x32c   : > { %v4236_v5 = vadd.f32 %v4222_v29, %v4182_v8  ;;  %v5105_v10 = vadd.f32 %v5093_v32, %v5075_v20  ;;  %v5253_v33 = vmul.f32 0.26601174, %v5067_v31  ;;  %v9693_v46 = vmul.f32 0.10936069, %v4117_v56 }
 0x32d   : > { %v4330_v55 = vsel %vm1486_vm7, %v4328_v3, %v10919_v47  ;;  %10920 = vst [vmem:[#allocation110_spill] sm:$0xff] %v9691_v25  ;;  %v10921_v6 = vrot.slane %v9625_v42, 7  ;;  %v5173_v0 = vrot.slane %v9691_v25, 3  ;;  %v5227_v23 = vrot.slane %v5199_v21, 4 }
 0x32e   : > { %v5311_v19 = vrot.slane %v5199_v21, 6  ;;  %v4290_v30 = vadd.f32 %v4276_v53, %v4236_v5  ;;  %v5135_v59 = vadd.f32 %v5123_v14, %v5105_v10  ;;  %v5281_v3 = vrot.slane %v5253_v33, 5 }
 0x32f   : > { %v4390_v51 = vsel %vm1548_vm9, %v4388_v9, %v10921_v6  ;;  %v5045_v17 = vadd.f32 %v5033_v48, %v9587_v38  ;;  %v5175_v13 = vsel %vm1376_vm4, %v5173_v0, %v5174_v24  ;;  %v4224_v31 = vrot.slane %v9693_v46, 3 }
 0x330   : > { %v4249_v29 = vmul.f32 0.21300554, %v4117_v56  ;;  %v4344_v36 = vadd.f32 %v4330_v55, %v4290_v30  ;;  %v5189_v42 = vadd.f32 %v5175_v13, %v5135_v59  ;;  %v5229_v9 = vsel %vm1431_vm6, %v5227_v23, %v5228_v15  ;;  %v4822_v13 = vpop.f32.mrf.mxu0 }
 0x331   : > { %v4303_v11 = vmul.f32 0.26601174, %v4117_v56  ;;  %v5283_v8 = vsel %vm1486_vm7, %v5281_v3, %v5282_v49  ;;  %v9706_v41 = vsel %vm1517_vm8, %v5311_v19, %v5312_v45  ;;  %v4392_v24 = vrot.slane %v9693_v46, 7  ;;  %v10923_v49 = vld [vmem:[#allocation21_spill] sm:$0xff] }
 0x332   : > { %v4278_v53 = vrot.slane %v4249_v29, 4  ;;  %v4362_v32 = vrot.slane %v4249_v29, 6  ;;  %v4374_v38 = vadd.f32 %v4360_v34, %v4344_v36  ;;  %v5243_v48 = vadd.f32 %v5229_v9, %v5189_v42  ;;  %v10925_v45 = vld [vmem:[#allocation29_spill] sm:$0xff]  ;;  %v10927_v9 = vld [vmem:[#allocation19_spill] sm:$0xff] }
 0x333   : > { %v9709_v47 = vmul.f32 0.0075987563, %v4117_v56  ;;  %v9711_v14 = vmul.f32 0.0010283804, %v4117_v56  ;;  %v9714_v55 = vmul.f32 0.10936069, %v9679_v62 }
 0x334   : > { %v9717_v15 = vmul.f32 0.21300554, %v9679_v62  ;;  %v10924_v21 = vrot.slane %v10923_v49, 4  ;;  %v10926_v5 = vrot.slane %v10925_v45, 4  ;;  %v4404_v34 = vadd.f32 %v4390_v51, %v4374_v38 }
 0x335   : > { %10922 = vst [vmem:[#allocation118_spill] sm:$0xff] %v9711_v14  ;;  %v4332_v33 = vrot.slane %v4303_v11, 5  ;;  %v9724_v6 = vmul.f32 0.036000773, %v4117_v56  ;;  %v9727_v46 = vmul.f32 0.26601174, %v9679_v62  ;;  %v9729_v0 = vadd.f32 %v5283_v8, %v5243_v48 }
 0x336   : > { %v1440_v10 = vsel %vm1431_vm6, %v10926_v5, %v10924_v21  ;;  %v5177_v30 = vrot.slane %v9714_v55, 3  ;;  %v9735_v59 = vadd.f32 %v9639_v18, %v4404_v34  ;;  %v5231_v3 = vrot.slane %v9717_v15, 4  ;;  %v10929_v8 = vld [vmem:[#allocation33_spill] sm:$0xff]  ;;  %v10931_v34 = vld [vmem:[#allocation27_spill] sm:$0xff] }
 0x337   : > { %v9741_v29 = vmul.f32 0.0075987563, %v9679_v62  ;;  %v4123_v36 = vmul.f32 0.0010283804, %v9682_v37  ;;  %v4129_v42 = vmul.f32 0.0075987563, %v9682_v37  ;;  %v9754_v19 = vadd.f32 %v1440_v10, %v10931_v34 }
 0x338   : > { %v10928_v11 = vrot.slane %v10927_v9, 4  ;;  %v10930_v38 = vrot.slane %v10929_v8, 4  ;;  %v4159_v48 = vmul.f32 0.036000773, %v9682_v37  ;;  %v4194_v21 = vmul.f32 0.10936069, %v9682_v37 }
 0x339   : > { %v4248_v5 = vmul.f32 0.21300554, %v9682_v37  ;;  %v4141_v23 = vrot.slane %v4129_v42, 1  ;;  %v4302_v56 = vmul.f32 0.26601174, %v9682_v37 }
 0x33a   : > { %v1443_v18 = vsel %vm1431_vm6, %v10930_v38, %v10928_v11  ;;  %v5057_v51 = vmul.f32 0.0010283804, %v4822_v13  ;;  %v9759_v14 = vmul.f32 0.036000773, %v9679_v62  ;;  %v4223_v60 = vrot.slane %v4194_v21, 3  ;;  %v10933_v62 = vld [vmem:[#allocation23_spill] sm:$0xff] }
 0x33b   : > { %v4277_v11 = vrot.slane %v4248_v5, 4  ;;  %v4361_v38 = vrot.slane %v4248_v5, 6  ;;  %v4153_v63 = vadd.f32 %v4141_v23, %v4123_v36  ;;  %v4171_v40 = vrot.slane %v4159_v48, 2 }
 0x33c   : > { %10932 = vst [vmem:[#allocation111_spill] sm:$0xff] %v9759_v14  ;;  %v4331_v22 = vrot.slane %v4302_v56, 5  ;;  %v5069_v25 = vadd.f32 %v5057_v51, %v5045_v17  ;;  %v4225_v10 = vsel %vm1376_vm4, %v4223_v60, %v4224_v31  ;;  %v4391_v42 = vrot.slane %v4194_v21, 7  ;;  %v10934_v31 = vld [vmem:[#allocation14_spill] sm:$0xff] }
 0x33d   : > { %v4279_v34 = vsel %vm1431_vm6, %v4277_v11, %v4278_v53  ;;  %v4183_v20 = vadd.f32 %v4171_v40, %v4153_v63  ;;  %v4363_v13 = vsel %vm1517_vm8, %v4361_v38, %v4362_v32  ;;  %v9767_v14 = vmul.f32 0.10936069, %v10933_v62 }
 0x33e   : > { %v4333_v37 = vsel %vm1486_vm7, %v4331_v22, %v4332_v33  ;;  %v5082_v5 = vmul.f32 0.0075987563, %v5069_v25  ;;  %v5112_v23 = vmul.f32 0.036000773, %v5069_v25  ;;  %v9769_v36 = vmul.f32 0.10936069, %v5069_v25 }
 0x33f   : > { %v1459_v17 = vadd.f32 %v1443_v18, %v9632_v54  ;;  %v4237_v51 = vadd.f32 %v4225_v10, %v4183_v20  ;;  %v5201_v56 = vmul.f32 0.21300554, %v5069_v25  ;;  %v5255_v60 = vmul.f32 0.26601174, %v5069_v25 }
 0x340   : > { %v9773_v53 = vmul.f32 0.10936069, %v10934_v31  ;;  %v4393_v63 = vsel %vm1548_vm9, %v4391_v42, %v4392_v24  ;;  %v5076_v22 = vmul.f32 0.0010283804, %v5069_v25  ;;  %v5094_v40 = vrot.slane %v5082_v5, 1 }
 0x341   : > { %v5176_v32 = vrot.slane %v9769_v36, 3  ;;  %v4291_v33 = vadd.f32 %v4279_v34, %v4237_v51  ;;  %v5124_v48 = vrot.slane %v5112_v23, 2  ;;  %v5230_v21 = vrot.slane %v5201_v56, 4 }
 0x342   : > { %v5106_v38 = vadd.f32 %v5094_v40, %v5076_v22  ;;  %v5284_v12 = vrot.slane %v5255_v60, 5  ;;  %v1389_v54 = vrot.slane %v9767_v14, 3  ;;  %v1390_v20 = vrot.slane %v9773_v53, 3  ;;  %v10935_v22 = vld [vmem:[#allocation25_spill] sm:$0xff] }
 0x343   : > { %v4345_v18 = vadd.f32 %v4333_v37, %v4291_v33  ;;  %v5178_v10 = vsel %vm1376_vm4, %v5176_v32, %v5177_v30  ;;  %v5232_v24 = vsel %vm1431_vm6, %v5230_v21, %v5231_v3  ;;  %v5314_v25 = vrot.slane %v5201_v56, 6  ;;  %v10936_v32 = vld [vmem:[#allocation15_spill] sm:$0xff]  ;;  %v10938_v56 = vld [vmem:[#allocation26_spill] sm:$0xff] }
 0x344   : > { %v5136_v42 = vadd.f32 %v5124_v48, %v5106_v38  ;;  %v1391_v5 = vsel %vm1376_vm4, %v1389_v54, %v1390_v20  ;;  %v1415_v34 = vmul.f32 0.21300554, %v10933_v62  ;;  %v1416_v23 = vmul.f32 0.21300554, %v10934_v31 }
 0x345   : > { %v4375_v51 = vadd.f32 %v4363_v13, %v4345_v18  ;;  %v1405_v60 = vadd.f32 %v1391_v5, %v10935_v22  ;;  %v1470_v40 = vmul.f32 0.26601174, %v10933_v62  ;;  %v1471_v11 = vmul.f32 0.26601174, %v10934_v31  ;;  %v10941_v13 = vld [vmem:[#allocation17_spill] sm:$0xff]  ;;  %v10943_v18 = vld [vmem:[#allocation30_spill] sm:$0xff] }
 0x346   : > { %v5190_v37 = vadd.f32 %v5178_v10, %v5136_v42  ;;  %v1444_v33 = vrot.slane %v1415_v34, 4  ;;  %v1445_v30 = vrot.slane %v1416_v23, 4  ;;  %v10937_v3 = vrot.slane %v10936_v32, 5 }
 0x347   : > { %v10939_v48 = vrot.slane %v10938_v56, 5  ;;  %v10940_v38 = vrot.slane %v9727_v46, 5  ;;  %v10942_v20 = vrot.slane %v10941_v13, 5  ;;  %v10944_v62 = vrot.slane %v10943_v18, 5  ;;  %v10946_v56 = vld [vmem:[#allocation28_spill] sm:$0xff] }
 0x348   : > { %v1499_v10 = vrot.slane %v1470_v40, 5  ;;  %v1500_v42 = vrot.slane %v1471_v11, 5  ;;  %v10945_v22 = vrot.slane %v9717_v15, 6  ;;  %v10947_v46 = vld [vmem:[#allocation32_spill] sm:$0xff]  ;;  %v9815_v40 = vadd.f32 %v5232_v24, %v5190_v37  ;;  %v10954_v37 = vld [vmem:[#allocation37_spill] sm:$0xff] }
 0x349   : > { %v1495_v21 = vsel %vm1486_vm7, %v10939_v48, %v10937_v3  ;;  %v9796_v54 = vsel %vm1486_vm7, %v5284_v12, %v10940_v38  ;;  %v1498_v5 = vsel %vm1486_vm7, %v10944_v62, %v10942_v20  ;;  %v1446_v3 = vsel %vm1431_vm6, %v1444_v33, %v1445_v30  ;;  %v10948_v11 = vld [vmem:[#allocation16_spill] sm:$0xff]  ;;  %v10950_v62 = vld [vmem:[#allocation61_spill] sm:$0xff] }
 0x34a   : > { %v9806_v32 = vsel %vm1517_vm8, %v5314_v25, %v10945_v22  ;;  %v1512_v48 = vadd.f32 %v10947_v46, %v10946_v56  ;;  %v1513_v12 = vadd.f32 %v1495_v21, %v9754_v19  ;;  %v9812_v38 = vadd.f32 %v4393_v63, %v4375_v51  ;;  %v10955_v21 = vld [vmem:[#allocation41_spill] sm:$0xff]  ;;  %v10958_v46 = vld [vmem:[#allocation24_spill] sm:$0xff] }
 0x34b   : > { %v1460_v13 = vadd.f32 %v1446_v3, %v1405_v60  ;;  %v1501_v18 = vsel %vm1486_vm7, %v1499_v10, %v1500_v42  ;;  %v1514_v20 = vadd.f32 %v1498_v5, %v1459_v17  ;;  %v10949_v15 = vrot.slane %v10948_v11, 6  ;;  %v10956_v3 = vld [vmem:[#allocation62_spill] sm:$0xff] }
 0x34c   : > { %v10951_v25 = vrot.slane %v10950_v62, 6  ;;  %v10952_v33 = vrot.slane %v10923_v49, 6  ;;  %v10953_v30 = vrot.slane %v10925_v45, 6  ;;  %v1527_v63 = vrot.slane %v10929_v8, 6 }
 0x34d   : > { %v1515_v51 = vadd.f32 %v1501_v18, %v1460_v13  ;;  %v1528_v60 = vrot.slane %v10927_v9, 6  ;;  %v1530_v17 = vrot.slane %v1415_v34, 6  ;;  %v1531_v24 = vrot.slane %v1416_v23, 6  ;;  %v10960_v13 = vld [vmem:[#allocation20_spill] sm:$0xff]  ;;  %v10962_v9 = vld [vmem:[#allocation47_spill] sm:$0xff] }
 0x34e   : > { %v1523_v22 = vsel %vm1517_vm8, %v10951_v25, %v10949_v15  ;;  %v1526_v19 = vsel %vm1517_vm8, %v10953_v30, %v10952_v33  ;;  %v1542_v5 = vadd.f32 %v10955_v21, %v10954_v37  ;;  %v10957_v56 = vrot.slane %v10956_v3, 7  ;;  %v10964_v15 = vld [vmem:[#allocation36_spill] sm:$0xff]  ;;  %v10968_v3 = vld [vmem:[#allocation43_spill] sm:$0xff] }
 0x34f   : > { %v1543_v10 = vadd.f32 %v1523_v22, %v1512_v48  ;;  %v1544_v42 = vadd.f32 %v1526_v19, %v1513_v12  ;;  %v10959_v49 = vrot.slane %v10958_v46, 7  ;;  %v1529_v11 = vsel %vm1517_vm8, %v1527_v63, %v1528_v60  ;;  %v10966_v48 = vld [vmem:[#allocation63_spill] sm:$0xff] }
 0x350   : > { %v1532_v8 = vsel %vm1517_vm8, %v1530_v17, %v1531_v24  ;;  %v10961_v18 = vrot.slane %v10960_v13, 7  ;;  %v10963_v34 = vrot.slane %v10962_v9, 7  ;;  %v10965_v62 = vrot.slane %v10964_v15, 7 }
 0x351   : > { %v1551_v45 = vsel %vm1548_vm9, %v10959_v49, %v10957_v56  ;;  %v10967_v12 = vrot.slane %v10966_v48, 7  ;;  %v1545_v22 = vadd.f32 %v1529_v11, %v1514_v20  ;;  %v1546_v33 = vadd.f32 %v1532_v8, %v1515_v51  ;;  %v10969_v56 = vld [vmem:[#allocation52_spill] sm:$0xff]  ;;  %v10970_v49 = vld [vmem:[#allocation13_spill] sm:$0xff] }
 0x352   : > { %v1554_v23 = vsel %vm1548_vm9, %v10963_v34, %v10961_v18  ;;  %v1558_v30 = vrot.slane %v10906_v43, 7  ;;  %v1559_v19 = vrot.slane %v10904_v1, 7  ;;  %v1561_v63 = vrot.slane %v9767_v14, 7  ;;  %v10971_v43 = vld [vmem:[#allocation60_spill] sm:$0xff] }
 0x353   : > { %v1557_v25 = vsel %vm1548_vm9, %v10967_v12, %v10965_v62  ;;  %v1562_v60 = vrot.slane %v9773_v53, 7  ;;  %v1573_v17 = vadd.f32 %v1551_v45, %v1542_v5  ;;  %v1574_v24 = vadd.f32 %v1554_v23, %v1543_v10  ;;  %v10972_v8 = vld [vmem:[#allocation40_spill] sm:$0xff]  ;;  %v10973_v5 = vld [vmem:[#allocation18_spill] sm:$0xff] }
 0x354   : > { %v1560_v37 = vsel %vm1548_vm9, %v1558_v30, %v1559_v19  ;;  %v1575_v21 = vadd.f32 %v1557_v25, %v1544_v42  ;;  %v1578_v46 = vadd.f32 %v10969_v56, %v10968_v3  ;;  %v1581_v13 = vmul.f32 0.036000773, %v10970_v49  ;;  %v10974_v42 = vld [vmem:[#allocation45_spill] sm:$0xff]  ;;  %v10975_v48 = vld [vmem:[#allocation44_spill] sm:$0xff]  ;;  %v10976_v25 = vld [vmem:[#allocation38_spill] sm:$0xff] }
 0x355   : > { %v1563_v20 = vsel %vm1548_vm9, %v1561_v63, %v1562_v60  ;;  %v1576_v51 = vadd.f32 %v1560_v37, %v1545_v22  ;;  %v1582_v11 = vmul.f32 0.036000773, %v10971_v43  ;;  %v1583_v1 = vmul.f32 0.036000773, %v10934_v31  ;;  %v10978_v63 = vld [vmem:[#allocation48_spill] sm:$0xff] }
 0x356   : > { %v1577_v14 = vadd.f32 %v1563_v20, %v1546_v33  ;;  %v1585_v53 = vadd.f32 %v10972_v8, %v1573_v17  ;;  %v1586_v10 = vadd.f32 %v10973_v5, %v1574_v24  ;;  %v1587_v45 = vadd.f32 %v1581_v13, %v1575_v21  ;;  %v10980_v24 = vld [vmem:[#allocation57_spill] sm:$0xff] }
 0x357   : > { %v1588_v18 = vadd.f32 %v1582_v11, %v1576_v51  ;;  %v1590_v9 = vadd.f32 %v10974_v42, %v1578_v46  ;;  %v1593_v34 = vmul.f32 0.0075987563, %v10970_v49  ;;  %v1594_v23 = vmul.f32 0.0075987563, %v10971_v43  ;;  %v10981_v11 = vld [vmem:[#allocation42_spill] sm:$0xff] }
 0x358   : > { %v1589_v15 = vadd.f32 %v1583_v1, %v1577_v14  ;;  %v1595_v62 = vmul.f32 0.0075987563, %v10934_v31  ;;  %v1604_v12 = vrot.slane %v10975_v48, 1  ;;  %v10977_v22 = vrot.slane %v10976_v25, 1 }
 0x359   : > { %v1605_v30 = vrot.slane %v1593_v34, 1  ;;  %v1606_v19 = vrot.slane %v1594_v23, 1  ;;  %v10979_v60 = vrot.slane %v10978_v63, 1  ;;  %v1622_v37 = vmul.f32 0.0010283804, %v10980_v24  ;;  %v10982_v34 = vld [vmem:[#allocation50_spill] sm:$0xff] }
 0x35a   : > { %v1615_v33 = vadd.f32 %v10977_v22, %v1585_v53  ;;  %v1607_v21 = vrot.slane %v1595_v62, 1  ;;  %v1616_v3 = vadd.f32 %v1604_v12, %v1586_v10  ;;  %v1623_v56 = vmul.f32 0.0010283804, %v10970_v49  ;;  %v10984_v49 = vld [vmem:[#allocation72_spill] sm:$0xff]  ;;  %v10988_v12 = vld [vmem:[#allocation67_spill] sm:$0xff] }
 0x35b   : > { %v1620_v17 = vadd.f32 %v10979_v60, %v1590_v9  ;;  %v1624_v46 = vmul.f32 0.0010283804, %v10971_v43  ;;  %v1617_v13 = vadd.f32 %v1605_v30, %v1587_v45  ;;  %v1618_v20 = vadd.f32 %v1606_v19, %v1588_v18  ;;  %v10985_v62 = vld [vmem:[#allocation68_spill] sm:$0xff]  ;;  %v10990_v19 = vld [vmem:[#allocation87_spill] sm:$0xff] }
 0x35c   : > { %v1625_v51 = vmul.f32 0.0010283804, %v10934_v31  ;;  %v1633_v1 = vrot.slane %v10981_v11, 2  ;;  %v1619_v14 = vadd.f32 %v1607_v21, %v1589_v15  ;;  %v1634_v8 = vrot.slane %v1622_v37, 2  ;;  %v10986_v15 = vld [vmem:[#allocation31_spill] sm:$0xff]  ;;  %v10991_v63 = vld [vmem:[#allocation84_spill] sm:$0xff] }
 0x35d   : > { %v1635_v53 = vrot.slane %v1623_v56, 2  ;;  %v1636_v5 = vrot.slane %v1624_v46, 2  ;;  %v10983_v23 = vrot.slane %v10982_v34, 2  ;;  %v2434_v43 = vadd.f32 %v10985_v62, %v10984_v49  ;;  %v10993_v24 = vld [vmem:[#allocation103_spill] sm:$0xff]  ;;  %v10994_v21 = vld [vmem:[#allocation54_spill] sm:$0xff]  ;;  %v10996_v56 = vld [vmem:[#allocation65_spill] sm:$0xff] }
 0x35e   : > { %v1637_v42 = vrot.slane %v1625_v51, 2  ;;  %v9875_v9 = vadd.f32 %v1633_v1, %v1615_v33  ;;  %v9883_v45 = vadd.f32 %v1634_v8, %v1616_v3  ;;  %v10987_v48 = vrot.slane %v10986_v15, 6  ;;  %v11000_v11 = vld [vmem:[#allocation83_spill] sm:$0xff]  ;;  %v11002_v8 = vld [vmem:[#allocation69_spill] sm:$0xff]  ;;  %v11007_v49 = vld [vmem:[#allocation94_spill] sm:$0xff] }
 0x35f   : > { %v9879_v10 = vadd.f32 %v10983_v23, %v1620_v17  ;;  %v9885_v18 = vadd.f32 %v1635_v53, %v1617_v13  ;;  %v9887_v31 = vadd.f32 %v1636_v5, %v1618_v20  ;;  %v10989_v25 = vrot.slane %v10988_v12, 6  ;;  %v10992_v17 = vld [vmem:[#allocation39_spill] sm:$0xff]  ;;  %v10998_v20 = vld [vmem:[#allocation73_spill] sm:$0xff]  ;;  %v11006_v23 = vld [vmem:[#allocation96_spill] sm:$0xff] }
 0x360   : > { %v9894_v33 = vadd.f32 %v1637_v42, %v1619_v14  ;;  %v2465_v60 = vadd.f32 %v10991_v63, %v10990_v19  ;;  %v2469_v37 = vadd.f32 %v10993_v24, %v10992_v17  ;;  %v10995_v3 = vrot.slane %v10994_v21, 7  ;;  %v11004_v5 = vld [vmem:[#allocation101_spill] sm:$0xff]  ;;  %v11009_v12 = vld [vmem:[#allocation78_spill] sm:$0xff] }
 0x361   : > { %v2442_v22 = vsel %vm1517_vm8, %v10989_v25, %v10987_v48  ;;  %v10997_v46 = vrot.slane %v10996_v56, 7  ;;  %v10999_v51 = vrot.slane %v10998_v20, 7  ;;  %v11001_v1 = vrot.slane %v11000_v11, 7  ;;  %v11008_v48 = vld [vmem:[#allocation79_spill] sm:$0xff]  ;;  %v11011_v19 = vld [vmem:[#allocation86_spill] sm:$0xff]  ;;  %v11012_v24 = vld [vmem:[#allocation89_spill] sm:$0xff] }
 0x362   : > { %v2464_v30 = vadd.f32 %v2442_v22, %v2434_v43  ;;  %v11003_v53 = vrot.slane %v11002_v8, 7  ;;  %v11005_v42 = vrot.slane %v11004_v5, 7  ;;  %v2496_v62 = vadd.f32 %v11007_v49, %v11006_v23  ;;  %v11010_v22 = vld [vmem:[#allocation85_spill] sm:$0xff] }
 0x363   : > { %v2472_v13 = vsel %vm1548_vm9, %v10997_v46, %v10995_v3  ;;  %v2475_v14 = vsel %vm1548_vm9, %v11001_v1, %v10999_v51  ;;  %v2497_v25 = vadd.f32 %v11009_v12, %v11008_v48  ;;  %v2498_v63 = vadd.f32 %v11011_v19, %v11010_v22  ;;  %v11013_v3 = vld [vmem:[#allocation34_spill] sm:$0xff]  ;;  %v11014_v46 = vld [vmem:[#allocation51_spill] sm:$0xff]  ;;  %v11016_v1 = vld [vmem:[#allocation76_spill] sm:$0xff] }
 0x364   : > { %v2487_v34 = vsel %vm1548_vm9, %v11005_v42, %v11003_v53  ;;  %v2494_v43 = vadd.f32 %v2472_v13, %v2464_v30  ;;  %v2495_v15 = vadd.f32 %v2475_v14, %v2465_v60  ;;  %v2508_v21 = vadd.f32 %v11012_v24, %v2496_v62  ;;  %v11015_v51 = vld [vmem:[#allocation55_spill] sm:$0xff]  ;;  %v11018_v60 = vld [vmem:[#allocation58_spill] sm:$0xff]  ;;  %v11020_v42 = vld [vmem:[#allocation88_spill] sm:$0xff] }
 0x365   : > { %v2499_v17 = vadd.f32 %v2487_v34, %v2469_v37  ;;  %v2524_v56 = vrot.slane %v11013_v3, 1  ;;  %v2542_v20 = vmul.f32 0.0010283804, %v11014_v46  ;;  %v11017_v53 = vld [vmem:[#allocation99_spill] sm:$0xff]  ;;  %v2510_v13 = vadd.f32 %v11018_v60, %v2498_v63  ;;  %v11019_v14 = vld [vmem:[#allocation82_spill] sm:$0xff]  ;;  %v11022_v34 = vld [vmem:[#allocation81_spill] sm:$0xff] }
 0x366   : > { %v2506_v11 = vadd.f32 %v11015_v51, %v2494_v43  ;;  %v2507_v8 = vadd.f32 %v11016_v1, %v2495_v15  ;;  %v2509_v30 = vadd.f32 %v11017_v53, %v2497_v25  ;;  %v11021_v23 = vrot.slane %v11020_v42, 1  ;;  %v11023_v62 = vld [vmem:[#allocation64_spill] sm:$0xff]  ;;  %v11025_v19 = vld [vmem:[#allocation74_spill] sm:$0xff]  ;;  %v11027_v3 = vld [vmem:[#allocation97_spill] sm:$0xff] }
 0x367   : > { %v2511_v5 = vadd.f32 %v11019_v14, %v2499_v17  ;;  %v2554_v37 = vrot.slane %v2542_v20, 2  ;;  %v11024_v48 = vrot.slane %v11023_v62, 1  ;;  %v11026_v24 = vrot.slane %v11025_v19, 1  ;;  %v11029_v25 = vld [vmem:[#allocation80_spill] sm:$0xff]  ;;  %v11031_v1 = vld [vmem:[#allocation35_spill] sm:$0xff]  ;;  %v11033_v60 = vld [vmem:[#allocation90_spill] sm:$0xff] }
 0x368   : > { %v2538_v49 = vadd.f32 %v11021_v23, %v2508_v21  ;;  %v2536_v22 = vadd.f32 %v2524_v56, %v2506_v11  ;;  %v11028_v15 = vrot.slane %v11027_v3, 1  ;;  %v11030_v51 = vrot.slane %v11029_v25, 1  ;;  %v11035_v14 = vld [vmem:[#allocation66_spill] sm:$0xff]  ;;  %v11037_v56 = vld [vmem:[#allocation93_spill] sm:$0xff]  ;;  %v11040_v62 = vld [vmem:[#allocation75_spill] sm:$0xff] }
 0x369   : > { %v3489_v12 = vadd.f32 %v11024_v48, %v11022_v34  ;;  %v2537_v43 = vadd.f32 %v11026_v24, %v2507_v8  ;;  %v11032_v17 = vrot.slane %v11031_v1, 1  ;;  %v11034_v21 = vrot.slane %v11033_v60, 2  ;;  %v11038_v11 = vld [vmem:[#allocation77_spill] sm:$0xff]  ;;  %v11044_v3 = vld [vmem:[#allocation91_spill] sm:$0xff] }
 0x36a   : > { %v2539_v46 = vadd.f32 %v11028_v15, %v2509_v30  ;;  %v2540_v63 = vadd.f32 %v11030_v51, %v2510_v13  ;;  %v11036_v42 = vrot.slane %v11035_v14, 2  ;;  %v11039_v8 = vrot.slane %v11038_v11, 2  ;;  %v11046_v51 = vld [vmem:[#allocation70_spill] sm:$0xff]  ;;  %v11052_v60 = vld [vmem:[#allocation59_spill] sm:$0xff] }
 0x36b   : > { %v2541_v53 = vadd.f32 %v11032_v17, %v2511_v5  ;;  %v9944_v20 = vadd.f32 %v11034_v21, %v2538_v49  ;;  %v4417_v30 = vadd.f32 %v9724_v6, %v9812_v38  ;;  %v9957_v13 = vadd.f32 %v2554_v37, %v2536_v22  ;;  %v11042_v49 = vld [vmem:[#allocation98_spill] sm:$0xff]  ;;  %v11048_v38 = vld [vmem:[#allocation100_spill] sm:$0xff]  ;;  %v11049_v37 = vld [vmem:[#allocation95_spill] sm:$0xff] }
 0x36c   : > { %v9948_v23 = vadd.f32 %v11036_v42, %v3489_v12  ;;  %v9953_v34 = vadd.f32 %v11039_v8, %v11037_v56  ;;  %v11041_v5 = vrot.slane %v11040_v62, 2  ;;  %v11043_v19 = vrot.slane %v11042_v49, 2  ;;  %v11051_v17 = vld [vmem:[#allocation53_spill] sm:$0xff]  ;;  %v11054_v14 = vld [vmem:[#allocation130_spill] sm:$0xff]  ;;  %v11060_v62 = vld [vmem:[#allocation71_spill] sm:$0xff] }
 0x36d   : > { %v5298_v12 = vadd.f32 %v9796_v54, %v9815_v40  ;;  %v11045_v15 = vrot.slane %v11044_v3, 2  ;;  %v11047_v1 = vrot.slane %v11046_v51, 2  ;;  %v11050_v22 = vrot.slane %v11049_v37, 2  ;;  %v11055_v54 = vld [vmem:[#allocation108_spill] sm:$0xff]  ;;  %v11059_v8 = vld [vmem:[#allocation102_spill] sm:$0xff]  ;;  %v11066_v37 = vld [vmem:[#allocation49_spill] sm:$0xff] }
 0x36e   : > { %v9961_v48 = vadd.f32 %v11041_v5, %v2537_v43  ;;  %v9965_v24 = vadd.f32 %v11043_v19, %v2539_v46  ;;  %v11053_v46 = vrot.slane %v11052_v60, 2  ;;  %v4412_v40 = vadd.f32 %v11055_v54, %v11054_v14 }
 0x36f   : > { %v9971_v25 = vadd.f32 %v11045_v15, %v2540_v63  ;;  %v9975_v6 = vadd.f32 %v11047_v1, %v2541_v53  ;;  %v9980_v43 = vadd.f32 %v11050_v22, %v11048_v38  ;;  %v11056_v63 = vld [vmem:[#allocation127_spill] sm:$0xff]  ;;  %v11058_v53 = vrot.slane %v9405_v35, 1  ;;  %v11064_v1 = vld [vmem:[#allocation126_spill] sm:$0xff]  ;;  %v11067_v22 = vld [vmem:[#allocation92_spill] sm:$0xff] }
 0x370   : > { %v9985_v21 = vadd.f32 %v11053_v46, %v11051_v17  ;;  %v11057_v42 = vrot.slane %v11056_v63, 1  ;;  %v11061_v5 = vrot.slane %v11060_v62, 2  ;;  %v11062_v19 = vrot.slane %v9510_v27, 1  ;;  %v11065_v38 = vld [vmem:[#allocation123_spill] sm:$0xff]  ;;  %v11069_v17 = vld [vmem:[#allocation112_spill] sm:$0xff]  ;;  %v11074_v63 = vld [vmem:[#allocation122_spill] sm:$0xff] }
 0x371   : > { %v4444_v11 = vadd.f32 %v11058_v53, %v9516_v16  ;;  %v11063_v15 = vrot.slane %v9634_v52, 1  ;;  %v11068_v35 = vrot.slane %v11067_v22, 2  ;;  %v11070_v60 = vrot.slane %v11069_v17, 1  ;;  %v11072_v27 = vld [vmem:[#allocation116_spill] sm:$0xff]  ;;  %v11078_v62 = vld [vmem:[#allocation141_spill] sm:$0xff] }
 0x372   : > { %v4443_v56 = vadd.f32 %v11057_v42, %v9445_v61  ;;  %v9998_v49 = vadd.f32 %v11061_v5, %v11059_v8  ;;  %v4445_v3 = vadd.f32 %v11062_v19, %v9649_v2  ;;  %v5239_v61 = vadd.f32 %v11065_v38, %v11064_v1  ;;  %v11082_v38 = vld [vmem:[#allocation115_spill] sm:$0xff]  ;;  %v11084_v22 = vld [vmem:[#allocation121_spill] sm:$0xff]  ;;  %v11086_v17 = vld [vmem:[#allocation132_spill] sm:$0xff] }
 0x373   : > { %v4446_v51 = vadd.f32 %v11063_v15, %v9735_v59  ;;  %v10011_v16 = vadd.f32 %v11068_v35, %v11066_v37  ;;  %v4442_v46 = vadd.f32 %v11070_v60, %v4412_v40  ;;  %v11071_v14 = vrot.slane %v9709_v47, 1  ;;  %v11076_v59 = vld [vmem:[#allocation128_spill] sm:$0xff] }
 0x374   : > { %v11073_v2 = vrot.slane %v11072_v27, 5  ;;  %v11075_v42 = vrot.slane %v11074_v63, 5  ;;  %v11077_v53 = vrot.slane %v11076_v59, 2  ;;  %v11079_v5 = vrot.slane %v11078_v62, 2  ;;  %v11093_v59 = vld [vmem:[#allocation120_spill] sm:$0xff] }
 0x375   : > { %v4447_v54 = vadd.f32 %v11071_v14, %v4417_v30  ;;  %v11080_v15 = vrot.slane %v9512_v44, 2  ;;  %v11081_v30 = vrot.slane %v9646_v28, 2  ;;  %v11083_v37 = vrot.slane %v11082_v38, 6  ;;  %v11088_v14 = vld [vmem:[#allocation140_spill] sm:$0xff] }
 0x376   : > { %v5271_v52 = vsel %vm1486_vm7, %v11075_v42, %v11073_v2  ;;  %v10024_v8 = vadd.f32 %v11077_v53, %v4443_v56  ;;  %v10028_v19 = vadd.f32 %v11079_v5, %v4444_v11  ;;  %v11085_v35 = vrot.slane %v11084_v22, 6  ;;  %v11091_v42 = vld [vmem:[#allocation114_spill] sm:$0xff]  ;;  %v11095_v5 = vld [vmem:[#allocation131_spill] sm:$0xff] }
 0x377   : > { %v10032_v40 = vadd.f32 %v11080_v15, %v4445_v3  ;;  %v5293_v47 = vadd.f32 %v5271_v52, %v5239_v61  ;;  %v10036_v1 = vadd.f32 %v11081_v30, %v4446_v51  ;;  %v11087_v60 = vrot.slane %v11086_v17, 6  ;;  %v11090_v61 = vld [vmem:[#allocation142_spill] sm:$0xff]  ;;  %v11099_v30 = vld [vmem:[#allocation143_spill] sm:$0xff] }
 0x378   : > { %v5301_v56 = vsel %vm1517_vm8, %v11085_v35, %v11083_v37  ;;  %v11089_v11 = vrot.slane %v11088_v14, 6  ;;  %v5325_v44 = vadd.f32 %v9494_v4, %v9518_v26  ;;  %v5326_v51 = vadd.f32 %v9623_v39, %v9653_v57  ;;  %v11097_v4 = vld [vmem:[#allocation139_spill] sm:$0xff]  ;;  %v11106_v22 = vld [vmem:[#allocation110_spill] sm:$0xff] }
 0x379   : > { %v5323_v3 = vadd.f32 %v5301_v56, %v5293_v47  ;;  %v5327_v2 = vadd.f32 %v9706_v41, %v9729_v0  ;;  %v5328_v63 = vadd.f32 %v9806_v32, %v5298_v12  ;;  %v11092_v52 = vrot.slane %v11091_v42, 7  ;;  %v11104_v12 = vld [vmem:[#allocation124_spill] sm:$0xff]  ;;  %v11110_v42 = vld [vmem:[#allocation105_spill] sm:$0xff] }
 0x37a   : > { %v5304_v27 = vsel %vm1517_vm8, %v11089_v11, %v11087_v60  ;;  %v11094_v53 = vrot.slane %v11093_v59, 7  ;;  %v11096_v15 = vrot.slane %v11095_v5, 7  ;;  %v11098_v26 = vrot.slane %v11097_v4, 7  ;;  %v11111_v5 = vld [vmem:[#allocation133_spill] sm:$0xff]  ;;  %v11112_v4 = vld [vmem:[#allocation144_spill] sm:$0xff] }
 0x37b   : > { %v5324_v28 = vadd.f32 %v5304_v27, %v11090_v61  ;;  %v11100_v38 = vrot.slane %v11099_v30, 7  ;;  %v11101_v39 = vrot.slane %v9480_v7, 7  ;;  %v11102_v41 = vrot.slane %v9544_v58, 7  ;;  %v11114_v30 = vld [vmem:[#allocation129_spill] sm:$0xff] }
 0x37c   : > { %v5331_v62 = vsel %vm1548_vm9, %v11094_v53, %v11092_v52  ;;  %v5334_v47 = vsel %vm1548_vm9, %v11098_v26, %v11096_v15  ;;  %v11103_v0 = vrot.slane %v9603_v50, 7  ;;  %v11105_v37 = vrot.slane %v11104_v12, 7  ;;  %v11113_v26 = vld [vmem:[#allocation104_spill] sm:$0xff] }
 0x37d   : > { %v5337_v57 = vsel %vm1548_vm9, %v11101_v39, %v11100_v38  ;;  %v11107_v35 = vrot.slane %v11106_v22, 7  ;;  %v11108_v17 = vrot.slane %v9714_v55, 7  ;;  %v11109_v60 = vrot.slane %v9769_v36, 7  ;;  %v11123_v22 = vld [vmem:[#allocation135_spill] sm:$0xff] }
 0x37e   : > { %v5340_v32 = vsel %vm1548_vm9, %v11103_v0, %v11102_v41  ;;  %v5353_v14 = vadd.f32 %v5331_v62, %v5323_v3  ;;  %v5354_v11 = vadd.f32 %v5334_v47, %v5324_v28  ;;  %v5355_v27 = vadd.f32 %v5337_v57, %v5325_v44  ;;  %v11115_v28 = vld [vmem:[#allocation111_spill] sm:$0xff]  ;;  %v11117_v62 = vld [vmem:[#allocation134_spill] sm:$0xff]  ;;  %v11119_v57 = vld [vmem:[#allocation145_spill] sm:$0xff] }
 0x37f   : > { %v5343_v56 = vsel %vm1548_vm9, %v11107_v35, %v11105_v37  ;;  %v5346_v7 = vsel %vm1548_vm9, %v11109_v60, %v11108_v17  ;;  %v5356_v58 = vadd.f32 %v5340_v32, %v5326_v51  ;;  %v5359_v52 = vmul.f32 0.036000773, %v11110_v42  ;;  %v11121_v32 = vld [vmem:[#allocation106_spill] sm:$0xff] }
 0x380   : > { %v5357_v61 = vadd.f32 %v5343_v56, %v5327_v2  ;;  %v5358_v50 = vadd.f32 %v5346_v7, %v5328_v63  ;;  %v5371_v59 = vmul.f32 0.0075987563, %v11110_v42  ;;  %v5401_v53 = vmul.f32 0.0010283804, %v11110_v42  ;;  %v11116_v2 = vld [vmem:[#allocation125_spill] sm:$0xff]  ;;  %v11129_v42 = vld [vmem:[#allocation118_spill] sm:$0xff] }
 0x381   : > { %v5366_v15 = vadd.f32 %v11111_v5, %v5354_v11  ;;  %v5367_v55 = vadd.f32 %v11112_v4, %v5355_v27  ;;  %v5368_v36 = vadd.f32 %v11113_v26, %v5356_v58  ;;  %v5365_v3 = vadd.f32 %v5359_v52, %v5353_v14  ;;  %v11126_v14 = vld [vmem:[#allocation117_spill] sm:$0xff] }
 0x382   : > { %v5369_v38 = vadd.f32 %v11114_v30, %v5357_v61  ;;  %v5370_v44 = vadd.f32 %v11115_v28, %v5358_v50  ;;  %v5383_v51 = vrot.slane %v5371_v59, 1  ;;  %v5402_v63 = vmul.f32 0.0010283804, %v11116_v2  ;;  %v11127_v58 = vld [vmem:[#allocation113_spill] sm:$0xff] }
 0x383   : > { %v11118_v47 = vrot.slane %v11117_v62, 1  ;;  %v11120_v41 = vrot.slane %v11119_v57, 1  ;;  %v11122_v12 = vrot.slane %v11121_v32, 1  ;;  %v11124_v35 = vrot.slane %v11123_v22, 1 }
 0x384   : > { %v5395_v17 = vadd.f32 %v5383_v51, %v5365_v3  ;;  %v11125_v60 = vrot.slane %v9741_v29, 1  ;;  %v5406_v11 = vmul.f32 0.0010283804, %v11126_v14  ;;  %v5413_v27 = vrot.slane %v5401_v53, 2 }
 0x385   : > { %v5396_v39 = vadd.f32 %v11118_v47, %v5366_v15  ;;  %v5397_v0 = vadd.f32 %v11120_v41, %v5367_v55  ;;  %v5398_v37 = vadd.f32 %v11122_v12, %v5368_v36  ;;  %v5399_v56 = vadd.f32 %v11124_v35, %v5369_v38  ;;  %v11131_v15 = vld [vmem:[#allocation146_spill] sm:$0xff]  ;;  %v11132_v55 = vld [vmem:[#allocation107_spill] sm:$0xff]  ;;  %v11133_v36 = vld [vmem:[#allocation109_spill] sm:$0xff] }
 0x386   : > { %v5400_v7 = vadd.f32 %v11125_v60, %v5370_v44  ;;  %v11128_v61 = vrot.slane %v11127_v58, 2  ;;  %v11130_v52 = vrot.slane %v11129_v42, 2  ;;  %v5414_v5 = vrot.slane %v5402_v63, 2 }
 0x387   : > { %v5415_v4 = vrot.slane %v11131_v15, 2  ;;  %v5416_v26 = vrot.slane %v11132_v55, 2  ;;  %v5417_v30 = vrot.slane %v11133_v36, 2  ;;  %v5418_v29 = vrot.slane %v5406_v11, 2 }
 0x388   : > { %v10108_v50 = vadd.f32 %v11128_v61, %v4442_v46  ;;  %v10112_v59 = vadd.f32 %v11130_v52, %v4447_v54  ;;  %v5425_v38 = vadd.f32 %v5413_v27, %v5395_v17  ;;  %v5426_v3 = vadd.f32 %v5414_v5, %v5396_v39 }
 0x389   : > { %v5427_v28 = vadd.f32 %v5415_v4, %v5397_v0  ;;  %v10119_v53 = vmul.f32 %v9875_v9, %v9875_v9  ;;  %v10123_v46 = vmul.f32 %v9883_v45, %v9883_v45  ;;  %v5428_v54 = vadd.f32 %v5416_v26, %v5398_v37 }
 0x38a   : > { %v5429_v44 = vadd.f32 %v5417_v30, %v5399_v56  ;;  %v5430_v51 = vadd.f32 %v5418_v29, %v5400_v7  ;;  %v10127_v2 = vmul.f32 %v9885_v18, %v9885_v18  ;;  %v10131_v63 = vmul.f32 %v9887_v31, %v9887_v31 }
 0x38b   : > { %v10135_v62 = vmul.f32 %v9894_v33, %v9894_v33  ;;  %v5437_v47 = vsub.f32 %v9948_v23, %v10119_v53  ;;  %v5438_v39 = vsub.f32 %v9953_v34, %v10123_v46  ;;  %v10143_v57 = vmul.f32 %v9879_v10, %v9879_v10 }
 0x38c   : > { %v10149_v0 = vmul.f32 %v9957_v13, %v9957_v13  ;;  %v10153_v32 = vmul.f32 %v9961_v48, %v9961_v48  ;;  %v10159_v37 = vmul.f32 %v9944_v20, %v9944_v20  ;;  %v10163_v22 = vmul.f32 %v9965_v24, %v9965_v24 }
 0x38d   : > { %v10167_v35 = vmul.f32 %v9971_v25, %v9971_v25  ;;  %v10171_v56 = vmul.f32 %v9975_v6, %v9975_v6  ;;  %v5455_v7 = vmul.f32 %v9957_v13, %v9875_v9  ;;  %v5456_v58 = vmul.f32 %v9961_v48, %v9883_v45 }
 0x38e   : > { %v5449_v17 = vsub.f32 %v10108_v50, %v10149_v0  ;;  %v5457_v42 = vmul.f32 %v9944_v20, %v9885_v18  ;;  %v5458_v52 = vmul.f32 %v9965_v24, %v9887_v31  ;;  %v5459_v5 = vmul.f32 %v9971_v25, %v9894_v33 }
 0x38f   : > { %v5460_v15 = vmul.f32 %v9975_v6, %v9879_v10  ;;  %v5461_v4 = vsub.f32 %v5425_v38, %v5455_v7  ;;  %v5462_v55 = vsub.f32 %v5426_v3, %v5456_v58  ;;  %v5467_v26 = vmul.f32 2.0, %v9875_v9 }
 0x390   : > { %v5463_v36 = vsub.f32 %v5427_v28, %v5457_v42  ;;  %v5464_v30 = vsub.f32 %v5428_v54, %v5458_v52  ;;  %v5465_v29 = vsub.f32 %v5429_v44, %v5459_v5  ;;  %v5468_v61 = vmul.f32 2.0, %v9883_v45 }
 0x391   : > { %v5466_v27 = vsub.f32 %v5430_v51, %v5460_v15  ;;  %v5469_v11 = vmul.f32 2.0, %v9885_v18  ;;  %v5470_v12 = vmul.f32 2.0, %v9887_v31  ;;  %v5471_v14 = vmul.f32 2.0, %v9894_v33 }
 0x392   : > { %v5472_v41 = vmul.f32 2.0, %v9879_v10  ;;  %v5473_v60 = vmul.f32 %v5467_v26, %v9957_v13  ;;  %v5474_v38 = vmul.f32 %v5468_v61, %v9961_v48  ;;  %v5485_v3 = vmul.f32 2.0, %v5461_v4 }
 0x393   : > { %v5475_v9 = vmul.f32 %v5469_v11, %v9944_v20  ;;  %v5476_v28 = vmul.f32 %v5470_v12, %v9965_v24  ;;  %v5477_v45 = vmul.f32 %v5471_v14, %v9971_v25  ;;  %v5486_v54 = vmul.f32 2.0, %v5462_v55 }
 0x394   : > { %v5478_v18 = vmul.f32 %v5472_v41, %v9975_v6  ;;  %v5479_v44 = vadd.f32 0.0001, %v5473_v60  ;;  %v5480_v31 = vadd.f32 0.0001, %v5474_v38  ;;  %v5487_v51 = vmul.f32 2.0, %v5463_v36 }
 0x395   : > { %v5481_v33 = vadd.f32 0.0001, %v5475_v9  ;;  %v5482_v7 = vadd.f32 0.0001, %v5476_v28  ;;  %v5483_v10 = vadd.f32 0.0001, %v5477_v45  ;;  %v5503_v13 = vadd.f32 %v10149_v0, %v10119_v53 }
 0x396   : > { %v5484_v48 = vadd.f32 0.0001, %v5478_v18  ;;  %v5488_v58 = vmul.f32 2.0, %v5464_v30  ;;  %v5489_v61 = vmul.f32 2.0, %v5465_v29  ;;  %v5490_v20 = vmul.f32 2.0, %v5466_v27 }
 0x397   : > { %v5491_v11 = vadd.f32 0.0009, %v5485_v3  ;;  %v5492_v24 = vadd.f32 0.0009, %v5486_v54  ;;  %v5493_v12 = vadd.f32 0.0009, %v5487_v51  ;;  %v5504_v25 = vadd.f32 %v10153_v32, %v10123_v46 }
 0x398   : > { %v5494_v6 = vadd.f32 0.0009, %v5488_v58  ;;  %v5495_v41 = vadd.f32 0.0009, %v5489_v61  ;;  %v5496_v60 = vadd.f32 0.0009, %v5490_v20  ;;  %v5505_v14 = vadd.f32 %v10159_v37, %v10127_v2 }
 0x399   : > { %v5497_v42 = vmul.f32 %v5491_v11, %v5479_v44  ;;  %v5498_v52 = vmul.f32 %v5492_v24, %v5480_v31  ;;  %v5499_v5 = vmul.f32 %v5493_v12, %v5481_v33  ;;  %v5506_v15 = vadd.f32 %v10163_v22, %v10131_v63 }
 0x39a   : > { %v5500_v4 = vmul.f32 %v5494_v6, %v5482_v7  ;;  %v5501_v27 = vmul.f32 %v5495_v41, %v5483_v10  ;;  %v5502_v55 = vmul.f32 %v5496_v60, %v5484_v48  ;;  %v5507_v26 = vadd.f32 %v10167_v35, %v10135_v62 }
 0x39b   : > { %v5441_v36 = vsub.f32 %v9998_v49, %v10135_v62  ;;  %v5442_v30 = vsub.f32 %v10011_v16, %v10143_v57  ;;  %v5508_v29 = vadd.f32 %v10171_v56, %v10143_v57  ;;  %v5509_v38 = vadd.f32 0.0001, %v5503_v13 }
 0x39c   : > { %v5510_v3 = vadd.f32 0.0001, %v5504_v25  ;;  %v5511_v9 = vadd.f32 0.0001, %v5505_v14  ;;  %v5515_v28 = vadd.f32 %v5449_v17, %v5437_v47  ;;  %v11134_v49 = vsub.f32 %v10024_v8, %v10153_v32 }
 0x39d   : > { %v5512_v62 = vadd.f32 0.0001, %v5506_v15  ;;  %v11135_v57 = vsub.f32 %v9980_v43, %v10127_v2  ;;  %v11136_v45 = vsub.f32 %v10028_v19, %v10159_v37  ;;  %v11137_v23 = vsub.f32 %v9985_v21, %v10131_v63 }
 0x39e   : > { %v5516_v16 = vadd.f32 %v11134_v49, %v5438_v39  ;;  %v11138_v50 = vsub.f32 %v10032_v40, %v10163_v22  ;;  %v11139_v34 = vsub.f32 %v10036_v1, %v10167_v35  ;;  %v5513_v46 = vadd.f32 0.0001, %v5507_v26 }
 0x39f   : > { %v5517_v54 = vadd.f32 %v11136_v45, %v11135_v57  ;;  %v11140_v47 = vsub.f32 %v10112_v59, %v10171_v56  ;;  %v5521_v2 = vadd.f32 0.0009, %v5515_v28  ;;  %v5514_v37 = vadd.f32 0.0001, %v5508_v29 }
 0x3a0   : > { %v5518_v53 = vadd.f32 %v11138_v50, %v11137_v23  ;;  %v5519_v8 = vadd.f32 %v11139_v34, %v5441_v36  ;;  %v5522_v39 = vadd.f32 0.0009, %v5516_v16 }
 0x3a1   : > { %v5520_v43 = vadd.f32 %v11140_v47, %v5442_v30  ;;  %v5523_v19 = vadd.f32 0.0009, %v5517_v54  ;;  %v5527_v63 = vmul.f32 %v5521_v2, %v5509_v38 }
 0x3a2   : > { %v5524_v0 = vadd.f32 0.0009, %v5518_v53  ;;  %v5525_v32 = vadd.f32 0.0009, %v5519_v8  ;;  %v5528_v17 = vmul.f32 %v5522_v39, %v5510_v3 }
 0x3a3   : > { %v5526_v21 = vadd.f32 0.0009, %v5520_v43  ;;  %v5529_v40 = vmul.f32 %v5523_v19, %v5511_v9  ;;  %6334 = vrcp.f32 %v5527_v63 }
 0x3a4   : > { %v5530_v22 = vmul.f32 %v5524_v0, %v5512_v62  ;;  %v5531_v18 = vmul.f32 %v5525_v32, %v5513_v46  ;;  %6336 = vrcp.f32 %v5528_v17 }
 0x3a5   : > { %v5532_v44 = vmul.f32 %v5526_v21, %v5514_v37  ;;  %6338 = vrcp.f32 %v5529_v40 }
 0x3a6   : > { %6340 = vrcp.f32 %v5530_v22 }
 0x3a7   : > { %6342 = vrcp.f32 %v5531_v18 }
 0x3a8   : > { %6344 = vrcp.f32 %v5532_v44 }
 0x3b0   : > { %v6335_v1 = vpop.eup %6334 }
 0x3b1   : > { %v6337_v59 = vpop.eup %6336  ;;  %v5534_v35 = vmul.f32 %v6335_v1, %v5497_v42 }
 0x3b2   : > { %v6339_v56 = vpop.eup %6338  ;;  %v5536_v31 = vmul.f32 %v6337_v59, %v5498_v52 }
 0x3b3   : > { %v6341_v51 = vpop.eup %6340  ;;  %v5538_v33 = vmul.f32 %v6339_v56, %v5499_v5  ;;  %v5545_v7 = vsub.f32 1.0, %v5534_v35 }
 0x3b4   : > { %v6343_v10 = vpop.eup %6342  ;;  %v5540_v13 = vmul.f32 %v6341_v51, %v5500_v4  ;;  %v5546_v48 = vsub.f32 1.0, %v5536_v31 }
 0x3b5   : > { %v6345_v58 = vpop.eup %6344  ;;  %v5542_v61 = vmul.f32 %v6343_v10, %v5501_v27  ;;  %v5547_v20 = vsub.f32 1.0, %v5538_v33  ;;  %v5552_v12 = vsel %vm360_vm0, %v5545_v7, 0.0 }
 0x3b6   : > { %v5544_v11 = vmul.f32 %v6345_v58, %v5502_v55  ;;  %v5548_v24 = vsub.f32 1.0, %v5540_v13  ;;  %v5553_v25 = vsel %vm360_vm0, %v5546_v48, 0.0  ;;  %v5551_v55 = vld [vmem:[#allocation5] sm:$0x3f] }
 0x3b7   : > { %v5549_v6 = vsub.f32 1.0, %v5542_v61  ;;  %v5554_v41 = vadd.f32 %v5553_v25, %v5552_v12  ;;  %v5555_v60 = vsel %vm360_vm0, %v5547_v20, 0.0 }
 0x3b8   : > { %v5550_v14 = vsub.f32 1.0, %v5544_v11  ;;  %v5557_v42 = vsel %vm360_vm0, %v5548_v24, 0.0 }
 0x3b9   : > { %v5556_v52 = vadd.f32 %v5555_v60, %v5554_v41  ;;  %v5559_v5 = vsel %vm360_vm0, %v5549_v6, 0.0 }
 0x3ba   : > { %v5561_v4 = vsel %vm360_vm0, %v5550_v14, 0.0 }
 0x3bb   : > { %v5558_v15 = vadd.f32 %v5557_v42, %v5556_v52 }
 0x3bd   : > { %v5560_v27 = vadd.f32 %v5559_v5, %v5558_v15 }
 0x3bf   : > { %v5562_v26 = vadd.f32 %v5561_v4, %v5560_v27 }
 0x3c1   : > { %v5563_v36 = vadd.f32 %v5562_v26, %v5551_v55 }
 0x3c3   : > { %5564 = vst.msk [vmem:[#allocation5] sm:$0x3f] %vm360_vm0, %v5563_v36 }
 0x3ca   : > { %v5565_v30 = vld [vmem:[#allocation5] sm:$0x3f] }
 0x3cb   : > { %v5566_v29 = vsel %vm360_vm0, %v5565_v30, 0.0 }
 0x3cc   : > { %5567 = vadd.xlane.f32.xlu0 %v5566_v29 }
 0x455   : > { %v5568_v38 = vpop.xlane.xlu0 %5567 }
 0x456   : > { %v5569_v3 = vrot.slane %v5568_v38, 4 }
 0x458   : > { %v5570_v9 = vadd.f32 %v5569_v3, %v5568_v38 }
 0x45a   : > { %v5571_v28 = vrot.slane %v5570_v9, 2 }
 0x45c   : > { %v5572_v49 = vadd.f32 %v5571_v28, %v5570_v9 }
 0x45e   : > { %v5573_v16 = vrot.slane %v5572_v49, 1 }
 0x460   : > { %v5574_v62 = vadd.f32 %v5573_v16, %v5572_v49 }
 0x462   : > { %6312 = vpush %v5574_v62 }
 0x493   : > { %s6313_s16 = spop %6312 }
 0x494   : > { %v5576_v57 = vstv %s6313_s16 }
 0x495   : > { %5577 = vst [vmem:[%s135_s9] sm:$0x1] %v5576_v57 }
 0x496 PF: > { %s15_s15 = sadd.s32 1, %s6375_s15  }
 0x497   : > { %p12_p1 = scmp.ge.s32.totalorder %s15_s15, 6  }
 0x499   :  { %14 = sbr.rel (!%p12_p1) target bundleno = 1 (0x1), region = 150 }
 0x49e   :  { %5595 = vsyncpa [#allocation7], 1 }
 0x49f   :  { %5597 = vsyncpa [#allocation7 + $0x1], 1 }
 0x4a0   :  { %5598 = vsyncmov [#allocation4] }
 0x4a3   :  { %s5599_s24 = vpop.sfrf %5598 }
 0x4a4   :  { %p5874_p2 = scmp.ne.s32.totalorder %s5599_s24, 0 }
 0x4a6   :  { %5603 = shalt.err (%p5874_p2)  }
 0x4a7   :  { %5605 = vsyncmov [#allocation4 + $0x1] }
 0x4aa   :  { %s5606_s25 = vpop.sfrf %5605 }
 0x4ab   :  { %p5875_p3 = scmp.ne.s32.totalorder %s5606_s25, 0 }
 0x4ad   :  { %5610 = shalt.err (%p5875_p3)  }
 0x4ae   :  { %5612 = vsyncmov [#allocation4 + $0x2] }
 0x4b1   :  { %s5613_s26 = vpop.sfrf %5612 }
 0x4b2   :  { %p5876_p4 = scmp.ne.s32.totalorder %s5613_s26, 0 }
 0x4b4   :  { %5617 = shalt.err (%p5876_p4)  }
 0x4b5   :  { %5619 = vsyncmov [#allocation4 + $0x3] }
 0x4b8   :  { %s5620_s27 = vpop.sfrf %5619 }
 0x4b9   :  { %p5877_p5 = scmp.ne.s32.totalorder %s5620_s27, 0 }
 0x4bb   :  { %5624 = shalt.err (%p5877_p5)  }

</bundles_post_ra>
